<compile_context>
chip_gen: v6e
topology: v6e:2x2x1
jax: 0.10.0
libtpu: 0.0.40
codegen_flags: <defaults>
</compile_context>

<pallas_src>
import functools

import jax
import jax.numpy as jnp
from jax.experimental import pallas as pl
from jax.experimental.pallas import tpu as pltpu


_MXU_DTYPE = jnp.bfloat16      # MXU operand dtype (f32 accumulation enforced)
_ACT_DTYPE = jnp.bfloat16      # inter-layer activation storage dtype

# Row-tile sizing: target ~32x224 pixels per tile (bigger rows once W shrinks),
# capped so the per-tile working set stays far under v7x's 64 MiB VMEM.
_TILE_PIXEL_BUDGET = 32 * 224
_MAX_TILE_ROWS = 64
_MIN_TILE_ROWS = 8


def _row_tile(h, w, pooled):
    """Largest row tile dividing h under the pixel-budget cap (even if pooled)."""
    cap = max(_MIN_TILE_ROWS, min(_MAX_TILE_ROWS, _TILE_PIXEL_BUDGET // max(w, 1)))
    cap = min(cap, h)
    divisors = [t for t in range(1, h + 1)
                if h % t == 0 and (not pooled or t % 2 == 0)]
    if not divisors:
        raise ValueError(f"no legal row tile for H={h}, pooled={pooled}")
    fitting = [t for t in divisors if t <= cap]
    return max(fitting) if fitting else min(divisors)


# ----------------------------------------------------------------------------
# Fused kernel: 3x3 conv (pad=1) + bias [+ ReLU] [+ 2x2 maxpool]
# ----------------------------------------------------------------------------
def _conv3x3_kernel(x_ref, top_ref, bot_ref, w_ref, b_ref, o_ref,
                    *, W, Cin, Cout, Th, relu, pool):
    # x_ref   : (1, Th, W, Cin)  interior row tile (pipelined)
    # top_ref : (1, 1, W, Cin)   row i*Th - 1 (clamped at the top image edge)
    # bot_ref : (1, 1, W, Cin)   row i*Th + Th (clamped at the bottom edge)
    # w_ref   : (9, Cin, Cout)   bf16 taps, tap index = ky*3 + kx
    # b_ref   : (1, Cout)        f32
    # o_ref   : (1, Th_out, W_out, Cout)
    i = pl.program_id(1)
    n_rows = pl.num_programs(1)

    x_int = x_ref[0].astype(_MXU_DTYPE)                       # (Th, W, Cin)
    top = top_ref[0].astype(_MXU_DTYPE)                       # (1, W, Cin)
    bot = bot_ref[0].astype(_MXU_DTYPE)
    # Rows outside the image are zero padding (the clamped fetch is discarded).
    top = jnp.where(i > 0, top, jnp.zeros_like(top))
    bot = jnp.where(i + 1 < n_rows, bot, jnp.zeros_like(bot))

    xf = jnp.concatenate([top, x_int, bot], axis=0)           # (Th+2, W, Cin)
    zcol = jnp.zeros((Th + 2, 1, Cin), _MXU_DTYPE)
    x_l = jnp.concatenate([zcol, xf[:, :W - 1, :]], axis=1)   # col c -> c-1 (kx=0)
    x_r = jnp.concatenate([xf[:, 1:, :], zcol], axis=1)       # col c -> c+1 (kx=2)
    xs = (x_l, xf, x_r)

    # 9 MXU matmuls with K=Cin on row-slices of the shifted views (leading-dim
    # slices are free; (Th, W, Cin) -> (Th*W, Cin) is a relabeling when W%8==0).
    # Partial sums are SSA values (no VMEM accumulator round trips); bias is
    # folded into the first tap.
    acc = None
    for ky in range(3):
        for kx in range(3):
            lhs = xs[kx][ky:ky + Th].reshape(Th * W, Cin)
            tap = jnp.dot(lhs, w_ref[ky * 3 + kx],
                          preferred_element_type=jnp.float32)
            acc = (tap + b_ref[...]) if acc is None else (acc + tap)

    out = jnp.maximum(acc, 0.0) if relu else acc
    if pool:
        out = out.reshape(Th // 2, 2, W // 2, 2, Cout)
        out = jnp.max(jnp.max(out, axis=3), axis=1)           # (Th//2, W//2, Cout)
        o_ref[0] = out.astype(o_ref.dtype)
    else:
        o_ref[0] = out.reshape(Th, W, Cout).astype(o_ref.dtype)


# ----------------------------------------------------------------------------
# Wrapper
# ----------------------------------------------------------------------------
def conv3x3(x, w, b, *, relu, pool=False, out_dtype=_ACT_DTYPE):
    """Fused 3x3 stride-1 pad-1 conv (+bias, optional ReLU, optional 2x2 maxpool).

    x: (N, H, W, Cin) NHWC; w: (3, 3, Cin, Cout); b: (Cout,).
    """
    N, H, W, Cin = x.shape
    Cout = w.shape[-1]
    assert w.shape == (3, 3, Cin, Cout)
    if pool:
        assert H % 2 == 0 and W % 2 == 0, "fused 2x2 maxpool needs even H, W"

    Th = _row_tile(H, W, pool)
    n_row = H // Th
    Th_out, H_out, W_out = (Th // 2, H // 2, W // 2) if pool else (Th, H, W)

    w9 = w.reshape(9, Cin, Cout).astype(_MXU_DTYPE)
    b2 = b.reshape(1, Cout).astype(jnp.float32)

    kern = functools.partial(_conv3x3_kernel, W=W, Cin=Cin, Cout=Cout, Th=Th,
                             relu=relu, pool=pool)

    # Halo rows ride the regular BlockSpec pipeline: the 1-row block index is
    # clamped at the image boundary (the kernel zero-masks those rows), so they
    # are prefetched/double-buffered like every other input -- no manual DMA,
    # no exposed wait.
    top_spec = pl.BlockSpec(
        (1, 1, W, Cin), lambda n, i: (n, jnp.maximum(i * Th - 1, 0), 0, 0))
    bot_spec = pl.BlockSpec(
        (1, 1, W, Cin), lambda n, i: (n, jnp.minimum(i * Th + Th, H - 1), 0, 0))

    in_specs = [
        pl.BlockSpec((1, Th, W, Cin), lambda n, i: (n, i, 0, 0)),   # interior
        top_spec,
        bot_spec,
        pl.BlockSpec((9, Cin, Cout), lambda n, i: (0, 0, 0)),       # VMEM-resident
        pl.BlockSpec((1, Cout), lambda n, i: (0, 0)),
    ]

    in_isz = jnp.dtype(x.dtype).itemsize
    out_isz = jnp.dtype(out_dtype).itemsize
    est = (2 * Th * W * Cin * in_isz             # interior tile, double buffered
           + 4 * W * Cin * in_isz                # 2 halo specs, double buffered
           + 9 * Cin * Cout * 2 + Cout * 4       # weights + bias (resident)
           + 2 * Th_out * W_out * Cout * out_isz # output tile, double buffered
           + 3 * (Th + 2) * W * Cin * 2          # xf / x_l / x_r temporaries
           + 3 * Th * W * Cout * 4)              # acc + live tap + epilogue
    vmem_limit = int(min(max(2 * est, 32 << 20), 48 << 20))  # v7x physical = 64 MiB

    return pl.pallas_call(
        kern,
        out_shape=jax.ShapeDtypeStruct((N, H_out, W_out, Cout), out_dtype),
        grid=(N, n_row),
        in_specs=in_specs,
        out_specs=pl.BlockSpec((1, Th_out, W_out, Cout),
                               lambda n, i: (n, i, 0, 0)),
        compiler_params=pltpu.CompilerParams(
            dimension_semantics=("parallel", "parallel"),
            vmem_limit_bytes=vmem_limit),
    )(x, x, x, w9, b2)


# ----------------------------------------------------------------------------
# conv1_1 (Cin=3): left to XLA per the perf review (lane-sparse in Pallas,
# <1% of total FLOPs).  Normalization is fused by XLA into this producer.
# ----------------------------------------------------------------------------
def _norm_conv1_1(x, w, b, mean, std):
    xn = (x - mean.reshape(1, 1, 1, 3)) * (1.0 / std).reshape(1, 1, 1, 3)
    y = jax.lax.conv_general_dilated(
        xn.astype(_MXU_DTYPE), w.astype(_MXU_DTYPE), (1, 1), "SAME",
        dimension_numbers=("NHWC", "HWIO", "NHWC"),
        preferred_element_type=jnp.float32) + b
    return jnp.maximum(y, 0.0).astype(_ACT_DTYPE)


# ----------------------------------------------------------------------------
# Module: parameters + forward
# ----------------------------------------------------------------------------
_VGG_SHAPES = [
    (3, 3, 3, 64),     # conv1_1
    (3, 3, 64, 64),    # conv1_2
    (3, 3, 64, 128),   # conv2_1
    (3, 3, 128, 128),  # conv2_2
    (3, 3, 128, 256),  # conv3_1
]


def init_params(key):
    params = []
    for i, s in enumerate(_VGG_SHAPES):
        kw, kb = jax.random.split(jax.random.fold_in(key, i))
        fan_in = s[0] * s[1] * s[2]
        w = jax.random.normal(kw, s, jnp.float32) * (2.0 / fan_in) ** 0.5
        b = jax.random.normal(kb, (s[-1],), jnp.float32) * 0.01
        params.append((w, b))
    return params


def contrast_extractor_layer(x_nchw, params, mean, std):
    """VGG16 features[:conv3_1] with ImageNet normalization (NCHW in/out)."""
    x = jnp.transpose(x_nchw, (0, 2, 3, 1))                        # NCHW -> NHWC
    x = _norm_conv1_1(x, *params[0], mean, std)                    # normalize + conv1_1 + relu (XLA)
    x = conv3x3(x, *params[1], relu=True, pool=True)               # conv1_2 + relu + pool1
    x = conv3x3(x, *params[2], relu=True)                          # conv2_1 + relu
    x = conv3x3(x, *params[3], relu=True, pool=True)               # conv2_2 + relu + pool2
    x = conv3x3(x, *params[4], relu=False, out_dtype=jnp.float32)  # conv3_1 (sequence ends)
    return jnp.transpose(x, (0, 3, 1, 2))                          # NHWC -> NCHW


# ----------------------------------------------------------------------------
# Pure-JAX reference (same bf16-operand / f32-accum / bf16-activation numerics)
# ----------------------------------------------------------------------------
def _reference_forward(x_nchw, params, mean, std):
    x = jnp.transpose(x_nchw, (0, 2, 3, 1))
    x = (x - mean.reshape(1, 1, 1, -1)) * (1.0 / std).reshape(1, 1, 1, -1)

    def conv(x, w, b, relu):
        y = jax.lax.conv_general_dilated(
            x.astype(_MXU_DTYPE), w.astype(_MXU_DTYPE), (1, 1), "SAME",
            dimension_numbers=("NHWC", "HWIO", "NHWC"),
            preferred_element_type=jnp.float32) + b
        return jnp.maximum(y, 0.0) if relu else y

    def pool2(x):
        n, h, w, c = x.shape
        return jnp.max(x.reshape(n, h // 2, 2, w // 2, 2, c), axis=(2, 4))

    x = conv(x, *params[0], True).astype(_ACT_DTYPE)
    x = pool2(conv(x, *params[1], True)).astype(_ACT_DTYPE)
    x = conv(x, *params[2], True).astype(_ACT_DTYPE)
    x = pool2(conv(x, *params[3], True)).astype(_ACT_DTYPE)
    x = conv(x, *params[4], False)
    return jnp.transpose(x, (0, 3, 1, 2))


if __name__ == "__main__":
    key = jax.random.PRNGKey(0)
    params = init_params(jax.random.fold_in(key, 100))
    mean = jnp.array([0.485, 0.456, 0.406], jnp.float32)
    std = jnp.array([0.229, 0.224, 0.225], jnp.float32)

    x = jax.random.uniform(jax.random.fold_in(key, 0), (2, 3, 16, 16),
                           dtype=jnp.float32)

    fwd = jax.jit(functools.partial(contrast_extractor_layer,
                                    params=params, mean=mean, std=std))
    out = fwd(x)
    jax.block_until_ready(out)
    assert out.shape == (2, 256, 4, 4), out.shape
    assert out.dtype == jnp.float32

    # correctness self-check against a matched-precision pure-JAX reference
    ref = jax.jit(functools.partial(_reference_forward,
                                    params=params, mean=mean, std=std))(x)
    err = float(jnp.max(jnp.abs(out - ref)))
    scale = float(jnp.max(jnp.abs(ref)))
    assert err <= 2e-2 * (scale + 1.0), (err, scale)

    print("KERNEL_OK")
</pallas_src>

<mosaic_0001>
module attributes {stable_mosaic.version = 11 : i64} {
  func.func @_conv3x3_kernel(%arg0: i32, %arg1: i32, %arg2: memref<1x16x16x64xbf16, #tpu.memory_space<vmem>>, %arg3: memref<1x1x16x64xbf16, #tpu.memory_space<vmem>>, %arg4: memref<1x1x16x64xbf16, #tpu.memory_space<vmem>>, %arg5: memref<9x64x64xbf16, #tpu.memory_space<vmem>>, %arg6: memref<1x64xf32, #tpu.memory_space<vmem>>, %arg7: memref<1x8x8x64xbf16, #tpu.memory_space<vmem>>) attributes {dimension_semantics = [#tpu.dimension_semantics<parallel>, #tpu.dimension_semantics<parallel>], iteration_bounds = array<i64: 2, 1>, scalar_prefetch = 0 : i64, scratch_operands = 0 : i64, tpu.core_type = #tpu.core_type<tc>, window_params = [{transform_indices = @transform_0, window_bounds = array<i64: 1, 16, 16, 64>}, {transform_indices = @transform_1, window_bounds = array<i64: 1, 1, 16, 64>}, {transform_indices = @transform_2, window_bounds = array<i64: 1, 1, 16, 64>}, {pipeline_mode = #tpu.pipeline_mode<synchronous>, transform_indices = @transform_3, window_bounds = array<i64: 9, 64, 64>}, {pipeline_mode = #tpu.pipeline_mode<synchronous>, transform_indices = @transform_4, window_bounds = array<i64: 1, 64>}, {transform_indices = @transform_5, window_bounds = array<i64: 1, 8, 8, 64>}]} {
    %c0 = arith.constant 0 : index
    %c0_0 = arith.constant 0 : index
    %c0_1 = arith.constant 0 : index
    %c0_2 = arith.constant 0 : index
    %0 = vector.load %arg2[%c0, %c0_0, %c0_1, %c0_2] : memref<1x16x16x64xbf16, #tpu.memory_space<vmem>>, vector<1x16x16x64xbf16>
    %1 = vector.shape_cast %0 : vector<1x16x16x64xbf16> to vector<16x16x64xbf16>
    %c0_3 = arith.constant 0 : index
    %c0_4 = arith.constant 0 : index
    %c0_5 = arith.constant 0 : index
    %c0_6 = arith.constant 0 : index
    %2 = vector.load %arg3[%c0_3, %c0_4, %c0_5, %c0_6] : memref<1x1x16x64xbf16, #tpu.memory_space<vmem>>, vector<1x1x16x64xbf16>
    %3 = vector.shape_cast %2 : vector<1x1x16x64xbf16> to vector<1x16x64xbf16>
    %c0_7 = arith.constant 0 : index
    %c0_8 = arith.constant 0 : index
    %c0_9 = arith.constant 0 : index
    %c0_10 = arith.constant 0 : index
    %4 = vector.load %arg4[%c0_7, %c0_8, %c0_9, %c0_10] : memref<1x1x16x64xbf16, #tpu.memory_space<vmem>>, vector<1x1x16x64xbf16>
    %5 = vector.shape_cast %4 : vector<1x1x16x64xbf16> to vector<1x16x64xbf16>
    %c0_i32 = arith.constant 0 : i32
    %6 = arith.cmpi sgt, %arg1, %c0_i32 : i32
    %cst = arith.constant 0.000000e+00 : bf16
    %7 = vector.broadcast %cst : bf16 to vector<1x16x64xbf16>
    %8 = arith.select %6, %3, %7 : vector<1x16x64xbf16>
    %c1_i32 = arith.constant 1 : i32
    %9 = arith.addi %arg1, %c1_i32 : i32
    %c1_i32_11 = arith.constant 1 : i32
    %10 = arith.cmpi slt, %9, %c1_i32_11 : i32
    %cst_12 = arith.constant 0.000000e+00 : bf16
    %11 = vector.broadcast %cst_12 : bf16 to vector<1x16x64xbf16>
    %12 = arith.select %10, %5, %11 : vector<1x16x64xbf16>
    %13 = tpu.concatenate %8, %1, %12 in 0 : vector<1x16x64xbf16>, vector<16x16x64xbf16>, vector<1x16x64xbf16> -> vector<18x16x64xbf16>
    %cst_13 = arith.constant 0.000000e+00 : bf16
    %14 = vector.broadcast %cst_13 : bf16 to vector<18x1x64xbf16>
    %15 = vector.extract_strided_slice %13 {offsets = [0, 0, 0], sizes = [18, 15, 64], strides = [1, 1, 1]} : vector<18x16x64xbf16> to vector<18x15x64xbf16>
    %16 = tpu.concatenate %14, %15 in 1 : vector<18x1x64xbf16>, vector<18x15x64xbf16> -> vector<18x16x64xbf16>
    %17 = vector.extract_strided_slice %13 {offsets = [0, 1, 0], sizes = [18, 15, 64], strides = [1, 1, 1]} : vector<18x16x64xbf16> to vector<18x15x64xbf16>
    %18 = tpu.concatenate %17, %14 in 1 : vector<18x15x64xbf16>, vector<18x1x64xbf16> -> vector<18x16x64xbf16>
    %19 = vector.extract_strided_slice %16 {offsets = [0, 0, 0], sizes = [16, 16, 64], strides = [1, 1, 1]} : vector<18x16x64xbf16> to vector<16x16x64xbf16>
    %20 = vector.shape_cast %19 : vector<16x16x64xbf16> to vector<256x64xbf16>
    %c0_14 = arith.constant 0 : index
    %c0_15 = arith.constant 0 : index
    %c0_16 = arith.constant 0 : index
    %21 = vector.load %arg5[%c0_14, %c0_15, %c0_16] : memref<9x64x64xbf16, #tpu.memory_space<vmem>>, vector<1x64x64xbf16>
    %22 = vector.shape_cast %21 : vector<1x64x64xbf16> to vector<64x64xbf16>
    %cst_17 = arith.constant dense<0.000000e+00> : vector<256x64xf32>
    %23 = tpu.matmul %20, %22, %cst_17 {dimension_numbers = #tpu.dot_dimension_numbers<[1], [0], [0], [1], [0, 0, 1, 1], [], []>} : vector<256x64xbf16>, vector<64x64xbf16>, vector<256x64xf32> -> vector<256x64xf32>
    %c0_18 = arith.constant 0 : index
    %c0_19 = arith.constant 0 : index
    %24 = vector.load %arg6[%c0_18, %c0_19] : memref<1x64xf32, #tpu.memory_space<vmem>>, vector<1x64xf32>
    %25 = vector.broadcast %24 : vector<1x64xf32> to vector<256x64xf32>
    %26 = arith.addf %23, %25 : vector<256x64xf32>
    %27 = vector.extract_strided_slice %13 {offsets = [0, 0, 0], sizes = [16, 16, 64], strides = [1, 1, 1]} : vector<18x16x64xbf16> to vector<16x16x64xbf16>
    %28 = vector.shape_cast %27 : vector<16x16x64xbf16> to vector<256x64xbf16>
    %c1 = arith.constant 1 : index
    %c0_20 = arith.constant 0 : index
    %c0_21 = arith.constant 0 : index
    %29 = vector.load %arg5[%c1, %c0_20, %c0_21] : memref<9x64x64xbf16, #tpu.memory_space<vmem>>, vector<1x64x64xbf16>
    %30 = vector.shape_cast %29 : vector<1x64x64xbf16> to vector<64x64xbf16>
    %cst_22 = arith.constant dense<0.000000e+00> : vector<256x64xf32>
    %31 = tpu.matmul %28, %30, %cst_22 {dimension_numbers = #tpu.dot_dimension_numbers<[1], [0], [0], [1], [0, 0, 1, 1], [], []>} : vector<256x64xbf16>, vector<64x64xbf16>, vector<256x64xf32> -> vector<256x64xf32>
    %32 = arith.addf %26, %31 : vector<256x64xf32>
    %33 = vector.extract_strided_slice %18 {offsets = [0, 0, 0], sizes = [16, 16, 64], strides = [1, 1, 1]} : vector<18x16x64xbf16> to vector<16x16x64xbf16>
    %34 = vector.shape_cast %33 : vector<16x16x64xbf16> to vector<256x64xbf16>
    %c2 = arith.constant 2 : index
    %c0_23 = arith.constant 0 : index
    %c0_24 = arith.constant 0 : index
    %35 = vector.load %arg5[%c2, %c0_23, %c0_24] : memref<9x64x64xbf16, #tpu.memory_space<vmem>>, vector<1x64x64xbf16>
    %36 = vector.shape_cast %35 : vector<1x64x64xbf16> to vector<64x64xbf16>
    %cst_25 = arith.constant dense<0.000000e+00> : vector<256x64xf32>
    %37 = tpu.matmul %34, %36, %cst_25 {dimension_numbers = #tpu.dot_dimension_numbers<[1], [0], [0], [1], [0, 0, 1, 1], [], []>} : vector<256x64xbf16>, vector<64x64xbf16>, vector<256x64xf32> -> vector<256x64xf32>
    %38 = arith.addf %32, %37 : vector<256x64xf32>
    %39 = vector.extract_strided_slice %16 {offsets = [1, 0, 0], sizes = [16, 16, 64], strides = [1, 1, 1]} : vector<18x16x64xbf16> to vector<16x16x64xbf16>
    %40 = vector.shape_cast %39 : vector<16x16x64xbf16> to vector<256x64xbf16>
    %c3 = arith.constant 3 : index
    %c0_26 = arith.constant 0 : index
    %c0_27 = arith.constant 0 : index
    %41 = vector.load %arg5[%c3, %c0_26, %c0_27] : memref<9x64x64xbf16, #tpu.memory_space<vmem>>, vector<1x64x64xbf16>
    %42 = vector.shape_cast %41 : vector<1x64x64xbf16> to vector<64x64xbf16>
    %cst_28 = arith.constant dense<0.000000e+00> : vector<256x64xf32>
    %43 = tpu.matmul %40, %42, %cst_28 {dimension_numbers = #tpu.dot_dimension_numbers<[1], [0], [0], [1], [0, 0, 1, 1], [], []>} : vector<256x64xbf16>, vector<64x64xbf16>, vector<256x64xf32> -> vector<256x64xf32>
    %44 = arith.addf %38, %43 : vector<256x64xf32>
    %45 = vector.extract_strided_slice %13 {offsets = [1, 0, 0], sizes = [16, 16, 64], strides = [1, 1, 1]} : vector<18x16x64xbf16> to vector<16x16x64xbf16>
    %46 = vector.shape_cast %45 : vector<16x16x64xbf16> to vector<256x64xbf16>
    %c4 = arith.constant 4 : index
    %c0_29 = arith.constant 0 : index
    %c0_30 = arith.constant 0 : index
    %47 = vector.load %arg5[%c4, %c0_29, %c0_30] : memref<9x64x64xbf16, #tpu.memory_space<vmem>>, vector<1x64x64xbf16>
    %48 = vector.shape_cast %47 : vector<1x64x64xbf16> to vector<64x64xbf16>
    %cst_31 = arith.constant dense<0.000000e+00> : vector<256x64xf32>
    %49 = tpu.matmul %46, %48, %cst_31 {dimension_numbers = #tpu.dot_dimension_numbers<[1], [0], [0], [1], [0, 0, 1, 1], [], []>} : vector<256x64xbf16>, vector<64x64xbf16>, vector<256x64xf32> -> vector<256x64xf32>
    %50 = arith.addf %44, %49 : vector<256x64xf32>
    %51 = vector.extract_strided_slice %18 {offsets = [1, 0, 0], sizes = [16, 16, 64], strides = [1, 1, 1]} : vector<18x16x64xbf16> to vector<16x16x64xbf16>
    %52 = vector.shape_cast %51 : vector<16x16x64xbf16> to vector<256x64xbf16>
    %c5 = arith.constant 5 : index
    %c0_32 = arith.constant 0 : index
    %c0_33 = arith.constant 0 : index
    %53 = vector.load %arg5[%c5, %c0_32, %c0_33] : memref<9x64x64xbf16, #tpu.memory_space<vmem>>, vector<1x64x64xbf16>
    %54 = vector.shape_cast %53 : vector<1x64x64xbf16> to vector<64x64xbf16>
    %cst_34 = arith.constant dense<0.000000e+00> : vector<256x64xf32>
    %55 = tpu.matmul %52, %54, %cst_34 {dimension_numbers = #tpu.dot_dimension_numbers<[1], [0], [0], [1], [0, 0, 1, 1], [], []>} : vector<256x64xbf16>, vector<64x64xbf16>, vector<256x64xf32> -> vector<256x64xf32>
    %56 = arith.addf %50, %55 : vector<256x64xf32>
    %57 = vector.extract_strided_slice %16 {offsets = [2, 0, 0], sizes = [16, 16, 64], strides = [1, 1, 1]} : vector<18x16x64xbf16> to vector<16x16x64xbf16>
    %58 = vector.shape_cast %57 : vector<16x16x64xbf16> to vector<256x64xbf16>
    %c6 = arith.constant 6 : index
    %c0_35 = arith.constant 0 : index
    %c0_36 = arith.constant 0 : index
    %59 = vector.load %arg5[%c6, %c0_35, %c0_36] : memref<9x64x64xbf16, #tpu.memory_space<vmem>>, vector<1x64x64xbf16>
    %60 = vector.shape_cast %59 : vector<1x64x64xbf16> to vector<64x64xbf16>
    %cst_37 = arith.constant dense<0.000000e+00> : vector<256x64xf32>
    %61 = tpu.matmul %58, %60, %cst_37 {dimension_numbers = #tpu.dot_dimension_numbers<[1], [0], [0], [1], [0, 0, 1, 1], [], []>} : vector<256x64xbf16>, vector<64x64xbf16>, vector<256x64xf32> -> vector<256x64xf32>
    %62 = arith.addf %56, %61 : vector<256x64xf32>
    %63 = vector.extract_strided_slice %13 {offsets = [2, 0, 0], sizes = [16, 16, 64], strides = [1, 1, 1]} : vector<18x16x64xbf16> to vector<16x16x64xbf16>
    %64 = vector.shape_cast %63 : vector<16x16x64xbf16> to vector<256x64xbf16>
    %c7 = arith.constant 7 : index
    %c0_38 = arith.constant 0 : index
    %c0_39 = arith.constant 0 : index
    %65 = vector.load %arg5[%c7, %c0_38, %c0_39] : memref<9x64x64xbf16, #tpu.memory_space<vmem>>, vector<1x64x64xbf16>
    %66 = vector.shape_cast %65 : vector<1x64x64xbf16> to vector<64x64xbf16>
    %cst_40 = arith.constant dense<0.000000e+00> : vector<256x64xf32>
    %67 = tpu.matmul %64, %66, %cst_40 {dimension_numbers = #tpu.dot_dimension_numbers<[1], [0], [0], [1], [0, 0, 1, 1], [], []>} : vector<256x64xbf16>, vector<64x64xbf16>, vector<256x64xf32> -> vector<256x64xf32>
    %68 = arith.addf %62, %67 : vector<256x64xf32>
    %69 = vector.extract_strided_slice %18 {offsets = [2, 0, 0], sizes = [16, 16, 64], strides = [1, 1, 1]} : vector<18x16x64xbf16> to vector<16x16x64xbf16>
    %70 = vector.shape_cast %69 : vector<16x16x64xbf16> to vector<256x64xbf16>
    %c8 = arith.constant 8 : index
    %c0_41 = arith.constant 0 : index
    %c0_42 = arith.constant 0 : index
    %71 = vector.load %arg5[%c8, %c0_41, %c0_42] : memref<9x64x64xbf16, #tpu.memory_space<vmem>>, vector<1x64x64xbf16>
    %72 = vector.shape_cast %71 : vector<1x64x64xbf16> to vector<64x64xbf16>
    %cst_43 = arith.constant dense<0.000000e+00> : vector<256x64xf32>
    %73 = tpu.matmul %70, %72, %cst_43 {dimension_numbers = #tpu.dot_dimension_numbers<[1], [0], [0], [1], [0, 0, 1, 1], [], []>} : vector<256x64xbf16>, vector<64x64xbf16>, vector<256x64xf32> -> vector<256x64xf32>
    %74 = arith.addf %68, %73 : vector<256x64xf32>
    %cst_44 = arith.constant 0.000000e+00 : f32
    %75 = vector.broadcast %cst_44 : f32 to vector<256x64xf32>
    %76 = arith.maximumf %74, %75 : vector<256x64xf32>
    %77 = vector.shape_cast %76 : vector<256x64xf32> to vector<8x2x8x2x64xf32>
    %cst_45 = arith.constant dense<0xFF800000> : vector<8x2x8x64xf32>
    %78 = vector.multi_reduction <maximumf>, %77, %cst_45 [3] : vector<8x2x8x2x64xf32> to vector<8x2x8x64xf32>
    %cst_46 = arith.constant dense<0xFF800000> : vector<8x8x64xf32>
    %79 = vector.multi_reduction <maximumf>, %78, %cst_46 [1] : vector<8x2x8x64xf32> to vector<8x8x64xf32>
    %80 = arith.truncf %79 : vector<8x8x64xf32> to vector<8x8x64xbf16>
    %c0_47 = arith.constant 0 : index
    %c0_48 = arith.constant 0 : index
    %c0_49 = arith.constant 0 : index
    %c0_50 = arith.constant 0 : index
    %81 = vector.load %arg7[%c0_47, %c0_48, %c0_49, %c0_50] : memref<1x8x8x64xbf16, #tpu.memory_space<vmem>>, vector<1x8x8x64xbf16>
    %82 = vector.shape_cast %81 : vector<1x8x8x64xbf16> to vector<8x8x64xbf16>
    %83 = vector.shape_cast %80 : vector<8x8x64xbf16> to vector<1x8x8x64xbf16>
    tpu.vector_store %arg7[%c0_47, %c0_48, %c0_49, %c0_50], %83 {strides = array<i32>} : memref<1x8x8x64xbf16, #tpu.memory_space<vmem>>, vector<1x8x8x64xbf16>,
    return
  }
  func.func @transform_0(%arg0: i32, %arg1: i32) -> (i32, i32, i32, i32) {
    %c0_i32 = arith.constant 0 : i32
    %c0_i32_0 = arith.constant 0 : i32
    %c0_i32_1 = arith.constant 0 : i32
    return %arg0, %arg1, %c0_i32, %c0_i32_0 : i32, i32, i32, i32
  }
  func.func @transform_1(%arg0: i32, %arg1: i32) -> (i32, i32, i32, i32) {
    %c16_i32 = arith.constant 16 : i32
    %0 = arith.muli %arg1, %c16_i32 : i32
    %c1_i32 = arith.constant 1 : i32
    %1 = arith.subi %0, %c1_i32 : i32
    %c0_i32 = arith.constant 0 : i32
    %2 = arith.maxsi %1, %c0_i32 : i32
    %c0_i32_0 = arith.constant 0 : i32
    %c0_i32_1 = arith.constant 0 : i32
    %c0_i32_2 = arith.constant 0 : i32
    return %arg0, %2, %c0_i32_0, %c0_i32_1 : i32, i32, i32, i32
  }
  func.func @transform_2(%arg0: i32, %arg1: i32) -> (i32, i32, i32, i32) {
    %c16_i32 = arith.constant 16 : i32
    %0 = arith.muli %arg1, %c16_i32 : i32
    %c16_i32_0 = arith.constant 16 : i32
    %1 = arith.addi %0, %c16_i32_0 : i32
    %c15_i32 = arith.constant 15 : i32
    %2 = arith.minsi %1, %c15_i32 : i32
    %c0_i32 = arith.constant 0 : i32
    %c0_i32_1 = arith.constant 0 : i32
    %c0_i32_2 = arith.constant 0 : i32
    return %arg0, %2, %c0_i32, %c0_i32_1 : i32, i32, i32, i32
  }
  func.func @transform_3(%arg0: i32, %arg1: i32) -> (i32, i32, i32) {
    %c0_i32 = arith.constant 0 : i32
    %c0_i32_0 = arith.constant 0 : i32
    %c0_i32_1 = arith.constant 0 : i32
    %c0_i32_2 = arith.constant 0 : i32
    return %c0_i32, %c0_i32_0, %c0_i32_1 : i32, i32, i32
  }
  func.func @transform_4(%arg0: i32, %arg1: i32) -> (i32, i32) {
    %c0_i32 = arith.constant 0 : i32
    %c0_i32_0 = arith.constant 0 : i32
    %c0_i32_1 = arith.constant 0 : i32
    return %c0_i32, %c0_i32_0 : i32, i32
  }
  func.func @transform_5(%arg0: i32, %arg1: i32) -> (i32, i32, i32, i32) {
    %c0_i32 = arith.constant 0 : i32
    %c0_i32_0 = arith.constant 0 : i32
    %c0_i32_1 = arith.constant 0 : i32
    return %arg0, %arg1, %c0_i32, %c0_i32_0 : i32, i32, i32, i32
  }
}

module attributes {stable_mosaic.version = 11 : i64} {
  func.func @_conv3x3_kernel(%arg0: i32, %arg1: i32, %arg2: memref<1x8x8x64xbf16, #tpu.memory_space<vmem>>, %arg3: memref<1x1x8x64xbf16, #tpu.memory_space<vmem>>, %arg4: memref<1x1x8x64xbf16, #tpu.memory_space<vmem>>, %arg5: memref<9x64x128xbf16, #tpu.memory_space<vmem>>, %arg6: memref<1x128xf32, #tpu.memory_space<vmem>>, %arg7: memref<1x8x8x128xbf16, #tpu.memory_space<vmem>>) attributes {dimension_semantics = [#tpu.dimension_semantics<parallel>, #tpu.dimension_semantics<parallel>], iteration_bounds = array<i64: 2, 1>, scalar_prefetch = 0 : i64, scratch_operands = 0 : i64, tpu.core_type = #tpu.core_type<tc>, window_params = [{transform_indices = @transform_0, window_bounds = array<i64: 1, 8, 8, 64>}, {transform_indices = @transform_1, window_bounds = array<i64: 1, 1, 8, 64>}, {transform_indices = @transform_2, window_bounds = array<i64: 1, 1, 8, 64>}, {pipeline_mode = #tpu.pipeline_mode<synchronous>, transform_indices = @transform_3, window_bounds = array<i64: 9, 64, 128>}, {pipeline_mode = #tpu.pipeline_mode<synchronous>, transform_indices = @transform_4, window_bounds = array<i64: 1, 128>}, {transform_indices = @transform_5, window_bounds = array<i64: 1, 8, 8, 128>}]} {
    %c0 = arith.constant 0 : index
    %c0_0 = arith.constant 0 : index
    %c0_1 = arith.constant 0 : index
    %c0_2 = arith.constant 0 : index
    %0 = vector.load %arg2[%c0, %c0_0, %c0_1, %c0_2] : memref<1x8x8x64xbf16, #tpu.memory_space<vmem>>, vector<1x8x8x64xbf16>
    %1 = vector.shape_cast %0 : vector<1x8x8x64xbf16> to vector<8x8x64xbf16>
    %c0_3 = arith.constant 0 : index
    %c0_4 = arith.constant 0 : index
    %c0_5 = arith.constant 0 : index
    %c0_6 = arith.constant 0 : index
    %2 = vector.load %arg3[%c0_3, %c0_4, %c0_5, %c0_6] : memref<1x1x8x64xbf16, #tpu.memory_space<vmem>>, vector<1x1x8x64xbf16>
    %3 = vector.shape_cast %2 : vector<1x1x8x64xbf16> to vector<1x8x64xbf16>
    %c0_7 = arith.constant 0 : index
    %c0_8 = arith.constant 0 : index
    %c0_9 = arith.constant 0 : index
    %c0_10 = arith.constant 0 : index
    %4 = vector.load %arg4[%c0_7, %c0_8, %c0_9, %c0_10] : memref<1x1x8x64xbf16, #tpu.memory_space<vmem>>, vector<1x1x8x64xbf16>
    %5 = vector.shape_cast %4 : vector<1x1x8x64xbf16> to vector<1x8x64xbf16>
    %c0_i32 = arith.constant 0 : i32
    %6 = arith.cmpi sgt, %arg1, %c0_i32 : i32
    %cst = arith.constant 0.000000e+00 : bf16
    %7 = vector.broadcast %cst : bf16 to vector<1x8x64xbf16>
    %8 = arith.select %6, %3, %7 : vector<1x8x64xbf16>
    %c1_i32 = arith.constant 1 : i32
    %9 = arith.addi %arg1, %c1_i32 : i32
    %c1_i32_11 = arith.constant 1 : i32
    %10 = arith.cmpi slt, %9, %c1_i32_11 : i32
    %cst_12 = arith.constant 0.000000e+00 : bf16
    %11 = vector.broadcast %cst_12 : bf16 to vector<1x8x64xbf16>
    %12 = arith.select %10, %5, %11 : vector<1x8x64xbf16>
    %13 = tpu.concatenate %8, %1, %12 in 0 : vector<1x8x64xbf16>, vector<8x8x64xbf16>, vector<1x8x64xbf16> -> vector<10x8x64xbf16>
    %cst_13 = arith.constant 0.000000e+00 : bf16
    %14 = vector.broadcast %cst_13 : bf16 to vector<10x1x64xbf16>
    %15 = vector.extract_strided_slice %13 {offsets = [0, 0, 0], sizes = [10, 7, 64], strides = [1, 1, 1]} : vector<10x8x64xbf16> to vector<10x7x64xbf16>
    %16 = tpu.concatenate %14, %15 in 1 : vector<10x1x64xbf16>, vector<10x7x64xbf16> -> vector<10x8x64xbf16>
    %17 = vector.extract_strided_slice %13 {offsets = [0, 1, 0], sizes = [10, 7, 64], strides = [1, 1, 1]} : vector<10x8x64xbf16> to vector<10x7x64xbf16>
    %18 = tpu.concatenate %17, %14 in 1 : vector<10x7x64xbf16>, vector<10x1x64xbf16> -> vector<10x8x64xbf16>
    %19 = vector.extract_strided_slice %16 {offsets = [0, 0, 0], sizes = [8, 8, 64], strides = [1, 1, 1]} : vector<10x8x64xbf16> to vector<8x8x64xbf16>
    %20 = vector.shape_cast %19 : vector<8x8x64xbf16> to vector<64x64xbf16>
    %c0_14 = arith.constant 0 : index
    %c0_15 = arith.constant 0 : index
    %c0_16 = arith.constant 0 : index
    %21 = vector.load %arg5[%c0_14, %c0_15, %c0_16] : memref<9x64x128xbf16, #tpu.memory_space<vmem>>, vector<1x64x128xbf16>
    %22 = vector.shape_cast %21 : vector<1x64x128xbf16> to vector<64x128xbf16>
    %cst_17 = arith.constant dense<0.000000e+00> : vector<64x128xf32>
    %23 = tpu.matmul %20, %22, %cst_17 {dimension_numbers = #tpu.dot_dimension_numbers<[1], [0], [0], [1], [0, 0, 1, 1], [], []>} : vector<64x64xbf16>, vector<64x128xbf16>, vector<64x128xf32> -> vector<64x128xf32>
    %c0_18 = arith.constant 0 : index
    %c0_19 = arith.constant 0 : index
    %24 = vector.load %arg6[%c0_18, %c0_19] : memref<1x128xf32, #tpu.memory_space<vmem>>, vector<1x128xf32>
    %25 = vector.broadcast %24 : vector<1x128xf32> to vector<64x128xf32>
    %26 = arith.addf %23, %25 : vector<64x128xf32>
    %27 = vector.extract_strided_slice %13 {offsets = [0, 0, 0], sizes = [8, 8, 64], strides = [1, 1, 1]} : vector<10x8x64xbf16> to vector<8x8x64xbf16>
    %28 = vector.shape_cast %27 : vector<8x8x64xbf16> to vector<64x64xbf16>
    %c1 = arith.constant 1 : index
    %c0_20 = arith.constant 0 : index
    %c0_21 = arith.constant 0 : index
    %29 = vector.load %arg5[%c1, %c0_20, %c0_21] : memref<9x64x128xbf16, #tpu.memory_space<vmem>>, vector<1x64x128xbf16>
    %30 = vector.shape_cast %29 : vector<1x64x128xbf16> to vector<64x128xbf16>
    %cst_22 = arith.constant dense<0.000000e+00> : vector<64x128xf32>
    %31 = tpu.matmul %28, %30, %cst_22 {dimension_numbers = #tpu.dot_dimension_numbers<[1], [0], [0], [1], [0, 0, 1, 1], [], []>} : vector<64x64xbf16>, vector<64x128xbf16>, vector<64x128xf32> -> vector<64x128xf32>
    %32 = arith.addf %26, %31 : vector<64x128xf32>
    %33 = vector.extract_strided_slice %18 {offsets = [0, 0, 0], sizes = [8, 8, 64], strides = [1, 1, 1]} : vector<10x8x64xbf16> to vector<8x8x64xbf16>
    %34 = vector.shape_cast %33 : vector<8x8x64xbf16> to vector<64x64xbf16>
    %c2 = arith.constant 2 : index
    %c0_23 = arith.constant 0 : index
    %c0_24 = arith.constant 0 : index
    %35 = vector.load %arg5[%c2, %c0_23, %c0_24] : memref<9x64x128xbf16, #tpu.memory_space<vmem>>, vector<1x64x128xbf16>
    %36 = vector.shape_cast %35 : vector<1x64x128xbf16> to vector<64x128xbf16>
    %cst_25 = arith.constant dense<0.000000e+00> : vector<64x128xf32>
    %37 = tpu.matmul %34, %36, %cst_25 {dimension_numbers = #tpu.dot_dimension_numbers<[1], [0], [0], [1], [0, 0, 1, 1], [], []>} : vector<64x64xbf16>, vector<64x128xbf16>, vector<64x128xf32> -> vector<64x128xf32>
    %38 = arith.addf %32, %37 : vector<64x128xf32>
    %39 = vector.extract_strided_slice %16 {offsets = [1, 0, 0], sizes = [8, 8, 64], strides = [1, 1, 1]} : vector<10x8x64xbf16> to vector<8x8x64xbf16>
    %40 = vector.shape_cast %39 : vector<8x8x64xbf16> to vector<64x64xbf16>
    %c3 = arith.constant 3 : index
    %c0_26 = arith.constant 0 : index
    %c0_27 = arith.constant 0 : index
    %41 = vector.load %arg5[%c3, %c0_26, %c0_27] : memref<9x64x128xbf16, #tpu.memory_space<vmem>>, vector<1x64x128xbf16>
    %42 = vector.shape_cast %41 : vector<1x64x128xbf16> to vector<64x128xbf16>
    %cst_28 = arith.constant dense<0.000000e+00> : vector<64x128xf32>
    %43 = tpu.matmul %40, %42, %cst_28 {dimension_numbers = #tpu.dot_dimension_numbers<[1], [0], [0], [1], [0, 0, 1, 1], [], []>} : vector<64x64xbf16>, vector<64x128xbf16>, vector<64x128xf32> -> vector<64x128xf32>
    %44 = arith.addf %38, %43 : vector<64x128xf32>
    %45 = vector.extract_strided_slice %13 {offsets = [1, 0, 0], sizes = [8, 8, 64], strides = [1, 1, 1]} : vector<10x8x64xbf16> to vector<8x8x64xbf16>
    %46 = vector.shape_cast %45 : vector<8x8x64xbf16> to vector<64x64xbf16>
    %c4 = arith.constant 4 : index
    %c0_29 = arith.constant 0 : index
    %c0_30 = arith.constant 0 : index
    %47 = vector.load %arg5[%c4, %c0_29, %c0_30] : memref<9x64x128xbf16, #tpu.memory_space<vmem>>, vector<1x64x128xbf16>
    %48 = vector.shape_cast %47 : vector<1x64x128xbf16> to vector<64x128xbf16>
    %cst_31 = arith.constant dense<0.000000e+00> : vector<64x128xf32>
    %49 = tpu.matmul %46, %48, %cst_31 {dimension_numbers = #tpu.dot_dimension_numbers<[1], [0], [0], [1], [0, 0, 1, 1], [], []>} : vector<64x64xbf16>, vector<64x128xbf16>, vector<64x128xf32> -> vector<64x128xf32>
    %50 = arith.addf %44, %49 : vector<64x128xf32>
    %51 = vector.extract_strided_slice %18 {offsets = [1, 0, 0], sizes = [8, 8, 64], strides = [1, 1, 1]} : vector<10x8x64xbf16> to vector<8x8x64xbf16>
    %52 = vector.shape_cast %51 : vector<8x8x64xbf16> to vector<64x64xbf16>
    %c5 = arith.constant 5 : index
    %c0_32 = arith.constant 0 : index
    %c0_33 = arith.constant 0 : index
    %53 = vector.load %arg5[%c5, %c0_32, %c0_33] : memref<9x64x128xbf16, #tpu.memory_space<vmem>>, vector<1x64x128xbf16>
    %54 = vector.shape_cast %53 : vector<1x64x128xbf16> to vector<64x128xbf16>
    %cst_34 = arith.constant dense<0.000000e+00> : vector<64x128xf32>
    %55 = tpu.matmul %52, %54, %cst_34 {dimension_numbers = #tpu.dot_dimension_numbers<[1], [0], [0], [1], [0, 0, 1, 1], [], []>} : vector<64x64xbf16>, vector<64x128xbf16>, vector<64x128xf32> -> vector<64x128xf32>
    %56 = arith.addf %50, %55 : vector<64x128xf32>
    %57 = vector.extract_strided_slice %16 {offsets = [2, 0, 0], sizes = [8, 8, 64], strides = [1, 1, 1]} : vector<10x8x64xbf16> to vector<8x8x64xbf16>
    %58 = vector.shape_cast %57 : vector<8x8x64xbf16> to vector<64x64xbf16>
    %c6 = arith.constant 6 : index
    %c0_35 = arith.constant 0 : index
    %c0_36 = arith.constant 0 : index
    %59 = vector.load %arg5[%c6, %c0_35, %c0_36] : memref<9x64x128xbf16, #tpu.memory_space<vmem>>, vector<1x64x128xbf16>
    %60 = vector.shape_cast %59 : vector<1x64x128xbf16> to vector<64x128xbf16>
    %cst_37 = arith.constant dense<0.000000e+00> : vector<64x128xf32>
    %61 = tpu.matmul %58, %60, %cst_37 {dimension_numbers = #tpu.dot_dimension_numbers<[1], [0], [0], [1], [0, 0, 1, 1], [], []>} : vector<64x64xbf16>, vector<64x128xbf16>, vector<64x128xf32> -> vector<64x128xf32>
    %62 = arith.addf %56, %61 : vector<64x128xf32>
    %63 = vector.extract_strided_slice %13 {offsets = [2, 0, 0], sizes = [8, 8, 64], strides = [1, 1, 1]} : vector<10x8x64xbf16> to vector<8x8x64xbf16>
    %64 = vector.shape_cast %63 : vector<8x8x64xbf16> to vector<64x64xbf16>
    %c7 = arith.constant 7 : index
    %c0_38 = arith.constant 0 : index
    %c0_39 = arith.constant 0 : index
    %65 = vector.load %arg5[%c7, %c0_38, %c0_39] : memref<9x64x128xbf16, #tpu.memory_space<vmem>>, vector<1x64x128xbf16>
    %66 = vector.shape_cast %65 : vector<1x64x128xbf16> to vector<64x128xbf16>
    %cst_40 = arith.constant dense<0.000000e+00> : vector<64x128xf32>
    %67 = tpu.matmul %64, %66, %cst_40 {dimension_numbers = #tpu.dot_dimension_numbers<[1], [0], [0], [1], [0, 0, 1, 1], [], []>} : vector<64x64xbf16>, vector<64x128xbf16>, vector<64x128xf32> -> vector<64x128xf32>
    %68 = arith.addf %62, %67 : vector<64x128xf32>
    %69 = vector.extract_strided_slice %18 {offsets = [2, 0, 0], sizes = [8, 8, 64], strides = [1, 1, 1]} : vector<10x8x64xbf16> to vector<8x8x64xbf16>
    %70 = vector.shape_cast %69 : vector<8x8x64xbf16> to vector<64x64xbf16>
    %c8 = arith.constant 8 : index
    %c0_41 = arith.constant 0 : index
    %c0_42 = arith.constant 0 : index
    %71 = vector.load %arg5[%c8, %c0_41, %c0_42] : memref<9x64x128xbf16, #tpu.memory_space<vmem>>, vector<1x64x128xbf16>
    %72 = vector.shape_cast %71 : vector<1x64x128xbf16> to vector<64x128xbf16>
    %cst_43 = arith.constant dense<0.000000e+00> : vector<64x128xf32>
    %73 = tpu.matmul %70, %72, %cst_43 {dimension_numbers = #tpu.dot_dimension_numbers<[1], [0], [0], [1], [0, 0, 1, 1], [], []>} : vector<64x64xbf16>, vector<64x128xbf16>, vector<64x128xf32> -> vector<64x128xf32>
    %74 = arith.addf %68, %73 : vector<64x128xf32>
    %cst_44 = arith.constant 0.000000e+00 : f32
    %75 = vector.broadcast %cst_44 : f32 to vector<64x128xf32>
    %76 = arith.maximumf %74, %75 : vector<64x128xf32>
    %77 = vector.shape_cast %76 : vector<64x128xf32> to vector<8x8x128xf32>
    %78 = arith.truncf %77 : vector<8x8x128xf32> to vector<8x8x128xbf16>
    %c0_45 = arith.constant 0 : index
    %c0_46 = arith.constant 0 : index
    %c0_47 = arith.constant 0 : index
    %c0_48 = arith.constant 0 : index
    %79 = vector.load %arg7[%c0_45, %c0_46, %c0_47, %c0_48] : memref<1x8x8x128xbf16, #tpu.memory_space<vmem>>, vector<1x8x8x128xbf16>
    %80 = vector.shape_cast %79 : vector<1x8x8x128xbf16> to vector<8x8x128xbf16>
    %81 = vector.shape_cast %78 : vector<8x8x128xbf16> to vector<1x8x8x128xbf16>
    tpu.vector_store %arg7[%c0_45, %c0_46, %c0_47, %c0_48], %81 {strides = array<i32>} : memref<1x8x8x128xbf16, #tpu.memory_space<vmem>>, vector<1x8x8x128xbf16>,
    return
  }
  func.func @transform_0(%arg0: i32, %arg1: i32) -> (i32, i32, i32, i32) {
    %c0_i32 = arith.constant 0 : i32
    %c0_i32_0 = arith.constant 0 : i32
    %c0_i32_1 = arith.constant 0 : i32
    return %arg0, %arg1, %c0_i32, %c0_i32_0 : i32, i32, i32, i32
  }
  func.func @transform_1(%arg0: i32, %arg1: i32) -> (i32, i32, i32, i32) {
    %c8_i32 = arith.constant 8 : i32
    %0 = arith.muli %arg1, %c8_i32 : i32
    %c1_i32 = arith.constant 1 : i32
    %1 = arith.subi %0, %c1_i32 : i32
    %c0_i32 = arith.constant 0 : i32
    %2 = arith.maxsi %1, %c0_i32 : i32
    %c0_i32_0 = arith.constant 0 : i32
    %c0_i32_1 = arith.constant 0 : i32
    %c0_i32_2 = arith.constant 0 : i32
    return %arg0, %2, %c0_i32_0, %c0_i32_1 : i32, i32, i32, i32
  }
  func.func @transform_2(%arg0: i32, %arg1: i32) -> (i32, i32, i32, i32) {
    %c8_i32 = arith.constant 8 : i32
    %0 = arith.muli %arg1, %c8_i32 : i32
    %c8_i32_0 = arith.constant 8 : i32
    %1 = arith.addi %0, %c8_i32_0 : i32
    %c7_i32 = arith.constant 7 : i32
    %2 = arith.minsi %1, %c7_i32 : i32
    %c0_i32 = arith.constant 0 : i32
    %c0_i32_1 = arith.constant 0 : i32
    %c0_i32_2 = arith.constant 0 : i32
    return %arg0, %2, %c0_i32, %c0_i32_1 : i32, i32, i32, i32
  }
  func.func @transform_3(%arg0: i32, %arg1: i32) -> (i32, i32, i32) {
    %c0_i32 = arith.constant 0 : i32
    %c0_i32_0 = arith.constant 0 : i32
    %c0_i32_1 = arith.constant 0 : i32
    %c0_i32_2 = arith.constant 0 : i32
    return %c0_i32, %c0_i32_0, %c0_i32_1 : i32, i32, i32
  }
  func.func @transform_4(%arg0: i32, %arg1: i32) -> (i32, i32) {
    %c0_i32 = arith.constant 0 : i32
    %c0_i32_0 = arith.constant 0 : i32
    %c0_i32_1 = arith.constant 0 : i32
    return %c0_i32, %c0_i32_0 : i32, i32
  }
  func.func @transform_5(%arg0: i32, %arg1: i32) -> (i32, i32, i32, i32) {
    %c0_i32 = arith.constant 0 : i32
    %c0_i32_0 = arith.constant 0 : i32
    %c0_i32_1 = arith.constant 0 : i32
    return %arg0, %arg1, %c0_i32, %c0_i32_0 : i32, i32, i32, i32
  }
}

module attributes {stable_mosaic.version = 11 : i64} {
  func.func @_conv3x3_kernel(%arg0: i32, %arg1: i32, %arg2: memref<1x8x8x128xbf16, #tpu.memory_space<vmem>>, %arg3: memref<1x1x8x128xbf16, #tpu.memory_space<vmem>>, %arg4: memref<1x1x8x128xbf16, #tpu.memory_space<vmem>>, %arg5: memref<9x128x128xbf16, #tpu.memory_space<vmem>>, %arg6: memref<1x128xf32, #tpu.memory_space<vmem>>, %arg7: memref<1x4x4x128xbf16, #tpu.memory_space<vmem>>) attributes {dimension_semantics = [#tpu.dimension_semantics<parallel>, #tpu.dimension_semantics<parallel>], iteration_bounds = array<i64: 2, 1>, scalar_prefetch = 0 : i64, scratch_operands = 0 : i64, tpu.core_type = #tpu.core_type<tc>, window_params = [{transform_indices = @transform_0, window_bounds = array<i64: 1, 8, 8, 128>}, {transform_indices = @transform_1, window_bounds = array<i64: 1, 1, 8, 128>}, {transform_indices = @transform_2, window_bounds = array<i64: 1, 1, 8, 128>}, {pipeline_mode = #tpu.pipeline_mode<synchronous>, transform_indices = @transform_3, window_bounds = array<i64: 9, 128, 128>}, {pipeline_mode = #tpu.pipeline_mode<synchronous>, transform_indices = @transform_4, window_bounds = array<i64: 1, 128>}, {transform_indices = @transform_5, window_bounds = array<i64: 1, 4, 4, 128>}]} {
    %c0 = arith.constant 0 : index
    %c0_0 = arith.constant 0 : index
    %c0_1 = arith.constant 0 : index
    %c0_2 = arith.constant 0 : index
    %0 = vector.load %arg2[%c0, %c0_0, %c0_1, %c0_2] : memref<1x8x8x128xbf16, #tpu.memory_space<vmem>>, vector<1x8x8x128xbf16>
    %1 = vector.shape_cast %0 : vector<1x8x8x128xbf16> to vector<8x8x128xbf16>
    %c0_3 = arith.constant 0 : index
    %c0_4 = arith.constant 0 : index
    %c0_5 = arith.constant 0 : index
    %c0_6 = arith.constant 0 : index
    %2 = vector.load %arg3[%c0_3, %c0_4, %c0_5, %c0_6] : memref<1x1x8x128xbf16, #tpu.memory_space<vmem>>, vector<1x1x8x128xbf16>
    %3 = vector.shape_cast %2 : vector<1x1x8x128xbf16> to vector<1x8x128xbf16>
    %c0_7 = arith.constant 0 : index
    %c0_8 = arith.constant 0 : index
    %c0_9 = arith.constant 0 : index
    %c0_10 = arith.constant 0 : index
    %4 = vector.load %arg4[%c0_7, %c0_8, %c0_9, %c0_10] : memref<1x1x8x128xbf16, #tpu.memory_space<vmem>>, vector<1x1x8x128xbf16>
    %5 = vector.shape_cast %4 : vector<1x1x8x128xbf16> to vector<1x8x128xbf16>
    %c0_i32 = arith.constant 0 : i32
    %6 = arith.cmpi sgt, %arg1, %c0_i32 : i32
    %cst = arith.constant 0.000000e+00 : bf16
    %7 = vector.broadcast %cst : bf16 to vector<1x8x128xbf16>
    %8 = arith.select %6, %3, %7 : vector<1x8x128xbf16>
    %c1_i32 = arith.constant 1 : i32
    %9 = arith.addi %arg1, %c1_i32 : i32
    %c1_i32_11 = arith.constant 1 : i32
    %10 = arith.cmpi slt, %9, %c1_i32_11 : i32
    %cst_12 = arith.constant 0.000000e+00 : bf16
    %11 = vector.broadcast %cst_12 : bf16 to vector<1x8x128xbf16>
    %12 = arith.select %10, %5, %11 : vector<1x8x128xbf16>
    %13 = tpu.concatenate %8, %1, %12 in 0 : vector<1x8x128xbf16>, vector<8x8x128xbf16>, vector<1x8x128xbf16> -> vector<10x8x128xbf16>
    %cst_13 = arith.constant 0.000000e+00 : bf16
    %14 = vector.broadcast %cst_13 : bf16 to vector<10x1x128xbf16>
    %15 = vector.extract_strided_slice %13 {offsets = [0, 0, 0], sizes = [10, 7, 128], strides = [1, 1, 1]} : vector<10x8x128xbf16> to vector<10x7x128xbf16>
    %16 = tpu.concatenate %14, %15 in 1 : vector<10x1x128xbf16>, vector<10x7x128xbf16> -> vector<10x8x128xbf16>
    %17 = vector.extract_strided_slice %13 {offsets = [0, 1, 0], sizes = [10, 7, 128], strides = [1, 1, 1]} : vector<10x8x128xbf16> to vector<10x7x128xbf16>
    %18 = tpu.concatenate %17, %14 in 1 : vector<10x7x128xbf16>, vector<10x1x128xbf16> -> vector<10x8x128xbf16>
    %19 = vector.extract_strided_slice %16 {offsets = [0, 0, 0], sizes = [8, 8, 128], strides = [1, 1, 1]} : vector<10x8x128xbf16> to vector<8x8x128xbf16>
    %20 = vector.shape_cast %19 : vector<8x8x128xbf16> to vector<64x128xbf16>
    %c0_14 = arith.constant 0 : index
    %c0_15 = arith.constant 0 : index
    %c0_16 = arith.constant 0 : index
    %21 = vector.load %arg5[%c0_14, %c0_15, %c0_16] : memref<9x128x128xbf16, #tpu.memory_space<vmem>>, vector<1x128x128xbf16>
    %22 = vector.shape_cast %21 : vector<1x128x128xbf16> to vector<128x128xbf16>
    %cst_17 = arith.constant dense<0.000000e+00> : vector<64x128xf32>
    %23 = tpu.matmul %20, %22, %cst_17 {dimension_numbers = #tpu.dot_dimension_numbers<[1], [0], [0], [1], [0, 0, 1, 1], [], []>} : vector<64x128xbf16>, vector<128x128xbf16>, vector<64x128xf32> -> vector<64x128xf32>
    %c0_18 = arith.constant 0 : index
    %c0_19 = arith.constant 0 : index
    %24 = vector.load %arg6[%c0_18, %c0_19] : memref<1x128xf32, #tpu.memory_space<vmem>>, vector<1x128xf32>
    %25 = vector.broadcast %24 : vector<1x128xf32> to vector<64x128xf32>
    %26 = arith.addf %23, %25 : vector<64x128xf32>
    %27 = vector.extract_strided_slice %13 {offsets = [0, 0, 0], sizes = [8, 8, 128], strides = [1, 1, 1]} : vector<10x8x128xbf16> to vector<8x8x128xbf16>
    %28 = vector.shape_cast %27 : vector<8x8x128xbf16> to vector<64x128xbf16>
    %c1 = arith.constant 1 : index
    %c0_20 = arith.constant 0 : index
    %c0_21 = arith.constant 0 : index
    %29 = vector.load %arg5[%c1, %c0_20, %c0_21] : memref<9x128x128xbf16, #tpu.memory_space<vmem>>, vector<1x128x128xbf16>
    %30 = vector.shape_cast %29 : vector<1x128x128xbf16> to vector<128x128xbf16>
    %cst_22 = arith.constant dense<0.000000e+00> : vector<64x128xf32>
    %31 = tpu.matmul %28, %30, %cst_22 {dimension_numbers = #tpu.dot_dimension_numbers<[1], [0], [0], [1], [0, 0, 1, 1], [], []>} : vector<64x128xbf16>, vector<128x128xbf16>, vector<64x128xf32> -> vector<64x128xf32>
    %32 = arith.addf %26, %31 : vector<64x128xf32>
    %33 = vector.extract_strided_slice %18 {offsets = [0, 0, 0], sizes = [8, 8, 128], strides = [1, 1, 1]} : vector<10x8x128xbf16> to vector<8x8x128xbf16>
    %34 = vector.shape_cast %33 : vector<8x8x128xbf16> to vector<64x128xbf16>
    %c2 = arith.constant 2 : index
    %c0_23 = arith.constant 0 : index
    %c0_24 = arith.constant 0 : index
    %35 = vector.load %arg5[%c2, %c0_23, %c0_24] : memref<9x128x128xbf16, #tpu.memory_space<vmem>>, vector<1x128x128xbf16>
    %36 = vector.shape_cast %35 : vector<1x128x128xbf16> to vector<128x128xbf16>
    %cst_25 = arith.constant dense<0.000000e+00> : vector<64x128xf32>
    %37 = tpu.matmul %34, %36, %cst_25 {dimension_numbers = #tpu.dot_dimension_numbers<[1], [0], [0], [1], [0, 0, 1, 1], [], []>} : vector<64x128xbf16>, vector<128x128xbf16>, vector<64x128xf32> -> vector<64x128xf32>
    %38 = arith.addf %32, %37 : vector<64x128xf32>
    %39 = vector.extract_strided_slice %16 {offsets = [1, 0, 0], sizes = [8, 8, 128], strides = [1, 1, 1]} : vector<10x8x128xbf16> to vector<8x8x128xbf16>
    %40 = vector.shape_cast %39 : vector<8x8x128xbf16> to vector<64x128xbf16>
    %c3 = arith.constant 3 : index
    %c0_26 = arith.constant 0 : index
    %c0_27 = arith.constant 0 : index
    %41 = vector.load %arg5[%c3, %c0_26, %c0_27] : memref<9x128x128xbf16, #tpu.memory_space<vmem>>, vector<1x128x128xbf16>
    %42 = vector.shape_cast %41 : vector<1x128x128xbf16> to vector<128x128xbf16>
    %cst_28 = arith.constant dense<0.000000e+00> : vector<64x128xf32>
    %43 = tpu.matmul %40, %42, %cst_28 {dimension_numbers = #tpu.dot_dimension_numbers<[1], [0], [0], [1], [0, 0, 1, 1], [], []>} : vector<64x128xbf16>, vector<128x128xbf16>, vector<64x128xf32> -> vector<64x128xf32>
    %44 = arith.addf %38, %43 : vector<64x128xf32>
    %45 = vector.extract_strided_slice %13 {offsets = [1, 0, 0], sizes = [8, 8, 128], strides = [1, 1, 1]} : vector<10x8x128xbf16> to vector<8x8x128xbf16>
    %46 = vector.shape_cast %45 : vector<8x8x128xbf16> to vector<64x128xbf16>
    %c4 = arith.constant 4 : index
    %c0_29 = arith.constant 0 : index
    %c0_30 = arith.constant 0 : index
    %47 = vector.load %arg5[%c4, %c0_29, %c0_30] : memref<9x128x128xbf16, #tpu.memory_space<vmem>>, vector<1x128x128xbf16>
    %48 = vector.shape_cast %47 : vector<1x128x128xbf16> to vector<128x128xbf16>
    %cst_31 = arith.constant dense<0.000000e+00> : vector<64x128xf32>
    %49 = tpu.matmul %46, %48, %cst_31 {dimension_numbers = #tpu.dot_dimension_numbers<[1], [0], [0], [1], [0, 0, 1, 1], [], []>} : vector<64x128xbf16>, vector<128x128xbf16>, vector<64x128xf32> -> vector<64x128xf32>
    %50 = arith.addf %44, %49 : vector<64x128xf32>
    %51 = vector.extract_strided_slice %18 {offsets = [1, 0, 0], sizes = [8, 8, 128], strides = [1, 1, 1]} : vector<10x8x128xbf16> to vector<8x8x128xbf16>
    %52 = vector.shape_cast %51 : vector<8x8x128xbf16> to vector<64x128xbf16>
    %c5 = arith.constant 5 : index
    %c0_32 = arith.constant 0 : index
    %c0_33 = arith.constant 0 : index
    %53 = vector.load %arg5[%c5, %c0_32, %c0_33] : memref<9x128x128xbf16, #tpu.memory_space<vmem>>, vector<1x128x128xbf16>
    %54 = vector.shape_cast %53 : vector<1x128x128xbf16> to vector<128x128xbf16>
    %cst_34 = arith.constant dense<0.000000e+00> : vector<64x128xf32>
    %55 = tpu.matmul %52, %54, %cst_34 {dimension_numbers = #tpu.dot_dimension_numbers<[1], [0], [0], [1], [0, 0, 1, 1], [], []>} : vector<64x128xbf16>, vector<128x128xbf16>, vector<64x128xf32> -> vector<64x128xf32>
    %56 = arith.addf %50, %55 : vector<64x128xf32>
    %57 = vector.extract_strided_slice %16 {offsets = [2, 0, 0], sizes = [8, 8, 128], strides = [1, 1, 1]} : vector<10x8x128xbf16> to vector<8x8x128xbf16>
    %58 = vector.shape_cast %57 : vector<8x8x128xbf16> to vector<64x128xbf16>
    %c6 = arith.constant 6 : index
    %c0_35 = arith.constant 0 : index
    %c0_36 = arith.constant 0 : index
    %59 = vector.load %arg5[%c6, %c0_35, %c0_36] : memref<9x128x128xbf16, #tpu.memory_space<vmem>>, vector<1x128x128xbf16>
    %60 = vector.shape_cast %59 : vector<1x128x128xbf16> to vector<128x128xbf16>
    %cst_37 = arith.constant dense<0.000000e+00> : vector<64x128xf32>
    %61 = tpu.matmul %58, %60, %cst_37 {dimension_numbers = #tpu.dot_dimension_numbers<[1], [0], [0], [1], [0, 0, 1, 1], [], []>} : vector<64x128xbf16>, vector<128x128xbf16>, vector<64x128xf32> -> vector<64x128xf32>
    %62 = arith.addf %56, %61 : vector<64x128xf32>
    %63 = vector.extract_strided_slice %13 {offsets = [2, 0, 0], sizes = [8, 8, 128], strides = [1, 1, 1]} : vector<10x8x128xbf16> to vector<8x8x128xbf16>
    %64 = vector.shape_cast %63 : vector<8x8x128xbf16> to vector<64x128xbf16>
    %c7 = arith.constant 7 : index
    %c0_38 = arith.constant 0 : index
    %c0_39 = arith.constant 0 : index
    %65 = vector.load %arg5[%c7, %c0_38, %c0_39] : memref<9x128x128xbf16, #tpu.memory_space<vmem>>, vector<1x128x128xbf16>
    %66 = vector.shape_cast %65 : vector<1x128x128xbf16> to vector<128x128xbf16>
    %cst_40 = arith.constant dense<0.000000e+00> : vector<64x128xf32>
    %67 = tpu.matmul %64, %66, %cst_40 {dimension_numbers = #tpu.dot_dimension_numbers<[1], [0], [0], [1], [0, 0, 1, 1], [], []>} : vector<64x128xbf16>, vector<128x128xbf16>, vector<64x128xf32> -> vector<64x128xf32>
    %68 = arith.addf %62, %67 : vector<64x128xf32>
    %69 = vector.extract_strided_slice %18 {offsets = [2, 0, 0], sizes = [8, 8, 128], strides = [1, 1, 1]} : vector<10x8x128xbf16> to vector<8x8x128xbf16>
    %70 = vector.shape_cast %69 : vector<8x8x128xbf16> to vector<64x128xbf16>
    %c8 = arith.constant 8 : index
    %c0_41 = arith.constant 0 : index
    %c0_42 = arith.constant 0 : index
    %71 = vector.load %arg5[%c8, %c0_41, %c0_42] : memref<9x128x128xbf16, #tpu.memory_space<vmem>>, vector<1x128x128xbf16>
    %72 = vector.shape_cast %71 : vector<1x128x128xbf16> to vector<128x128xbf16>
    %cst_43 = arith.constant dense<0.000000e+00> : vector<64x128xf32>
    %73 = tpu.matmul %70, %72, %cst_43 {dimension_numbers = #tpu.dot_dimension_numbers<[1], [0], [0], [1], [0, 0, 1, 1], [], []>} : vector<64x128xbf16>, vector<128x128xbf16>, vector<64x128xf32> -> vector<64x128xf32>
    %74 = arith.addf %68, %73 : vector<64x128xf32>
    %cst_44 = arith.constant 0.000000e+00 : f32
    %75 = vector.broadcast %cst_44 : f32 to vector<64x128xf32>
    %76 = arith.maximumf %74, %75 : vector<64x128xf32>
    %77 = vector.shape_cast %76 : vector<64x128xf32> to vector<4x2x4x2x128xf32>
    %cst_45 = arith.constant dense<0xFF800000> : vector<4x2x4x128xf32>
    %78 = vector.multi_reduction <maximumf>, %77, %cst_45 [3] : vector<4x2x4x2x128xf32> to vector<4x2x4x128xf32>
    %cst_46 = arith.constant dense<0xFF800000> : vector<4x4x128xf32>
    %79 = vector.multi_reduction <maximumf>, %78, %cst_46 [1] : vector<4x2x4x128xf32> to vector<4x4x128xf32>
    %80 = arith.truncf %79 : vector<4x4x128xf32> to vector<4x4x128xbf16>
    %c0_47 = arith.constant 0 : index
    %c0_48 = arith.constant 0 : index
    %c0_49 = arith.constant 0 : index
    %c0_50 = arith.constant 0 : index
    %81 = vector.load %arg7[%c0_47, %c0_48, %c0_49, %c0_50] : memref<1x4x4x128xbf16, #tpu.memory_space<vmem>>, vector<1x4x4x128xbf16>
    %82 = vector.shape_cast %81 : vector<1x4x4x128xbf16> to vector<4x4x128xbf16>
    %83 = vector.shape_cast %80 : vector<4x4x128xbf16> to vector<1x4x4x128xbf16>
    tpu.vector_store %arg7[%c0_47, %c0_48, %c0_49, %c0_50], %83 {strides = array<i32>} : memref<1x4x4x128xbf16, #tpu.memory_space<vmem>>, vector<1x4x4x128xbf16>,
    return
  }
  func.func @transform_0(%arg0: i32, %arg1: i32) -> (i32, i32, i32, i32) {
    %c0_i32 = arith.constant 0 : i32
    %c0_i32_0 = arith.constant 0 : i32
    %c0_i32_1 = arith.constant 0 : i32
    return %arg0, %arg1, %c0_i32, %c0_i32_0 : i32, i32, i32, i32
  }
  func.func @transform_1(%arg0: i32, %arg1: i32) -> (i32, i32, i32, i32) {
    %c8_i32 = arith.constant 8 : i32
    %0 = arith.muli %arg1, %c8_i32 : i32
    %c1_i32 = arith.constant 1 : i32
    %1 = arith.subi %0, %c1_i32 : i32
    %c0_i32 = arith.constant 0 : i32
    %2 = arith.maxsi %1, %c0_i32 : i32
    %c0_i32_0 = arith.constant 0 : i32
    %c0_i32_1 = arith.constant 0 : i32
    %c0_i32_2 = arith.constant 0 : i32
    return %arg0, %2, %c0_i32_0, %c0_i32_1 : i32, i32, i32, i32
  }
  func.func @transform_2(%arg0: i32, %arg1: i32) -> (i32, i32, i32, i32) {
    %c8_i32 = arith.constant 8 : i32
    %0 = arith.muli %arg1, %c8_i32 : i32
    %c8_i32_0 = arith.constant 8 : i32
    %1 = arith.addi %0, %c8_i32_0 : i32
    %c7_i32 = arith.constant 7 : i32
    %2 = arith.minsi %1, %c7_i32 : i32
    %c0_i32 = arith.constant 0 : i32
    %c0_i32_1 = arith.constant 0 : i32
    %c0_i32_2 = arith.constant 0 : i32
    return %arg0, %2, %c0_i32, %c0_i32_1 : i32, i32, i32, i32
  }
  func.func @transform_3(%arg0: i32, %arg1: i32) -> (i32, i32, i32) {
    %c0_i32 = arith.constant 0 : i32
    %c0_i32_0 = arith.constant 0 : i32
    %c0_i32_1 = arith.constant 0 : i32
    %c0_i32_2 = arith.constant 0 : i32
    return %c0_i32, %c0_i32_0, %c0_i32_1 : i32, i32, i32
  }
  func.func @transform_4(%arg0: i32, %arg1: i32) -> (i32, i32) {
    %c0_i32 = arith.constant 0 : i32
    %c0_i32_0 = arith.constant 0 : i32
    %c0_i32_1 = arith.constant 0 : i32
    return %c0_i32, %c0_i32_0 : i32, i32
  }
  func.func @transform_5(%arg0: i32, %arg1: i32) -> (i32, i32, i32, i32) {
    %c0_i32 = arith.constant 0 : i32
    %c0_i32_0 = arith.constant 0 : i32
    %c0_i32_1 = arith.constant 0 : i32
    return %arg0, %arg1, %c0_i32, %c0_i32_0 : i32, i32, i32, i32
  }
}

module attributes {stable_mosaic.version = 11 : i64} {
  func.func @_conv3x3_kernel(%arg0: i32, %arg1: i32, %arg2: memref<1x4x4x128xbf16, #tpu.memory_space<vmem>>, %arg3: memref<1x1x4x128xbf16, #tpu.memory_space<vmem>>, %arg4: memref<1x1x4x128xbf16, #tpu.memory_space<vmem>>, %arg5: memref<9x128x256xbf16, #tpu.memory_space<vmem>>, %arg6: memref<1x256xf32, #tpu.memory_space<vmem>>, %arg7: memref<1x4x4x256xf32, #tpu.memory_space<vmem>>) attributes {dimension_semantics = [#tpu.dimension_semantics<parallel>, #tpu.dimension_semantics<parallel>], iteration_bounds = array<i64: 2, 1>, scalar_prefetch = 0 : i64, scratch_operands = 0 : i64, tpu.core_type = #tpu.core_type<tc>, window_params = [{transform_indices = @transform_0, window_bounds = array<i64: 1, 4, 4, 128>}, {transform_indices = @transform_1, window_bounds = array<i64: 1, 1, 4, 128>}, {transform_indices = @transform_2, window_bounds = array<i64: 1, 1, 4, 128>}, {pipeline_mode = #tpu.pipeline_mode<synchronous>, transform_indices = @transform_3, window_bounds = array<i64: 9, 128, 256>}, {pipeline_mode = #tpu.pipeline_mode<synchronous>, transform_indices = @transform_4, window_bounds = array<i64: 1, 256>}, {transform_indices = @transform_5, window_bounds = array<i64: 1, 4, 4, 256>}]} {
    %c0 = arith.constant 0 : index
    %c0_0 = arith.constant 0 : index
    %c0_1 = arith.constant 0 : index
    %c0_2 = arith.constant 0 : index
    %0 = vector.load %arg2[%c0, %c0_0, %c0_1, %c0_2] : memref<1x4x4x128xbf16, #tpu.memory_space<vmem>>, vector<1x4x4x128xbf16>
    %1 = vector.shape_cast %0 : vector<1x4x4x128xbf16> to vector<4x4x128xbf16>
    %c0_3 = arith.constant 0 : index
    %c0_4 = arith.constant 0 : index
    %c0_5 = arith.constant 0 : index
    %c0_6 = arith.constant 0 : index
    %2 = vector.load %arg3[%c0_3, %c0_4, %c0_5, %c0_6] : memref<1x1x4x128xbf16, #tpu.memory_space<vmem>>, vector<1x1x4x128xbf16>
    %3 = vector.shape_cast %2 : vector<1x1x4x128xbf16> to vector<1x4x128xbf16>
    %c0_7 = arith.constant 0 : index
    %c0_8 = arith.constant 0 : index
    %c0_9 = arith.constant 0 : index
    %c0_10 = arith.constant 0 : index
    %4 = vector.load %arg4[%c0_7, %c0_8, %c0_9, %c0_10] : memref<1x1x4x128xbf16, #tpu.memory_space<vmem>>, vector<1x1x4x128xbf16>
    %5 = vector.shape_cast %4 : vector<1x1x4x128xbf16> to vector<1x4x128xbf16>
    %c0_i32 = arith.constant 0 : i32
    %6 = arith.cmpi sgt, %arg1, %c0_i32 : i32
    %cst = arith.constant 0.000000e+00 : bf16
    %7 = vector.broadcast %cst : bf16 to vector<1x4x128xbf16>
    %8 = arith.select %6, %3, %7 : vector<1x4x128xbf16>
    %c1_i32 = arith.constant 1 : i32
    %9 = arith.addi %arg1, %c1_i32 : i32
    %c1_i32_11 = arith.constant 1 : i32
    %10 = arith.cmpi slt, %9, %c1_i32_11 : i32
    %cst_12 = arith.constant 0.000000e+00 : bf16
    %11 = vector.broadcast %cst_12 : bf16 to vector<1x4x128xbf16>
    %12 = arith.select %10, %5, %11 : vector<1x4x128xbf16>
    %13 = tpu.concatenate %8, %1, %12 in 0 : vector<1x4x128xbf16>, vector<4x4x128xbf16>, vector<1x4x128xbf16> -> vector<6x4x128xbf16>
    %cst_13 = arith.constant 0.000000e+00 : bf16
    %14 = vector.broadcast %cst_13 : bf16 to vector<6x1x128xbf16>
    %15 = vector.extract_strided_slice %13 {offsets = [0, 0, 0], sizes = [6, 3, 128], strides = [1, 1, 1]} : vector<6x4x128xbf16> to vector<6x3x128xbf16>
    %16 = tpu.concatenate %14, %15 in 1 : vector<6x1x128xbf16>, vector<6x3x128xbf16> -> vector<6x4x128xbf16>
    %17 = vector.extract_strided_slice %13 {offsets = [0, 1, 0], sizes = [6, 3, 128], strides = [1, 1, 1]} : vector<6x4x128xbf16> to vector<6x3x128xbf16>
    %18 = tpu.concatenate %17, %14 in 1 : vector<6x3x128xbf16>, vector<6x1x128xbf16> -> vector<6x4x128xbf16>
    %19 = vector.extract_strided_slice %16 {offsets = [0, 0, 0], sizes = [4, 4, 128], strides = [1, 1, 1]} : vector<6x4x128xbf16> to vector<4x4x128xbf16>
    %20 = vector.shape_cast %19 : vector<4x4x128xbf16> to vector<16x128xbf16>
    %c0_14 = arith.constant 0 : index
    %c0_15 = arith.constant 0 : index
    %c0_16 = arith.constant 0 : index
    %21 = vector.load %arg5[%c0_14, %c0_15, %c0_16] : memref<9x128x256xbf16, #tpu.memory_space<vmem>>, vector<1x128x256xbf16>
    %22 = vector.shape_cast %21 : vector<1x128x256xbf16> to vector<128x256xbf16>
    %cst_17 = arith.constant dense<0.000000e+00> : vector<16x256xf32>
    %23 = tpu.matmul %20, %22, %cst_17 {dimension_numbers = #tpu.dot_dimension_numbers<[1], [0], [0], [1], [0, 0, 1, 1], [], []>} : vector<16x128xbf16>, vector<128x256xbf16>, vector<16x256xf32> -> vector<16x256xf32>
    %c0_18 = arith.constant 0 : index
    %c0_19 = arith.constant 0 : index
    %24 = vector.load %arg6[%c0_18, %c0_19] : memref<1x256xf32, #tpu.memory_space<vmem>>, vector<1x256xf32>
    %25 = vector.broadcast %24 : vector<1x256xf32> to vector<16x256xf32>
    %26 = arith.addf %23, %25 : vector<16x256xf32>
    %27 = vector.extract_strided_slice %13 {offsets = [0, 0, 0], sizes = [4, 4, 128], strides = [1, 1, 1]} : vector<6x4x128xbf16> to vector<4x4x128xbf16>
    %28 = vector.shape_cast %27 : vector<4x4x128xbf16> to vector<16x128xbf16>
    %c1 = arith.constant 1 : index
    %c0_20 = arith.constant 0 : index
    %c0_21 = arith.constant 0 : index
    %29 = vector.load %arg5[%c1, %c0_20, %c0_21] : memref<9x128x256xbf16, #tpu.memory_space<vmem>>, vector<1x128x256xbf16>
    %30 = vector.shape_cast %29 : vector<1x128x256xbf16> to vector<128x256xbf16>
    %cst_22 = arith.constant dense<0.000000e+00> : vector<16x256xf32>
    %31 = tpu.matmul %28, %30, %cst_22 {dimension_numbers = #tpu.dot_dimension_numbers<[1], [0], [0], [1], [0, 0, 1, 1], [], []>} : vector<16x128xbf16>, vector<128x256xbf16>, vector<16x256xf32> -> vector<16x256xf32>
    %32 = arith.addf %26, %31 : vector<16x256xf32>
    %33 = vector.extract_strided_slice %18 {offsets = [0, 0, 0], sizes = [4, 4, 128], strides = [1, 1, 1]} : vector<6x4x128xbf16> to vector<4x4x128xbf16>
    %34 = vector.shape_cast %33 : vector<4x4x128xbf16> to vector<16x128xbf16>
    %c2 = arith.constant 2 : index
    %c0_23 = arith.constant 0 : index
    %c0_24 = arith.constant 0 : index
    %35 = vector.load %arg5[%c2, %c0_23, %c0_24] : memref<9x128x256xbf16, #tpu.memory_space<vmem>>, vector<1x128x256xbf16>
    %36 = vector.shape_cast %35 : vector<1x128x256xbf16> to vector<128x256xbf16>
    %cst_25 = arith.constant dense<0.000000e+00> : vector<16x256xf32>
    %37 = tpu.matmul %34, %36, %cst_25 {dimension_numbers = #tpu.dot_dimension_numbers<[1], [0], [0], [1], [0, 0, 1, 1], [], []>} : vector<16x128xbf16>, vector<128x256xbf16>, vector<16x256xf32> -> vector<16x256xf32>
    %38 = arith.addf %32, %37 : vector<16x256xf32>
    %39 = vector.extract_strided_slice %16 {offsets = [1, 0, 0], sizes = [4, 4, 128], strides = [1, 1, 1]} : vector<6x4x128xbf16> to vector<4x4x128xbf16>
    %40 = vector.shape_cast %39 : vector<4x4x128xbf16> to vector<16x128xbf16>
    %c3 = arith.constant 3 : index
    %c0_26 = arith.constant 0 : index
    %c0_27 = arith.constant 0 : index
    %41 = vector.load %arg5[%c3, %c0_26, %c0_27] : memref<9x128x256xbf16, #tpu.memory_space<vmem>>, vector<1x128x256xbf16>
    %42 = vector.shape_cast %41 : vector<1x128x256xbf16> to vector<128x256xbf16>
    %cst_28 = arith.constant dense<0.000000e+00> : vector<16x256xf32>
    %43 = tpu.matmul %40, %42, %cst_28 {dimension_numbers = #tpu.dot_dimension_numbers<[1], [0], [0], [1], [0, 0, 1, 1], [], []>} : vector<16x128xbf16>, vector<128x256xbf16>, vector<16x256xf32> -> vector<16x256xf32>
    %44 = arith.addf %38, %43 : vector<16x256xf32>
    %45 = vector.extract_strided_slice %13 {offsets = [1, 0, 0], sizes = [4, 4, 128], strides = [1, 1, 1]} : vector<6x4x128xbf16> to vector<4x4x128xbf16>
    %46 = vector.shape_cast %45 : vector<4x4x128xbf16> to vector<16x128xbf16>
    %c4 = arith.constant 4 : index
    %c0_29 = arith.constant 0 : index
    %c0_30 = arith.constant 0 : index
    %47 = vector.load %arg5[%c4, %c0_29, %c0_30] : memref<9x128x256xbf16, #tpu.memory_space<vmem>>, vector<1x128x256xbf16>
    %48 = vector.shape_cast %47 : vector<1x128x256xbf16> to vector<128x256xbf16>
    %cst_31 = arith.constant dense<0.000000e+00> : vector<16x256xf32>
    %49 = tpu.matmul %46, %48, %cst_31 {dimension_numbers = #tpu.dot_dimension_numbers<[1], [0], [0], [1], [0, 0, 1, 1], [], []>} : vector<16x128xbf16>, vector<128x256xbf16>, vector<16x256xf32> -> vector<16x256xf32>
    %50 = arith.addf %44, %49 : vector<16x256xf32>
    %51 = vector.extract_strided_slice %18 {offsets = [1, 0, 0], sizes = [4, 4, 128], strides = [1, 1, 1]} : vector<6x4x128xbf16> to vector<4x4x128xbf16>
    %52 = vector.shape_cast %51 : vector<4x4x128xbf16> to vector<16x128xbf16>
    %c5 = arith.constant 5 : index
    %c0_32 = arith.constant 0 : index
    %c0_33 = arith.constant 0 : index
    %53 = vector.load %arg5[%c5, %c0_32, %c0_33] : memref<9x128x256xbf16, #tpu.memory_space<vmem>>, vector<1x128x256xbf16>
    %54 = vector.shape_cast %53 : vector<1x128x256xbf16> to vector<128x256xbf16>
    %cst_34 = arith.constant dense<0.000000e+00> : vector<16x256xf32>
    %55 = tpu.matmul %52, %54, %cst_34 {dimension_numbers = #tpu.dot_dimension_numbers<[1], [0], [0], [1], [0, 0, 1, 1], [], []>} : vector<16x128xbf16>, vector<128x256xbf16>, vector<16x256xf32> -> vector<16x256xf32>
    %56 = arith.addf %50, %55 : vector<16x256xf32>
    %57 = vector.extract_strided_slice %16 {offsets = [2, 0, 0], sizes = [4, 4, 128], strides = [1, 1, 1]} : vector<6x4x128xbf16> to vector<4x4x128xbf16>
    %58 = vector.shape_cast %57 : vector<4x4x128xbf16> to vector<16x128xbf16>
    %c6 = arith.constant 6 : index
    %c0_35 = arith.constant 0 : index
    %c0_36 = arith.constant 0 : index
    %59 = vector.load %arg5[%c6, %c0_35, %c0_36] : memref<9x128x256xbf16, #tpu.memory_space<vmem>>, vector<1x128x256xbf16>
    %60 = vector.shape_cast %59 : vector<1x128x256xbf16> to vector<128x256xbf16>
    %cst_37 = arith.constant dense<0.000000e+00> : vector<16x256xf32>
    %61 = tpu.matmul %58, %60, %cst_37 {dimension_numbers = #tpu.dot_dimension_numbers<[1], [0], [0], [1], [0, 0, 1, 1], [], []>} : vector<16x128xbf16>, vector<128x256xbf16>, vector<16x256xf32> -> vector<16x256xf32>
    %62 = arith.addf %56, %61 : vector<16x256xf32>
    %63 = vector.extract_strided_slice %13 {offsets = [2, 0, 0], sizes = [4, 4, 128], strides = [1, 1, 1]} : vector<6x4x128xbf16> to vector<4x4x128xbf16>
    %64 = vector.shape_cast %63 : vector<4x4x128xbf16> to vector<16x128xbf16>
    %c7 = arith.constant 7 : index
    %c0_38 = arith.constant 0 : index
    %c0_39 = arith.constant 0 : index
    %65 = vector.load %arg5[%c7, %c0_38, %c0_39] : memref<9x128x256xbf16, #tpu.memory_space<vmem>>, vector<1x128x256xbf16>
    %66 = vector.shape_cast %65 : vector<1x128x256xbf16> to vector<128x256xbf16>
    %cst_40 = arith.constant dense<0.000000e+00> : vector<16x256xf32>
    %67 = tpu.matmul %64, %66, %cst_40 {dimension_numbers = #tpu.dot_dimension_numbers<[1], [0], [0], [1], [0, 0, 1, 1], [], []>} : vector<16x128xbf16>, vector<128x256xbf16>, vector<16x256xf32> -> vector<16x256xf32>
    %68 = arith.addf %62, %67 : vector<16x256xf32>
    %69 = vector.extract_strided_slice %18 {offsets = [2, 0, 0], sizes = [4, 4, 128], strides = [1, 1, 1]} : vector<6x4x128xbf16> to vector<4x4x128xbf16>
    %70 = vector.shape_cast %69 : vector<4x4x128xbf16> to vector<16x128xbf16>
    %c8 = arith.constant 8 : index
    %c0_41 = arith.constant 0 : index
    %c0_42 = arith.constant 0 : index
    %71 = vector.load %arg5[%c8, %c0_41, %c0_42] : memref<9x128x256xbf16, #tpu.memory_space<vmem>>, vector<1x128x256xbf16>
    %72 = vector.shape_cast %71 : vector<1x128x256xbf16> to vector<128x256xbf16>
    %cst_43 = arith.constant dense<0.000000e+00> : vector<16x256xf32>
    %73 = tpu.matmul %70, %72, %cst_43 {dimension_numbers = #tpu.dot_dimension_numbers<[1], [0], [0], [1], [0, 0, 1, 1], [], []>} : vector<16x128xbf16>, vector<128x256xbf16>, vector<16x256xf32> -> vector<16x256xf32>
    %74 = arith.addf %68, %73 : vector<16x256xf32>
    %75 = vector.shape_cast %74 : vector<16x256xf32> to vector<4x4x256xf32>
    %c0_44 = arith.constant 0 : index
    %c0_45 = arith.constant 0 : index
    %c0_46 = arith.constant 0 : index
    %c0_47 = arith.constant 0 : index
    %76 = vector.load %arg7[%c0_44, %c0_45, %c0_46, %c0_47] : memref<1x4x4x256xf32, #tpu.memory_space<vmem>>, vector<1x4x4x256xf32>
    %77 = vector.shape_cast %76 : vector<1x4x4x256xf32> to vector<4x4x256xf32>
    %78 = vector.shape_cast %75 : vector<4x4x256xf32> to vector<1x4x4x256xf32>
    tpu.vector_store %arg7[%c0_44, %c0_45, %c0_46, %c0_47], %78 {strides = array<i32>} : memref<1x4x4x256xf32, #tpu.memory_space<vmem>>, vector<1x4x4x256xf32>,
    return
  }
  func.func @transform_0(%arg0: i32, %arg1: i32) -> (i32, i32, i32, i32) {
    %c0_i32 = arith.constant 0 : i32
    %c0_i32_0 = arith.constant 0 : i32
    %c0_i32_1 = arith.constant 0 : i32
    return %arg0, %arg1, %c0_i32, %c0_i32_0 : i32, i32, i32, i32
  }
  func.func @transform_1(%arg0: i32, %arg1: i32) -> (i32, i32, i32, i32) {
    %c4_i32 = arith.constant 4 : i32
    %0 = arith.muli %arg1, %c4_i32 : i32
    %c1_i32 = arith.constant 1 : i32
    %1 = arith.subi %0, %c1_i32 : i32
    %c0_i32 = arith.constant 0 : i32
    %2 = arith.maxsi %1, %c0_i32 : i32
    %c0_i32_0 = arith.constant 0 : i32
    %c0_i32_1 = arith.constant 0 : i32
    %c0_i32_2 = arith.constant 0 : i32
    return %arg0, %2, %c0_i32_0, %c0_i32_1 : i32, i32, i32, i32
  }
  func.func @transform_2(%arg0: i32, %arg1: i32) -> (i32, i32, i32, i32) {
    %c4_i32 = arith.constant 4 : i32
    %0 = arith.muli %arg1, %c4_i32 : i32
    %c4_i32_0 = arith.constant 4 : i32
    %1 = arith.addi %0, %c4_i32_0 : i32
    %c3_i32 = arith.constant 3 : i32
    %2 = arith.minsi %1, %c3_i32 : i32
    %c0_i32 = arith.constant 0 : i32
    %c0_i32_1 = arith.constant 0 : i32
    %c0_i32_2 = arith.constant 0 : i32
    return %arg0, %2, %c0_i32, %c0_i32_1 : i32, i32, i32, i32
  }
  func.func @transform_3(%arg0: i32, %arg1: i32) -> (i32, i32, i32) {
    %c0_i32 = arith.constant 0 : i32
    %c0_i32_0 = arith.constant 0 : i32
    %c0_i32_1 = arith.constant 0 : i32
    %c0_i32_2 = arith.constant 0 : i32
    return %c0_i32, %c0_i32_0, %c0_i32_1 : i32, i32, i32
  }
  func.func @transform_4(%arg0: i32, %arg1: i32) -> (i32, i32) {
    %c0_i32 = arith.constant 0 : i32
    %c0_i32_0 = arith.constant 0 : i32
    %c0_i32_1 = arith.constant 0 : i32
    return %c0_i32, %c0_i32_0 : i32, i32
  }
  func.func @transform_5(%arg0: i32, %arg1: i32) -> (i32, i32, i32, i32) {
    %c0_i32 = arith.constant 0 : i32
    %c0_i32_0 = arith.constant 0 : i32
    %c0_i32_1 = arith.constant 0 : i32
    return %arg0, %arg1, %c0_i32, %c0_i32_0 : i32, i32, i32, i32
  }
}

</mosaic_0001>

<bundles_post_ra>
// kernel: contrast_extractor_layer.5
= control target key start
LH: loop header
LB: loop body
LE: loop exit
PB: predicated region body
PF: predicated region fallthrough
CT: control target
= control target key end

     0   :  { %s2390_s18 = smov 0   ;;  %s2392_s19 = smov 0   ;;  %s2867_s0 = inlined_call_operand.vmem [shape: bf16[2,8,8,64], index: 0, kind: input, shape index: {}, may-alias: {0,1,2}]   ;;  %s2868_s1 = inlined_call_operand.vmem [shape: bf16[2,8,8,64], index: 1, kind: input, shape index: {}, may-alias: {0,1,2}]   ;;  %s2869_s2 = inlined_call_operand.vmem [shape: bf16[2,8,8,64], index: 2, kind: input, shape index: {}, may-alias: {0,1,2}]   ;;  %s2870_s3 = inlined_call_operand.vmem [shape: bf16[9,64,128], index: 3, kind: input, shape index: {}]   ;;  %s2871_s4 = inlined_call_operand.vmem [shape: f32[1,128], index: 4, kind: input, shape index: {}]   ;;  %s2872_s5 = inlined_call_operand.vmem [shape: bf16[2,8,8,128], index: 5, kind: output, shape index: {}]  }
   0x1   :  { %s2394_s20 = smov 0  }
   0x2 LB: > { %s27_s1 = sadd.s32 1, %s2353_s19  ;;  %p1822_p0 = scmp.ge.s32.totalorder %s2357_s20, 1  ;;  %s2357_s20 = sphi %s2394_s20, %s15_s20   ;;  %s2353_s19 = sphi %s2392_s19, %s2878_s19   ;;  %s2349_s18 = sphi %s2390_s18, %s2877_s18  }
   0x3   : > { %p29_p1 = scmp.ge.s32.totalorder %s27_s1, 2  ;;  %p270_p2 = scmp.lt.s32.totalorder %s2357_s20, 3 }
   0x5   : > { %s2880_s1 = smov (%p29_p1, %s27_s1), 0  ;;  %p271_p3 = pnand %p1822_p0, %p270_p2 }
   0x6   : > { %p331_p4 = scmp.lt.s32.totalorder (!%p271_p3), %s2349_s18, 1 }
   0x7   : > { %274 = sbr.rel (%p271_p3) target bundleno = 302 (0x12e), region = 40 }
   0xc   : > { %v2284_v0 = vld [vmem:[%s2870_s3 + $0x18] sm:$0xff]   ;;  %v2286_v2 = vld [vmem:[%s2870_s3 + $0x10] sm:$0xff]   ;;  %s2882_s18 = smov (!%p331_p4, %s2349_s18), 1  ;;  %v2359_v3 = vmov 0   ;;  %v2288_v6 = vld [vmem:[%s2870_s3 + $0x8] sm:$0xff]   ;;  %vm514_vm0 = vcmask 1040384  }
   0xd   : > { %v2285_v1 = vld [vmem:[%s2870_s3 + $0x38] sm:$0xff]   ;;  %2107 = vmatprep.subr.bf16.mxu0 %v2284_v0  ;;  %v2421_v4 = vcombine.low %v2359_v3, %v2359_v3  ;;  %v2287_v5 = vld [vmem:[%s2870_s3 + $0x30] sm:$0xff]   ;;  %s2007_s30 = sshll.u32 %s2882_s18, 5  ;;  %v2289_v7 = vld [vmem:[%s2870_s3 + $0x28] sm:$0xff]   ;;  %vm515_vm1 = vsmask.f32 256 }
   0xe   : > { %2123 = vmatprep.subr.bf16.mxu1 %v2285_v1  ;;  %2108 = vmatpush3.bf16.msra.mxu0 %v2284_v0  ;;  %s2438_s10 = scalar_lea.vmem %s2867_s0, %s2007_s30  ;;  %v2290_v9 = vld [vmem:[%s2870_s3] sm:$0xff]   ;;  %v2300_v29 = vld [vmem:[%s2870_s3 + $0x58] sm:$0xff]   ;;  %vm2504_vm2 = vmand %vm514_vm0, %vm515_vm1  ;;  %vm629_vm3 = vcmask 523264   ;;  %vm557_vm4 = vcmask 1043456   ;;  %vm558_vm5 = vsmask.f32 3328  ;;  %s380_s9 = scalar_lea.vmem %s2872_s5, %s2007_s30 }
   0xf   : > { %2124 = vmatpush3.bf16.msra.mxu1 %v2285_v1  ;;  %2109 = vmatprep.subr.bf16.mxu0 %v2286_v2  ;;  %v435_v8 = vshrl.u32 %v2421_v4, 16  ;;  %v438_v10 = vshll.u32 %v2421_v4, 16  ;;  %v2446_v11 = vld [vmem:[%s2438_s10] sm:$0xf]  ;;  %v2449_v12 = vld [vmem:[%s2438_s10 + $0x4] sm:$0xf]  ;;  %vm2586_vm6 = vmand %vm557_vm4, %vm558_vm5 }
  0x10   : > { %2125 = vmatprep.subr.bf16.mxu1 %v2287_v5  ;;  %v2452_v13 = vld [vmem:[%s2438_s10 + $0x8] sm:$0xf]  ;;  %v2291_v14 = vld [vmem:[%s2870_s3 + $0x20] sm:$0xff]   ;;  %v2458_v15 = vld [vmem:[%s2438_s10 + $0xc] sm:$0xf]  ;;  %v2465_v17 = vcombine.low %v2446_v11, %v2446_v11  ;;  %v2469_v18 = vcombine.low %v2449_v12, %v2449_v12  ;;  %v1862_v61 = vcombine.low %v2359_v3, %v2446_v11 }
  0x11   : > { %v2461_v16 = vld [vmem:[%s2438_s10 + $0x18] sm:$0xf]  ;;  %v2473_v19 = vcombine.low %v2452_v13, %v2452_v13  ;;  %v437_v20 = vrot.slane %v435_v8, 7  ;;  %v2479_v21 = vcombine.low %v2458_v15, %v2458_v15  ;;  %v2520_v43 = vld [vmem:[%s2438_s10 + $0x1c] sm:$0xf]  ;;  %v527_v50 = vrot.slane %v438_v10, 1 }
  0x12   : > { %2110 = vmatpush3.bf16.msra.mxu0 %v2286_v2  ;;  %v2483_v22 = vcombine.low %v2461_v16, %v2461_v16  ;;  %v442_v23 = vshrl.u32 %v2465_v17, 16  ;;  %v445_v24 = vshll.u32 %v2465_v17, 16  ;;  %v449_v25 = vshrl.u32 %v2469_v18, 16  ;;  %v2301_v33 = vld [vmem:[%s2870_s3 + $0x78] sm:$0xff]   ;;  %v2302_v51 = vld [vmem:[%s2870_s3 + $0x50] sm:$0xff]   ;;  %2131 = vmatprep.mubr.msk.bf16.mxu1 %vm629_vm3, %v1862_v61 }
  0x13   : > { %2126 = vmatpush3.bf16.msra.mxu1 %v2287_v5  ;;  %2111 = vmatprep.subr.bf16.mxu0 %v2288_v6  ;;  %v452_v26 = vshll.u32 %v2469_v18, 16  ;;  %v456_v27 = vshrl.u32 %v2473_v19, 16  ;;  %v459_v28 = vshll.u32 %v2473_v19, 16  ;;  %v440_v30 = vor.u32 %v438_v10, %v437_v20  ;;  %v2542_v53 = vld [vmem:[%s2438_s10 + $0x10] sm:$0xf]  ;;  %v2308_v5 = vld [vmem:[%s2870_s3 + $0x48] sm:$0xff]  }
  0x14   : > { %2127 = vmatprep.subr.bf16.mxu1 %v2289_v7  ;;  %v444_v31 = vrot.slane %v442_v23, 7  ;;  %v451_v32 = vrot.slane %v449_v25, 7  ;;  %v463_v35 = vshrl.u32 %v2479_v21, 16  ;;  %v484_v39 = vshrl.u32 %v2483_v22, 16  ;;  %v2545_v54 = vld [vmem:[%s2438_s10 + $0x14] sm:$0xf] }
  0x15   : > { %v458_v34 = vrot.slane %v456_v27, 7  ;;  %v2513_v41 = vsel %vm2504_vm2, 0, %v440_v30  ;;  %v466_v45 = vshll.u32 %v2479_v21, 16  ;;  %v487_v49 = vshll.u32 %v2483_v22, 16  ;;  %v2303_v59 = vld [vmem:[%s2870_s3 + $0x70] sm:$0xff]   ;;  %v2317_v22 = vld [vmem:[%s2870_s3 + $0xa8] sm:$0xff]  }
  0x16   : > { %2112 = vmatpush3.bf16.msra.mxu0 %v2288_v6  ;;  %v447_v37 = vor.u32 %v445_v24, %v444_v31  ;;  %v454_v38 = vor.u32 %v452_v26, %v451_v32  ;;  %v465_v44 = vrot.slane %v463_v35, 7  ;;  %v486_v48 = vrot.slane %v484_v39, 7  ;;  %v2310_v31 = vld [vmem:[%s2870_s3 + $0x40] sm:$0xff]  }
  0x17   : > { %2128 = vmatpush3.bf16.msra.mxu1 %v2289_v7  ;;  %2113 = vmatprep.subr.bf16.mxu0 %v2290_v9  ;;  %v461_v40 = vor.u32 %v459_v28, %v458_v34  ;;  %v529_v55 = vrot.slane %v445_v24, 1  ;;  %v2553_v57 = vcombine.low %v2520_v43, %v2520_v43  ;;  %v2567_v62 = vcombine.low %v2449_v12, %v2452_v13 }
  0x18   : > { %2129 = vmatprep.subr.bf16.mxu1 %v2291_v14  ;;  %v2517_v42 = vsel %vm2504_vm2, 0, %v447_v37  ;;  %v2527_v46 = vsel %vm2504_vm2, 0, %v454_v38  ;;  %v468_v58 = vor.u32 %v466_v45, %v465_v44  ;;  %v489_v60 = vor.u32 %v487_v49, %v486_v48 }
  0x19   : > { %v2531_v47 = vsel %vm2504_vm2, 0, %v461_v40  ;;  %v1842_v52 = vcombine.low %v2513_v41, %v2517_v42  ;;  %v1836_v63 = vcombine.low %v2542_v53, %v2542_v53  ;;  %v2573_v0 = vcombine.low %v2458_v15, %v2542_v53 }
  0x1a   : > { %2114 = vmatpush3.bf16.msra.mxu0 %v2290_v9  ;;  %v2549_v56 = vcombine.low %v2527_v46, %v2531_v47  ;;  %v2577_v1 = vcombine.low %v2545_v54, %v2545_v54  ;;  %v531_v2 = vrot.slane %v452_v26, 1  ;;  %v528_v6 = vor.u32 %v527_v50, %v435_v8 }
  0x1b   : > { %2130 = vmatpush3.bf16.msra.mxu1 %v2291_v14  ;;  %2139 = vmatprep.subr.bf16.mxu0 %v2300_v29  ;;  %v530_v7 = vor.u32 %v529_v55, %v442_v23  ;;  %v470_v10 = vshrl.u32 %v1836_v63, 16  ;;  %v473_v14 = vshll.u32 %v1836_v63, 16  ;;  %v491_v24 = vshrl.u32 %v2553_v57, 16  ;;  %v2309_v23 = vld [vmem:[%s2870_s3 + $0x68] sm:$0xff]  }
  0x1c   : > { %2155 = vmatprep.subr.bf16.mxu1 %v2301_v33  ;;  %2115 = vmatprep.mubr.msk.bf16.mxu0 %vm629_vm3, %v1842_v52  ;;  %v477_v17 = vshrl.u32 %v2577_v1, 16  ;;  %v480_v20 = vshll.u32 %v2577_v1, 16  ;;  %v2597_v4 = vsel %vm2504_vm2, 0, %v468_v58  ;;  %v2601_v8 = vsel %vm2504_vm2, 0, %v489_v60 }
  0x1d   : > { %2116 = vmatmul.mubr.msk.bf16.vlgmr.msra.gmra.mxu0 %vm629_vm3, %v2549_v56  ;;  %v533_v26 = vrot.slane %v459_v28, 1  ;;  %v2617_v32 = vsel %vm2586_vm6, %v528_v6, 0  ;;  %v535_v28 = vrot.slane %v466_v45, 1  ;;  %v537_v34 = vrot.slane %v473_v14, 1 }
  0x1e   : > { %2140 = vmatpush3.bf16.msra.mxu0 %v2300_v29  ;;  %2132 = vmatmul.mubr.msk.bf16.vlgmr.msra.gmra.mxu1 %vm629_vm3, %v2567_v62  ;;  %v472_v29 = vrot.slane %v470_v10, 7  ;;  %v479_v30 = vrot.slane %v477_v17, 7  ;;  %v532_v37 = vor.u32 %v531_v2, %v449_v25  ;;  %v2627_v44 = vcombine.low %v2545_v54, %v2461_v16  ;;  %v2311_v25 = vld [vmem:[%s2870_s3 + $0x60] sm:$0xff]  }
  0x1f   : > { %2141 = vmatprep.subr.bf16.mxu0 %v2302_v51  ;;  %2156 = vmatpush3.bf16.msra.mxu1 %v2301_v33  ;;  %v2621_v33 = vsel %vm2586_vm6, %v530_v7, 0  ;;  %v494_v48 = vshll.u32 %v2553_v57, 16  ;;  %v493_v50 = vrot.slane %v491_v24, 7  ;;  %v1902_v58 = vcombine.low %v2517_v42, %v2527_v46  ;;  %v2313_v42 = vld [vmem:[%s2870_s3 + $0xb8] sm:$0xff]   ;;  %v2323_v57 = vld [vmem:[%s2870_s3 + $0xd0] sm:$0xff]  }
  0x20   : > { %2135 = vmatprep.mubr.msk.bf16.mxu1 %vm629_vm3, %v2573_v0  ;;  %2157 = vmatprep.subr.bf16.mxu1 %v2303_v59  ;;  %v475_v38 = vor.u32 %v473_v14, %v472_v29  ;;  %v482_v40 = vor.u32 %v480_v20, %v479_v30  ;;  %v1882_v19 = vcombine.low %v2617_v32, %v2621_v33  ;;  %v539_v21 = vrot.slane %v480_v20, 1  ;;  %v2319_v30 = vld [vmem:[%s2870_s3 + $0xa0] sm:$0xff]  }
  0x21   : > { %v536_v60 = vor.u32 %v535_v28, %v463_v35  ;;  %v538_v61 = vor.u32 %v537_v34, %v470_v10  ;;  %v541_v35 = vrot.slane %v487_v49, 1  ;;  %v1903_v46 = vcombine.low %v2531_v47, %v2597_v4  ;;  %v2315_v47 = vld [vmem:[%s2870_s3 + $0xb0] sm:$0xff]   ;;  %v2321_v28 = vld [vmem:[%s2870_s3 + $0xd8] sm:$0xff]  }
  0x22   : > { %2142 = vmatpush3.bf16.msra.mxu0 %v2302_v51  ;;  %v534_v51 = vor.u32 %v533_v26, %v456_v27  ;;  %v522_v45 = vsel %vm2504_vm2, 0, %v475_v38  ;;  %v523_v18 = vsel %vm2504_vm2, 0, %v482_v40  ;;  %v562_v27 = vsel %vm2586_vm6, %v532_v37, 0  ;;  %v2324_v40 = vld [vmem:[%s2870_s3 + $0xf0] sm:$0xff]  }
  0x23   : > { %2143 = vmatprep.subr.bf16.mxu0 %v2308_v5  ;;  %2158 = vmatpush3.bf16.msra.mxu1 %v2303_v59  ;;  %v2642_v52 = vcombine.low %v2597_v4, %v522_v45  ;;  %v2645_v55 = vcombine.low %v523_v18, %v2601_v8  ;;  %v2312_v59 = vld [vmem:[%s2870_s3 + $0x98] sm:$0xff]   ;;  %v564_v2 = vsel %vm2586_vm6, %v536_v60, 0  ;;  %v496_v6 = vor.u32 %v494_v48, %v493_v50  ;;  %v2314_v4 = vld [vmem:[%s2870_s3 + $0x90] sm:$0xff]   ;;  %v2329_v50 = vld [vmem:[%s2870_s3 + $0xc0] sm:$0xff]  }
  0x24   : > { %2159 = vmatprep.subr.bf16.mxu1 %v2309_v23  ;;  %v2664_v63 = vsel %vm2586_vm6, %v534_v51, 0  ;;  %v1904_v7 = vcombine.low %v522_v45, %v523_v18  ;;  %v540_v14 = vor.u32 %v539_v21, %v477_v17  ;;  %v542_v20 = vor.u32 %v541_v35, %v484_v39  ;;  %v2316_v17 = vld [vmem:[%s2870_s3 + $0x88] sm:$0xff]   ;;  %v2332_v51 = vld [vmem:[%s2870_s3 + $0x110] sm:$0xff]  }
  0x25   : > { %2119 = vmatprep.mubr.msk.bf16.mxu0 %vm629_vm3, %v2642_v52  ;;  %v2684_v10 = vcombine.low %v562_v27, %v2664_v63  ;;  %v1942_v26 = vcombine.low %v2621_v33, %v562_v27  ;;  %v543_v33 = vrot.slane %v494_v48, 1  ;;  %v1923_v38 = vcombine.low %v2452_v13, %v2458_v15  ;;  %v2328_v15 = vld [vmem:[%s2870_s3 + $0xe8] sm:$0xff]  }
  0x26   : > { %2144 = vmatpush3.bf16.msra.mxu0 %v2308_v5  ;;  %2136 = vmatmul.mubr.msk.bf16.gmra.mxu1 %vm629_vm3, %v2627_v44  ;;  %v565_v5 = vsel %vm2586_vm6, %v538_v61, 0  ;;  %v566_v36 = vsel %vm2586_vm6, %v540_v14, 0  ;;  %v567_v39 = vsel %vm2586_vm6, %v542_v20, 0  ;;  %v1924_v48 = vcombine.low %v2542_v53, %v2545_v54  ;;  %v2327_v54 = vld [vmem:[%s2870_s3 + $0xc8] sm:$0xff]  }
  0x27   : > { %2145 = vmatprep.subr.bf16.mxu0 %v2310_v31  ;;  %2160 = vmatpush3.bf16.msra.mxu1 %v2309_v23  ;;  %v2689_v49 = vcombine.low %v564_v2, %v565_v5  ;;  %v2701_v23 = vsel %vm2504_vm2, 0, %v496_v6  ;;  %v2721_v29 = vcombine.low %v566_v36, %v567_v39  ;;  %v1944_v34 = vcombine.low %v565_v5, %v566_v36 }
  0x28   : > { %2120 = vmatmul.mubr.msk.bf16.gmra.mxu0 %vm629_vm3, %v2645_v55  ;;  %2161 = vmatprep.subr.bf16.mxu1 %v2311_v25  ;;  %v1905_v1 = vcombine.low %v2601_v8, %v2701_v23  ;;  %v2318_v8 = vld [vmem:[%s2870_s3 + $0x80] sm:$0xff]   ;;  %v544_v37 = vor.u32 %v543_v33, %v491_v24  ;;  %v1925_v9 = vcombine.low %v2461_v16, %v2520_v43  ;;  %v2331_v16 = vld [vmem:[%s2870_s3 + $0x118] sm:$0xff]  }
  0x29   : > { %2147 = vmatprep.mubr.msk.bf16.mxu0 %vm629_vm3, %v1882_v19  ;;  %2163 = vmatprep.mubr.msk.bf16.mxu1 %vm629_vm3, %v1902_v58  ;;  %v2330_v24 = vld [vmem:[%s2870_s3 + $0xe0] sm:$0xff]  }
  0x2a   : > { %2146 = vmatpush3.bf16.msra.mxu0 %v2310_v31  ;;  %v1922_v31 = vcombine.low %v2446_v11, %v2449_v12  ;;  %v2322_v11 = vld [vmem:[%s2870_s3 + $0xf8] sm:$0xff]   ;;  %v1943_v12 = vcombine.low %v2664_v63, %v564_v2  ;;  %v568_v13 = vsel %vm2586_vm6, %v544_v37, 0 }
  0x2b   : > { %2171 = vmatprep.subr.bf16.mxu0 %v2312_v59  ;;  %2162 = vmatpush3.bf16.msra.mxu1 %v2311_v25  ;;  %v1945_v53 = vcombine.low %v567_v39, %v568_v13 }
  0x2c   : > { %2187 = vmatprep.subr.bf16.mxu1 %v2313_v42 }
  0x2e   : > { %2164 = vmatmul.mubr.msk.bf16.vlgmr.msra.gmra.mxu1 %vm629_vm3, %v1903_v46 }
  0x2f   : > { %2188 = vmatpush3.bf16.msra.mxu1 %v2313_v42  ;;  %2167 = vmatprep.mubr.msk.bf16.mxu1 %vm629_vm3, %v1904_v7 }
  0x30   : > { %2148 = vmatmul.mubr.msk.bf16.vlgmr.msra.gmra.mxu0 %vm629_vm3, %v2684_v10  ;;  %2189 = vmatprep.subr.bf16.mxu1 %v2315_v47 }
  0x31   : > { %2172 = vmatpush3.bf16.msra.mxu0 %v2312_v59  ;;  %2151 = vmatprep.mubr.msk.bf16.mxu0 %vm629_vm3, %v2689_v49 }
  0x32   : > { %2173 = vmatprep.subr.bf16.mxu0 %v2314_v4 }
  0x33   : > { %2190 = vmatpush3.bf16.msra.mxu1 %v2315_v47 }
  0x34   : > { %2191 = vmatprep.subr.bf16.mxu1 %v2317_v22 }
  0x35   : > { %2174 = vmatpush3.bf16.msra.mxu0 %v2314_v4 }
  0x36   : > { %2168 = vmatmul.mubr.msk.bf16.gmra.mxu1 %vm629_vm3, %v1905_v1  ;;  %2175 = vmatprep.subr.bf16.mxu0 %v2316_v17 }
  0x37   : > { %2192 = vmatpush3.bf16.msra.mxu1 %v2317_v22  ;;  %2195 = vmatprep.mubr.msk.bf16.mxu1 %vm629_vm3, %v1942_v26 }
  0x38   : > { %2152 = vmatmul.mubr.msk.bf16.gmra.mxu0 %vm629_vm3, %v2721_v29  ;;  %2193 = vmatprep.subr.bf16.mxu1 %v2319_v30 }
  0x39   : > { %2176 = vmatpush3.bf16.msra.mxu0 %v2316_v17  ;;  %2179 = vmatprep.mubr.msk.bf16.mxu0 %vm629_vm3, %v1922_v31 }
  0x3a   : > { %2177 = vmatprep.subr.bf16.mxu0 %v2318_v8 }
  0x3b   : > { %2194 = vmatpush3.bf16.msra.mxu1 %v2319_v30 }
  0x3c   : > { %2219 = vmatprep.subr.bf16.mxu1 %v2322_v11 }
  0x3d   : > { %2178 = vmatpush3.bf16.msra.mxu0 %v2318_v8 }
  0x3e   : > { %2196 = vmatmul.mubr.msk.bf16.vlgmr.msra.gmra.mxu1 %vm629_vm3, %v1943_v12  ;;  %2203 = vmatprep.subr.bf16.mxu0 %v2321_v28 }
  0x3f   : > { %2220 = vmatpush3.bf16.msra.mxu1 %v2322_v11  ;;  %2199 = vmatprep.mubr.msk.bf16.mxu1 %vm629_vm3, %v1944_v34  ;;  %v1841_v11 = vld [vmem:[%s2871_s4] ss:$0 sm:$0xff] }
  0x40   : > { %2180 = vmatmul.mubr.msk.bf16.vlgmr.msra.gmra.mxu0 %vm629_vm3, %v1923_v38  ;;  %2221 = vmatprep.subr.bf16.mxu1 %v2324_v40 }
  0x41   : > { %2204 = vmatpush3.bf16.msra.mxu0 %v2321_v28  ;;  %2183 = vmatprep.mubr.msk.bf16.mxu0 %vm629_vm3, %v1924_v48 }
  0x42   : > { %2205 = vmatprep.subr.bf16.mxu0 %v2323_v57 }
  0x43   : > { %2222 = vmatpush3.bf16.msra.mxu1 %v2324_v40 }
  0x44   : > { %2223 = vmatprep.subr.bf16.mxu1 %v2328_v15 }
  0x45   : > { %2206 = vmatpush3.bf16.msra.mxu0 %v2323_v57 }
  0x46   : > { %2200 = vmatmul.mubr.msk.bf16.gmra.mxu1 %vm629_vm3, %v1945_v53  ;;  %2207 = vmatprep.subr.bf16.mxu0 %v2327_v54 }
  0x47   : > { %2224 = vmatpush3.bf16.msra.mxu1 %v2328_v15  ;;  %2227 = vmatprep.mubr.msk.bf16.mxu1 %vm629_vm3, %v2567_v62  ;;  %v1979_v62 = vcombine.low %v2520_v43, %v2359_v3  ;;  %v1996_v3 = vcombine.low %v568_v13, %v2617_v32 }
  0x48   : > { %2184 = vmatmul.mubr.msk.bf16.gmra.mxu0 %vm629_vm3, %v1925_v9  ;;  %2225 = vmatprep.subr.bf16.mxu1 %v2330_v24 }
  0x49   : > { %2208 = vmatpush3.bf16.msra.mxu0 %v2327_v54  ;;  %2211 = vmatprep.mubr.msk.bf16.mxu0 %vm629_vm3, %v2549_v56  ;;  %v2333_v56 = vld [vmem:[%s2870_s3 + $0x108] sm:$0xff]  }
  0x4a   : > { %2209 = vmatprep.subr.bf16.mxu0 %v2329_v50 }
  0x4b   : > { %2226 = vmatpush3.bf16.msra.mxu1 %v2330_v24 }
  0x4c   : > { %2251 = vmatprep.subr.bf16.mxu1 %v2331_v16 }
  0x4d   : > { %2210 = vmatpush3.bf16.msra.mxu0 %v2329_v50 }
  0x4e   : > { %2228 = vmatmul.mubr.msk.bf16.vlgmr.msra.gmra.mxu1 %vm629_vm3, %v2573_v0  ;;  %2235 = vmatprep.subr.bf16.mxu0 %v2331_v16  ;;  %v1962_v0 = vcombine.low %v2701_v23, %v2513_v41 }
  0x4f   : > { %2255 = vmatpush3.bf16.msra.mxu1 %v2331_v16  ;;  %2231 = vmatprep.mubr.msk.bf16.mxu1 %vm629_vm3, %v2627_v44  ;;  %v2334_v44 = vld [vmem:[%s2870_s3 + $0x100] sm:$0xff]  }
  0x50   : > { %2212 = vmatmul.mubr.msk.bf16.vlgmr.msra.gmra.mxu0 %vm629_vm3, %v2642_v52  ;;  %2252 = vmatprep.subr.bf16.mxu1 %v2332_v51 }
  0x51   : > { %2236 = vmatpush3.bf16.msra.mxu0 %v2331_v16  ;;  %2215 = vmatprep.mubr.msk.bf16.mxu0 %vm629_vm3, %v2645_v55 }
  0x52   : > { %2237 = vmatprep.subr.bf16.mxu0 %v2332_v51 }
  0x53   : > { %2256 = vmatpush3.bf16.msra.mxu1 %v2332_v51 }
  0x54   : > { %2253 = vmatprep.subr.bf16.mxu1 %v2333_v56 }
  0x55   : > { %2238 = vmatpush3.bf16.msra.mxu0 %v2332_v51 }
  0x56   : > { %2232 = vmatmul.mubr.msk.bf16.gmra.mxu1 %vm629_vm3, %v1979_v62  ;;  %2239 = vmatprep.subr.bf16.mxu0 %v2333_v56 }
  0x57   : > { %2257 = vmatpush3.bf16.msra.mxu1 %v2333_v56  ;;  %2247 = vmatprep.mubr.msk.bf16.mxu1 %vm629_vm3, %v2721_v29 }
  0x58   : > { %2216 = vmatmul.mubr.msk.bf16.gmra.mxu0 %vm629_vm3, %v1962_v0  ;;  %2254 = vmatprep.subr.bf16.mxu1 %v2334_v44 }
  0x59   : > { %2240 = vmatpush3.bf16.msra.mxu0 %v2333_v56  ;;  %2243 = vmatprep.mubr.msk.bf16.mxu0 %vm629_vm3, %v2684_v10 }
  0x5a   : > { %2241 = vmatprep.subr.bf16.mxu0 %v2334_v44 }
  0x5b   : > { %2258 = vmatpush3.bf16.msra.mxu1 %v2334_v44 }
  0x5d   : > { %2242 = vmatpush3.bf16.msra.mxu0 %v2334_v44 }
  0x5e   : > { %2248 = vmatmul.mubr.msk.bf16.vlgmr.msra.gmra.mxu1 %vm629_vm3, %v1996_v3 }
  0x60   : > { %2244 = vmatmul.mubr.msk.bf16.vlgmr.msra.gmra.mxu0 %vm629_vm3, %v2689_v49 }
  0xdd   : > { %v2117_v41 = vpop.f32.mrf.mxu0 }
  0xde   : > { %v2133_v45 = vpop.f32.mrf.mxu1  ;;  %v685_v37 = vadd.f32 %v2117_v41, %v1841_v11 }
  0xdf   : > { %v676_v43 = vpop.f32.mrf.mxu0 }
  0xe0   : > { %v2817_v18 = vpop.f32.mrf.mxu1  ;;  %v677_v54 = vadd.f32 %v1841_v11, %v676_v43  ;;  %v823_v50 = vadd.f32 %v2133_v45, %v685_v37 }
  0xe1   : > { %v2118_v25 = vpop.f32.mrf.mxu0 }
  0xe2   : > { %v2819_v52 = vpop.f32.mrf.mxu1  ;;  %v688_v9 = vadd.f32 %v2118_v25, %v1841_v11 }
  0xe3   : > { %v679_v55 = vpop.f32.mrf.mxu0 }
  0xe4   : > { %v2821_v19 = vpop.f32.mrf.mxu1  ;;  %v680_v16 = vadd.f32 %v1841_v11, %v679_v55 }
  0xe6   : > { %v2137_v32 = vpop.f32.mrf.mxu1  ;;  %v822_v25 = vadd.f32 %v2821_v19, %v680_v16 }
  0xe8   : > { %v2121_v27 = vpop.f32.mrf.mxu0  ;;  %v806_v58 = vpop.f32.mrf.mxu1 }
  0xe9   : > { %v701_v12 = vadd.f32 %v2121_v27, %v1841_v11 }
  0xea   : > { %v692_v59 = vpop.f32.mrf.mxu0  ;;  %v2138_v60 = vpop.f32.mrf.mxu1 }
  0xeb   : > { %v693_v38 = vadd.f32 %v1841_v11, %v692_v59  ;;  %v827_v13 = vadd.f32 %v2137_v32, %v701_v12  ;;  %v824_v32 = vadd.f32 %v2819_v52, %v688_v9 }
  0xec   : > { %v2122_v61 = vpop.f32.mrf.mxu0  ;;  %v809_v63 = vpop.f32.mrf.mxu1 }
  0xed   : > { %v704_v57 = vadd.f32 %v2122_v61, %v1841_v11  ;;  %v825_v51 = vadd.f32 %v806_v58, %v693_v38  ;;  %v821_v61 = vadd.f32 %v2817_v18, %v677_v54 }
  0xee   : > { %v695_v42 = vpop.f32.mrf.mxu0  ;;  %v2165_v21 = vpop.f32.mrf.mxu1 }
  0xef   : > { %v696_v24 = vadd.f32 %v1841_v11, %v695_v42  ;;  %v828_v44 = vadd.f32 %v2138_v60, %v704_v57 }
  0xf0   : > { %v2149_v35 = vpop.f32.mrf.mxu0  ;;  %v2823_v46 = vpop.f32.mrf.mxu1 }
  0xf1   : > { %v961_v3 = vadd.f32 %v2149_v35, %v823_v50  ;;  %v826_v12 = vadd.f32 %v809_v63, %v696_v24 }
  0xf2   : > { %v928_v2 = vpop.f32.mrf.mxu0  ;;  %v2825_v5 = vpop.f32.mrf.mxu1 }
  0xf3   : > { %v959_v42 = vadd.f32 %v928_v2, %v821_v61  ;;  %v1085_v60 = vadd.f32 %v2165_v21, %v961_v3 }
  0xf4   : > { %v2150_v6 = vpop.f32.mrf.mxu0  ;;  %v2827_v7 = vpop.f32.mrf.mxu1 }
  0xf6   : > { %v931_v10 = vpop.f32.mrf.mxu0  ;;  %v2169_v47 = vpop.f32.mrf.mxu1 }
  0xf7   : > { %v960_v35 = vadd.f32 %v931_v10, %v822_v25 }
  0xf8   : > { %v2153_v49 = vpop.f32.mrf.mxu0  ;;  %v1068_v14 = vpop.f32.mrf.mxu1 }
  0xf9   : > { %v965_v56 = vadd.f32 %v2153_v49, %v827_v13  ;;  %v962_v49 = vadd.f32 %v2150_v6, %v824_v32  ;;  %v1084_v2 = vadd.f32 %v2827_v7, %v960_v35 }
  0xfa   : > { %v944_v20 = vpop.f32.mrf.mxu0  ;;  %v2170_v4 = vpop.f32.mrf.mxu1 }
  0xfb   : > { %v963_v27 = vadd.f32 %v944_v20, %v825_v51  ;;  %v1089_v45 = vadd.f32 %v2169_v47, %v965_v56  ;;  %v1086_v19 = vadd.f32 %v2825_v5, %v962_v49 }
  0xfc   : > { %v2154_v23 = vpop.f32.mrf.mxu0  ;;  %v1071_v22 = vpop.f32.mrf.mxu1 }
  0xfd   : > { %v966_v43 = vadd.f32 %v2154_v23, %v828_v44  ;;  %v1087_v20 = vadd.f32 %v1068_v14, %v963_v27  ;;  %v1083_v23 = vadd.f32 %v2823_v46, %v959_v42 }
  0xfe   : > { %v947_v36 = vpop.f32.mrf.mxu0  ;;  %v2829_v39 = vpop.f32.mrf.mxu1 }
  0xff   : > { %v964_v11 = vadd.f32 %v947_v36, %v826_v12  ;;  %v1090_v13 = vadd.f32 %v2170_v4, %v966_v43 }
 0x100   : > { %v2181_v1 = vpop.f32.mrf.mxu0  ;;  %v2831_v17 = vpop.f32.mrf.mxu1 }
 0x101   : > { %v1207_v18 = vadd.f32 %v2181_v1, %v1085_v60  ;;  %v1088_v47 = vadd.f32 %v1071_v22, %v964_v11 }
 0x102   : > { %v1174_v26 = vpop.f32.mrf.mxu0  ;;  %v2833_v29 = vpop.f32.mrf.mxu1 }
 0x103   : > { %v1205_v14 = vadd.f32 %v1174_v26, %v1083_v23  ;;  %v1331_v4 = vadd.f32 %v2829_v39, %v1207_v18 }
 0x104   : > { %v2182_v30 = vpop.f32.mrf.mxu0  ;;  %v2835_v31 = vpop.f32.mrf.mxu1 }
 0x105   : > { %v1208_v36 = vadd.f32 %v2182_v30, %v1086_v19  ;;  %v1329_v7 = vadd.f32 %v2831_v17, %v1205_v14 }
 0x106   : > { %v1177_v8 = vpop.f32.mrf.mxu0  ;;  %v2201_v33 = vpop.f32.mrf.mxu1 }
 0x107   : > { %v1206_v1 = vadd.f32 %v1177_v8, %v1084_v2 }
 0x108   : > { %v2185_v28 = vpop.f32.mrf.mxu0  ;;  %v1314_v34 = vpop.f32.mrf.mxu1 }
 0x109   : > { %v1211_v37 = vadd.f32 %v2185_v28, %v1089_v45  ;;  %v1330_v30 = vadd.f32 %v2835_v31, %v1206_v1 }
 0x10a   : > { %v1190_v40 = vpop.f32.mrf.mxu0  ;;  %v2202_v48 = vpop.f32.mrf.mxu1 }
 0x10b   : > { %v1209_v54 = vadd.f32 %v1190_v40, %v1087_v20  ;;  %v1335_v6 = vadd.f32 %v2201_v33, %v1211_v37  ;;  %v1332_v33 = vadd.f32 %v2833_v29, %v1208_v36 }
 0x10c   : > { %v2186_v15 = vpop.f32.mrf.mxu0  ;;  %v1317_v53 = vpop.f32.mrf.mxu1 }
 0x10d   : > { %v1212_v9 = vadd.f32 %v2186_v15, %v1090_v13  ;;  %v1333_v40 = vadd.f32 %v1314_v34, %v1209_v54 }
 0x10e   : > { %v1193_v62 = vpop.f32.mrf.mxu0  ;;  %v2229_v0 = vpop.f32.mrf.mxu1 }
 0x10f   : > { %v1210_v28 = vadd.f32 %v1193_v62, %v1088_v47  ;;  %v1336_v46 = vadd.f32 %v2202_v48, %v1212_v9 }
 0x110   : > { %v2213_v41 = vpop.f32.mrf.mxu0  ;;  %v2840_v59 = vpop.f32.mrf.mxu1 }
 0x111   : > { %v1443_v51 = vadd.f32 %v2213_v41, %v1331_v4  ;;  %v1334_v56 = vadd.f32 %v1317_v53, %v1210_v28 }
 0x112   : > { %v1410_v55 = vpop.f32.mrf.mxu0  ;;  %v2230_v58 = vpop.f32.mrf.mxu1 }
 0x113   : > { %v1441_v34 = vadd.f32 %v1410_v55, %v1329_v7  ;;  %v1553_v27 = vadd.f32 %v2229_v0, %v1443_v51 }
 0x114   : > { %v2214_v38 = vpop.f32.mrf.mxu0  ;;  %v1523_v57 = vpop.f32.mrf.mxu1 }
 0x115   : > { %v1444_v44 = vadd.f32 %v2214_v38, %v1332_v33  ;;  %v1551_v31 = vadd.f32 %v2840_v59, %v1441_v34 }
 0x116   : > { %v1413_v52 = vpop.f32.mrf.mxu0  ;;  %v2233_v63 = vpop.f32.mrf.mxu1 }
 0x117   : > { %v1442_v48 = vadd.f32 %v1413_v52, %v1330_v30  ;;  %v1554_v45 = vadd.f32 %v2230_v58, %v1444_v44 }
 0x118   : > { %v2217_v21 = vpop.f32.mrf.mxu0  ;;  %v1536_v10 = vpop.f32.mrf.mxu1 }
 0x119   : > { %v1447_v24 = vadd.f32 %v2217_v21, %v1335_v6  ;;  %v1552_v55 = vadd.f32 %v1523_v57, %v1442_v48 }
 0x11a   : > { %v1426_v50 = vpop.f32.mrf.mxu0  ;;  %v2234_v16 = vpop.f32.mrf.mxu1 }
 0x11b   : > { %v1445_v5 = vadd.f32 %v1426_v50, %v1333_v40  ;;  %v1557_v62 = vadd.f32 %v2233_v63, %v1447_v24 }
 0x11c   : > { %v2218_v22 = vpop.f32.mrf.mxu0  ;;  %v1539_v15 = vpop.f32.mrf.mxu1 }
 0x11d   : > { %v1448_v26 = vadd.f32 %v2218_v22, %v1336_v46  ;;  %v1555_v41 = vadd.f32 %v1536_v10, %v1445_v5 }
 0x11e   : > { %v1429_v39 = vpop.f32.mrf.mxu0  ;;  %v2249_v8 = vpop.f32.mrf.mxu1 }
 0x11f   : > { %v1446_v3 = vadd.f32 %v1429_v39, %v1334_v56  ;;  %v1669_v32 = vadd.f32 %v2249_v8, %v1557_v62  ;;  %v1558_v43 = vadd.f32 %v2234_v16, %v1448_v26 }
 0x120   : > { %v2245_v61 = vpop.f32.mrf.mxu0  ;;  %v1648_v12 = vpop.f32.mrf.mxu1 }
 0x121   : > { %v1665_v17 = vadd.f32 %v2245_v61, %v1553_v27  ;;  %v1667_v29 = vadd.f32 %v1648_v12, %v1555_v41  ;;  %v1556_v42 = vadd.f32 %v1539_v15, %v1446_v3  ;;  %v1677_v11 = vmax.f32 %v1669_v32, 0.0 }
 0x122   : > { %v1632_v25 = vpop.f32.mrf.mxu0  ;;  %v2250_v53 = vpop.f32.mrf.mxu1 }
 0x123   : > { %v1670_v49 = vadd.f32 %v2250_v53, %v1558_v43  ;;  %v1663_v35 = vadd.f32 %v1632_v25, %v1551_v31  ;;  %v1673_v13 = vmax.f32 %v1665_v17, 0.0  ;;  %v1675_v18 = vmax.f32 %v1667_v29, 0.0 }
 0x124   : > { %v2246_v60 = vpop.f32.mrf.mxu0  ;;  %v1651_v0 = vpop.f32.mrf.mxu1 }
 0x125   : > { %v1666_v20 = vadd.f32 %v2246_v60, %v1554_v45  ;;  %v1678_v37 = vmax.f32 %v1670_v49, 0.0  ;;  %v1668_v38 = vadd.f32 %v1651_v0, %v1556_v42  ;;  %v1671_v57 = vmax.f32 %v1663_v35, 0.0 }
 0x126   : > { %v1635_v54 = vpop.f32.mrf.mxu0 }
 0x127   : > { %v1674_v59 = vmax.f32 %v1666_v20, 0.0  ;;  %v2030_v58 = vpack.c.bf16 %v1678_v37, %v1677_v11  ;;  %v1664_v52 = vadd.f32 %v1635_v54, %v1552_v55  ;;  %v1676_v63 = vmax.f32 %v1668_v38, 0.0 }
 0x129   : > { %v2020_v23 = vpack.c.bf16 %v1674_v59, %v1673_v13  ;;  %2034 = vst [vmem:[%s380_s9 + $0x18] sm:$0xff] %v2030_v58   ;;  %v1672_v19 = vmax.f32 %v1664_v52, 0.0  ;;  %v2025_v47 = vpack.c.bf16 %v1676_v63, %v1675_v18 }
 0x12b   : > { %2032 = vst [vmem:[%s380_s9 + $0x8] sm:$0xff] %v2020_v23   ;;  %v2015_v9 = vpack.c.bf16 %v1672_v19, %v1671_v57  ;;  %2033 = vst [vmem:[%s380_s9 + $0x10] sm:$0xff] %v2025_v47  }
 0x12d   : > { %2016 = vst [vmem:[%s380_s9] sm:$0xff] %v2015_v9  }
 0x12e PF: > { %s15_s20 = sadd.s32 1, %s2357_s20   ;;  %s2877_s18 = smov %s2353_s19 }
 0x12f   : > { %p12_p5 = scmp.ge.s32.totalorder %s15_s20, 4   ;;  %s2878_s19 = smov %s2880_s1 }
 0x131   :  { %14 = sbr.rel (!%p12_p5) target bundleno = 2 (0x2), region = 84 }

// kernel: contrast_extractor_layer.7
= control target key start
LH: loop header
LB: loop body
LE: loop exit
PB: predicated region body
PF: predicated region fallthrough
CT: control target
= control target key end

     0   :  { %10 = vsyncpa [#allocation3], 0  ;;  %s3555_s0 = inlined_call_operand.vmem [shape: bf16[2,4,4,128], index: 0, kind: input, shape index: {}, may-alias: {0,1,2}]   ;;  %s3556_s1 = inlined_call_operand.vmem [shape: bf16[2,4,4,128], index: 1, kind: input, shape index: {}, may-alias: {0,1,2}]   ;;  %s3557_s2 = inlined_call_operand.vmem [shape: bf16[2,4,4,128], index: 2, kind: input, shape index: {}, may-alias: {0,1,2}]   ;;  %s3558_s3 = inlined_call_operand.vmem [shape: bf16[9,128,256], index: 3, kind: input, shape index: {}]   ;;  %s3559_s4 = inlined_call_operand.vmem [shape: f32[1,256], index: 4, kind: input, shape index: {}]   ;;  %s3560_s5 = inlined_call_operand.hbm [shape: f32[2,4,4,256], index: 5, kind: output, shape index: {}]  }
   0x1   :  { %12 = vsyncpa [#allocation3 + $0x1], 0  ;;  %s2812_s18 = smov 0   ;;  %s2814_s19 = smov 0  }
   0x2   :  { %s2816_s20 = smov 0   ;;  %s2818_s1 = smov 0  }
   0x3   :  { %s2820_s2 = smov 0   ;;  %s2822_s21 = smov 0  }
   0x4 LB: > { %s2130_s22 = sadd.s32 4294967295, %s2775_s21   ;;  %s2131_s23 = sadd.s32 4294967294, %s2775_s21   ;;  %s2775_s21 = sphi %s2822_s21, %s18_s21   ;;  %s2771_s2 = sphi %s2820_s2, %s3571_s2   ;;  %s2767_s1 = sphi %s2818_s1, %s3570_s1   ;;  %s2763_s20 = sphi %s2816_s20, %s3569_s20   ;;  %s2759_s19 = sphi %s2814_s19, %s3568_s19   ;;  %s2755_s18 = sphi %s2812_s18, %s3567_s18  }
   0x5   : > { %s30_s24 = sadd.s32 1, %s2771_s2  ;;  %s181_s25 = sadd.s32 1, %s2763_s20 }
   0x6   : > { %p32_p0 = scmp.ge.s32.totalorder %s30_s24, 2  ;;  %p191_p1 = scmp.ne.s32.totalorder %s2763_s20, %s2759_s19 }
   0x7   : > { %p192_p2 = scmp.eq.s32.totalorder %s2130_s22, 1  ;;  %p197_p3 = scmp.ne.s32.totalorder %s2759_s19, %s2755_s18 }
   0x8   : > { %s3573_s24 = smov (%p32_p0, %s30_s24), 0  ;;  %p198_p5 = scmp.eq.s32.totalorder %s2131_s23, 1 }
   0x9   : > { %p2852_p4 = por %p192_p2, %p191_p1  ;;  %s176_s27 = ssub.s32 %s2771_s2, %s3573_s24 }
   0xa   : > { %p2134_p6 = scmp.ge.s32.totalorder %s2775_s21, 1  ;;  %p179_p7 = scmp.eq.s32.totalorder %s176_s27, 0 }
   0xb   : > { %p2859_p8 = por %p198_p5, %p197_p3  ;;  %p273_p9 = scmp.lt.s32.totalorder %s2775_s21, 3 }
   0xc   : > { %s2865_s29 = scalar_select %p179_p7, %s2763_s20, %s181_s25  }
   0xd   : > { %p274_p10 = pnand %p2134_p6, %p273_p9 }
   0xe   : > { %p330_p11 = scmp.lt.s32.totalorder (!%p274_p10), %s2767_s1, 1  ;;  %s326_s11 = sand.u32 (!%p274_p10), 1, %s2759_s19  }
   0xf   : > { %277 = sbr.rel (%p274_p10) target bundleno = 401 (0x191), region = 40  ;;  %s2135_s12 = sshll.u32 (!%p274_p10), %s326_s11, 5 }
  0x10   : > { %s328_s13 = scalar_lea.vmem (!%p274_p10), [#allocation2], %s2135_s12  ;;  %s2423_s15 = sshll.u32 (!%p274_p10), %s2767_s1, 9 }
  0x11   : > { %s2015_s14 = sshll.u32 (!%p274_p10), %s328_s13, 4  ;;  %s3506_s23 = scalar_lea.hbm (!%p274_p10), %s3560_s5, %s2423_s15  ;;  %s3501_s14 = int_to_ptr.vmem [resolvable:$true] %s2015_s14 }
  0x12   : > { %s2779_s25 = smov (!%p274_p10), [#allocation2]  }
  0x13   : > { %s2703_s27 = sshll.u32 (!%p274_p10), %s2779_s25, 4  ;;  %s2704_s27 = int_to_ptr.vmem [resolvable:$false] %s2703_s27 }
  0x14   : > { %v2483_v0 = vld [vmem:[%s3558_s3 + $0x74] ss:$8 sps:$4 sm:$0xff]   ;;  %v406_v1 = vlaneseq  ;;  %v2485_v2 = vld [vmem:[%s3558_s3 + $0x70] ss:$8 sps:$4 sm:$0xff]   ;;  %v2777_v3 = vmov 0   ;;  %s331_s22 = scalar_select %p330_p11, %s2767_s1, 1 }
  0x15   : > { %691 = vmatprep.mubr.bf16.mxu0 %v2777_v3  ;;  %849 = vmatprep.mubr.bf16.mxu1 %v2777_v3  ;;  %v2486_v4 = vld [vmem:[%s3558_s3 + $0xf4] ss:$8 sps:$4 sm:$0xff]   ;;  %v2488_v5 = vld [vmem:[%s3558_s3 + $0xf0] ss:$8 sps:$4 sm:$0xff]   ;;  %v2778_v6 = vmov 1983009808   ;;  %p2706_p1 = scmp.lt.s32.totalorder %s3501_s14, %s2704_s27 }
  0x16   : > { %659 = vmatprep.subr.bf16.mxu0 %v2483_v0  ;;  %v404_v7 = vunpack.c.l.s4 %v2778_v6  ;;  %v2489_v8 = vld [vmem:[%s3558_s3 + $0x64] ss:$8 sps:$4 sm:$0xff]   ;;  %v2491_v9 = vld [vmem:[%s3558_s3 + $0x60] ss:$8 sps:$4 sm:$0xff]   ;;  %v2887_v10 = vshrl.u32 %v406_v1, 7  ;;  %817 = vmatprep.subr.bf16.mxu1 %v2486_v4  ;;  %s2419_s10 = sshll.u32 %s331_s22, 3 }
  0x17   : > { %660 = vmatpush1.bf16.msra.mxu0 %v2485_v2  ;;  %v2492_v11 = vld [vmem:[%s3558_s3 + $0xe4] ss:$8 sps:$4 sm:$0xff]   ;;  %818 = vmatpush1.bf16.msra.mxu1 %v2488_v5  ;;  %v2494_v13 = vld [vmem:[%s3558_s3 + $0xe0] ss:$8 sps:$4 sm:$0xff]   ;;  %v2495_v14 = vld [vmem:[%s3558_s3 + $0x54] ss:$8 sps:$4 sm:$0xff]   ;;  %s337_s22 = scalar_lea.vmem %s3555_s0, %s2419_s10 }
  0x18   : > { %v405_v12 = vunpack.c.0.s8 %v404_v7  ;;  %661 = vmatprep.subr.bf16.mxu0 %v2489_v8  ;;  %819 = vmatprep.subr.bf16.mxu1 %v2492_v11  ;;  %v2497_v16 = vld [vmem:[%s3558_s3 + $0x50] ss:$8 sps:$4 sm:$0xff]   ;;  %v2498_v17 = vld [vmem:[%s3558_s3 + $0xd4] ss:$8 sps:$4 sm:$0xff]   ;;  %v2501_v18 = vld [vmem:[%s3558_s3 + $0x44] ss:$8 sps:$4 sm:$0xff]  }
  0x19   : > { %v2500_v19 = vld [vmem:[%s3558_s3 + $0xd0] ss:$8 sps:$4 sm:$0xff]   ;;  %v2504_v20 = vld [vmem:[%s3558_s3 + $0xc4] ss:$8 sps:$4 sm:$0xff]   ;;  %v2503_v22 = vld [vmem:[%s3558_s3 + $0x40] ss:$8 sps:$4 sm:$0xff]  }
  0x1a   : > { %v2899_v15 = vsub.s32 %v405_v12, %v2887_v10  ;;  %v2507_v23 = vld [vmem:[%s3558_s3 + $0x34] ss:$8 sps:$4 sm:$0xff]   ;;  %v2506_v24 = vld [vmem:[%s3558_s3 + $0xc0] ss:$8 sps:$4 sm:$0xff]   ;;  %v2509_v27 = vld [vmem:[%s3558_s3 + $0x30] ss:$8 sps:$4 sm:$0xff]  }
  0x1b   : > { %662 = vmatpush1.bf16.msra.mxu0 %v2491_v9  ;;  %820 = vmatpush1.bf16.msra.mxu1 %v2494_v13  ;;  %v2510_v25 = vld [vmem:[%s3558_s3 + $0xb4] ss:$8 sps:$4 sm:$0xff]   ;;  %v2513_v28 = vld [vmem:[%s3558_s3 + $0x24] ss:$8 sps:$4 sm:$0xff]   ;;  %v2512_v29 = vld [vmem:[%s3558_s3 + $0xb0] ss:$8 sps:$4 sm:$0xff]  }
  0x1c   : > { %663 = vmatprep.subr.bf16.mxu0 %v2495_v14  ;;  %821 = vmatprep.subr.bf16.mxu1 %v2498_v17  ;;  %v2919_v21 = vrot.slane %v2777_v3, %v2899_v15  ;;  %vm494_vm0 = vsmask.f32 256  ;;  %v2516_v30 = vld [vmem:[%s3558_s3 + $0xa4] ss:$8 sps:$4 sm:$0xff]   ;;  %v2515_v33 = vld [vmem:[%s3558_s3 + $0x20] ss:$8 sps:$4 sm:$0xff]  }
  0x1d   : > { %v2518_v34 = vld [vmem:[%s3558_s3 + $0xa0] ss:$8 sps:$4 sm:$0xff]   ;;  %vm493_vm1 = vcmask 1040384   ;;  %v2519_v35 = vld [vmem:[%s3558_s3 + $0x14] ss:$8 sps:$4 sm:$0xff]   ;;  %vm520_vm4 = vcmask 1041408  }
  0x1e   : > { %v446_v26 = vshrl.u32 %v2919_v21, 16  ;;  %v449_v32 = vshll.u32 %v2919_v21, 16  ;;  %vm521_vm2 = vsmask.f32 1280  ;;  %v2521_v36 = vld [vmem:[%s3558_s3 + $0x10] ss:$8 sps:$4 sm:$0xff]   ;;  %vm3004_vm3 = vmand %vm493_vm1, %vm494_vm0 }
  0x1f   : > { %664 = vmatpush1.bf16.msra.mxu0 %v2497_v16  ;;  %822 = vmatpush1.bf16.msra.mxu1 %v2500_v19  ;;  %v2965_v37 = vld [vmem:[%s337_s22] sm:$0x3]  ;;  %v2967_v38 = vld [vmem:[%s337_s22 + $0x2] sm:$0x3]  ;;  %v2522_v39 = vld [vmem:[%s3558_s3 + $0x94] ss:$8 sps:$4 sm:$0xff]  }
  0x20   : > { %665 = vmatprep.subr.bf16.mxu0 %v2501_v18  ;;  %823 = vmatprep.subr.bf16.mxu1 %v2504_v20  ;;  %v448_v31 = vrot.slane %v446_v26, 7  ;;  %v2972_v40 = vld [vmem:[%s337_s22 + $0x4] sm:$0x3]  ;;  %v2974_v41 = vld [vmem:[%s337_s22 + $0x6] sm:$0x3]  ;;  %v2978_v42 = vrot.slane %v2965_v37, %v2899_v15  ;;  %v423_v43 = vrot.slane %v2967_v38, %v2899_v15  ;;  %v1210_v45 = vcombine.low %v2965_v37, %v2967_v38  ;;  %vm3054_vm5 = vmand %vm520_vm4, %vm521_vm2  ;;  %s3510_s1 = scalar_lea.sflag [#allocation3], %s326_s11 }
  0x21   : > { %v2524_v46 = vld [vmem:[%s3558_s3 + $0x90] ss:$8 sps:$4 sm:$0xff]   ;;  %v430_v47 = vrot.slane %v2972_v40, %v2899_v15  ;;  %v2991_v48 = vrot.slane %v2974_v41, %v2899_v15  ;;  %v719_v49 = vcombine.low %v2777_v3, %v2965_v37  ;;  %v720_v50 = vcombine.low %v2967_v38, %v2972_v40  ;;  %v2525_v51 = vld [vmem:[%s3558_s3 + $0x4] ss:$8 sps:$4 sm:$0xff]   ;;  %v2527_v57 = vld [vmem:[%s3558_s3] ss:$8 sps:$4 sm:$0xff]  }
  0x22   : > { %v451_v44 = vor.u32 %v449_v32, %v448_v31  ;;  %v453_v52 = vshrl.u32 %v2978_v42, 16  ;;  %v456_v53 = vshll.u32 %v2978_v42, 16  ;;  %v460_v54 = vshrl.u32 %v423_v43, 16  ;;  %v2528_v62 = vld [vmem:[%s3558_s3 + $0x84] ss:$8 sps:$4 sm:$0xff]   ;;  %s2699_s22 = scalar_lea.vmem %s3501_s14, 512 }
  0x23   : > { %666 = vmatpush1.bf16.msra.mxu0 %v2503_v22  ;;  %824 = vmatpush1.bf16.msra.mxu1 %v2506_v24  ;;  %v463_v55 = vshll.u32 %v423_v43, 16  ;;  %v467_v58 = vshrl.u32 %v430_v47, 16  ;;  %v470_v59 = vshll.u32 %v430_v47, 16  ;;  %v474_v60 = vshrl.u32 %v2991_v48, 16  ;;  %v2533_v9 = vld [vmem:[%s3558_s3 + $0x174] ss:$8 sps:$4 sm:$0xff]   ;;  %p2700_p12 = scmp.ne.s32.totalorder %s3501_s14, %s2699_s22 }
  0x24   : > { %667 = vmatprep.subr.bf16.mxu0 %v2507_v23  ;;  %825 = vmatprep.subr.bf16.mxu1 %v2510_v25  ;;  %v477_v61 = vshll.u32 %v2991_v48, 16  ;;  %v455_v63 = vrot.slane %v453_v52, 7  ;;  %v462_v0 = vrot.slane %v460_v54, 7  ;;  %v496_v5 = vsel %vm3004_vm3, 0, %v451_v44  ;;  %v2530_v13 = vld [vmem:[%s3558_s3 + $0x80] ss:$8 sps:$4 sm:$0xff]  }
  0x25   : > { %v506_v1 = vrot.slane %v463_v55, 1  ;;  %v469_v2 = vrot.slane %v467_v58, 7  ;;  %v476_v4 = vrot.slane %v474_v60, 7  ;;  %v508_v6 = vrot.slane %v470_v59, 1  ;;  %v2536_v20 = vld [vmem:[%s3558_s3 + $0x1f4] ss:$8 sps:$4 sm:$0xff]   ;;  %p2701_p13 = pnand %p2700_p12, %p2852_p4 }
  0x26   : > { %v458_v7 = vor.u32 %v456_v53, %v455_v63  ;;  %v465_v8 = vor.u32 %v463_v55, %v462_v0  ;;  %v727_v11 = vrot.slane %v719_v49, %v2899_v15  ;;  %v3027_v12 = vrot.slane %v720_v50, %v2899_v15  ;;  %v2531_v43 = vld [vmem:[%s3558_s3 + $0x170] ss:$8 sps:$4 sm:$0xff]   ;;  %v2539_v48 = vld [vmem:[%s3558_s3 + $0x164] ss:$8 sps:$4 sm:$0xff]   ;;  %v2540_v49 = vld [vmem:[%s3558_s3 + $0x1e0] ss:$8 sps:$4 sm:$0xff]  }
  0x27   : > { %668 = vmatpush1.bf16.msra.mxu0 %v2509_v27  ;;  %826 = vmatpush1.bf16.msra.mxu1 %v2512_v29  ;;  %v472_v14 = vor.u32 %v470_v59, %v469_v2  ;;  %v479_v16 = vor.u32 %v477_v61, %v476_v4  ;;  %v502_v17 = vrot.slane %v449_v32, 1  ;;  %v507_v22 = vor.u32 %v506_v1, %v460_v54  ;;  %v2537_v55 = vld [vmem:[%s3558_s3 + $0x160] ss:$8 sps:$4 sm:$0xff]   ;;  %v2543_v2 = vld [vmem:[%s3558_s3 + $0x150] ss:$8 sps:$4 sm:$0xff]   ;;  %p2702_p0 = pneg %p2701_p13  ;;  %s2705_s30 = scalar_lea.vmem %s2704_s27, 1024 }
  0x28   : > { %669 = vmatprep.subr.bf16.mxu0 %v2513_v28  ;;  %827 = vmatprep.subr.bf16.mxu1 %v2516_v30  ;;  %v3034_v18 = vsel %vm3004_vm3, 0, %v458_v7  ;;  %v3038_v19 = vsel %vm3004_vm3, 0, %v465_v8  ;;  %v509_v23 = vor.u32 %v508_v6, %v467_v58  ;;  %v1211_v29 = vcombine.low %v2972_v40, %v2974_v41  ;;  %v2551_v4 = vld [vmem:[%s3558_s3 + $0x144] ss:$8 sps:$4 sm:$0xff]   ;;  %v2552_v6 = vld [vmem:[%s3558_s3 + $0x1c0] ss:$8 sps:$4 sm:$0xff]   ;;  %p2707_p2 = scmp.lt.s32.totalorder %s2705_s30, %s2699_s22 }
  0x29   : > { %v3045_v24 = vsel %vm3004_vm3, 0, %v472_v14  ;;  %v3049_v25 = vsel %vm3004_vm3, 0, %v479_v16  ;;  %v561_v27 = vcombine.low %v496_v5, %v3034_v18  ;;  %v735_v32 = vcombine.low %v727_v11, %v3027_v12  ;;  %v2560_v7 = vld [vmem:[%s3558_s3 + $0x1b4] ss:$8 sps:$4 sm:$0xff]   ;;  %v2563_v16 = vld [vmem:[%s3558_s3 + $0x124] ss:$8 sps:$4 sm:$0xff]  }
  0x2a   : > { %v562_v30 = vcombine.low %v3038_v19, %v3045_v24  ;;  %v1536_v31 = vcombine.low %v3049_v25, %v496_v5  ;;  %v3078_v40 = vsel %vm3054_vm5, %v507_v22, 0  ;;  %v3085_v44 = vsel %vm3054_vm5, %v509_v23, 0  ;;  %v2557_v11 = vld [vmem:[%s3558_s3 + $0x134] ss:$8 sps:$4 sm:$0xff]   ;;  %v2561_v42 = vld [vmem:[%s3558_s3 + $0x120] ss:$8 sps:$4 sm:$0xff]   ;;  %p2708_p3 = por %p2707_p2, %p2706_p1 }
  0x2b   : > { %670 = vmatpush1.bf16.msra.mxu0 %v2515_v33  ;;  %828 = vmatpush1.bf16.msra.mxu1 %v2518_v34  ;;  %v569_v33 = vrot.slane %v561_v27, %v2899_v15  ;;  %v2534_v34 = vld [vmem:[%s3558_s3 + $0x1f0] ss:$8 sps:$4 sm:$0xff]   ;;  %v3094_v21 = vrot.slane %v1211_v29, %v2899_v15  ;;  %v886_v50 = vcombine.low %v3078_v40, %v3085_v44  ;;  %v504_v8 = vrot.slane %v456_v53, 1  ;;  %v2566_v53 = vld [vmem:[%s3558_s3 + $0x1a4] ss:$8 sps:$4 sm:$0xff]  }
  0x2c   : > { %671 = vmatprep.subr.bf16.mxu0 %v2519_v35  ;;  %829 = vmatprep.subr.bf16.mxu1 %v2522_v39  ;;  %v3069_v35 = vrot.slane %v562_v30, %v2899_v15  ;;  %v503_v39 = vor.u32 %v502_v17, %v446_v26  ;;  %v510_v26 = vrot.slane %v477_v61, 1  ;;  %v1690_v54 = vcombine.low %v2974_v41, %v2777_v3  ;;  %v2545_v41 = vld [vmem:[%s3558_s3 + $0x154] ss:$8 sps:$4 sm:$0xff]   ;;  %v2546_v61 = vld [vmem:[%s3558_s3 + $0x1d0] ss:$8 sps:$4 sm:$0xff]   ;;  %p2709_p5 = pnand %p2708_p3, %p2702_p0 }
  0x2d   : > { %v3143_v63 = vrot.slane %v886_v50, %v2899_v15  ;;  %v505_v14 = vor.u32 %v504_v8, %v453_v52  ;;  %v2564_v17 = vld [vmem:[%s3558_s3 + $0x1a0] ss:$8 sps:$4 sm:$0xff]   ;;  %v1048_v22 = vcombine.low %v3034_v18, %v3038_v19  ;;  %v1049_v23 = vcombine.low %v3045_v24, %v3049_v25  ;;  %v2569_v27 = vld [vmem:[%s3558_s3 + $0x114] ss:$8 sps:$4 sm:$0xff]   ;;  %v2570_v29 = vld [vmem:[%s3558_s3 + $0x190] ss:$8 sps:$4 sm:$0xff]  }
  0x2e   : > { %v577_v47 = vcombine.low %v569_v33, %v3069_v35  ;;  %v511_v38 = vor.u32 %v510_v26, %v474_v60  ;;  %v3122_v56 = vsel %vm3054_vm5, %v503_v39, 0  ;;  %v1697_v59 = vrot.slane %v1690_v54, %v2899_v15  ;;  %v2578_v28 = vld [vmem:[%s3558_s3 + $0x184] ss:$8 sps:$4 sm:$0xff]   ;;  %v2567_v19 = vld [vmem:[%s3558_s3 + $0x110] ss:$8 sps:$4 sm:$0xff]  }
  0x2f   : > { %672 = vmatpush1.bf16.msra.mxu0 %v2521_v36  ;;  %830 = vmatpush1.bf16.msra.mxu1 %v2524_v46  ;;  %v2542_v36 = vld [vmem:[%s3558_s3 + $0x1e4] ss:$8 sps:$4 sm:$0xff]   ;;  %v3091_v46 = vrot.slane %v1210_v45, %v2899_v15  ;;  %v2548_v45 = vld [vmem:[%s3558_s3 + $0x1d4] ss:$8 sps:$4 sm:$0xff]   ;;  %v3198_v52 = vsel %vm3054_vm5, %v505_v14, 0  ;;  %v1056_v25 = vrot.slane %v1048_v22, %v2899_v15  ;;  %v1063_v30 = vrot.slane %v1049_v23, %v2899_v15 }
  0x30   : > { %673 = vmatprep.subr.bf16.mxu0 %v2525_v51  ;;  %831 = vmatprep.subr.bf16.mxu1 %v2528_v62  ;;  %v3112_v51 = vrot.slane %v1536_v31, %v2899_v15  ;;  %v2554_v62 = vld [vmem:[%s3558_s3 + $0x1c4] ss:$8 sps:$4 sm:$0xff]   ;;  %v3146_v0 = vcombine.low %v3027_v12, %v1697_v59  ;;  %v2558_v12 = vld [vmem:[%s3558_s3 + $0x1b0] ss:$8 sps:$4 sm:$0xff]   ;;  %v885_v18 = vcombine.low %v3122_v56, %v3198_v52  ;;  %v2576_v31 = vld [vmem:[%s3558_s3 + $0x180] ss:$8 sps:$4 sm:$0xff]  }
  0x31   : > { %v1226_v37 = vcombine.low %v3091_v46, %v3094_v21  ;;  %v2575_v24 = vld [vmem:[%s3558_s3 + $0x104] ss:$8 sps:$4 sm:$0xff]   ;;  %v2584_v33 = vld [vmem:[%s3558_s3 + $0x2f4] ss:$8 sps:$4 sm:$0xff]   ;;  %v1064_v39 = vcombine.low %v1056_v25, %v1063_v30  ;;  %v2585_v50 = vld [vmem:[%s3558_s3 + $0x260] ss:$8 sps:$4 sm:$0xff]  }
  0x32   : > { %v1544_v58 = vcombine.low %v3069_v35, %v3112_v51  ;;  %v2593_v54 = vld [vmem:[%s3558_s3 + $0x254] ss:$8 sps:$4 sm:$0xff]   ;;  %v2599_v59 = vld [vmem:[%s3558_s3 + $0x244] ss:$8 sps:$4 sm:$0xff]   ;;  %v2621_v22 = vld [vmem:[%s3558_s3 + $0x200] ss:$8 sps:$4 sm:$0xff]  }
  0x33   : > { %674 = vmatpush1.bf16.msra.mxu0 %v2527_v57  ;;  %832 = vmatpush1.bf16.msra.mxu1 %v2530_v13  ;;  %v3126_v57 = vsel %vm3054_vm5, %v511_v38, 0  ;;  %v2555_v13 = vld [vmem:[%s3558_s3 + $0x130] ss:$8 sps:$4 sm:$0xff]   ;;  %v2588_v38 = vld [vmem:[%s3558_s3 + $0x2e0] ss:$8 sps:$4 sm:$0xff]  }
  0x34   : > { %983 = vmatprep.subr.bf16.mxu0 %v2533_v9  ;;  %1146 = vmatprep.subr.bf16.mxu1 %v2536_v20  ;;  %v1845_v60 = vcombine.low %v3126_v57, %v3122_v56  ;;  %v2549_v9 = vld [vmem:[%s3558_s3 + $0x140] ss:$8 sps:$4 sm:$0xff]   ;;  %v2572_v20 = vld [vmem:[%s3558_s3 + $0x194] ss:$8 sps:$4 sm:$0xff]   ;;  %v2602_v56 = vld [vmem:[%s3558_s3 + $0x2c4] ss:$8 sps:$4 sm:$0xff]   ;;  %v1374_v14 = vcombine.low %v3085_v44, %v3126_v57 }
  0x35   : > { %v2611_v8 = vld [vmem:[%s3558_s3 + $0x224] ss:$8 sps:$4 sm:$0xff]   ;;  %v2633_v25 = vld [vmem:[%s3558_s3 + $0x360] ss:$8 sps:$4 sm:$0xff]   ;;  %v2641_v30 = vld [vmem:[%s3558_s3 + $0x354] ss:$8 sps:$4 sm:$0xff]  }
  0x36   : > { %850 = vmatmul.mubr.bf16.vlgmr.msra.gmra.mxu1 %v735_v32  ;;  %692 = vmatmul.mubr.bf16.vlgmr.msra.gmra.mxu0 %v577_v47  ;;  %v3149_v1 = vrot.slane %v1845_v60, %v2899_v15  ;;  %v893_v32 = vrot.slane %v885_v18, %v2899_v15  ;;  %v2590_v47 = vld [vmem:[%s3558_s3 + $0x2e4] ss:$8 sps:$4 sm:$0xff]   ;;  %v2600_v60 = vld [vmem:[%s3558_s3 + $0x2c0] ss:$8 sps:$4 sm:$0xff]   ;;  %v1388_v57 = vrot.slane %v1374_v14, %v2899_v15  ;;  %v2642_v46 = vld [vmem:[%s3558_s3 + $0x3d0] ss:$8 sps:$4 sm:$0xff]  }
  0x37   : > { %1147 = vmatpush1.bf16.msra.mxu1 %v2534_v34  ;;  %1178 = vmatprep.mubr.bf16.mxu1 %v2777_v3  ;;  %v2573_v34 = vld [vmem:[%s3558_s3 + $0x100] ss:$8 sps:$4 sm:$0xff]   ;;  %v2635_v18 = vld [vmem:[%s3558_s3 + $0x364] ss:$8 sps:$4 sm:$0xff]   ;;  %v2689_v51 = vld [vmem:[%s3558_s3 + $0x434] ss:$8 sps:$4 sm:$0xff]  }
  0x38   : > { %1148 = vmatprep.subr.bf16.mxu1 %v2542_v36  ;;  %984 = vmatpush1.bf16.msra.mxu0 %v2531_v43  ;;  %v1853_v5 = vcombine.low %v3143_v63, %v3149_v1  ;;  %v2581_v36 = vld [vmem:[%s3558_s3 + $0x274] ss:$8 sps:$4 sm:$0xff]   ;;  %v2582_v43 = vld [vmem:[%s3558_s3 + $0x2f0] ss:$8 sps:$4 sm:$0xff]   ;;  %v901_v26 = vcombine.low %v893_v32, %v3143_v63  ;;  %v2650_v21 = vld [vmem:[%s3558_s3 + $0x3c4] ss:$8 sps:$4 sm:$0xff]  }
  0x39   : > { %1015 = vmatprep.mubr.bf16.mxu0 %v2777_v3  ;;  %985 = vmatprep.subr.bf16.mxu0 %v2539_v48  ;;  %v2579_v48 = vld [vmem:[%s3558_s3 + $0x270] ss:$8 sps:$4 sm:$0xff]   ;;  %v2648_v32 = vld [vmem:[%s3558_s3 + $0x3c0] ss:$8 sps:$4 sm:$0xff]   ;;  %v2686_v35 = vld [vmem:[%s3558_s3 + $0x444] ss:$8 sps:$4 sm:$0xff]  }
  0x3a   : > { %v553_v63 = vsub.s32 1, %v2887_v10  ;;  %v545_v1 = vld [vmem:[%s3559_s4] sm:$0x3] }
  0x3b   : > { %1149 = vmatpush1.bf16.msra.mxu1 %v2540_v49  ;;  %v2587_v49 = vld [vmem:[%s3558_s3 + $0x264] ss:$8 sps:$4 sm:$0xff]  }
  0x3c   : > { %1150 = vmatprep.subr.bf16.mxu1 %v2548_v45  ;;  %986 = vmatpush1.bf16.msra.mxu0 %v2537_v55  ;;  %v2596_v45 = vld [vmem:[%s3558_s3 + $0x2d4] ss:$8 sps:$4 sm:$0xff]   ;;  %v2594_v55 = vld [vmem:[%s3558_s3 + $0x2d0] ss:$8 sps:$4 sm:$0xff]  }
  0x3d   : > { %987 = vmatprep.subr.bf16.mxu0 %v2545_v41  ;;  %v2591_v41 = vld [vmem:[%s3558_s3 + $0x250] ss:$8 sps:$4 sm:$0xff]  }
  0x3f   : > { %1151 = vmatpush1.bf16.msra.mxu1 %v2546_v61  ;;  %v2608_v61 = vld [vmem:[%s3558_s3 + $0x2b4] ss:$8 sps:$4 sm:$0xff]  }
  0x40   : > { %1152 = vmatprep.subr.bf16.mxu1 %v2554_v62  ;;  %988 = vmatpush1.bf16.msra.mxu0 %v2543_v2  ;;  %v2597_v62 = vld [vmem:[%s3558_s3 + $0x240] ss:$8 sps:$4 sm:$0xff]   ;;  %v2605_v2 = vld [vmem:[%s3558_s3 + $0x234] ss:$8 sps:$4 sm:$0xff]  }
  0x41   : > { %989 = vmatprep.subr.bf16.mxu0 %v2551_v4  ;;  %v2606_v4 = vld [vmem:[%s3558_s3 + $0x2b0] ss:$8 sps:$4 sm:$0xff]  }
  0x43   : > { %1153 = vmatpush1.bf16.msra.mxu1 %v2552_v6  ;;  %v2614_v6 = vld [vmem:[%s3558_s3 + $0x2a4] ss:$8 sps:$4 sm:$0xff]  }
  0x44   : > { %1154 = vmatprep.subr.bf16.mxu1 %v2560_v7  ;;  %990 = vmatpush1.bf16.msra.mxu0 %v2549_v9  ;;  %v2603_v7 = vld [vmem:[%s3558_s3 + $0x230] ss:$8 sps:$4 sm:$0xff]   ;;  %v2612_v9 = vld [vmem:[%s3558_s3 + $0x2a0] ss:$8 sps:$4 sm:$0xff]  }
  0x45   : > { %991 = vmatprep.subr.bf16.mxu0 %v2557_v11  ;;  %v2620_v11 = vld [vmem:[%s3558_s3 + $0x294] ss:$8 sps:$4 sm:$0xff]  }
  0x47   : > { %1155 = vmatpush1.bf16.msra.mxu1 %v2558_v12  ;;  %v2609_v12 = vld [vmem:[%s3558_s3 + $0x220] ss:$8 sps:$4 sm:$0xff]  }
  0x48   : > { %1156 = vmatprep.subr.bf16.mxu1 %v2566_v53  ;;  %992 = vmatpush1.bf16.msra.mxu0 %v2555_v13  ;;  %v2617_v53 = vld [vmem:[%s3558_s3 + $0x214] ss:$8 sps:$4 sm:$0xff]   ;;  %v1373_v13 = vcombine.low %v3198_v52, %v3078_v40  ;;  %v2623_v40 = vld [vmem:[%s3558_s3 + $0x204] ss:$8 sps:$4 sm:$0xff]  }
  0x49   : > { %993 = vmatprep.subr.bf16.mxu0 %v2563_v16  ;;  %v2618_v16 = vld [vmem:[%s3558_s3 + $0x290] ss:$8 sps:$4 sm:$0xff]   ;;  %v2632_v52 = vld [vmem:[%s3558_s3 + $0x3f4] ss:$8 sps:$4 sm:$0xff]  }
  0x4a   : > { %v1381_v44 = vrot.slane %v1373_v13, %v2899_v15  ;;  %v2629_v15 = vld [vmem:[%s3558_s3 + $0x374] ss:$8 sps:$4 sm:$0xff]  }
  0x4b   : > { %1157 = vmatpush1.bf16.msra.mxu1 %v2564_v17  ;;  %v2626_v17 = vld [vmem:[%s3558_s3 + $0x284] ss:$8 sps:$4 sm:$0xff]  }
  0x4c   : > { %1158 = vmatprep.subr.bf16.mxu1 %v2572_v20  ;;  %994 = vmatpush1.bf16.msra.mxu0 %v2561_v42  ;;  %v2615_v20 = vld [vmem:[%s3558_s3 + $0x210] ss:$8 sps:$4 sm:$0xff]   ;;  %v2624_v42 = vld [vmem:[%s3558_s3 + $0x280] ss:$8 sps:$4 sm:$0xff]   ;;  %v1389_v23 = vcombine.low %v1381_v44, %v1388_v57 }
  0x4d   : > { %995 = vmatprep.subr.bf16.mxu0 %v2569_v27  ;;  %v2630_v27 = vld [vmem:[%s3558_s3 + $0x3f0] ss:$8 sps:$4 sm:$0xff]  }
  0x4f   : > { %1159 = vmatpush1.bf16.msra.mxu1 %v2570_v29  ;;  %v2638_v29 = vld [vmem:[%s3558_s3 + $0x3e4] ss:$8 sps:$4 sm:$0xff]  }
  0x50   : > { %1160 = vmatprep.subr.bf16.mxu1 %v2578_v28  ;;  %996 = vmatpush1.bf16.msra.mxu0 %v2567_v19  ;;  %v2627_v28 = vld [vmem:[%s3558_s3 + $0x370] ss:$8 sps:$4 sm:$0xff]   ;;  %v2636_v19 = vld [vmem:[%s3558_s3 + $0x3e0] ss:$8 sps:$4 sm:$0xff]  }
  0x51   : > { %997 = vmatprep.subr.bf16.mxu0 %v2575_v24  ;;  %v2644_v24 = vld [vmem:[%s3558_s3 + $0x3d4] ss:$8 sps:$4 sm:$0xff]  }
  0x53   : > { %1161 = vmatpush1.bf16.msra.mxu1 %v2576_v31  ;;  %v2647_v31 = vld [vmem:[%s3558_s3 + $0x344] ss:$8 sps:$4 sm:$0xff]  }
  0x54   : > { %1471 = vmatprep.subr.bf16.mxu1 %v2584_v33  ;;  %998 = vmatpush1.bf16.msra.mxu0 %v2573_v34  ;;  %v2656_v33 = vld [vmem:[%s3558_s3 + $0x3b4] ss:$8 sps:$4 sm:$0xff]   ;;  %v2645_v34 = vld [vmem:[%s3558_s3 + $0x340] ss:$8 sps:$4 sm:$0xff]  }
  0x55   : > { %1308 = vmatprep.subr.bf16.mxu0 %v2581_v36  ;;  %v2653_v36 = vld [vmem:[%s3558_s3 + $0x334] ss:$8 sps:$4 sm:$0xff]  }
  0x56   : > { %1179 = vmatmul.mubr.bf16.vlgmr.msra.gmra.mxu1 %v1064_v39  ;;  %v2654_v39 = vld [vmem:[%s3558_s3 + $0x3b0] ss:$8 sps:$4 sm:$0xff]  }
  0x57   : > { %1472 = vmatpush1.bf16.msra.mxu1 %v2582_v43  ;;  %1503 = vmatprep.mubr.bf16.mxu1 %v2777_v3  ;;  %v2662_v43 = vld [vmem:[%s3558_s3 + $0x3a4] ss:$8 sps:$4 sm:$0xff]  }
  0x58   : > { %1016 = vmatmul.mubr.bf16.vlgmr.msra.gmra.mxu0 %v901_v26  ;;  %1473 = vmatprep.subr.bf16.mxu1 %v2590_v47  ;;  %v2651_v26 = vld [vmem:[%s3558_s3 + $0x330] ss:$8 sps:$4 sm:$0xff]   ;;  %v2659_v47 = vld [vmem:[%s3558_s3 + $0x324] ss:$8 sps:$4 sm:$0xff]  }
  0x59   : > { %1309 = vmatpush1.bf16.msra.mxu0 %v2579_v48  ;;  %1340 = vmatprep.mubr.bf16.mxu0 %v2777_v3  ;;  %v2660_v48 = vld [vmem:[%s3558_s3 + $0x3a0] ss:$8 sps:$4 sm:$0xff]  }
  0x5a   : > { %1310 = vmatprep.subr.bf16.mxu0 %v2587_v49  ;;  %v2668_v49 = vld [vmem:[%s3558_s3 + $0x394] ss:$8 sps:$4 sm:$0xff]  }
  0x5b   : > { %1474 = vmatpush1.bf16.msra.mxu1 %v2588_v38  ;;  %v2657_v38 = vld [vmem:[%s3558_s3 + $0x320] ss:$8 sps:$4 sm:$0xff]  }
  0x5c   : > { %1475 = vmatprep.subr.bf16.mxu1 %v2596_v45  ;;  %v2665_v45 = vld [vmem:[%s3558_s3 + $0x314] ss:$8 sps:$4 sm:$0xff]  }
  0x5d   : > { %1311 = vmatpush1.bf16.msra.mxu0 %v2585_v50  ;;  %v2666_v50 = vld [vmem:[%s3558_s3 + $0x390] ss:$8 sps:$4 sm:$0xff]  }
  0x5e   : > { %1312 = vmatprep.subr.bf16.mxu0 %v2593_v54  ;;  %v2674_v54 = vld [vmem:[%s3558_s3 + $0x384] ss:$8 sps:$4 sm:$0xff]  }
  0x5f   : > { %1476 = vmatpush1.bf16.msra.mxu1 %v2594_v55  ;;  %v2663_v55 = vld [vmem:[%s3558_s3 + $0x310] ss:$8 sps:$4 sm:$0xff]  }
  0x60   : > { %1477 = vmatprep.subr.bf16.mxu1 %v2602_v56  ;;  %v2671_v56 = vld [vmem:[%s3558_s3 + $0x304] ss:$8 sps:$4 sm:$0xff]  }
  0x61   : > { %1313 = vmatpush1.bf16.msra.mxu0 %v2591_v41  ;;  %v2672_v41 = vld [vmem:[%s3558_s3 + $0x380] ss:$8 sps:$4 sm:$0xff]  }
  0x62   : > { %1314 = vmatprep.subr.bf16.mxu0 %v2599_v59  ;;  %v2669_v59 = vld [vmem:[%s3558_s3 + $0x300] ss:$8 sps:$4 sm:$0xff]  }
  0x63   : > { %1478 = vmatpush1.bf16.msra.mxu1 %v2600_v60  ;;  %v2677_v60 = vld [vmem:[%s3558_s3 + $0x474] ss:$8 sps:$4 sm:$0xff]  }
  0x64   : > { %1479 = vmatprep.subr.bf16.mxu1 %v2608_v61  ;;  %v2675_v61 = vld [vmem:[%s3558_s3 + $0x470] ss:$8 sps:$4 sm:$0xff]  }
  0x65   : > { %1315 = vmatpush1.bf16.msra.mxu0 %v2597_v62  ;;  %v2680_v62 = vld [vmem:[%s3558_s3 + $0x464] ss:$8 sps:$4 sm:$0xff]  }
  0x66   : > { %1316 = vmatprep.subr.bf16.mxu0 %v2605_v2  ;;  %v2678_v2 = vld [vmem:[%s3558_s3 + $0x460] ss:$8 sps:$4 sm:$0xff]  }
  0x67   : > { %1480 = vmatpush1.bf16.msra.mxu1 %v2606_v4  ;;  %v2681_v4 = vld [vmem:[%s3558_s3 + $0x450] ss:$8 sps:$4 sm:$0xff]  }
  0x68   : > { %1481 = vmatprep.subr.bf16.mxu1 %v2614_v6  ;;  %v2692_v6 = vld [vmem:[%s3558_s3 + $0x424] ss:$8 sps:$4 sm:$0xff]  }
  0x69   : > { %1317 = vmatpush1.bf16.msra.mxu0 %v2603_v7  ;;  %v2690_v7 = vld [vmem:[%s3558_s3 + $0x420] ss:$8 sps:$4 sm:$0xff]  }
  0x6a   : > { %1318 = vmatprep.subr.bf16.mxu0 %v2611_v8  ;;  %v2695_v8 = vld [vmem:[%s3558_s3 + $0x414] ss:$8 sps:$4 sm:$0xff]  }
  0x6b   : > { %1482 = vmatpush1.bf16.msra.mxu1 %v2612_v9  ;;  %v2693_v9 = vld [vmem:[%s3558_s3 + $0x410] ss:$8 sps:$4 sm:$0xff]  }
  0x6c   : > { %1483 = vmatprep.subr.bf16.mxu1 %v2620_v11  ;;  %v2698_v11 = vld [vmem:[%s3558_s3 + $0x404] ss:$8 sps:$4 sm:$0xff]  }
  0x6d   : > { %1319 = vmatpush1.bf16.msra.mxu0 %v2609_v12  ;;  %v2696_v12 = vld [vmem:[%s3558_s3 + $0x400] ss:$8 sps:$4 sm:$0xff]  }
  0x6e   : > { %1320 = vmatprep.subr.bf16.mxu0 %v2617_v53 }
  0x6f   : > { %1484 = vmatpush1.bf16.msra.mxu1 %v2618_v16 }
  0x70   : > { %1485 = vmatprep.subr.bf16.mxu1 %v2626_v17 }
  0x71   : > { %1321 = vmatpush1.bf16.msra.mxu0 %v2615_v20 }
  0x72   : > { %1322 = vmatprep.subr.bf16.mxu0 %v2623_v40 }
  0x73   : > { %1486 = vmatpush1.bf16.msra.mxu1 %v2624_v42 }
  0x74   : > { %1780 = vmatprep.subr.bf16.mxu1 %v2632_v52 }
  0x75   : > { %1323 = vmatpush1.bf16.msra.mxu0 %v2621_v22 }
  0x76   : > { %1626 = vmatprep.subr.bf16.mxu0 %v2629_v15  ;;  %1504 = vmatmul.mubr.bf16.vlgmr.msra.gmra.mxu1 %v1389_v23 }
  0x77   : > { %1781 = vmatpush1.bf16.msra.mxu1 %v2630_v27  ;;  %1812 = vmatprep.mubr.bf16.mxu1 %v2777_v3 }
  0x78   : > { %1341 = vmatmul.mubr.bf16.vlgmr.msra.gmra.mxu0 %v1226_v37  ;;  %1782 = vmatprep.subr.bf16.mxu1 %v2638_v29  ;;  %v2639_v37 = vld [vmem:[%s3558_s3 + $0x350] ss:$8 sps:$4 sm:$0xff]   ;;  %v549_v29 = vsub.s32 0, %v2887_v10 }
  0x79   : > { %1627 = vmatpush1.bf16.msra.mxu0 %v2627_v28  ;;  %1658 = vmatprep.mubr.bf16.mxu0 %v2777_v3 }
  0x7a   : > { %1628 = vmatprep.subr.bf16.mxu0 %v2635_v18  ;;  %v550_v18 = vrot.slane %v545_v1, %v549_v29 }
  0x7b   : > { %1783 = vmatpush1.bf16.msra.mxu1 %v2636_v19  ;;  %v554_v19 = vrot.slane %v545_v1, %v553_v63 }
  0x7c   : > { %1784 = vmatprep.subr.bf16.mxu1 %v2644_v24 }
  0x7d   : > { %1629 = vmatpush1.bf16.msra.mxu0 %v2633_v25 }
  0x7e   : > { %1630 = vmatprep.subr.bf16.mxu0 %v2641_v30 }
  0x7f   : > { %1785 = vmatpush1.bf16.msra.mxu1 %v2642_v46 }
  0x80   : > { %1786 = vmatprep.subr.bf16.mxu1 %v2650_v21 }
  0x81   : > { %1631 = vmatpush1.bf16.msra.mxu0 %v2639_v37 }
  0x82   : > { %1632 = vmatprep.subr.bf16.mxu0 %v2647_v31 }
  0x83   : > { %1787 = vmatpush1.bf16.msra.mxu1 %v2648_v32 }
  0x84   : > { %1788 = vmatprep.subr.bf16.mxu1 %v2656_v33 }
  0x85   : > { %1633 = vmatpush1.bf16.msra.mxu0 %v2645_v34 }
  0x86   : > { %1634 = vmatprep.subr.bf16.mxu0 %v2653_v36 }
  0x87   : > { %1789 = vmatpush1.bf16.msra.mxu1 %v2654_v39 }
  0x88   : > { %1790 = vmatprep.subr.bf16.mxu1 %v2662_v43 }
  0x89   : > { %1635 = vmatpush1.bf16.msra.mxu0 %v2651_v26 }
  0x8a   : > { %1636 = vmatprep.subr.bf16.mxu0 %v2659_v47 }
  0x8b   : > { %1791 = vmatpush1.bf16.msra.mxu1 %v2660_v48 }
  0x8c   : > { %1792 = vmatprep.subr.bf16.mxu1 %v2668_v49 }
  0x8d   : > { %1637 = vmatpush1.bf16.msra.mxu0 %v2657_v38 }
  0x8e   : > { %1638 = vmatprep.subr.bf16.mxu0 %v2665_v45 }
  0x8f   : > { %1793 = vmatpush1.bf16.msra.mxu1 %v2666_v50 }
  0x90   : > { %1794 = vmatprep.subr.bf16.mxu1 %v2674_v54 }
  0x91   : > { %1639 = vmatpush1.bf16.msra.mxu0 %v2663_v55 }
  0x92   : > { %1640 = vmatprep.subr.bf16.mxu0 %v2671_v56 }
  0x93   : > { %1795 = vmatpush1.bf16.msra.mxu1 %v2672_v41 }
  0x95   : > { %1641 = vmatpush1.bf16.msra.mxu0 %v2669_v59 }
  0x96   : > { %1935 = vmatprep.subr.bf16.mxu0 %v2677_v60  ;;  %1813 = vmatmul.mubr.bf16.vlgmr.msra.gmra.mxu1 %v3146_v0  ;;  %v2683_v0 = vld [vmem:[%s3558_s3 + $0x454] ss:$8 sps:$4 sm:$0xff]  }
  0x98   : > { %1659 = vmatmul.mubr.bf16.vlgmr.msra.gmra.mxu0 %v1544_v58  ;;  %v2687_v58 = vld [vmem:[%s3558_s3 + $0x430] ss:$8 sps:$4 sm:$0xff]  }
  0x99   : > { %1936 = vmatpush1.bf16.msra.mxu0 %v2675_v61  ;;  %1967 = vmatprep.mubr.bf16.mxu0 %v2777_v3  ;;  %v2684_v3 = vld [vmem:[%s3558_s3 + $0x440] ss:$8 sps:$4 sm:$0xff]  }
  0x9a   : > { %1937 = vmatprep.subr.bf16.mxu0 %v2680_v62 }
  0x9d   : > { %1938 = vmatpush1.bf16.msra.mxu0 %v2678_v2 }
  0x9e   : > { %1939 = vmatprep.subr.bf16.mxu0 %v2683_v0 }
  0xa1   : > { %1940 = vmatpush1.bf16.msra.mxu0 %v2681_v4 }
  0xa2   : > { %1941 = vmatprep.subr.bf16.mxu0 %v2686_v35 }
  0xa5   : > { %1942 = vmatpush1.bf16.msra.mxu0 %v2684_v3 }
  0xa6   : > { %1943 = vmatprep.subr.bf16.mxu0 %v2689_v51 }
  0xa9   : > { %1944 = vmatpush1.bf16.msra.mxu0 %v2687_v58 }
  0xaa   : > { %1945 = vmatprep.subr.bf16.mxu0 %v2692_v6 }
  0xad   : > { %1946 = vmatpush1.bf16.msra.mxu0 %v2690_v7 }
  0xae   : > { %1947 = vmatprep.subr.bf16.mxu0 %v2695_v8 }
  0xb1   : > { %1948 = vmatpush1.bf16.msra.mxu0 %v2693_v9 }
  0xb2   : > { %1949 = vmatprep.subr.bf16.mxu0 %v2698_v11 }
  0xb5   : > { %1950 = vmatpush1.bf16.msra.mxu0 %v2696_v12 }
  0xb8   : > { %1968 = vmatmul.mubr.bf16.vlgmr.msra.gmra.mxu0 %v1853_v5 }
  0xf6   : > { %v693_v53 = vpop.f32.mrf.mxu0  ;;  %v851_v14 = vpop.f32.mrf.mxu1 }
  0xf7   : > { %v694_v30 = vadd.f32 %v693_v53, %v550_v18 }
  0xf8   : > { %v695_v13 = vpop.f32.mrf.mxu0  ;;  %v853_v17 = vpop.f32.mrf.mxu1 }
  0xf9   : > { %v696_v46 = vadd.f32 %v695_v13, %v554_v19  ;;  %v860_v31 = vadd.f32 %v851_v14, %v694_v30 }
  0xfa   : > { %v697_v16 = vpop.f32.mrf.mxu0  ;;  %v855_v40 = vpop.f32.mrf.mxu1 }
  0xfb   : > { %v698_v32 = vadd.f32 %v697_v16, %v550_v18  ;;  %v861_v33 = vadd.f32 %v853_v17, %v696_v46 }
  0xfc   : > { %v699_v20 = vpop.f32.mrf.mxu0  ;;  %v857_v57 = vpop.f32.mrf.mxu1 }
  0xfd   : > { %v700_v34 = vadd.f32 %v699_v20, %v554_v19  ;;  %v862_v47 = vadd.f32 %v855_v40, %v698_v32 }
  0xff   : > { %v863_v48 = vadd.f32 %v857_v57, %v700_v34 }
 0x116   : > { %v1180_v52 = vpop.f32.mrf.mxu1 }
 0x118   : > { %v1017_v44 = vpop.f32.mrf.mxu0  ;;  %v1182_v15 = vpop.f32.mrf.mxu1 }
 0x119   : > { %v1026_v39 = vadd.f32 %v1017_v44, %v860_v31 }
 0x11a   : > { %v1019_v42 = vpop.f32.mrf.mxu0  ;;  %v1184_v27 = vpop.f32.mrf.mxu1 }
 0x11b   : > { %v1027_v43 = vadd.f32 %v1019_v42, %v861_v33  ;;  %v1189_v38 = vadd.f32 %v1180_v52, %v1026_v39 }
 0x11c   : > { %v1021_v22 = vpop.f32.mrf.mxu0  ;;  %v1186_v28 = vpop.f32.mrf.mxu1 }
 0x11d   : > { %v1028_v45 = vadd.f32 %v1021_v22, %v862_v47  ;;  %v1190_v50 = vadd.f32 %v1182_v15, %v1027_v43 }
 0x11e   : > { %v1023_v23 = vpop.f32.mrf.mxu0 }
 0x11f   : > { %v1029_v54 = vadd.f32 %v1023_v23, %v863_v48  ;;  %v1191_v60 = vadd.f32 %v1184_v27, %v1028_v45 }
 0x121   : > { %v1192_v61 = vadd.f32 %v1186_v28, %v1029_v54 }
 0x136   : > { %v1505_v25 = vpop.f32.mrf.mxu1 }
 0x138   : > { %v1342_v5 = vpop.f32.mrf.mxu0  ;;  %v1507_v37 = vpop.f32.mrf.mxu1 }
 0x139   : > { %v1351_v41 = vadd.f32 %v1342_v5, %v1189_v38 }
 0x13a   : > { %v1344_v24 = vpop.f32.mrf.mxu0  ;;  %v1509_v10 = vpop.f32.mrf.mxu1 }
 0x13b   : > { %v1352_v59 = vadd.f32 %v1344_v24, %v1190_v50  ;;  %v1514_v0 = vadd.f32 %v1505_v25, %v1351_v41 }
 0x13c   : > { %v1346_v21 = vpop.f32.mrf.mxu0  ;;  %v1511_v49 = vpop.f32.mrf.mxu1 }
 0x13d   : > { %v1353_v4 = vadd.f32 %v1346_v21, %v1191_v60  ;;  %v1515_v35 = vadd.f32 %v1507_v37, %v1352_v59 }
 0x13e   : > { %v1348_v36 = vpop.f32.mrf.mxu0 }
 0x13f   : > { %v1354_v3 = vadd.f32 %v1348_v36, %v1192_v61  ;;  %v1516_v8 = vadd.f32 %v1509_v10, %v1353_v4 }
 0x141   : > { %v1517_v9 = vadd.f32 %v1511_v49, %v1354_v3 }
 0x156   : > { %v1814_v56 = vpop.f32.mrf.mxu1 }
 0x158   : > { %v1660_v26 = vpop.f32.mrf.mxu0  ;;  %v1816_v2 = vpop.f32.mrf.mxu1 }
 0x159   : > { %v1669_v51 = vadd.f32 %v1660_v26, %v1514_v0 }
 0x15a   : > { %v1662_v55 = vpop.f32.mrf.mxu0  ;;  %v1818_v7 = vpop.f32.mrf.mxu1 }
 0x15b   : > { %v1670_v58 = vadd.f32 %v1662_v55, %v1515_v35  ;;  %v1823_v12 = vadd.f32 %v1814_v56, %v1669_v51 }
 0x15c   : > { %v1664_v62 = vpop.f32.mrf.mxu0  ;;  %v1820_v16 = vpop.f32.mrf.mxu1 }
 0x15d   : > { %v1671_v53 = vadd.f32 %v1664_v62, %v1516_v8  ;;  %v1824_v13 = vadd.f32 %v1816_v2, %v1670_v58 }
 0x15e   : > { %v1666_v6 = vpop.f32.mrf.mxu0 }
 0x15f   : > { %v1672_v14 = vadd.f32 %v1666_v6, %v1517_v9  ;;  %v1825_v57 = vadd.f32 %v1818_v7, %v1671_v53 }
 0x161   : > { %v1826_v42 = vadd.f32 %v1820_v16, %v1672_v14 }
 0x178   : > { %v1969_v11 = vpop.f32.mrf.mxu0 }
 0x179   : > { %v1978_v20 = vadd.f32 %v1969_v11, %v1823_v12 }
 0x17a   : > { %v1971_v17 = vpop.f32.mrf.mxu0 }
 0x17b   : > { %v1979_v40 = vadd.f32 %v1971_v17, %v1824_v13 }
 0x17c   : > { %v1973_v44 = vpop.f32.mrf.mxu0 }
 0x17d   : > { %v1986_v52 = vcombine.low %v1978_v20, %v1979_v40  ;;  %v1987_v22 = vcombine.high %v1978_v20, %v1979_v40  ;;  %v1980_v23 = vadd.f32 %v1973_v44, %v1825_v57 }
 0x17e   : > { %v1975_v15 = vpop.f32.mrf.mxu0 }
 0x17f   : > { %1994 = vst [vmem:[%s328_s13] sm:$0xff] %v1986_v52  ;;  %1995 = vst [vmem:[%s328_s13 + $0x8] sm:$0xff] %v1987_v22  ;;  %v1981_v27 = vadd.f32 %v1975_v15, %v1826_v42 }
 0x181   : > { %v1988_v29 = vcombine.low %v1980_v23, %v1981_v27  ;;  %v1989_v63 = vcombine.high %v1980_v23, %v1981_v27 }
 0x183   : > { %1996 = vst [vmem:[%s328_s13 + $0x10] sm:$0xff] %v1988_v29  ;;  %1997 = vst [vmem:[%s328_s13 + $0x18] sm:$0xff] %v1989_v63 }
 0x184   : > { %2712 = shalt.err (!%p2709_p5)
}
 0x185   : > { %s2713_s6 = scalar_lea.hbm %s3506_s23, 512  ;;  %s2717_s9 = scalar_lea.hbm %s3560_s5, 1024 }
 0x186   : > { %p2714_p6 = scmp.ne.s32.totalorder %s3506_s23, %s2713_s6  ;;  %p2718_p10 = scmp.lt.s32.totalorder %s3506_s23, %s3560_s5 }
 0x187   : > { %p2719_p11 = scmp.lt.s32.totalorder %s2717_s9, %s2713_s6 }
 0x188   : > { %p2715_p7 = pnand %p2714_p6, %p2852_p4 }
 0x189   : > { %p2720_p12 = por %p2719_p11, %p2718_p10 }
 0x18a   : > { %p2716_p9 = pneg %p2715_p7 }
 0x18c   : > { %p2721_p13 = pnand %p2720_p12, %p2716_p9 }
 0x18e   : > { %2724 = shalt.err (!%p2721_p13)
}
 0x18f   : > { %s2780_s12 = smov 128   ;;  %s2781_s13 = smov 8  }
 0x190   : > { %2424 = dma.vmem_to_hbm [thread:$0]  (%p2852_p4), %s3501_s14, 512, %s3506_s23, %s3510_s1, %s2780_s12, %s2780_s12, %s2781_s13  }
 0x191 PF: > { %p2430_p0 = scmp.ge.s32.totalorder %s2775_s21, 2  ;;  %s2030_s15 = sand.u32 1, %s2755_s18  }
 0x192   : > { %s2031_s16 = scalar_lea.sflag [#allocation3], %s2030_s15 }
 0x193   : > { %p2427_p1 = pnand %p2430_p0, %p2859_p8 }
 0x195   : > { %p2428_p2 = pneg %p2427_p1 }
 0x197   : > { %2750 = dma.done.wait (%p2428_p2), %s2031_s16, 512  }
 0x198   : > { %2752 = vsyncadd (%p2428_p2), %s2031_s16, 4294966784  ;;  %s18_s21 = sadd.s32 1, %s2775_s21   ;;  %s3567_s18 = smov %s2759_s19 }
 0x199   : > { %p15_p3 = scmp.ge.s32.totalorder %s18_s21, 4   ;;  %s3568_s19 = smov %s2763_s20 }
 0x19a   : > { %s3569_s20 = smov %s2865_s29  ;;  %s3570_s1 = smov %s2771_s2 }
 0x19b   : > { %s3571_s2 = smov %s3573_s24  ;;  %17 = sbr.rel (!%p15_p3) target bundleno = 4 (0x4), region = 89 }
 0x1a0   :  { %2036 = vsyncpa [#allocation3], 1 }
 0x1a1   :  { %2038 = vsyncpa [#allocation3 + $0x1], 1 }

// kernel: contrast_extractor_layer.6
= control target key start
LH: loop header
LB: loop body
LE: loop exit
PB: predicated region body
PF: predicated region fallthrough
CT: control target
= control target key end

     0   :  { %s3562_s18 = smov 0   ;;  %s3564_s19 = smov 0   ;;  %s4405_s0 = inlined_call_operand.vmem [shape: bf16[2,8,8,128], index: 0, kind: input, shape index: {}, may-alias: {0,1,2}]   ;;  %s4406_s1 = inlined_call_operand.vmem [shape: bf16[2,8,8,128], index: 1, kind: input, shape index: {}, may-alias: {0,1,2}]   ;;  %s4407_s2 = inlined_call_operand.vmem [shape: bf16[2,8,8,128], index: 2, kind: input, shape index: {}, may-alias: {0,1,2}]   ;;  %s4408_s3 = inlined_call_operand.vmem [shape: bf16[9,128,128], index: 3, kind: input, shape index: {}]   ;;  %s4409_s4 = inlined_call_operand.vmem [shape: f32[1,128], index: 4, kind: input, shape index: {}]   ;;  %s4410_s5 = inlined_call_operand.vmem [shape: bf16[2,4,4,128], index: 5, kind: output, shape index: {}]  }
   0x1   :  { %s3566_s20 = smov 0  }
   0x2 LB: > { %s27_s1 = sadd.s32 1, %s3524_s19  ;;  %p2795_p0 = scmp.ge.s32.totalorder %s3528_s20, 1  ;;  %s3528_s20 = sphi %s3566_s20, %s15_s20   ;;  %s3524_s19 = sphi %s3564_s19, %s4416_s19   ;;  %s3520_s18 = sphi %s3562_s18, %s4415_s18  }
   0x3   : > { %p29_p1 = scmp.ge.s32.totalorder %s27_s1, 2  ;;  %p270_p2 = scmp.lt.s32.totalorder %s3528_s20, 3 }
   0x5   : > { %s4418_s1 = smov (%p29_p1, %s27_s1), 0  ;;  %p271_p3 = pnand %p2795_p0, %p270_p2 }
   0x6   : > { %p331_p4 = scmp.lt.s32.totalorder (!%p271_p3), %s3520_s18, 1 }
   0x7   : > { %274 = sbr.rel (%p271_p3) target bundleno = 477 (0x1dd), region = 40 }
   0xc   : > { %v3419_v0 = vld [vmem:[%s4408_s3 + $0x38] sm:$0xff]   ;;  %v3421_v2 = vld [vmem:[%s4408_s3 + $0x30] sm:$0xff]   ;;  %v3423_v4 = vld [vmem:[%s4408_s3 + $0x28] sm:$0xff]   ;;  %s4420_s18 = smov (!%p331_p4, %s3520_s18), 1  ;;  %v3530_v6 = vmov 0   ;;  %vm514_vm0 = vcmask 1040384  }
   0xd   : > { %v3420_v1 = vld [vmem:[%s4408_s3 + $0x78] sm:$0xff]   ;;  %3161 = vmatprep.subr.bf16.mxu0 %v3419_v0  ;;  %v3422_v3 = vld [vmem:[%s4408_s3 + $0x70] sm:$0xff]   ;;  %v3424_v5 = vld [vmem:[%s4408_s3 + $0x68] sm:$0xff]   ;;  %v3600_v7 = vcombine.low %v3530_v6, %v3530_v6  ;;  %s3048_s11 = sshll.u32 %s4420_s18, 5  ;;  %vm515_vm1 = vsmask.f32 256 }
   0xe   : > { %3185 = vmatprep.subr.bf16.mxu1 %v3420_v1  ;;  %3162 = vmatpush3.bf16.msra.mxu0 %v3419_v0  ;;  %v3425_v8 = vld [vmem:[%s4408_s3 + $0x20] sm:$0xff]   ;;  %v3427_v11 = vld [vmem:[%s4408_s3 + $0x18] sm:$0xff]   ;;  %s3619_s2 = scalar_lea.vmem %s4405_s0, %s3048_s11  ;;  %v3429_v15 = vld [vmem:[%s4408_s3 + $0x10] sm:$0xff]   ;;  %vm558_vm3 = vsmask.f32 3328  ;;  %vm557_vm4 = vcmask 1043456  }
   0xf   : > { %3186 = vmatpush3.bf16.msra.mxu1 %v3420_v1  ;;  %3163 = vmatprep.subr.bf16.mxu0 %v3421_v2  ;;  %v3426_v9 = vld [vmem:[%s4408_s3 + $0x60] sm:$0xff]   ;;  %v435_v10 = vshrl.u32 %v3600_v7, 16  ;;  %v3428_v12 = vld [vmem:[%s4408_s3 + $0x58] sm:$0xff]   ;;  %v438_v14 = vshll.u32 %v3600_v7, 16  ;;  %v3430_v16 = vld [vmem:[%s4408_s3 + $0x50] sm:$0xff]   ;;  %vm2088_vm6 = vcmask 1041408  }
  0x10   : > { %3187 = vmatprep.subr.bf16.mxu1 %v3422_v3  ;;  %v3631_v17 = vld [vmem:[%s3619_s2] sm:$0xf]  ;;  %v3634_v18 = vld [vmem:[%s3619_s2 + $0x4] sm:$0xf]  ;;  %v3645_v21 = vld [vmem:[%s3619_s2 + $0x8] sm:$0xf] }
  0x11   : > { %v437_v13 = vrot.slane %v435_v10, 7  ;;  %v3638_v19 = vcombine.low %v3631_v17, %v3631_v17  ;;  %v3642_v20 = vcombine.low %v3634_v18, %v3634_v18  ;;  %v2843_v23 = vcombine.low %v3530_v6, %v3631_v17  ;;  %vm3656_vm2 = vmand %vm514_vm0, %vm515_vm1  ;;  %v3431_v30 = vld [vmem:[%s4408_s3 + $0x8] sm:$0xff]   ;;  %v3668_v33 = vld [vmem:[%s3619_s2 + $0x1c] sm:$0xf]  ;;  %s3052_s7 = sshll.u32 %s4420_s18, 3 }
  0x12   : > { %3164 = vmatpush3.bf16.msra.mxu0 %v3421_v2  ;;  %v3650_v24 = vcombine.low %v3645_v21, %v3645_v21  ;;  %v3432_v32 = vld [vmem:[%s4408_s3 + $0x48] sm:$0xff]   ;;  %v3433_v41 = vld [vmem:[%s4408_s3] sm:$0xff]   ;;  %v3689_v43 = vcombine.low %v3668_v33, %v3530_v6  ;;  %v527_v47 = vrot.slane %v438_v14, 1  ;;  %v3440_v50 = vld [vmem:[%s4408_s3 + $0xb8] sm:$0xff]   ;;  %v3734_v58 = vcombine.low %v3634_v18, %v3645_v21  ;;  %s4331_s9 = scalar_lea.vmem %s4410_s5, %s3052_s7 }
  0x13   : > { %3188 = vmatpush3.bf16.msra.mxu1 %v3422_v3  ;;  %3165 = vmatprep.subr.bf16.mxu0 %v3423_v4  ;;  %v440_v22 = vor.u32 %v438_v14, %v437_v13  ;;  %v442_v25 = vshrl.u32 %v3638_v19, 16  ;;  %v445_v26 = vshll.u32 %v3638_v19, 16  ;;  %v449_v27 = vshrl.u32 %v3642_v20, 16  ;;  %v3434_v44 = vld [vmem:[%s4408_s3 + $0x40] sm:$0xff]   ;;  %v3712_v51 = vld [vmem:[%s3619_s2 + $0xc] sm:$0xf]  ;;  %vm3788_vm5 = vmand %vm557_vm4, %vm558_vm3 }
  0x14   : > { %3189 = vmatprep.subr.bf16.mxu1 %v3424_v5  ;;  %v452_v28 = vshll.u32 %v3642_v20, 16  ;;  %v456_v31 = vshrl.u32 %v3650_v24, 16  ;;  %3201 = vmatprep.mubr.bf16.mxu1 %v2843_v23  ;;  %v459_v38 = vshll.u32 %v3650_v24, 16  ;;  %v3715_v52 = vld [vmem:[%s3619_s2 + $0x10] sm:$0xf]  ;;  %v3441_v53 = vld [vmem:[%s4408_s3 + $0xf8] sm:$0xff]   ;;  %v3722_v54 = vcombine.low %v3712_v51, %v3712_v51 }
  0x15   : > { %v444_v34 = vrot.slane %v442_v25, 7  ;;  %v451_v35 = vrot.slane %v449_v27, 7  ;;  %v3676_v36 = vsel %vm3656_vm2, 0, %v440_v22  ;;  %v3726_v55 = vcombine.low %v3715_v52, %v3715_v52  ;;  %v3442_v59 = vld [vmem:[%s4408_s3 + $0xb0] sm:$0xff]   ;;  %v3749_v2 = vld [vmem:[%s3619_s2 + $0x18] sm:$0xf] }
  0x16   : > { %3166 = vmatpush3.bf16.msra.mxu0 %v3423_v4  ;;  %v458_v37 = vrot.slane %v456_v31, 7  ;;  %v529_v56 = vrot.slane %v445_v26, 1  ;;  %v2928_v60 = vcombine.low %v3645_v21, %v3712_v51  ;;  %v463_v61 = vshrl.u32 %v3722_v54, 16  ;;  %v3746_v1 = vld [vmem:[%s3619_s2 + $0x14] sm:$0xf]  ;;  %v3461_v24 = vld [vmem:[%s4408_s3 + $0xc0] sm:$0xff]  }
  0x17   : > { %3190 = vmatpush3.bf16.msra.mxu1 %v3424_v5  ;;  %3167 = vmatprep.subr.bf16.mxu0 %v3425_v8  ;;  %v447_v39 = vor.u32 %v445_v26, %v444_v34  ;;  %v454_v40 = vor.u32 %v452_v28, %v451_v35  ;;  %v466_v62 = vshll.u32 %v3722_v54, 16  ;;  %v470_v63 = vshrl.u32 %v3726_v55, 16  ;;  %v3443_v5 = vld [vmem:[%s4408_s3 + $0xf0] sm:$0xff]   ;;  %v3462_v54 = vld [vmem:[%s4408_s3 + $0x138] sm:$0xff]   ;;  %v3487_v21 = vld [vmem:[%s4408_s3 + $0x1e8] sm:$0xff]  }
  0x18   : > { %3191 = vmatprep.subr.bf16.mxu1 %v3426_v9  ;;  %v461_v42 = vor.u32 %v459_v38, %v458_v37  ;;  %v473_v0 = vshll.u32 %v3726_v55, 16  ;;  %v3753_v3 = vcombine.low %v3746_v1, %v3746_v1  ;;  %v2929_v4 = vcombine.low %v3715_v52, %v3746_v1  ;;  %v3463_v55 = vld [vmem:[%s4408_s3 + $0x178] sm:$0xff]   ;;  %v3488_v7 = vld [vmem:[%s4408_s3 + $0x1a0] sm:$0xff]  }
  0x19   : > { %v3696_v45 = vsel %vm3656_vm2, 0, %v447_v39  ;;  %v3700_v46 = vsel %vm3656_vm2, 0, %v454_v40  ;;  %v465_v6 = vrot.slane %v463_v61, 7  ;;  %v528_v14 = vor.u32 %v527_v47, %v435_v10  ;;  %v3444_v10 = vld [vmem:[%s4408_s3 + $0xa8] sm:$0xff]  }
  0x1a   : > { %3168 = vmatpush3.bf16.msra.mxu0 %v3425_v8  ;;  %v2815_v48 = vcombine.low %v3676_v36, %v3696_v45  ;;  %v3706_v49 = vsel %vm3656_vm2, 0, %v461_v42  ;;  %v472_v8 = vrot.slane %v470_v63, 7  ;;  %v480_v13 = vshll.u32 %v3753_v3, 16 }
  0x1b   : > { %3192 = vmatpush3.bf16.msra.mxu1 %v3426_v9  ;;  %3169 = vmatprep.subr.bf16.mxu0 %v3427_v11  ;;  %v3730_v57 = vcombine.low %v3700_v46, %v3706_v49  ;;  %v3766_v9 = vcombine.low %v3749_v2, %v3749_v2  ;;  %v3821_v40 = vcombine.low %v3746_v1, %v3749_v2  ;;  %v3491_v1 = vld [vmem:[%s4408_s3 + $0x1d8] sm:$0xff]   ;;  %vm2602_vm7 = vcmask 1041409  }
  0x1c   : > { %3193 = vmatprep.subr.bf16.mxu1 %v3428_v12  ;;  %3177 = vmatprep.mubr.bf16.mxu0 %v2815_v48  ;;  %v475_v22 = vor.u32 %v473_v0, %v472_v8  ;;  %v3447_v48 = vld [vmem:[%s4408_s3 + $0xe0] sm:$0xff]   ;;  %v531_v8 = vrot.slane %v452_v28, 1  ;;  %vm2605_vm8 = vcmask 1042434   ;;  %vm2608_vm9 = vcmask 1043459  }
  0x1d   : > { %v484_v23 = vshrl.u32 %v3766_v9, 16  ;;  %v487_v26 = vshll.u32 %v3766_v9, 16 }
  0x1e   : > { %3170 = vmatpush3.bf16.msra.mxu0 %v3427_v11  ;;  %v3770_v11 = vcombine.low %v3712_v51, %v3715_v52  ;;  %v532_v28 = vor.u32 %v531_v8, %v449_v27  ;;  %v2927_v8 = vcombine.low %v3631_v17, %v3634_v18  ;;  %v3472_v17 = vld [vmem:[%s4408_s3 + $0x110] sm:$0xff]   ;;  %v2930_v51 = vcombine.low %v3749_v2, %v3668_v33  ;;  %v3489_v52 = vld [vmem:[%s4408_s3 + $0x1e0] sm:$0xff]  }
  0x1f   : > { %3194 = vmatpush3.bf16.msra.mxu1 %v3428_v12  ;;  %3171 = vmatprep.subr.bf16.mxu0 %v3429_v15  ;;  %v477_v12 = vshrl.u32 %v3753_v3, 16  ;;  %v486_v34 = vrot.slane %v484_v23, 7  ;;  %v3473_v18 = vld [vmem:[%s4408_s3 + $0x150] sm:$0xff]  }
  0x20   : > { %3195 = vmatprep.subr.bf16.mxu1 %v3430_v16  ;;  %v562_v27 = vsel %vm3788_vm5, %v532_v28, 0  ;;  %v3476_v28 = vld [vmem:[%s4408_s3 + $0x100] sm:$0xff]   ;;  %v3492_v2 = vld [vmem:[%s4408_s3 + $0x190] sm:$0xff]  }
  0x21   : > { %v479_v19 = vrot.slane %v477_v12, 7  ;;  %v489_v39 = vor.u32 %v487_v26, %v486_v34  ;;  %v3460_v34 = vld [vmem:[%s4408_s3 + $0x80] sm:$0xff]  }
  0x22   : > { %3172 = vmatpush3.bf16.msra.mxu0 %v3429_v15  ;;  %v530_v15 = vor.u32 %v529_v56, %v442_v25  ;;  %v3445_v25 = vld [vmem:[%s4408_s3 + $0xe8] sm:$0xff]  }
  0x23   : > { %3196 = vmatpush3.bf16.msra.mxu1 %v3430_v16  ;;  %3173 = vmatprep.subr.bf16.mxu0 %v3431_v30  ;;  %v468_v16 = vor.u32 %v466_v62, %v465_v6  ;;  %v482_v37 = vor.u32 %v480_v13, %v479_v19  ;;  %v3457_v6 = vld [vmem:[%s4408_s3 + $0xd0] sm:$0xff]   ;;  %v537_v19 = vrot.slane %v473_v0, 1 }
  0x24   : > { %3197 = vmatprep.subr.bf16.mxu1 %v3432_v32  ;;  %v3829_v42 = vsel %vm3788_vm5, %v530_v15, 0  ;;  %v3874_v15 = vcombine.low %v3668_v33, %v3668_v33  ;;  %v3490_v33 = vld [vmem:[%s4408_s3 + $0x198] sm:$0xff]  }
  0x25   : > { %v3836_v47 = vsel %vm3656_vm2, 0, %v482_v37  ;;  %v538_v0 = vor.u32 %v537_v19, %v470_v63  ;;  %v539_v37 = vrot.slane %v480_v13, 1 }
  0x26   : > { %3174 = vmatpush3.bf16.msra.mxu0 %v3431_v30  ;;  %v3802_v30 = vsel %vm3656_vm2, 0, %v468_v16  ;;  %v3458_v16 = vld [vmem:[%s4408_s3 + $0x88] sm:$0xff]   ;;  %v494_v20 = vshll.u32 %v3874_v15, 16 }
  0x27   : > { %3198 = vmatpush3.bf16.msra.mxu1 %v3432_v32  ;;  %3175 = vmatprep.subr.bf16.mxu0 %v3433_v41  ;;  %v3806_v32 = vsel %vm3656_vm2, 0, %v475_v22  ;;  %v3459_v22 = vld [vmem:[%s4408_s3 + $0xc8] sm:$0xff]   ;;  %v3929_v13 = vsel %vm3788_vm5, %v538_v0, 0  ;;  %v3496_v0 = vld [vmem:[%s4408_s3 + $0x180] sm:$0xff]  }
  0x28   : > { %3199 = vmatprep.subr.bf16.mxu1 %v3434_v44  ;;  %v3813_v35 = vcombine.low %v3802_v30, %v3806_v32  ;;  %v2901_v9 = vcombine.low %v3806_v32, %v3836_v47  ;;  %v3466_v32 = vld [vmem:[%s4408_s3 + $0x128] sm:$0xff]   ;;  %v543_v19 = vrot.slane %v494_v20, 1 }
  0x2a   : > { %3176 = vmatpush3.bf16.msra.mxu0 %v3433_v41  ;;  %v3825_v41 = vsel %vm3788_vm5, %v528_v14, 0  ;;  %v533_v14 = vrot.slane %v459_v38, 1 }
  0x2b   : > { %3200 = vmatpush3.bf16.msra.mxu1 %v3434_v44  ;;  %3209 = vmatprep.subr.bf16.mxu0 %v3440_v50  ;;  %v3446_v44 = vld [vmem:[%s4408_s3 + $0xa0] sm:$0xff]  }
  0x2c   : > { %3233 = vmatprep.subr.bf16.mxu1 %v3441_v53  ;;  %v534_v38 = vor.u32 %v533_v14, %v456_v31  ;;  %v2955_v14 = vcombine.low %v3829_v42, %v562_v27 }
  0x2d   : > { %3178 = vmatmul.mubr.bf16.vlgmr.msra.gmra.mxu0 %v3730_v57 }
  0x2e   : > { %3202 = vmatmul.mubr.bf16.vlgmr.msra.gmra.mxu1 %v3734_v58  ;;  %3210 = vmatpush3.bf16.msra.mxu0 %v3440_v50  ;;  %v3844_v50 = vsel %vm3656_vm2, 0, %v489_v39  ;;  %v3902_v31 = vsel %vm3788_vm5, %v534_v38, 0  ;;  %v541_v39 = vrot.slane %v487_v26, 1  ;;  %v2900_v26 = vcombine.low %v3706_v49, %v3802_v30  ;;  %v3465_v49 = vld [vmem:[%s4408_s3 + $0x170] sm:$0xff]   ;;  %v3477_v38 = vld [vmem:[%s4408_s3 + $0x140] sm:$0xff]  }
  0x2f   : > { %3234 = vmatpush3.bf16.msra.mxu1 %v3441_v53  ;;  %3211 = vmatprep.subr.bf16.mxu0 %v3442_v59  ;;  %v2899_v53 = vcombine.low %v3696_v45, %v3700_v46  ;;  %v3850_v56 = vcombine.low %v3836_v47, %v3844_v50  ;;  %v3451_v45 = vld [vmem:[%s4408_s3 + $0xd8] sm:$0xff]   ;;  %v3456_v46 = vld [vmem:[%s4408_s3 + $0x90] sm:$0xff]   ;;  %v3467_v47 = vld [vmem:[%s4408_s3 + $0x168] sm:$0xff]  }
  0x30   : > { %3235 = vmatprep.subr.bf16.mxu1 %v3443_v5  ;;  %3205 = vmatprep.mubr.bf16.mxu1 %v3770_v11 }
  0x31   : > { %3181 = vmatprep.mubr.bf16.mxu0 %v3813_v35 }
  0x32   : > { %3212 = vmatpush3.bf16.msra.mxu0 %v3442_v59  ;;  %v2871_v59 = vcombine.low %v3825_v41, %v3829_v42  ;;  %v3474_v42 = vld [vmem:[%s4408_s3 + $0x108] sm:$0xff]  }
  0x33   : > { %3236 = vmatpush3.bf16.msra.mxu1 %v3443_v5  ;;  %3213 = vmatprep.subr.bf16.mxu0 %v3444_v10  ;;  %v3450_v5 = vld [vmem:[%s4408_s3 + $0x98] sm:$0xff]  }
  0x34   : > { %3237 = vmatprep.subr.bf16.mxu1 %v3445_v25 }
  0x35   : > { %3182 = vmatmul.mubr.bf16.gmra.mxu0 %v3850_v56 }
  0x36   : > { %3214 = vmatpush3.bf16.msra.mxu0 %v3444_v10  ;;  %3206 = vmatmul.mubr.bf16.gmra.mxu1 %v3821_v40  ;;  %v535_v10 = vrot.slane %v466_v62, 1 }
  0x37   : > { %3238 = vmatpush3.bf16.msra.mxu1 %v3445_v25  ;;  %3215 = vmatprep.subr.bf16.mxu0 %v3446_v44  ;;  %v491_v25 = vshrl.u32 %v3874_v15, 16  ;;  %v3486_v15 = vld [vmem:[%s4408_s3 + $0x1a8] sm:$0xff]  }
  0x38   : > { %3239 = vmatprep.subr.bf16.mxu1 %v3447_v48  ;;  %3225 = vmatprep.mubr.bf16.mxu0 %v2871_v59  ;;  %v536_v62 = vor.u32 %v535_v10, %v463_v61  ;;  %v3921_v61 = vcombine.low %v562_v27, %v3902_v31  ;;  %v3480_v10 = vld [vmem:[%s4408_s3 + $0x1b8] sm:$0xff]   ;;  %v3482_v27 = vld [vmem:[%s4408_s3 + $0x1b0] sm:$0xff]  }
  0x39   : > { %3249 = vmatprep.mubr.bf16.mxu1 %v2899_v53  ;;  %v542_v53 = vor.u32 %v541_v39, %v484_v23  ;;  %v3498_v39 = vld [vmem:[%s4408_s3 + $0x238] sm:$0xff]  }
  0x3a   : > { %3216 = vmatpush3.bf16.msra.mxu0 %v3446_v44  ;;  %v493_v44 = vrot.slane %v491_v25, 7  ;;  %v3925_v63 = vsel %vm3788_vm5, %v536_v62, 0  ;;  %v544_v62 = vor.u32 %v543_v19, %v491_v25 }
  0x3b   : > { %3240 = vmatpush3.bf16.msra.mxu1 %v3447_v48  ;;  %3217 = vmatprep.subr.bf16.mxu0 %v3450_v5  ;;  %v540_v48 = vor.u32 %v539_v37, %v477_v12  ;;  %v3947_v3 = vcombine.low %v3925_v63, %v3929_v13  ;;  %v3958_v23 = vsel %vm3788_vm5, %v542_v53, 0  ;;  %v3497_v37 = vld [vmem:[%s4408_s3 + $0x1c0] sm:$0xff]  }
  0x3c   : > { %3241 = vmatprep.subr.bf16.mxu1 %v3451_v45  ;;  %v496_v59 = vor.u32 %v494_v20, %v493_v44  ;;  %v3483_v20 = vld [vmem:[%s4408_s3 + $0x1f0] sm:$0xff]   ;;  %v4039_v25 = vsel %vm3788_vm5, %v544_v62, 0 }
  0x3d   : > { %v3954_v12 = vsel %vm3788_vm5, %v540_v48, 0  ;;  %v3499_v44 = vld [vmem:[%s4408_s3 + $0x230] sm:$0xff]  }
  0x3e   : > { %3218 = vmatpush3.bf16.msra.mxu0 %v3450_v5  ;;  %v3464_v5 = vld [vmem:[%s4408_s3 + $0x130] sm:$0xff]   ;;  %v3962_v30 = vsel %vm3656_vm2, 0, %v496_v59 }
  0x3f   : > { %3242 = vmatpush3.bf16.msra.mxu1 %v3451_v45  ;;  %3219 = vmatprep.subr.bf16.mxu0 %v3456_v46  ;;  %v3973_v45 = vcombine.low %v3954_v12, %v3958_v23  ;;  %v2902_v29 = vcombine.low %v3844_v50, %v3962_v30  ;;  %v3470_v50 = vld [vmem:[%s4408_s3 + $0x118] sm:$0xff]  }
  0x40   : > { %3243 = vmatprep.subr.bf16.mxu1 %v3457_v6 }
  0x42   : > { %3220 = vmatpush3.bf16.msra.mxu0 %v3456_v46  ;;  %v3468_v46 = vld [vmem:[%s4408_s3 + $0x120] sm:$0xff]  }
  0x43   : > { %3244 = vmatpush3.bf16.msra.mxu1 %v3457_v6  ;;  %3221 = vmatprep.subr.bf16.mxu0 %v3458_v16  ;;  %v3469_v6 = vld [vmem:[%s4408_s3 + $0x160] sm:$0xff]  }
  0x44   : > { %3245 = vmatprep.subr.bf16.mxu1 %v3459_v22 }
  0x46   : > { %3222 = vmatpush3.bf16.msra.mxu0 %v3458_v16  ;;  %v3471_v16 = vld [vmem:[%s4408_s3 + $0x158] sm:$0xff]  }
  0x47   : > { %3246 = vmatpush3.bf16.msra.mxu1 %v3459_v22  ;;  %3223 = vmatprep.subr.bf16.mxu0 %v3460_v34  ;;  %v3475_v22 = vld [vmem:[%s4408_s3 + $0x148] sm:$0xff]  }
  0x48   : > { %3247 = vmatprep.subr.bf16.mxu1 %v3461_v24 }
  0x4a   : > { %3224 = vmatpush3.bf16.msra.mxu0 %v3460_v34  ;;  %v3481_v34 = vld [vmem:[%s4408_s3 + $0x1f8] sm:$0xff]  }
  0x4b   : > { %3248 = vmatpush3.bf16.msra.mxu1 %v3461_v24  ;;  %3257 = vmatprep.subr.bf16.mxu0 %v3462_v54  ;;  %v2956_v24 = vcombine.low %v3902_v31, %v3925_v63  ;;  %v2957_v31 = vcombine.low %v3929_v13, %v3954_v12  ;;  %v4126_v13 = vld [vmem:[%s4409_s4] ss:$0 sm:$0xff] }
  0x4c   : > { %3281 = vmatprep.subr.bf16.mxu1 %v3463_v55 }
  0x4d   : > { %3226 = vmatmul.mubr.bf16.vlgmr.msra.gmra.mxu0 %v3921_v61 }
  0x4e   : > { %3250 = vmatmul.mubr.bf16.vlgmr.msra.gmra.mxu1 %v2900_v26  ;;  %3258 = vmatpush3.bf16.msra.mxu0 %v3462_v54  ;;  %v3500_v54 = vld [vmem:[%s4408_s3 + $0x228] sm:$0xff]  }
  0x4f   : > { %3282 = vmatpush3.bf16.msra.mxu1 %v3463_v55  ;;  %3259 = vmatprep.subr.bf16.mxu0 %v3464_v5  ;;  %v2983_v55 = vcombine.low %v3962_v30, %v3676_v36  ;;  %v3502_v36 = vld [vmem:[%s4408_s3 + $0x218] sm:$0xff]  }
  0x50   : > { %3283 = vmatprep.subr.bf16.mxu1 %v3465_v49  ;;  %3229 = vmatprep.mubr.bf16.mxu0 %v3947_v3 }
  0x51   : > { %3253 = vmatprep.mubr.bf16.mxu1 %v2901_v9 }
  0x52   : > { %3260 = vmatpush3.bf16.msra.mxu0 %v3464_v5 }
  0x53   : > { %3284 = vmatpush3.bf16.msra.mxu1 %v3465_v49  ;;  %3261 = vmatprep.subr.bf16.mxu0 %v3466_v32 }
  0x54   : > { %3285 = vmatprep.subr.bf16.mxu1 %v3467_v47 }
  0x55   : > { %3230 = vmatmul.mubr.bf16.gmra.mxu0 %v3973_v45 }
  0x56   : > { %3262 = vmatpush3.bf16.msra.mxu0 %v3466_v32  ;;  %3254 = vmatmul.mubr.bf16.gmra.mxu1 %v2902_v29 }
  0x57   : > { %3286 = vmatpush3.bf16.msra.mxu1 %v3467_v47  ;;  %3263 = vmatprep.subr.bf16.mxu0 %v3468_v46 }
  0x58   : > { %3287 = vmatprep.subr.bf16.mxu1 %v3469_v6  ;;  %3273 = vmatprep.mubr.bf16.mxu0 %v2927_v8 }
  0x59   : > { %3297 = vmatprep.mubr.bf16.mxu1 %v2955_v14 }
  0x5a   : > { %3264 = vmatpush3.bf16.msra.mxu0 %v3468_v46 }
  0x5b   : > { %3288 = vmatpush3.bf16.msra.mxu1 %v3469_v6  ;;  %3265 = vmatprep.subr.bf16.mxu0 %v3470_v50 }
  0x5c   : > { %3289 = vmatprep.subr.bf16.mxu1 %v3471_v16 }
  0x5e   : > { %3266 = vmatpush3.bf16.msra.mxu0 %v3470_v50 }
  0x5f   : > { %3290 = vmatpush3.bf16.msra.mxu1 %v3471_v16  ;;  %3267 = vmatprep.subr.bf16.mxu0 %v3472_v17 }
  0x60   : > { %3291 = vmatprep.subr.bf16.mxu1 %v3473_v18 }
  0x62   : > { %3268 = vmatpush3.bf16.msra.mxu0 %v3472_v17 }
  0x63   : > { %3292 = vmatpush3.bf16.msra.mxu1 %v3473_v18  ;;  %3269 = vmatprep.subr.bf16.mxu0 %v3474_v42 }
  0x64   : > { %3293 = vmatprep.subr.bf16.mxu1 %v3475_v22 }
  0x66   : > { %3270 = vmatpush3.bf16.msra.mxu0 %v3474_v42 }
  0x67   : > { %3294 = vmatpush3.bf16.msra.mxu1 %v3475_v22  ;;  %3271 = vmatprep.subr.bf16.mxu0 %v3476_v28 }
  0x68   : > { %3295 = vmatprep.subr.bf16.mxu1 %v3477_v38 }
  0x6a   : > { %3272 = vmatpush3.bf16.msra.mxu0 %v3476_v28 }
  0x6b   : > { %3296 = vmatpush3.bf16.msra.mxu1 %v3477_v38  ;;  %3305 = vmatprep.subr.bf16.mxu0 %v3480_v10 }
  0x6c   : > { %3329 = vmatprep.subr.bf16.mxu1 %v3481_v34 }
  0x6d   : > { %3274 = vmatmul.mubr.bf16.vlgmr.msra.gmra.mxu0 %v2928_v60  ;;  %v2958_v60 = vcombine.low %v3958_v23, %v4039_v25 }
  0x6e   : > { %3298 = vmatmul.mubr.bf16.vlgmr.msra.gmra.mxu1 %v2956_v24  ;;  %3306 = vmatpush3.bf16.msra.mxu0 %v3480_v10 }
  0x6f   : > { %3330 = vmatpush3.bf16.msra.mxu1 %v3481_v34  ;;  %3307 = vmatprep.subr.bf16.mxu0 %v3482_v27 }
  0x70   : > { %3331 = vmatprep.subr.bf16.mxu1 %v3483_v20  ;;  %3277 = vmatprep.mubr.bf16.mxu0 %v2929_v4  ;;  %v3493_v4 = vld [vmem:[%s4408_s3 + $0x1d0] sm:$0xff]  }
  0x71   : > { %3301 = vmatprep.mubr.bf16.mxu1 %v2957_v31 }
  0x72   : > { %3308 = vmatpush3.bf16.msra.mxu0 %v3482_v27 }
  0x73   : > { %3332 = vmatpush3.bf16.msra.mxu1 %v3483_v20  ;;  %3309 = vmatprep.subr.bf16.mxu0 %v3486_v15 }
  0x74   : > { %3333 = vmatprep.subr.bf16.mxu1 %v3487_v21 }
  0x75   : > { %3278 = vmatmul.mubr.bf16.gmra.mxu0 %v2930_v51 }
  0x76   : > { %3310 = vmatpush3.bf16.msra.mxu0 %v3486_v15  ;;  %3302 = vmatmul.mubr.bf16.gmra.mxu1 %v2958_v60 }
  0x77   : > { %3334 = vmatpush3.bf16.msra.mxu1 %v3487_v21  ;;  %3311 = vmatprep.subr.bf16.mxu0 %v3488_v7 }
  0x78   : > { %3335 = vmatprep.subr.bf16.mxu1 %v3489_v52  ;;  %3321 = vmatprep.mubr.bf16.mxu0 %v3730_v57  ;;  %v3494_v57 = vld [vmem:[%s4408_s3 + $0x188] sm:$0xff]  }
  0x79   : > { %3345 = vmatprep.mubr.bf16.mxu1 %v3734_v58  ;;  %v3495_v58 = vld [vmem:[%s4408_s3 + $0x1c8] sm:$0xff]  }
  0x7a   : > { %3312 = vmatpush3.bf16.msra.mxu0 %v3488_v7 }
  0x7b   : > { %3336 = vmatpush3.bf16.msra.mxu1 %v3489_v52  ;;  %3313 = vmatprep.subr.bf16.mxu0 %v3490_v33 }
  0x7c   : > { %3337 = vmatprep.subr.bf16.mxu1 %v3491_v1 }
  0x7e   : > { %3314 = vmatpush3.bf16.msra.mxu0 %v3490_v33 }
  0x7f   : > { %3338 = vmatpush3.bf16.msra.mxu1 %v3491_v1  ;;  %3315 = vmatprep.subr.bf16.mxu0 %v3492_v2 }
  0x80   : > { %3339 = vmatprep.subr.bf16.mxu1 %v3493_v4 }
  0x82   : > { %3316 = vmatpush3.bf16.msra.mxu0 %v3492_v2 }
  0x83   : > { %3340 = vmatpush3.bf16.msra.mxu1 %v3493_v4  ;;  %3317 = vmatprep.subr.bf16.mxu0 %v3494_v57 }
  0x84   : > { %3341 = vmatprep.subr.bf16.mxu1 %v3495_v58 }
  0x86   : > { %3318 = vmatpush3.bf16.msra.mxu0 %v3494_v57 }
  0x87   : > { %3342 = vmatpush3.bf16.msra.mxu1 %v3495_v58  ;;  %3319 = vmatprep.subr.bf16.mxu0 %v3496_v0 }
  0x88   : > { %3343 = vmatprep.subr.bf16.mxu1 %v3497_v37 }
  0x8a   : > { %3320 = vmatpush3.bf16.msra.mxu0 %v3496_v0 }
  0x8b   : > { %3344 = vmatpush3.bf16.msra.mxu1 %v3497_v37  ;;  %3353 = vmatprep.subr.bf16.mxu0 %v3498_v39 }
  0x8c   : > { %3377 = vmatprep.subr.bf16.mxu1 %v3498_v39 }
  0x8d   : > { %3322 = vmatmul.mubr.bf16.vlgmr.msra.gmra.mxu0 %v3813_v35  ;;  %v3503_v35 = vld [vmem:[%s4408_s3 + $0x210] sm:$0xff]  }
  0x8e   : > { %3346 = vmatmul.mubr.bf16.vlgmr.msra.gmra.mxu1 %v3770_v11  ;;  %3354 = vmatpush3.bf16.msra.mxu0 %v3498_v39  ;;  %v3501_v11 = vld [vmem:[%s4408_s3 + $0x220] sm:$0xff]  }
  0x8f   : > { %3385 = vmatpush3.bf16.msra.mxu1 %v3498_v39  ;;  %3355 = vmatprep.subr.bf16.mxu0 %v3499_v44 }
  0x90   : > { %3378 = vmatprep.subr.bf16.mxu1 %v3499_v44  ;;  %3325 = vmatprep.mubr.bf16.mxu0 %v3850_v56  ;;  %v3033_v56 = vcombine.low %v4039_v25, %v3825_v41 }
  0x91   : > { %3349 = vmatprep.mubr.bf16.mxu1 %v3821_v40  ;;  %v3505_v40 = vld [vmem:[%s4408_s3 + $0x200] sm:$0xff]  }
  0x92   : > { %3356 = vmatpush3.bf16.msra.mxu0 %v3499_v44 }
  0x93   : > { %3386 = vmatpush3.bf16.msra.mxu1 %v3499_v44  ;;  %3357 = vmatprep.subr.bf16.mxu0 %v3500_v54 }
  0x94   : > { %3379 = vmatprep.subr.bf16.mxu1 %v3500_v54 }
  0x95   : > { %3326 = vmatmul.mubr.bf16.gmra.mxu0 %v2983_v55 }
  0x96   : > { %3358 = vmatpush3.bf16.msra.mxu0 %v3500_v54  ;;  %3350 = vmatmul.mubr.bf16.gmra.mxu1 %v3689_v43  ;;  %v3504_v43 = vld [vmem:[%s4408_s3 + $0x208] sm:$0xff]  }
  0x97   : > { %3387 = vmatpush3.bf16.msra.mxu1 %v3500_v54  ;;  %3359 = vmatprep.subr.bf16.mxu0 %v3501_v11 }
  0x98   : > { %3380 = vmatprep.subr.bf16.mxu1 %v3501_v11  ;;  %3369 = vmatprep.mubr.bf16.mxu0 %v3921_v61 }
  0x99   : > { %3373 = vmatprep.mubr.bf16.mxu1 %v3973_v45 }
  0x9a   : > { %3360 = vmatpush3.bf16.msra.mxu0 %v3501_v11 }
  0x9b   : > { %3388 = vmatpush3.bf16.msra.mxu1 %v3501_v11  ;;  %3361 = vmatprep.subr.bf16.mxu0 %v3502_v36 }
  0x9c   : > { %3381 = vmatprep.subr.bf16.mxu1 %v3502_v36 }
  0x9e   : > { %3362 = vmatpush3.bf16.msra.mxu0 %v3502_v36 }
  0x9f   : > { %3389 = vmatpush3.bf16.msra.mxu1 %v3502_v36  ;;  %3363 = vmatprep.subr.bf16.mxu0 %v3503_v35 }
  0xa0   : > { %3382 = vmatprep.subr.bf16.mxu1 %v3503_v35 }
  0xa2   : > { %3364 = vmatpush3.bf16.msra.mxu0 %v3503_v35 }
  0xa3   : > { %3390 = vmatpush3.bf16.msra.mxu1 %v3503_v35  ;;  %3365 = vmatprep.subr.bf16.mxu0 %v3504_v43 }
  0xa4   : > { %3383 = vmatprep.subr.bf16.mxu1 %v3504_v43 }
  0xa6   : > { %3366 = vmatpush3.bf16.msra.mxu0 %v3504_v43 }
  0xa7   : > { %3391 = vmatpush3.bf16.msra.mxu1 %v3504_v43  ;;  %3367 = vmatprep.subr.bf16.mxu0 %v3505_v40 }
  0xa8   : > { %3384 = vmatprep.subr.bf16.mxu1 %v3505_v40 }
  0xaa   : > { %3368 = vmatpush3.bf16.msra.mxu0 %v3505_v40 }
  0xab   : > { %3392 = vmatpush3.bf16.msra.mxu1 %v3505_v40 }
  0xad   : > { %3370 = vmatmul.mubr.bf16.vlgmr.msra.gmra.mxu0 %v3947_v3 }
  0xae   : > { %3374 = vmatmul.mubr.bf16.vlgmr.msra.gmra.mxu1 %v3033_v56 }
  0xed   : > { %v4119_v61 = vpop.f32.mrf.mxu0 }
  0xee   : > { %v4121_v63 = vpop.f32.mrf.mxu1 }
  0xef   : > { %v699_v26 = vpop.f32.mrf.mxu0 }
  0xf0   : > { %v700_v48 = vadd.f32 %v4126_v13, %v699_v26  ;;  %v837_v53 = vpop.f32.mrf.mxu1  ;;  %v708_v26 = vadd.f32 %v4119_v61, %v4126_v13 }
  0xf1   : > { %v4129_v59 = vpop.f32.mrf.mxu0 }
  0xf2   : > { %v868_v41 = vadd.f32 %v837_v53, %v700_v48  ;;  %v4131_v5 = vpop.f32.mrf.mxu1 }
  0xf3   : > { %v702_v49 = vpop.f32.mrf.mxu0 }
  0xf4   : > { %v703_v3 = vadd.f32 %v4126_v13, %v702_v49  ;;  %v840_v9 = vpop.f32.mrf.mxu1  ;;  %v870_v49 = vadd.f32 %v4121_v63, %v708_v26  ;;  %v3531_v26 = vmov 1983009808  }
  0xf5   : > { %v3183_v30 = vpop.f32.mrf.mxu0 }
  0xf6   : > { %v4134_v12 = vadd.f32 %v840_v9, %v703_v3  ;;  %v3207_v23 = vpop.f32.mrf.mxu1  ;;  %v724_v53 = vadd.f32 %v3183_v30, %v4126_v13  ;;  %v711_v9 = vadd.f32 %v4129_v59, %v4126_v13 }
  0xf7   : > { %v715_v47 = vpop.f32.mrf.mxu0 }
  0xf8   : > { %v853_v32 = vpop.f32.mrf.mxu1  ;;  %v716_v29 = vadd.f32 %v4126_v13, %v715_v47  ;;  %v871_v61 = vadd.f32 %v4131_v5, %v711_v9 }
  0xf9   : > { %v3184_v46 = vpop.f32.mrf.mxu0 }
  0xfa   : > { %v4136_v45 = vpop.f32.mrf.mxu1  ;;  %v872_v6 = vadd.f32 %v853_v32, %v716_v29  ;;  %v874_v32 = vadd.f32 %v3207_v23, %v724_v53  ;;  %v727_v30 = vadd.f32 %v3184_v46, %v4126_v13  ;;  %v1922_v53 = vunpack.c.l.s4 %v3531_v26 }
  0xfb   : > { %v718_v8 = vpop.f32.mrf.mxu0 }
  0xfc   : > { %v856_v14 = vpop.f32.mrf.mxu1  ;;  %v719_v50 = vadd.f32 %v4126_v13, %v718_v8  ;;  %v875_v23 = vadd.f32 %v4136_v45, %v727_v30  ;;  %v1924_v13 = vlaneseq  ;;  %v1923_v45 = vunpack.c.0.s8 %v1922_v53 }
  0xfe   : > { %v873_v16 = vadd.f32 %v856_v14, %v719_v50 }
 0x10d   : > { %v3227_v17 = vpop.f32.mrf.mxu0 }
 0x10e   : > { %v3251_v18 = vpop.f32.mrf.mxu1  ;;  %v1032_v29 = vadd.f32 %v3227_v17, %v870_v49 }
 0x10f   : > { %v999_v42 = vpop.f32.mrf.mxu0 }
 0x110   : > { %v1030_v22 = vadd.f32 %v999_v42, %v868_v41  ;;  %v1147_v28 = vpop.f32.mrf.mxu1  ;;  %v1180_v50 = vadd.f32 %v3251_v18, %v1032_v29  ;;  %v1925_v29 = vshrl.u32 %v1924_v13, 7 }
 0x111   : > { %v3228_v38 = vpop.f32.mrf.mxu0 }
 0x112   : > { %v3252_v10 = vpop.f32.mrf.mxu1  ;;  %v1033_v63 = vadd.f32 %v3228_v38, %v871_v61 }
 0x113   : > { %v1002_v19 = vpop.f32.mrf.mxu0 }
 0x114   : > { %v4140_v34 = vpop.f32.mrf.mxu1  ;;  %v1031_v5 = vadd.f32 %v1002_v19, %v4134_v12 }
 0x115   : > { %v3231_v24 = vpop.f32.mrf.mxu0 }
 0x116   : > { %v3255_v27 = vpop.f32.mrf.mxu1 }
 0x117   : > { %v1015_v62 = vpop.f32.mrf.mxu0 }
 0x118   : > { %v1034_v20 = vadd.f32 %v1015_v62, %v872_v6  ;;  %v1163_v31 = vpop.f32.mrf.mxu1  ;;  %v1036_v6 = vadd.f32 %v3231_v24, %v874_v32  ;;  %v1178_v62 = vadd.f32 %v1147_v28, %v1030_v22  ;;  %v1181_v24 = vadd.f32 %v3252_v10, %v1033_v63 }
 0x119   : > { %v3232_v15 = vpop.f32.mrf.mxu0 }
 0x11a   : > { %v1182_v25 = vadd.f32 %v1163_v31, %v1034_v20  ;;  %v4144_v60 = vpop.f32.mrf.mxu1  ;;  %v1184_v42 = vadd.f32 %v3255_v27, %v1036_v6  ;;  %v1037_v49 = vadd.f32 %v3232_v15, %v875_v23 }
 0x11b   : > { %v1018_v21 = vpop.f32.mrf.mxu0 }
 0x11c   : > { %v4142_v51 = vadd.f32 %v1018_v21, %v873_v16  ;;  %v4146_v52 = vpop.f32.mrf.mxu1  ;;  %v1185_v10 = vadd.f32 %v4144_v60, %v1037_v49 }
 0x11e   : > { %v1183_v12 = vadd.f32 %v4146_v52, %v4142_v51 }
 0x12d   : > { %v3275_v7 = vpop.f32.mrf.mxu0 }
 0x12e   : > { %v3299_v1 = vpop.f32.mrf.mxu1  ;;  %v1326_v20 = vadd.f32 %v3275_v7, %v1180_v50 }
 0x12f   : > { %v1293_v33 = vpop.f32.mrf.mxu0 }
 0x130   : > { %v1441_v4 = vpop.f32.mrf.mxu1  ;;  %v1324_v21 = vadd.f32 %v1293_v33, %v1178_v62  ;;  %v1474_v9 = vadd.f32 %v3299_v1, %v1326_v20  ;;  %v1179_v33 = vadd.f32 %v4140_v34, %v1031_v5 }
 0x131   : > { %v3276_v2 = vpop.f32.mrf.mxu0 }
 0x132   : > { %v3300_v58 = vpop.f32.mrf.mxu1  ;;  %v1327_v46 = vadd.f32 %v3276_v2, %v1181_v24  ;;  %v1472_v22 = vadd.f32 %v1441_v4, %v1324_v21 }
 0x133   : > { %v4148_v57 = vpop.f32.mrf.mxu0 }
 0x134   : > { %v4150_v37 = vpop.f32.mrf.mxu1  ;;  %v1475_v19 = vadd.f32 %v3300_v58, %v1327_v46  ;;  %v1325_v1 = vadd.f32 %v4148_v57, %v1179_v33 }
 0x135   : > { %v3279_v0 = vpop.f32.mrf.mxu0 }
 0x136   : > { %v3303_v39 = vpop.f32.mrf.mxu1  ;;  %v1330_v31 = vadd.f32 %v3279_v0, %v1184_v42  ;;  %v1473_v58 = vadd.f32 %v4150_v37, %v1325_v1 }
 0x137   : > { %v1309_v44 = vpop.f32.mrf.mxu0 }
 0x138   : > { %v1457_v54 = vpop.f32.mrf.mxu1  ;;  %v1328_v18 = vadd.f32 %v1309_v44, %v1182_v25  ;;  %v1478_v38 = vadd.f32 %v3303_v39, %v1330_v31 }
 0x139   : > { %v3280_v55 = vpop.f32.mrf.mxu0 }
 0x13a   : > { %v4152_v11 = vpop.f32.mrf.mxu1  ;;  %v1476_v15 = vadd.f32 %v1457_v54, %v1328_v18  ;;  %v1331_v2 = vadd.f32 %v3280_v55, %v1185_v10 }
 0x13b   : > { %v1312_v36 = vpop.f32.mrf.mxu0 }
 0x13c   : > { %v4154_v43 = vpop.f32.mrf.mxu1  ;;  %v1329_v44 = vadd.f32 %v1312_v36, %v1183_v12  ;;  %v1479_v57 = vadd.f32 %v4152_v11, %v1331_v2 }
 0x13e   : > { %v1477_v36 = vadd.f32 %v4154_v43, %v1329_v44 }
 0x14d   : > { %v3323_v35 = vpop.f32.mrf.mxu0 }
 0x14e   : > { %v3347_v40 = vpop.f32.mrf.mxu1  ;;  %v1616_v28 = vadd.f32 %v3323_v35, %v1474_v9 }
 0x14f   : > { %v1583_v56 = vpop.f32.mrf.mxu0 }
 0x150   : > { %v1723_v48 = vpop.f32.mrf.mxu1  ;;  %v1614_v32 = vadd.f32 %v1583_v56, %v1472_v22  ;;  %v1756_v4 = vadd.f32 %v3347_v40, %v1616_v28 }
 0x151   : > { %v3324_v41 = vpop.f32.mrf.mxu0 }
 0x152   : > { %v4160_v3 = vpop.f32.mrf.mxu1  ;;  %v1617_v35 = vadd.f32 %v3324_v41, %v1475_v19  ;;  %v1754_v60 = vadd.f32 %v1723_v48, %v1614_v32 }
 0x153   : > { %v4164_v47 = vpop.f32.mrf.mxu0 }
 0x154   : > { %v4166_v8 = vpop.f32.mrf.mxu1  ;;  %v4187_v41 = vadd.f32 %v4160_v3, %v1617_v35 }
 0x155   : > { %v3327_v14 = vpop.f32.mrf.mxu0 }
 0x156   : > { %v3351_v16 = vpop.f32.mrf.mxu1  ;;  %v1620_v0 = vadd.f32 %v3327_v14, %v1478_v38  ;;  %v4181_v14 = vsub.s32 %v1923_v45, %v1925_v29 }
 0x157   : > { %v1599_v59 = vpop.f32.mrf.mxu0 }
 0x158   : > { %v1739_v17 = vpop.f32.mrf.mxu1  ;;  %v1618_v6 = vadd.f32 %v1599_v59, %v1476_v15  ;;  %v1760_v34 = vadd.f32 %v3351_v16, %v1620_v0  ;;  %v1615_v16 = vadd.f32 %v4164_v47, %v1473_v58 }
 0x159   : > { %v3328_v27 = vpop.f32.mrf.mxu0 }
 0x15a   : > { %v4172_v7 = vpop.f32.mrf.mxu1  ;;  %v1758_v48 = vadd.f32 %v1739_v17, %v1618_v6  ;;  %v1621_v63 = vadd.f32 %v3328_v27, %v1479_v57 }
 0x15b   : > { %v1602_v25 = vpop.f32.mrf.mxu0 }
 0x15c   : > { %v4179_v39 = vpop.f32.mrf.mxu1  ;;  %v1619_v20 = vadd.f32 %v1602_v25, %v1477_v36 }
 0x16d   : > { %v3371_v61 = vpop.f32.mrf.mxu0 }
 0x16e   : > { %v1898_v56 = vadd.f32 %v3371_v61, %v1756_v4  ;;  %v3375_v30 = vpop.f32.mrf.mxu1  ;;  %v4203_v4 = vadd.f32 %v4166_v8, %v1615_v16  ;;  %v4211_v8 = vadd.f32 %v4179_v39, %v1619_v20 }
 0x16f   : > { %v1902_v51 = vadd.f32 %v3375_v30, %v1760_v34  ;;  %v1865_v52 = vpop.f32.mrf.mxu0 }
 0x170   : > { %v1906_v54 = vmax.f32 %v1898_v56, 0.0  ;;  %v1896_v55 = vadd.f32 %v1865_v52, %v1754_v60  ;;  %v1881_v40 = vpop.f32.mrf.mxu1 }
 0x171   : > { %v1910_v50 = vmax.f32 %v1902_v51, 0.0  ;;  %v1900_v31 = vadd.f32 %v1881_v40, %v1758_v48  ;;  %v3372_v57 = vpop.f32.mrf.mxu0 }
 0x172   : > { %v1954_v42 = vcombine.high %v1906_v54, %v1906_v54  ;;  %v1961_v62 = vrot.slane %v1906_v54, %v4181_v14  ;;  %v1904_v3 = vmax.f32 %v1896_v55, 0.0  ;;  %v3376_v54 = vpop.f32.mrf.mxu1  ;;  %v1761_v55 = vadd.f32 %v4172_v7, %v1621_v63 }
 0x173   : > { %v2022_v37 = vcombine.high %v1910_v50, %v1910_v50  ;;  %v2029_v11 = vrot.slane %v1910_v50, %v4181_v14  ;;  %v1908_v36 = vmax.f32 %v1900_v31, 0.0 }
 0x174   : > { %v1968_v59 = vrot.slane %v1954_v42, %v4181_v14  ;;  %v1969_v23 = vcombine.high %v1961_v62, %v1961_v62  ;;  %v2145_v43 = vsel %vm2088_vm6, %v1961_v62, -inf  ;;  %v1920_v56 = vcombine.high %v1904_v3, %v1904_v3 }
 0x175   : > { %v2146_v21 = vrot.slane %v2145_v43, 4  ;;  %v2036_v17 = vrot.slane %v2022_v37, %v4181_v14  ;;  %v2037_v24 = vcombine.high %v2029_v11, %v2029_v11  ;;  %v2257_v47 = vsel %vm2088_vm6, %v2029_v11, -inf }
 0x176   : > { %v1970_v26 = vcombine.high %v1968_v59, %v1968_v59  ;;  %v2152_v53 = vsel %vm2088_vm6, %v1969_v23, -inf  ;;  %v2159_v5 = vsel %vm2088_vm6, %v1968_v59, -inf  ;;  %v2258_v49 = vrot.slane %v2257_v47, 4 }
 0x177   : > { %v2147_v9 = vmax.f32 %v2145_v43, %v2146_v21  ;;  %v2153_v13 = vrot.slane %v2152_v53, 4  ;;  %v2160_v46 = vrot.slane %v2159_v5, 4  ;;  %v2038_v18 = vcombine.high %v2036_v17, %v2036_v17 }
 0x178   : > { %v2166_v38 = vsel %vm2088_vm6, %v1970_v26, -inf  ;;  %v2259_v27 = vmax.f32 %v2257_v47, %v2258_v49  ;;  %v2264_v22 = vsel %vm2088_vm6, %v2037_v24, -inf  ;;  %v2271_v28 = vsel %vm2088_vm6, %v2036_v17, -inf }
 0x179   : > { %v2148_v0 = vrot.slane %v2147_v9, 2  ;;  %v2154_v45 = vmax.f32 %v2152_v53, %v2153_v13  ;;  %v2161_v33 = vmax.f32 %v2159_v5, %v2160_v46  ;;  %v2167_v10 = vrot.slane %v2166_v38, 4 }
 0x17a   : > { %v2260_v32 = vrot.slane %v2259_v27, 2  ;;  %v2265_v29 = vrot.slane %v2264_v22, 4  ;;  %v2272_v12 = vrot.slane %v2271_v28, 4  ;;  %v2278_v19 = vsel %vm2088_vm6, %v2038_v18, -inf }
 0x17b   : > { %v2149_v15 = vmax.f32 %v2147_v9, %v2148_v0  ;;  %v2155_v25 = vrot.slane %v2154_v45, 2  ;;  %v2162_v1 = vrot.slane %v2161_v33, 2  ;;  %v2168_v2 = vmax.f32 %v2166_v38, %v2167_v10 }
 0x17c   : > { %v2266_v44 = vmax.f32 %v2264_v22, %v2265_v29  ;;  %v2273_v35 = vmax.f32 %v2271_v28, %v2272_v12  ;;  %v2279_v6 = vrot.slane %v2278_v19, 4  ;;  %v4205_v60 = vmax.f32 %v2259_v27, %v2260_v32 }
 0x17d   : > { %v2150_v34 = vrot.slane %v2149_v15, 1  ;;  %v2169_v61 = vrot.slane %v2168_v2, 2  ;;  %v4207_v30 = vmax.f32 %v2154_v45, %v2155_v25  ;;  %v4213_v40 = vmax.f32 %v2161_v33, %v2162_v1 }
 0x17e   : > { %v2267_v51 = vrot.slane %v2266_v44, 2  ;;  %v2274_v52 = vrot.slane %v2273_v35, 2  ;;  %v2280_v58 = vmax.f32 %v2278_v19, %v2279_v6  ;;  %v2262_v62 = vrot.slane %v4205_v60, 1 }
 0x17f   : > { %v4215_v48 = vmax.f32 %v2168_v2, %v2169_v61  ;;  %v1927_v37 = vrot.slane %v1904_v3, %v4181_v14  ;;  %v1899_v11 = vadd.f32 %v3372_v57, %v4187_v41  ;;  %v4224_v7 = vadd.f32 %v3376_v54, %v1761_v55 }
 0x180   : > { %v4217_v50 = vmax.f32 %v2266_v44, %v2267_v51  ;;  %v4219_v16 = vmax.f32 %v2273_v35, %v2274_v52  ;;  %v2281_v42 = vrot.slane %v2280_v58, 2  ;;  %v4226_v39 = vmax.f32 %v2149_v15, %v2150_v34 }
 0x181   : > { %v2157_v63 = vrot.slane %v4207_v30, 1  ;;  %v1934_v31 = vrot.slane %v1920_v56, %v4181_v14  ;;  %v2164_v59 = vrot.slane %v4213_v40, 1  ;;  %v1935_v23 = vcombine.high %v1927_v37, %v1927_v37 }
 0x182   : > { %v2282_v20 = vmax.f32 %v2280_v58, %v2281_v42  ;;  %v2089_v43 = vsel %vm2088_vm6, %v1927_v37, -inf  ;;  %v1988_v21 = vcombine.high %v1908_v36, %v1908_v36  ;;  %v2171_v17 = vrot.slane %v4215_v48, 1 }
 0x183   : > { %v2269_v3 = vrot.slane %v4217_v50, 1  ;;  %v2276_v41 = vrot.slane %v4219_v16, 1  ;;  %v1936_v24 = vcombine.high %v1934_v31, %v1934_v31  ;;  %v2090_v47 = vrot.slane %v2089_v43, 4 }
 0x184   : > { %v2096_v26 = vsel %vm2088_vm6, %v1935_v23, -inf  ;;  %v2103_v53 = vsel %vm2088_vm6, %v1934_v31, -inf  ;;  %v1995_v5 = vrot.slane %v1908_v36, %v4181_v14  ;;  %v2283_v49 = vrot.slane %v2282_v20, 1 }
 0x185   : > { %v2097_v9 = vrot.slane %v2096_v26, 4  ;;  %v2104_v13 = vrot.slane %v2103_v53, 4  ;;  %v2110_v46 = vsel %vm2088_vm6, %v1936_v24, -inf  ;;  %v2091_v18 = vmax.f32 %v2089_v43, %v2090_v47 }
 0x186   : > { %v2111_v38 = vrot.slane %v2110_v46, 4  ;;  %v2002_v27 = vrot.slane %v1988_v21, %v4181_v14  ;;  %v2003_v22 = vcombine.high %v1995_v5, %v1995_v5  ;;  %v2201_v45 = vsel %vm2088_vm6, %v1995_v5, -inf }
 0x187   : > { %v2098_v28 = vmax.f32 %v2096_v26, %v2097_v9  ;;  %v2105_v0 = vmax.f32 %v2103_v53, %v2104_v13  ;;  %v1907_v33 = vmax.f32 %v1899_v11, 0.0  ;;  %v2092_v10 = vrot.slane %v2091_v18, 2 }
 0x188   : > { %v2112_v32 = vmax.f32 %v2110_v46, %v2111_v38  ;;  %v2004_v29 = vcombine.high %v2002_v27, %v2002_v27  ;;  %v2202_v12 = vrot.slane %v2201_v45, 4  ;;  %v2208_v25 = vsel %vm2088_vm6, %v2003_v22, -inf }
 0x189   : > { %v2099_v19 = vrot.slane %v2098_v28, 2  ;;  %v2106_v15 = vrot.slane %v2105_v0, 2  ;;  %v2215_v1 = vsel %vm2088_vm6, %v2002_v27, -inf  ;;  %v2093_v2 = vmax.f32 %v2091_v18, %v2092_v10 }
 0x18a   : > { %v2113_v44 = vrot.slane %v2112_v32, 2  ;;  %v2203_v35 = vmax.f32 %v2201_v45, %v2202_v12  ;;  %v2209_v6 = vrot.slane %v2208_v25, 4  ;;  %v2216_v56 = vrot.slane %v2215_v1, 4 }
 0x18b   : > { %v2100_v34 = vmax.f32 %v2098_v28, %v2099_v19  ;;  %v2107_v61 = vmax.f32 %v2105_v0, %v2106_v15  ;;  %v2222_v51 = vsel %vm2088_vm6, %v2004_v29, -inf  ;;  %v2094_v52 = vrot.slane %v2093_v2, 1 }
 0x18c   : > { %v2114_v58 = vmax.f32 %v2112_v32, %v2113_v44  ;;  %v2204_v57 = vrot.slane %v2203_v35, 2  ;;  %v2210_v54 = vmax.f32 %v2208_v25, %v2209_v6  ;;  %v4245_v55 = vmax.f32 %v4205_v60, %v2262_v62 }
 0x18d   : > { %v2101_v36 = vrot.slane %v2100_v34, 1  ;;  %v2217_v42 = vmax.f32 %v2215_v1, %v2216_v56  ;;  %v2223_v37 = vrot.slane %v2222_v51, 4  ;;  %v4248_v11 = vmax.f32 %v4207_v30, %v2157_v63 }
 0x18e   : > { %v4251_v31 = vmax.f32 %v4213_v40, %v2164_v59  ;;  %v2108_v23 = vrot.slane %v2107_v61, 1  ;;  %v2115_v43 = vrot.slane %v2114_v58, 1  ;;  %v4254_v21 = vmax.f32 %v4215_v48, %v2171_v17  ;;  %v1868_v17 = vpop.f32.mrf.mxu0 }
 0x18f   : > { %v4257_v24 = vmax.f32 %v4217_v50, %v2269_v3  ;;  %v2205_v47 = vmax.f32 %v2203_v35, %v2204_v57  ;;  %v2211_v60 = vrot.slane %v2210_v54, 2  ;;  %v4260_v62 = vmax.f32 %v4219_v16, %v2276_v41 }
 0x190   : > { %v4262_v26 = vmax.f32 %v2282_v20, %v2283_v49  ;;  %v4264_v30 = vmax.f32 %v2093_v2, %v2094_v52  ;;  %v1971_v63 = vcombine.high %v1907_v33, %v1907_v33  ;;  %v4266_v40 = vmax.f32 %v2100_v34, %v2101_v36 }
 0x191   : > { %v2218_v59 = vrot.slane %v2217_v42, 2  ;;  %v4268_v53 = vmax.f32 %v2222_v51, %v2223_v37  ;;  %v1978_v48 = vrot.slane %v1907_v33, %v4181_v14  ;;  %v4271_v50 = vmax.f32 %v2107_v61, %v2108_v23 }
 0x192   : > { %v4273_v3 = vmax.f32 %v2114_v58, %v2115_v43  ;;  %v1985_v16 = vrot.slane %v1971_v63, %v4181_v14  ;;  %v1911_v20 = vmax.f32 %v4224_v7, 0.0  ;;  %v2206_v41 = vrot.slane %v2205_v47, 1 }
 0x193   : > { %v4277_v5 = vmax.f32 %v2210_v54, %v2211_v60  ;;  %v1986_v49 = vcombine.high %v1978_v48, %v1978_v48  ;;  %v2173_v9 = vsel %vm2088_vm6, %v1978_v48, -inf  ;;  %v1897_v38 = vadd.f32 %v1868_v17, %v4203_v4 }
 0x194   : > { %v1987_v13 = vcombine.high %v1985_v16, %v1985_v16  ;;  %v2174_v46 = vrot.slane %v2173_v9, 4  ;;  %v2187_v18 = vsel %vm2088_vm6, %v1985_v16, -inf  ;;  %v4282_v27 = vmax.f32 %v2217_v42, %v2218_v59 }
 0x195   : > { %v2225_v22 = vrot.slane %v4268_v53, 2  ;;  %v2180_v28 = vsel %vm2088_vm6, %v1986_v49, -inf  ;;  %v2188_v0 = vrot.slane %v2187_v18, 4  ;;  %v2039_v10 = vcombine.high %v1911_v20, %v1911_v20 }
 0x196   : > { %v2175_v7 = vmax.f32 %v2173_v9, %v2174_v46  ;;  %v2181_v45 = vrot.slane %v2180_v28, 4  ;;  %v2194_v33 = vsel %vm2088_vm6, %v1987_v13, -inf  ;;  %v4287_v32 = vmax.f32 %v2205_v47, %v2206_v41 }
 0x197   : > { %v2189_v29 = vmax.f32 %v2187_v18, %v2188_v0  ;;  %v2195_v12 = vrot.slane %v2194_v33, 4  ;;  %v2046_v19 = vrot.slane %v1911_v20, %v4181_v14  ;;  %v2053_v25 = vrot.slane %v2039_v10, %v4181_v14 }
 0x198   : > { %v2176_v15 = vrot.slane %v2175_v7, 2  ;;  %v2182_v4 = vmax.f32 %v2180_v28, %v2181_v45  ;;  %v4291_v1 = vmax.f32 %v1897_v38, 0.0 }
 0x199   : > { %v2190_v2 = vrot.slane %v2189_v29, 2  ;;  %v2196_v44 = vmax.f32 %v2194_v33, %v2195_v12  ;;  %v2054_v35 = vcombine.high %v2046_v19, %v2046_v19  ;;  %v2285_v6 = vsel %vm2088_vm6, %v2046_v19, -inf }
 0x19a   : > { %v2177_v34 = vmax.f32 %v2175_v7, %v2176_v15  ;;  %v2183_v61 = vrot.slane %v2182_v4, 2  ;;  %v2055_v56 = vcombine.high %v2053_v25, %v2053_v25  ;;  %v2286_v51 = vrot.slane %v2285_v6, 4 }
 0x19b   : > { %v2191_v52 = vmax.f32 %v2189_v29, %v2190_v2  ;;  %v2197_v58 = vrot.slane %v2196_v44, 2  ;;  %v2292_v57 = vsel %vm2088_vm6, %v2054_v35, -inf  ;;  %v2299_v54 = vsel %vm2088_vm6, %v2053_v25, -inf }
 0x19c   : > { %v2178_v36 = vrot.slane %v2177_v34, 1  ;;  %v2184_v42 = vmax.f32 %v2182_v4, %v2183_v61  ;;  %v2287_v37 = vmax.f32 %v2285_v6, %v2286_v51  ;;  %v2293_v23 = vrot.slane %v2292_v57, 4 }
 0x19d   : > { %v2192_v43 = vrot.slane %v2191_v52, 1  ;;  %v2198_v47 = vmax.f32 %v2196_v44, %v2197_v58  ;;  %v2300_v60 = vrot.slane %v2299_v54, 4  ;;  %v2306_v63 = vsel %vm2088_vm6, %v2055_v56, -inf }
 0x19e   : > { %v2179_v59 = vmax.f32 %v2177_v34, %v2178_v36  ;;  %v2185_v48 = vrot.slane %v2184_v42, 1  ;;  %v2288_v17 = vrot.slane %v2287_v37, 2  ;;  %v2294_v16 = vmax.f32 %v2292_v57, %v2293_v23 }
 0x19f   : > { %v2193_v20 = vmax.f32 %v2191_v52, %v2192_v43  ;;  %v2199_v41 = vrot.slane %v2198_v47, 1  ;;  %v2301_v49 = vmax.f32 %v2299_v54, %v2300_v60  ;;  %v2307_v9 = vrot.slane %v2306_v63, 4 }
 0x1a0   : > { %v2186_v13 = vmax.f32 %v2184_v42, %v2185_v48  ;;  %v2317_v46 = vmax.f32 %v4226_v39, %v2179_v59  ;;  %v2289_v18 = vmax.f32 %v2287_v37, %v2288_v17  ;;  %v2295_v38 = vrot.slane %v2294_v16, 2 }
 0x1a1   : > { %v2200_v28 = vmax.f32 %v2198_v47, %v2199_v41  ;;  %v2319_v0 = vmax.f32 %v4251_v31, %v2193_v20  ;;  %v2302_v7 = vrot.slane %v2301_v49, 2  ;;  %v2308_v45 = vmax.f32 %v2306_v63, %v2307_v9 }
 0x1a2   : > { %v2318_v33 = vmax.f32 %v4248_v11, %v2186_v13  ;;  %v2333_v10 = vpack.c.bf16 %v2317_v46, %v2317_v46  ;;  %v2290_v29 = vrot.slane %v2289_v18, 1  ;;  %v2296_v12 = vmax.f32 %v2294_v16, %v2295_v38 }
 0x1a3   : > { %v2320_v19 = vmax.f32 %v4254_v21, %v2200_v28  ;;  %v2335_v15 = vpack.c.bf16 %v2319_v0, %v2319_v0  ;;  %v2303_v4 = vmax.f32 %v2301_v49, %v2302_v7  ;;  %v2309_v25 = vrot.slane %v2308_v45, 2 }
 0x1a4   : > { %v2334_v2 = vpack.c.bf16 %v2318_v33, %v2318_v33  ;;  %v2395_v39 = vrot.slane %v2333_v10, %v4181_v14  ;;  %v2291_v44 = vmax.f32 %v2289_v18, %v2290_v29  ;;  %v2297_v35 = vrot.slane %v2296_v12, 1 }
 0x1a5   : > { %v2336_v31 = vpack.c.bf16 %v2320_v19, %v2320_v19  ;;  %v2409_v6 = vrot.slane %v2335_v15, %v4181_v14  ;;  %v2304_v11 = vrot.slane %v2303_v4, 1  ;;  %v2310_v34 = vmax.f32 %v2308_v45, %v2309_v25 }
 0x1a6   : > { %v2402_v61 = vrot.slane %v2334_v2, %v4181_v14  ;;  %v2507_v21 = vrot.slane %v2395_v39, %v4181_v14  ;;  %v2298_v56 = vmax.f32 %v2296_v12, %v2297_v35  ;;  %v2325_v51 = vmax.f32 %v4245_v55, %v2291_v44  ;;  %v1884_v35 = vpop.f32.mrf.mxu1 }
 0x1a7   : > { %v2416_v52 = vrot.slane %v2336_v31, %v4181_v14  ;;  %v2521_v58 = vrot.slane %v2409_v6, %v4181_v14  ;;  %v2305_v57 = vmax.f32 %v2303_v4, %v2304_v11  ;;  %v2311_v54 = vrot.slane %v2310_v34, 1 }
 0x1a8   : > { %v2514_v36 = vrot.slane %v2402_v61, %v4181_v14  ;;  %v2589_v42 = vunpack.c.l.b16 %v2507_v21  ;;  %v2326_v37 = vmax.f32 %v4257_v24, %v2298_v56  ;;  %v2341_v23 = vpack.c.bf16 %v2325_v51, %v2325_v51 }
 0x1a9   : > { %v2528_v43 = vrot.slane %v2416_v52, %v4181_v14  ;;  %v2591_v47 = vunpack.c.l.b16 %v2521_v58  ;;  %v2312_v60 = vmax.f32 %v2310_v34, %v2311_v54  ;;  %v2327_v63 = vmax.f32 %v4260_v62, %v2305_v57 }
 0x1aa   : > { %v2590_v55 = vunpack.c.l.b16 %v2514_v36  ;;  %v2342_v59 = vpack.c.bf16 %v2326_v37, %v2326_v37  ;;  %v2451_v48 = vrot.slane %v2341_v23, %v4181_v14  ;;  %v1937_v17 = vcombine.high %v4291_v1, %v4291_v1 }
 0x1ab   : > { %v2592_v16 = vunpack.c.l.b16 %v2528_v43  ;;  %v2612_v20 = vrot.slane %v2591_v47, 6  ;;  %v2328_v41 = vmax.f32 %v4262_v26, %v2312_v60  ;;  %v2343_v24 = vpack.c.bf16 %v2327_v63, %v2327_v63 }
 0x1ac   : > { %v2610_v49 = vrot.slane %v2590_v55, 7  ;;  %v2458_v9 = vrot.slane %v2342_v59, %v4181_v14  ;;  %v2563_v13 = vrot.slane %v2451_v48, %v4181_v14  ;;  %v1944_v62 = vrot.slane %v4291_v1, %v4181_v14 }
 0x1ad   : > { %v2614_v46 = vrot.slane %v2592_v16, 5  ;;  %v2344_v18 = vpack.c.bf16 %v2328_v41, %v2328_v41  ;;  %v2465_v38 = vrot.slane %v2343_v24, %v4181_v14  ;;  %v1951_v28 = vrot.slane %v1937_v17, %v4181_v14 }
 0x1ae   : > { %v2611_v0 = vsel %vm2602_vm7, %v2610_v49, %v2589_v42  ;;  %v2570_v26 = vrot.slane %v2458_v9, %v4181_v14  ;;  %v2597_v7 = vunpack.c.l.b16 %v2563_v13  ;;  %v1952_v45 = vcombine.high %v1944_v62, %v1944_v62 }
 0x1af   : > { %v2613_v33 = vsel %vm2605_vm8, %v2612_v20, %v2611_v0  ;;  %v2472_v10 = vrot.slane %v2344_v18, %v4181_v14  ;;  %v2577_v29 = vrot.slane %v2465_v38, %v4181_v14  ;;  %v1953_v1 = vcombine.high %v1951_v28, %v1951_v28 }
 0x1b0   : > { %v2615_v12 = vsel %vm2608_vm9, %v2614_v46, %v2613_v33  ;;  %v2598_v19 = vunpack.c.l.b16 %v2570_v26  ;;  %v2117_v15 = vsel %vm2088_vm6, %v1944_v62, -inf  ;;  %v2124_v4 = vsel %vm2088_vm6, %v1952_v45, -inf }
 0x1b1   : > { %v2629_v25 = vpack.c.b16 %v2615_v12, %v2615_v12  ;;  %v2584_v2 = vrot.slane %v2472_v10, %v4181_v14  ;;  %v2599_v39 = vunpack.c.l.b16 %v2577_v29  ;;  %v2118_v44 = vrot.slane %v2117_v15, 4 }
 0x1b2   : > { %v2622_v31 = vrot.slane %v2598_v19, 7  ;;  %v2125_v6 = vrot.slane %v2124_v4, 4  ;;  %v2131_v11 = vsel %vm2088_vm6, %v1951_v28, -inf  ;;  %v2138_v34 = vsel %vm2088_vm6, %v1953_v1, -inf }
 0x1b3   : > { %3043 = vst.sshfl [vmem:[%s4331_s9 + $0x2] sm:$0x3 pattern:$0x76325410] %v2629_v25  ;;  %v2600_v61 = vunpack.c.l.b16 %v2584_v2  ;;  %v2624_v21 = vrot.slane %v2599_v39, 6  ;;  %v2119_v56 = vmax.f32 %v2117_v15, %v2118_v44  ;;  %v2132_v51 = vrot.slane %v2131_v11, 4 }
 0x1b4   : > { %v2623_v52 = vsel %vm2602_vm7, %v2622_v31, %v2597_v7  ;;  %v2126_v58 = vmax.f32 %v2124_v4, %v2125_v6  ;;  %v2139_v57 = vrot.slane %v2138_v34, 4  ;;  %v1901_v54 = vadd.f32 %v1884_v35, %v4211_v8 }
 0x1b5   : > { %v2625_v36 = vsel %vm2605_vm8, %v2624_v21, %v2623_v52  ;;  %v2626_v42 = vrot.slane %v2600_v61, 5  ;;  %v2120_v37 = vrot.slane %v2119_v56, 2  ;;  %v2133_v23 = vmax.f32 %v2131_v11, %v2132_v51 }
 0x1b6   : > { %v2213_v43 = vrot.slane %v4277_v5, 1  ;;  %v2127_v47 = vrot.slane %v2126_v58, 2  ;;  %v2140_v60 = vmax.f32 %v2138_v34, %v2139_v57  ;;  %v1909_v63 = vmax.f32 %v1901_v54, 0.0 }
 0x1b7   : > { %v2220_v55 = vrot.slane %v4282_v27, 1  ;;  %v2627_v59 = vsel %vm2608_vm9, %v2626_v42, %v2625_v36  ;;  %v2121_v48 = vmax.f32 %v2119_v56, %v2120_v37  ;;  %v2134_v17 = vrot.slane %v2133_v23, 2 }
 0x1b8   : > { %v2631_v16 = vpack.c.b16 %v2627_v59, %v2627_v59  ;;  %v2128_v20 = vmax.f32 %v2126_v58, %v2127_v47  ;;  %v2141_v8 = vrot.slane %v2140_v60, 2  ;;  %v2005_v41 = vcombine.high %v1909_v63, %v1909_v63 }
 0x1b9   : > { %v4349_v24 = vmax.f32 %v4268_v53, %v2225_v22  ;;  %v2122_v49 = vrot.slane %v2121_v48, 1  ;;  %v2135_v9 = vmax.f32 %v2133_v23, %v2134_v17  ;;  %v2012_v13 = vrot.slane %v1909_v63, %v4181_v14 }
 0x1ba   : > { %v4353_v62 = vmax.f32 %v4277_v5, %v2213_v43  ;;  %3045 = vst.sshfl [vmem:[%s4331_s9 + $0x6] sm:$0x3 pattern:$0x76325410] %v2631_v16  ;;  %v2129_v46 = vrot.slane %v2128_v20, 1  ;;  %v2142_v18 = vmax.f32 %v2140_v60, %v2141_v8  ;;  %v2019_v38 = vrot.slane %v2005_v41, %v4181_v14 }
 0x1bb   : > { %v2123_v28 = vmax.f32 %v2121_v48, %v2122_v49  ;;  %v2136_v0 = vrot.slane %v2135_v9, 1  ;;  %v2020_v26 = vcombine.high %v2012_v13, %v2012_v13  ;;  %v2229_v7 = vsel %vm2088_vm6, %v2012_v13, -inf }
 0x1bc   : > { %v2130_v45 = vmax.f32 %v2128_v20, %v2129_v46  ;;  %v2143_v53 = vrot.slane %v2142_v18, 1  ;;  %v2021_v22 = vcombine.high %v2019_v38, %v2019_v38  ;;  %v2230_v33 = vrot.slane %v2229_v7, 4 }
 0x1bd   : > { %v2137_v10 = vmax.f32 %v2135_v9, %v2136_v0  ;;  %v2313_v29 = vmax.f32 %v4264_v30, %v2123_v28  ;;  %v2236_v5 = vsel %vm2088_vm6, %v2020_v26, -inf  ;;  %v2243_v1 = vsel %vm2088_vm6, %v2019_v38, -inf }
 0x1be   : > { %v2144_v12 = vmax.f32 %v2142_v18, %v2143_v53  ;;  %v2314_v19 = vmax.f32 %v4266_v40, %v2130_v45  ;;  %v2231_v15 = vmax.f32 %v2229_v7, %v2230_v33  ;;  %v2237_v4 = vrot.slane %v2236_v5, 4 }
 0x1bf   : > { %v2315_v25 = vmax.f32 %v4271_v50, %v2137_v10  ;;  %v2329_v2 = vpack.c.bf16 %v2313_v29, %v2313_v29  ;;  %v2244_v39 = vrot.slane %v2243_v1, 4  ;;  %v2250_v44 = vsel %vm2088_vm6, %v2021_v22, -inf }
 0x1c0   : > { %v2316_v35 = vmax.f32 %v4273_v3, %v2144_v12  ;;  %v2330_v31 = vpack.c.bf16 %v2314_v19, %v2314_v19  ;;  %v2232_v6 = vrot.slane %v2231_v15, 2  ;;  %v2238_v30 = vmax.f32 %v2236_v5, %v2237_v4 }
 0x1c1   : > { %v2331_v11 = vpack.c.bf16 %v2315_v25, %v2315_v25  ;;  %v2367_v34 = vrot.slane %v2329_v2, %v4181_v14  ;;  %v2245_v61 = vmax.f32 %v2243_v1, %v2244_v39  ;;  %v2251_v21 = vrot.slane %v2250_v44, 4 }
 0x1c2   : > { %v2332_v56 = vpack.c.bf16 %v2316_v35, %v2316_v35  ;;  %v2374_v40 = vrot.slane %v2330_v31, %v4181_v14  ;;  %v2233_v51 = vmax.f32 %v2231_v15, %v2232_v6  ;;  %v2239_v52 = vrot.slane %v2238_v30, 2 }
 0x1c3   : > { %v2381_v50 = vrot.slane %v2331_v11, %v4181_v14  ;;  %v2479_v58 = vrot.slane %v2367_v34, %v4181_v14  ;;  %v2246_v57 = vrot.slane %v2245_v61, 2  ;;  %v2252_v54 = vmax.f32 %v2250_v44, %v2251_v21 }
 0x1c4   : > { %v2388_v3 = vrot.slane %v2332_v56, %v4181_v14  ;;  %v2486_v36 = vrot.slane %v2374_v40, %v4181_v14  ;;  %v2234_v42 = vrot.slane %v2233_v51, 1  ;;  %v2240_v37 = vmax.f32 %v2238_v30, %v2239_v52 }
 0x1c5   : > { %v2227_v23 = vrot.slane %v4349_v24, 1  ;;  %v2493_v43 = vrot.slane %v2381_v50, %v4181_v14  ;;  %v2247_v47 = vmax.f32 %v2245_v61, %v2246_v57  ;;  %v2253_v60 = vrot.slane %v2252_v54, 2 }
 0x1c6   : > { %v2500_v63 = vrot.slane %v2388_v3, %v4181_v14  ;;  %v2586_v59 = vunpack.c.l.b16 %v2486_v36  ;;  %v2235_v48 = vmax.f32 %v2233_v51, %v2234_v42  ;;  %v2241_v17 = vrot.slane %v2240_v37, 1 }
 0x1c7   : > { %v2585_v16 = vunpack.c.l.b16 %v2479_v58  ;;  %v2587_v20 = vunpack.c.l.b16 %v2493_v43  ;;  %v2248_v8 = vrot.slane %v2247_v47, 1  ;;  %v2254_v41 = vmax.f32 %v2252_v54, %v2253_v60 }
 0x1c8   : > { %v2588_v49 = vunpack.c.l.b16 %v2500_v63  ;;  %v2601_v9 = vrot.slane %v2586_v59, 7  ;;  %v2242_v13 = vmax.f32 %v2240_v37, %v2241_v17  ;;  %v2321_v46 = vmax.f32 %v4287_v32, %v2235_v48 }
 0x1c9   : > { %v2221_v18 = vmax.f32 %v4282_v27, %v2220_v55  ;;  %v2604_v38 = vrot.slane %v2587_v20, 6  ;;  %v2249_v28 = vmax.f32 %v2247_v47, %v2248_v8  ;;  %v2255_v0 = vrot.slane %v2254_v41, 1 }
 0x1ca   : > { %v2603_v26 = vsel %vm2602_vm7, %v2601_v9, %v2585_v16  ;;  %v2607_v7 = vrot.slane %v2588_v49, 5  ;;  %v2322_v45 = vmax.f32 %v4353_v62, %v2242_v13  ;;  %v2337_v53 = vpack.c.bf16 %v2321_v46, %v2321_v46 }
 0x1cb   : > { %v2228_v22 = vmax.f32 %v4349_v24, %v2227_v23  ;;  %v2606_v33 = vsel %vm2605_vm8, %v2604_v38, %v2603_v26  ;;  %v2256_v10 = vmax.f32 %v2254_v41, %v2255_v0  ;;  %v2323_v32 = vmax.f32 %v2221_v18, %v2249_v28 }
 0x1cc   : > { %v2609_v29 = vsel %vm2608_vm9, %v2607_v7, %v2606_v33  ;;  %v2338_v5 = vpack.c.bf16 %v2322_v45, %v2322_v45  ;;  %v2423_v27 = vrot.slane %v2337_v53, %v4181_v14 }
 0x1cd   : > { %v2628_v55 = vpack.c.b16 %v2609_v29, %v2609_v29  ;;  %v2324_v1 = vmax.f32 %v2228_v22, %v2256_v10  ;;  %v2339_v12 = vpack.c.bf16 %v2323_v32, %v2323_v32 }
 0x1ce   : > { %v2430_v19 = vrot.slane %v2338_v5, %v4181_v14  ;;  %v2535_v24 = vrot.slane %v2423_v27, %v4181_v14 }
 0x1cf   : > { %3042 = vst.sshfl [vmem:[%s4331_s9] sm:$0x3 pattern:$0x76325410] %v2628_v55  ;;  %v2340_v15 = vpack.c.bf16 %v2324_v1, %v2324_v1  ;;  %v2437_v62 = vrot.slane %v2339_v12, %v4181_v14 }
 0x1d0   : > { %v2542_v4 = vrot.slane %v2430_v19, %v4181_v14  ;;  %v2593_v31 = vunpack.c.l.b16 %v2535_v24 }
 0x1d1   : > { %v2444_v25 = vrot.slane %v2340_v15, %v4181_v14  ;;  %v2549_v2 = vrot.slane %v2437_v62, %v4181_v14 }
 0x1d2   : > { %v2594_v39 = vunpack.c.l.b16 %v2542_v4 }
 0x1d3   : > { %v2556_v44 = vrot.slane %v2444_v25, %v4181_v14  ;;  %v2595_v35 = vunpack.c.l.b16 %v2549_v2 }
 0x1d4   : > { %v2616_v6 = vrot.slane %v2594_v39, 7 }
 0x1d5   : > { %v2596_v30 = vunpack.c.l.b16 %v2556_v44  ;;  %v2618_v11 = vrot.slane %v2595_v35, 6 }
 0x1d6   : > { %v2617_v34 = vsel %vm2602_vm7, %v2616_v6, %v2593_v31 }
 0x1d7   : > { %v2619_v61 = vsel %vm2605_vm8, %v2618_v11, %v2617_v34  ;;  %v2620_v21 = vrot.slane %v2596_v30, 5 }
 0x1d9   : > { %v2621_v56 = vsel %vm2608_vm9, %v2620_v21, %v2619_v61 }
 0x1da   : > { %v2630_v40 = vpack.c.b16 %v2621_v56, %v2621_v56 }
 0x1dc   : > { %3044 = vst.sshfl [vmem:[%s4331_s9 + $0x4] sm:$0x3 pattern:$0x76325410] %v2630_v40 }
 0x1dd PF: > { %s15_s20 = sadd.s32 1, %s3528_s20   ;;  %s4415_s18 = smov %s3524_s19 }
 0x1de   : > { %p12_p5 = scmp.ge.s32.totalorder %s15_s20, 4   ;;  %s4416_s19 = smov %s4418_s1 }
 0x1e0   :  { %14 = sbr.rel (!%p12_p5) target bundleno = 2 (0x2), region = 84 }

// kernel: contrast_extractor_layer.4
= control target key start
LH: loop header
LB: loop body
LE: loop exit
PB: predicated region body
PF: predicated region fallthrough
CT: control target
= control target key end

     0   :  { %s6388_s18 = smov 0   ;;  %s6390_s19 = smov 0   ;;  %s8222_s0 = inlined_call_operand.vmem [shape: bf16[2,16,16,64], index: 0, kind: input, shape index: {}, may-alias: {0,1,2}]   ;;  %s8223_s1 = inlined_call_operand.vmem [shape: bf16[2,16,16,64], index: 1, kind: input, shape index: {}, may-alias: {0,1,2}]   ;;  %s8224_s2 = inlined_call_operand.vmem [shape: bf16[2,16,16,64], index: 2, kind: input, shape index: {}, may-alias: {0,1,2}]   ;;  %s8225_s3 = inlined_call_operand.vmem [shape: bf16[9,64,64], index: 3, kind: input, shape index: {}]   ;;  %s8226_s4 = inlined_call_operand.vmem [shape: f32[1,64], index: 4, kind: input, shape index: {}]   ;;  %s8227_s5 = inlined_call_operand.vmem [shape: bf16[2,8,8,64], index: 5, kind: output, shape index: {}]  }
   0x1   :  { %s6392_s20 = smov 0  }
   0x2 LB: > { %s27_s1 = sadd.s32 1, %s6350_s19  ;;  %p5293_p0 = scmp.ge.s32.totalorder %s6354_s20, 1  ;;  %s6354_s20 = sphi %s6392_s20, %s15_s20   ;;  %s6350_s19 = sphi %s6390_s19, %s8257_s19   ;;  %s6346_s18 = sphi %s6388_s18, %s8256_s18  }
   0x3   : > { %p29_p1 = scmp.ge.s32.totalorder %s27_s1, 2  ;;  %p273_p2 = scmp.lt.s32.totalorder %s6354_s20, 3 }
   0x5   : > { %s8259_s1 = smov (%p29_p1, %s27_s1), 0  ;;  %p274_p3 = pnand %p5293_p0, %p273_p2 }
   0x7   : > { %277 = sbr.rel (%p274_p3) target bundleno = 848 (0x350), region = 40 }
   0xc   : > { %v6274_v0 = vld [vmem:[%s8225_s3 + $0x18] sm:$0xff]   ;;  %v6275_v1 = vld [vmem:[%s8225_s3 + $0x10] sm:$0xff]   ;;  %v6356_v2 = vmov 0   ;;  %vm675_vm0 = vcmask 1040384   ;;  %v6276_v4 = vld [vmem:[%s8225_s3 + $0x8] sm:$0xff]   ;;  %p337_p4 = scmp.lt.s32.totalorder %s6346_s18, 1 }
   0xd   : > { %v6412_v3 = vcombine.low %v6356_v2, %v6356_v2  ;;  %5880 = vmatprep.subr.bf16.mxu0 %v6274_v0  ;;  %6240 = vmatprep.subr.bf16.mxu1 %v6274_v0  ;;  %vm676_vm1 = vsmask.f32 256  ;;  %vm810_vm3 = vcmask 523264   ;;  %v6277_v10 = vld [vmem:[%s8225_s3] sm:$0xff]   ;;  %v6281_v13 = vld [vmem:[%s8225_s3 + $0x38] sm:$0xff]   ;;  %v6288_v33 = vld [vmem:[%s8225_s3 + $0x50] sm:$0xff]  }
   0xe   : > { %5881 = vmatpush3.bf16.msra.mxu0 %v6274_v0  ;;  %6244 = vmatpush3.bf16.msra.mxu1 %v6274_v0  ;;  %vm6421_vm2 = vmand %vm675_vm0, %vm676_vm1  ;;  %s8261_s18 = smov (!%p337_p4, %s6346_s18), 1  ;;  %v6282_v14 = vld [vmem:[%s8225_s3 + $0x58] sm:$0xff]   ;;  %v6287_v41 = vld [vmem:[%s8225_s3 + $0x30] sm:$0xff]   ;;  %vm751_vm4 = vsmask.f32 7424  ;;  %vm750_vm5 = vcmask 1047552  }
   0xf   : > { %v532_v5 = vshrl.u32 %v6412_v3, 16  ;;  %5882 = vmatprep.subr.bf16.mxu0 %v6275_v1  ;;  %6241 = vmatprep.subr.bf16.mxu1 %v6275_v1  ;;  %v535_v6 = vshll.u32 %v6412_v3, 16  ;;  %s5631_s28 = sshll.u32 %s8261_s18, 7  ;;  %vm6691_vm6 = vmand %vm750_vm5, %vm751_vm4  ;;  %v6320_v8 = vld [vmem:[%s8225_s3 + $0xf0] sm:$0xff]   ;;  %vm3660_vm7 = vcmask 517120   ;;  %vm5069_vm8 = vcmask 1041409  }
  0x10   : > { %s6438_s6 = scalar_lea.vmem %s8222_s0, %s5631_s28  ;;  %vm5071_vm9 = vcmask 1042434   ;;  %vm5073_vm10 = vcmask 1043459   ;;  %vm5075_vm11 = vcmask 1044484   ;;  %vm5077_vm12 = vcmask 1045509  }
  0x11   : > { %v534_v7 = vrot.slane %v532_v5, 7  ;;  %v6443_v12 = vld [vmem:[%s6438_s6 + $0x38] sm:$0xff]   ;;  %v6452_v15 = vld [vmem:[%s6438_s6] sm:$0xff]   ;;  %v6462_v21 = vld [vmem:[%s6438_s6 + $0x8] sm:$0xff]   ;;  %v6469_v24 = vrot.slane %v535_v6, 1  ;;  %vm5079_vm13 = vcmask 1046534  }
  0x12   : > { %5883 = vmatpush3.bf16.msra.mxu0 %v6275_v1  ;;  %6245 = vmatpush3.bf16.msra.mxu1 %v6275_v1  ;;  %v588_v16 = vshrl.u32 %v6443_v12, 16  ;;  %v591_v17 = vshll.u32 %v6443_v12, 16  ;;  %v539_v18 = vshrl.u32 %v6452_v15, 16  ;;  %v542_v19 = vshll.u32 %v6452_v15, 16  ;;  %v6459_v20 = vld [vmem:[%s6438_s6 + $0x40] sm:$0xff]   ;;  %v6467_v23 = vld [vmem:[%s6438_s6 + $0x48] sm:$0xff]  }
  0x13   : > { %v537_v9 = vor.u32 %v535_v6, %v534_v7  ;;  %5884 = vmatprep.subr.bf16.mxu0 %v6276_v4  ;;  %6242 = vmatprep.subr.bf16.mxu1 %v6276_v4  ;;  %v595_v26 = vshrl.u32 %v6459_v20, 16  ;;  %v598_v27 = vshll.u32 %v6459_v20, 16  ;;  %v546_v29 = vshrl.u32 %v6462_v21, 16  ;;  %v6481_v32 = vld [vmem:[%s6438_s6 + $0x10] sm:$0xff]   ;;  %v6516_v46 = vld [vmem:[%s6438_s6 + $0x18] sm:$0xff]   ;;  %v6550_v59 = vld [vmem:[%s6438_s6 + $0x20] sm:$0xff]  }
  0x14   : > { %v590_v22 = vrot.slane %v588_v16, 7  ;;  %v541_v25 = vrot.slane %v539_v18, 7  ;;  %v549_v30 = vshll.u32 %v6462_v21, 16  ;;  %v602_v31 = vshrl.u32 %v6467_v23, 16  ;;  %v6513_v45 = vld [vmem:[%s6438_s6 + $0x50] sm:$0xff]   ;;  %v6527_v50 = vld [vmem:[%s6438_s6 + $0x58] sm:$0xff]  }
  0x15   : > { %v6433_v11 = vsel %vm6421_vm2, 0, %v537_v9  ;;  %v597_v35 = vrot.slane %v595_v26, 7  ;;  %v605_v36 = vshll.u32 %v6467_v23, 16  ;;  %v548_v38 = vrot.slane %v546_v29, 7 }
  0x16   : > { %5888 = vmatprep.mubr.msk.bf16.mxu0 %vm810_vm3, %v6433_v11  ;;  %5885 = vmatpush3.bf16.msra.mxu0 %v6276_v4  ;;  %v593_v28 = vor.u32 %v591_v17, %v590_v22  ;;  %v544_v34 = vor.u32 %v542_v19, %v541_v25  ;;  %v604_v39 = vrot.slane %v602_v31, 7  ;;  %v553_v40 = vshrl.u32 %v6481_v32, 16  ;;  %v6294_v25 = vld [vmem:[%s8225_s3 + $0x48] sm:$0xff]  }
  0x17   : > { %6246 = vmatpush3.bf16.msra.mxu1 %v6276_v4  ;;  %5886 = vmatprep.subr.bf16.mxu0 %v6277_v10  ;;  %v600_v43 = vor.u32 %v598_v27, %v597_v35  ;;  %v556_v44 = vshll.u32 %v6481_v32, 16  ;;  %v551_v47 = vor.u32 %v549_v30, %v548_v38  ;;  %v8231_v52 = vshrl.u32 %v6513_v45, 16  ;;  %v6569_v4 = vld [vmem:[%s6438_s6 + $0x60] sm:$0xff]  }
  0x18   : > { %6243 = vmatprep.subr.bf16.mxu1 %v6277_v10  ;;  %v6493_v37 = vsel %vm6421_vm2, 0, %v593_v28  ;;  %v6507_v42 = vsel %vm6421_vm2, 0, %v544_v34  ;;  %v607_v48 = vor.u32 %v605_v36, %v604_v39  ;;  %v555_v49 = vrot.slane %v553_v40, 7  ;;  %v6604_v39 = vld [vmem:[%s6438_s6 + $0x28] sm:$0xff]  }
  0x19   : > { %5904 = vmatprep.mubr.msk.bf16.mxu1 %vm810_vm3, %v6493_v37  ;;  %v6531_v51 = vsel %vm6421_vm2, 0, %v600_v43  ;;  %v8234_v53 = vshll.u32 %v6513_v45, 16  ;;  %v560_v54 = vshrl.u32 %v6516_v46, 16  ;;  %v6540_v55 = vsel %vm6421_vm2, 0, %v551_v47  ;;  %v6613_v43 = vld [vmem:[%s6438_s6 + $0x68] sm:$0xff]  }
  0x1a   : > { %5887 = vmatpush3.bf16.msra.mxu0 %v6277_v10  ;;  %v6544_v56 = vsel %vm6421_vm2, 0, %v607_v48  ;;  %v558_v57 = vor.u32 %v556_v44, %v555_v49  ;;  %v563_v58 = vshll.u32 %v6516_v46, 16  ;;  %v611_v60 = vrot.slane %v8231_v52, 7  ;;  %v6301_v52 = vld [vmem:[%s8225_s3 + $0x78] sm:$0xff]  }
  0x1b   : > { %6247 = vmatpush3.bf16.msra.mxu1 %v6277_v10  ;;  %5960 = vmatprep.subr.bf16.mxu0 %v6282_v14  ;;  %v562_v61 = vrot.slane %v560_v54, 7  ;;  %v8230_v62 = vshrl.u32 %v6527_v50, 16  ;;  %v8233_v63 = vshll.u32 %v6527_v50, 16  ;;  %v567_v1 = vshrl.u32 %v6550_v59, 16  ;;  %v6293_v10 = vld [vmem:[%s8225_s3 + $0x28] sm:$0xff]  }
  0x1c   : > { %5920 = vmatprep.subr.bf16.mxu1 %v6281_v13  ;;  %v6564_v0 = vsel %vm6421_vm2, 0, %v558_v57  ;;  %v570_v2 = vshll.u32 %v6550_v59, 16  ;;  %v614_v6 = vor.u32 %v8234_v53, %v611_v60  ;;  %v8229_v22 = vshll.u32 %v6569_v4, 16  ;;  %v6626_v60 = vld [vmem:[%s6438_s6 + $0x30] sm:$0xff]  }
  0x1d   : > { %5889 = vmatmul.mubr.msk.bf16.vlgmr.msra.gmra.mxu0 %vm810_vm3, %v6507_v42  ;;  %v565_v7 = vor.u32 %v563_v58, %v562_v61  ;;  %v618_v9 = vrot.slane %v8230_v62, 7  ;;  %v574_v49 = vshrl.u32 %v6604_v39, 16  ;;  %v577_v57 = vshll.u32 %v6604_v39, 16 }
  0x1e   : > { %5961 = vmatpush3.bf16.msra.mxu0 %v6282_v14  ;;  %5905 = vmatmul.mubr.msk.bf16.vlgmr.msra.gmra.mxu1 %vm810_vm3, %v6531_v51  ;;  %v8228_v14 = vshrl.u32 %v6569_v4, 16  ;;  %v6589_v28 = vsel %vm6421_vm2, 0, %v614_v6  ;;  %v8232_v61 = vshrl.u32 %v6613_v43, 16  ;;  %v633_v6 = vshll.u32 %v6613_v43, 16 }
  0x1f   : > { %5962 = vmatprep.subr.bf16.mxu0 %v6288_v33  ;;  %5921 = vmatpush3.bf16.msra.mxu1 %v6281_v13  ;;  %v569_v13 = vrot.slane %v567_v1, 7  ;;  %v621_v34 = vor.u32 %v8233_v63, %v618_v9  ;;  %v6299_v9 = vld [vmem:[%s8225_s3 + $0x20] sm:$0xff]   ;;  %vm5081_vm14 = vcmask 1047559   ;;  %vm5148_vm15 = vcmask 519168  }
  0x20   : > { %5892 = vmatprep.mubr.msk.bf16.mxu0 %vm810_vm3, %v6540_v55  ;;  %5908 = vmatprep.mubr.msk.bf16.mxu1 %vm810_vm3, %v6544_v56  ;;  %v625_v38 = vrot.slane %v8228_v14, 7 }
  0x21   : > { %5922 = vmatprep.subr.bf16.mxu1 %v6287_v41  ;;  %v572_v35 = vor.u32 %v570_v2, %v569_v13 }
  0x22   : > { %5963 = vmatpush3.bf16.msra.mxu0 %v6288_v33  ;;  %v6593_v33 = vsel %vm6421_vm2, 0, %v565_v7  ;;  %v628_v48 = vor.u32 %v8229_v22, %v625_v38  ;;  %v6633_v7 = vld [vmem:[%s6438_s6 + $0x70] sm:$0xff]  }
  0x23   : > { %5923 = vmatpush3.bf16.msra.mxu1 %v6287_v41  ;;  %v6610_v41 = vsel %vm6421_vm2, 0, %v621_v34  ;;  %5964 = vmatprep.subr.bf16.mxu0 %v6294_v25  ;;  %v6619_v47 = vsel %vm6421_vm2, 0, %v572_v35  ;;  %v581_v34 = vshrl.u32 %v6626_v60, 16  ;;  %v632_v35 = vrot.slane %v8232_v61, 7 }
  0x24   : > { %5924 = vmatprep.subr.bf16.mxu1 %v6293_v10  ;;  %v6640_v13 = vsel %vm6421_vm2, 0, %v628_v48  ;;  %v8235_v38 = vshrl.u32 %v6633_v7, 16  ;;  %v640_v14 = vshll.u32 %v6633_v7, 16  ;;  %v6300_v48 = vld [vmem:[%s8225_s3 + $0x40] sm:$0xff]  }
  0x25   : > { %5893 = vmatmul.mubr.msk.bf16.gmra.mxu0 %vm810_vm3, %v6564_v0  ;;  %v583_v62 = vrot.slane %v581_v34, 7  ;;  %v635_v61 = vor.u32 %v633_v6, %v632_v35 }
  0x26   : > { %5896 = vmatprep.mubr.msk.bf16.mxu0 %vm810_vm3, %v6593_v33  ;;  %5909 = vmatmul.mubr.msk.bf16.gmra.mxu1 %vm810_vm3, %v6589_v28  ;;  %v639_v63 = vrot.slane %v8235_v38, 7 }
  0x27   : > { %5965 = vmatpush3.bf16.msra.mxu0 %v6294_v25  ;;  %5912 = vmatprep.mubr.msk.bf16.mxu1 %vm810_vm3, %v6610_v41  ;;  %v576_v25 = vrot.slane %v574_v49, 7 }
  0x28   : > { %5925 = vmatpush3.bf16.msra.mxu1 %v6293_v10  ;;  %v584_v10 = vshll.u32 %v6626_v60, 16  ;;  %5966 = vmatprep.subr.bf16.mxu0 %v6300_v48  ;;  %v642_v38 = vor.u32 %v640_v14, %v639_v63 }
  0x29   : > { %5926 = vmatprep.subr.bf16.mxu1 %v6299_v9  ;;  %v579_v22 = vor.u32 %v577_v57, %v576_v25  ;;  %v6302_v25 = vld [vmem:[%s8225_s3 + $0x98] sm:$0xff]  }
  0x2a   : > { %v586_v35 = vor.u32 %v584_v10, %v583_v62  ;;  %v698_v62 = vrot.slane %v542_v19, 1  ;;  %v6709_v63 = vsel %vm6421_vm2, 0, %v642_v38  ;;  %v702_v38 = vrot.slane %v556_v44, 1 }
  0x2b   : > { %v6671_v53 = vsel %vm6421_vm2, 0, %v579_v22  ;;  %5967 = vmatpush3.bf16.msra.mxu0 %v6300_v48  ;;  %v697_v22 = vor.u32 %v6469_v24, %v532_v5  ;;  %v700_v24 = vrot.slane %v549_v30, 1 }
  0x2c   : > { %5927 = vmatpush3.bf16.msra.mxu1 %v6299_v9  ;;  %v6677_v9 = vsel %vm6421_vm2, 0, %v635_v61  ;;  %6040 = vmatprep.subr.bf16.mxu0 %v6302_v25  ;;  %v6699_v48 = vsel %vm6421_vm2, 0, %v586_v35  ;;  %v699_v19 = vor.u32 %v698_v62, %v539_v18  ;;  %v704_v18 = vrot.slane %v563_v58, 1  ;;  %v6303_v62 = vld [vmem:[%s8225_s3 + $0x70] sm:$0xff]  }
  0x2d   : > { %5897 = vmatmul.mubr.msk.bf16.gmra.mxu0 %vm810_vm3, %v6619_v47  ;;  %6000 = vmatprep.subr.bf16.mxu1 %v6301_v52  ;;  %v6703_v5 = vsel %vm6691_vm6, %v697_v22, 0  ;;  %v701_v35 = vor.u32 %v700_v24, %v546_v29  ;;  %v6304_v29 = vld [vmem:[%s8225_s3 + $0x90] sm:$0xff]   ;;  %v703_v44 = vor.u32 %v702_v38, %v553_v40  ;;  %v6306_v24 = vld [vmem:[%s8225_s3 + $0x88] sm:$0xff]  }
  0x2e   : > { %5900 = vmatprep.mubr.msk.bf16.mxu0 %vm810_vm3, %v6671_v53  ;;  %5913 = vmatmul.mubr.msk.bf16.gmra.mxu1 %vm810_vm3, %v6640_v13  ;;  %v6725_v30 = vsel %vm6691_vm6, %v699_v19, 0  ;;  %v705_v58 = vor.u32 %v704_v18, %v560_v54  ;;  %v6305_v40 = vld [vmem:[%s8225_s3 + $0x68] sm:$0xff]   ;;  %v6790_v18 = vld [vmem:[%s8225_s3 + $0xd8] sm:$0xff]  }
  0x2f   : > { %5916 = vmatprep.mubr.msk.bf16.mxu1 %vm810_vm3, %v6677_v9  ;;  %v6733_v22 = vsel %vm6691_vm6, %v701_v35, 0  ;;  %v6763_v54 = vsel %vm6691_vm6, %v703_v44, 0  ;;  %v6307_v35 = vld [vmem:[%s8225_s3 + $0x60] sm:$0xff]   ;;  %v712_v44 = vrot.slane %v591_v17, 1 }
  0x30   : > { %v6767_v19 = vsel %vm6691_vm6, %v705_v58, 0 }
  0x31   : > { %v713_v17 = vor.u32 %v712_v44, %v588_v16 }
  0x35   : > { %5901 = vmatmul.mubr.msk.bf16.gmra.mxu0 %vm810_vm3, %v6699_v48 }
  0x36   : > { %5968 = vmatprep.mubr.msk.bf16.mxu0 %vm810_vm3, %v6703_v5  ;;  %5917 = vmatmul.mubr.msk.bf16.gmra.mxu1 %vm810_vm3, %v6709_v63 }
  0x37   : > { %5928 = vmatprep.mubr.msk.bf16.mxu1 %vm810_vm3, %v6412_v3 }
  0x3d   : > { %5969 = vmatmul.mubr.msk.bf16.vlgmr.msra.gmra.mxu0 %vm810_vm3, %v6725_v30 }
  0x3e   : > { %6041 = vmatpush3.bf16.msra.mxu0 %v6302_v25  ;;  %5972 = vmatprep.mubr.msk.bf16.mxu0 %vm810_vm3, %v6733_v22  ;;  %v706_v25 = vrot.slane %v570_v2, 1  ;;  %v6308_v2 = vld [vmem:[%s8225_s3 + $0x80] sm:$0xff]  }
  0x3f   : > { %5929 = vmatmul.mubr.msk.bf16.vlgmr.msra.gmra.mxu1 %vm810_vm3, %v6452_v15  ;;  %6042 = vmatprep.subr.bf16.mxu0 %v6304_v29 }
  0x40   : > { %6001 = vmatpush3.bf16.msra.mxu1 %v6301_v52  ;;  %5932 = vmatprep.mubr.msk.bf16.mxu1 %vm810_vm3, %v6462_v21  ;;  %v708_v52 = vrot.slane %v577_v57, 1  ;;  %v707_v57 = vor.u32 %v706_v25, %v567_v1  ;;  %v6797_v1 = vld [vmem:[%s8225_s3 + $0xb8] sm:$0xff]   ;;  %v6833_v25 = vsel %vm6691_vm6, %v713_v17, 0 }
  0x41   : > { %6002 = vmatprep.subr.bf16.mxu1 %v6303_v62 }
  0x42   : > { %6043 = vmatpush3.bf16.msra.mxu0 %v6304_v29  ;;  %v709_v38 = vor.u32 %v708_v52, %v574_v49  ;;  %v6801_v29 = vsel %vm6691_vm6, %v707_v57, 0  ;;  %v710_v49 = vrot.slane %v584_v10, 1 }
  0x43   : > { %6044 = vmatprep.subr.bf16.mxu0 %v6306_v24 }
  0x44   : > { %6003 = vmatpush3.bf16.msra.mxu1 %v6303_v62  ;;  %v6807_v62 = vsel %vm6691_vm6, %v709_v38, 0  ;;  %v711_v10 = vor.u32 %v710_v49, %v581_v34  ;;  %v716_v34 = vrot.slane %v605_v36, 1  ;;  %v8243_v38 = vshrl.u32 %v6527_v50, 16 }
  0x45   : > { %5973 = vmatmul.mubr.msk.bf16.gmra.mxu0 %vm810_vm3, %v6763_v54  ;;  %6004 = vmatprep.subr.bf16.mxu1 %v6305_v40 }
  0x46   : > { %5976 = vmatprep.mubr.msk.bf16.mxu0 %vm810_vm3, %v6767_v19  ;;  %6045 = vmatpush3.bf16.msra.mxu0 %v6306_v24  ;;  %v6827_v58 = vsel %vm6691_vm6, %v711_v10, 0  ;;  %v714_v24 = vrot.slane %v598_v27, 1  ;;  %v717_v27 = vor.u32 %v716_v34, %v602_v31  ;;  %v8242_v31 = vshrl.u32 %v6513_v45, 16 }
  0x47   : > { %5933 = vmatmul.mubr.msk.bf16.gmra.mxu1 %vm810_vm3, %v6481_v32  ;;  %6046 = vmatprep.subr.bf16.mxu0 %v6308_v2  ;;  %v8244_v10 = vshll.u32 %v6569_v4, 16  ;;  %v724_v34 = vrot.slane %v633_v6, 1 }
  0x48   : > { %5936 = vmatprep.mubr.msk.bf16.mxu1 %vm810_vm3, %v6516_v46  ;;  %6005 = vmatpush3.bf16.msra.mxu1 %v6305_v40  ;;  %v715_v16 = vor.u32 %v714_v24, %v595_v26  ;;  %v8240_v40 = vshll.u32 %v6513_v45, 16  ;;  %v8241_v26 = vshll.u32 %v6527_v50, 16 }
  0x49   : > { %6006 = vmatprep.subr.bf16.mxu1 %v6307_v35  ;;  %v722_v17 = vrot.slane %v8244_v10, 1  ;;  %v6319_v10 = vld [vmem:[%s8225_s3 + $0x118] sm:$0xff]  }
  0x4a   : > { %6047 = vmatpush3.bf16.msra.mxu0 %v6308_v2  ;;  %v6851_v36 = vsel %vm6691_vm6, %v715_v16, 0  ;;  %v718_v52 = vrot.slane %v8240_v40, 1  ;;  %v6857_v2 = vsel %vm6691_vm6, %v717_v27, 0  ;;  %v8245_v16 = vshrl.u32 %v6569_v4, 16 }
  0x4b   : > { %6120 = vmatprep.subr.bf16.mxu0 %v6790_v18  ;;  %v8246_v40 = vshrl.u32 %v6613_v43, 16 }
  0x4c   : > { %6007 = vmatpush3.bf16.msra.mxu1 %v6307_v35  ;;  %v720_v35 = vrot.slane %v8241_v26, 1  ;;  %v719_v57 = vor.u32 %v718_v52, %v8242_v31  ;;  %v723_v27 = vor.u32 %v722_v17, %v8245_v16  ;;  %v726_v26 = vrot.slane %v640_v14, 1  ;;  %v6318_v17 = vld [vmem:[%s8225_s3 + $0xf8] sm:$0xff]  }
  0x4d   : > { %5977 = vmatmul.mubr.msk.bf16.gmra.mxu0 %vm810_vm3, %v6801_v29  ;;  %6080 = vmatprep.subr.bf16.mxu1 %v6797_v1  ;;  %v725_v52 = vor.u32 %v724_v34, %v8246_v40  ;;  %v8247_v31 = vshrl.u32 %v6633_v7, 16  ;;  %v6321_v34 = vld [vmem:[%s8225_s3 + $0x110] sm:$0xff]  }
  0x4e   : > { %5980 = vmatprep.mubr.msk.bf16.mxu0 %vm810_vm3, %v6807_v62  ;;  %v721_v49 = vor.u32 %v720_v35, %v8243_v38  ;;  %v6875_v44 = vsel %vm6691_vm6, %v719_v57, 0  ;;  %v6899_v6 = vsel %vm6691_vm6, %v723_v27, 0  ;;  %v6312_v38 = vld [vmem:[%s8225_s3 + $0xd0] sm:$0xff]  }
  0x4f   : > { %5937 = vmatmul.mubr.msk.bf16.gmra.mxu1 %vm810_vm3, %v6550_v59  ;;  %v6905_v35 = vsel %vm6691_vm6, %v725_v52, 0  ;;  %v727_v57 = vor.u32 %v726_v26, %v8247_v31 }
  0x50   : > { %5940 = vmatprep.mubr.msk.bf16.mxu1 %vm810_vm3, %v6604_v39  ;;  %v6881_v24 = vsel %vm6691_vm6, %v721_v49, 0  ;;  %v6311_v49 = vld [vmem:[%s8225_s3 + $0xb0] sm:$0xff]  }
  0x51   : > { %v6919_v14 = vsel %vm6691_vm6, %v727_v57, 0 }
  0x55   : > { %5981 = vmatmul.mubr.msk.bf16.gmra.mxu0 %vm810_vm3, %v6827_v58 }
  0x56   : > { %5984 = vmatprep.mubr.msk.bf16.mxu0 %vm810_vm3, %v6833_v25 }
  0x57   : > { %5941 = vmatmul.mubr.msk.bf16.gmra.mxu1 %vm810_vm3, %v6626_v60 }
  0x58   : > { %5944 = vmatprep.mubr.msk.bf16.mxu1 %vm810_vm3, %v6443_v12 }
  0x5d   : > { %5985 = vmatmul.mubr.msk.bf16.gmra.mxu0 %vm810_vm3, %v6851_v36 }
  0x5e   : > { %5988 = vmatprep.mubr.msk.bf16.mxu0 %vm810_vm3, %v6857_v2 }
  0x5f   : > { %5945 = vmatmul.mubr.msk.bf16.gmra.mxu1 %vm810_vm3, %v6459_v20 }
  0x60   : > { %5948 = vmatprep.mubr.msk.bf16.mxu1 %vm810_vm3, %v6467_v23 }
  0x65   : > { %5989 = vmatmul.mubr.msk.bf16.gmra.mxu0 %vm810_vm3, %v6875_v44 }
  0x66   : > { %5992 = vmatprep.mubr.msk.bf16.mxu0 %vm810_vm3, %v6881_v24 }
  0x67   : > { %5949 = vmatmul.mubr.msk.bf16.gmra.mxu1 %vm810_vm3, %v6513_v45 }
  0x68   : > { %5952 = vmatprep.mubr.msk.bf16.mxu1 %vm810_vm3, %v6527_v50 }
  0x6d   : > { %5993 = vmatmul.mubr.msk.bf16.gmra.mxu0 %vm810_vm3, %v6899_v6 }
  0x6e   : > { %5996 = vmatprep.mubr.msk.bf16.mxu0 %vm810_vm3, %v6905_v35 }
  0x6f   : > { %5953 = vmatmul.mubr.msk.bf16.gmra.mxu1 %vm810_vm3, %v6569_v4 }
  0x70   : > { %5956 = vmatprep.mubr.msk.bf16.mxu1 %vm810_vm3, %v6613_v43 }
  0x75   : > { %5997 = vmatmul.mubr.msk.bf16.gmra.mxu0 %vm810_vm3, %v6919_v14 }
  0x76   : > { %6048 = vmatprep.mubr.msk.bf16.mxu0 %vm810_vm3, %v6452_v15  ;;  %v6314_v15 = vld [vmem:[%s8225_s3 + $0xc8] sm:$0xff]  }
  0x77   : > { %5957 = vmatmul.mubr.msk.bf16.gmra.mxu1 %vm810_vm3, %v6633_v7 }
  0x78   : > { %6008 = vmatprep.mubr.msk.bf16.mxu1 %vm810_vm3, %v6507_v42  ;;  %v6313_v42 = vld [vmem:[%s8225_s3 + $0xa8] sm:$0xff]  }
  0x7d   : > { %6049 = vmatmul.mubr.msk.bf16.vlgmr.msra.gmra.mxu0 %vm810_vm3, %v6462_v21 }
  0x7e   : > { %6121 = vmatpush3.bf16.msra.mxu0 %v6790_v18  ;;  %6052 = vmatprep.mubr.msk.bf16.mxu0 %vm810_vm3, %v6481_v32  ;;  %v6316_v18 = vld [vmem:[%s8225_s3 + $0xc0] sm:$0xff]  }
  0x7f   : > { %6009 = vmatmul.mubr.msk.bf16.vlgmr.msra.gmra.mxu1 %vm810_vm3, %v6540_v55  ;;  %6122 = vmatprep.subr.bf16.mxu0 %v6312_v38 }
  0x80   : > { %6081 = vmatpush3.bf16.msra.mxu1 %v6797_v1  ;;  %6012 = vmatprep.mubr.msk.bf16.mxu1 %vm810_vm3, %v6564_v0  ;;  %v6315_v1 = vld [vmem:[%s8225_s3 + $0xa0] sm:$0xff]  }
  0x81   : > { %6082 = vmatprep.subr.bf16.mxu1 %v6311_v49 }
  0x82   : > { %6123 = vmatpush3.bf16.msra.mxu0 %v6312_v38 }
  0x83   : > { %6124 = vmatprep.subr.bf16.mxu0 %v6314_v15 }
  0x84   : > { %6083 = vmatpush3.bf16.msra.mxu1 %v6311_v49 }
  0x85   : > { %6053 = vmatmul.mubr.msk.bf16.gmra.mxu0 %vm810_vm3, %v6516_v46  ;;  %6084 = vmatprep.subr.bf16.mxu1 %v6313_v42 }
  0x86   : > { %6056 = vmatprep.mubr.msk.bf16.mxu0 %vm810_vm3, %v6550_v59  ;;  %6125 = vmatpush3.bf16.msra.mxu0 %v6314_v15 }
  0x87   : > { %6013 = vmatmul.mubr.msk.bf16.gmra.mxu1 %vm810_vm3, %v6593_v33  ;;  %6126 = vmatprep.subr.bf16.mxu0 %v6316_v18 }
  0x88   : > { %6016 = vmatprep.mubr.msk.bf16.mxu1 %vm810_vm3, %v6619_v47  ;;  %6085 = vmatpush3.bf16.msra.mxu1 %v6313_v42 }
  0x89   : > { %6086 = vmatprep.subr.bf16.mxu1 %v6315_v1 }
  0x8a   : > { %6127 = vmatpush3.bf16.msra.mxu0 %v6316_v18 }
  0x8b   : > { %6200 = vmatprep.subr.bf16.mxu0 %v6319_v10 }
  0x8c   : > { %6087 = vmatpush3.bf16.msra.mxu1 %v6315_v1 }
  0x8d   : > { %6057 = vmatmul.mubr.msk.bf16.gmra.mxu0 %vm810_vm3, %v6604_v39  ;;  %6160 = vmatprep.subr.bf16.mxu1 %v6318_v17 }
  0x8e   : > { %6060 = vmatprep.mubr.msk.bf16.mxu0 %vm810_vm3, %v6626_v60 }
  0x8f   : > { %6017 = vmatmul.mubr.msk.bf16.gmra.mxu1 %vm810_vm3, %v6671_v53 }
  0x90   : > { %6020 = vmatprep.mubr.msk.bf16.mxu1 %vm810_vm3, %v6699_v48 }
  0x95   : > { %6061 = vmatmul.mubr.msk.bf16.gmra.mxu0 %vm810_vm3, %v6443_v12  ;;  %v6996_v12 = vld [vmem:[%s6438_s6 + $0x78] sm:$0xff]  }
  0x96   : > { %6064 = vmatprep.mubr.msk.bf16.mxu0 %vm810_vm3, %v6459_v20  ;;  %v644_v20 = vshrl.u32 %v6996_v12, 16 }
  0x97   : > { %6021 = vmatmul.mubr.msk.bf16.gmra.mxu1 %vm810_vm3, %v6493_v37 }
  0x98   : > { %6024 = vmatprep.mubr.msk.bf16.mxu1 %vm810_vm3, %v6531_v51 }
  0x9d   : > { %6065 = vmatmul.mubr.msk.bf16.gmra.mxu0 %vm810_vm3, %v6467_v23  ;;  %v646_v23 = vrot.slane %v644_v20, 7 }
  0x9e   : > { %6068 = vmatprep.mubr.msk.bf16.mxu0 %vm810_vm3, %v6513_v45  ;;  %v647_v45 = vshll.u32 %v6996_v12, 16 }
  0x9f   : > { %6025 = vmatmul.mubr.msk.bf16.gmra.mxu1 %vm810_vm3, %v6544_v56 }
  0xa0   : > { %6028 = vmatprep.mubr.msk.bf16.mxu1 %vm810_vm3, %v6589_v28 }
  0xa5   : > { %6069 = vmatmul.mubr.msk.bf16.gmra.mxu0 %vm810_vm3, %v6527_v50  ;;  %v649_v50 = vor.u32 %v647_v45, %v646_v23 }
  0xa6   : > { %6072 = vmatprep.mubr.msk.bf16.mxu0 %vm810_vm3, %v6569_v4 }
  0xa7   : > { %6029 = vmatmul.mubr.msk.bf16.gmra.mxu1 %vm810_vm3, %v6610_v41  ;;  %v7022_v4 = vsel %vm6421_vm2, 0, %v649_v50 }
  0xa8   : > { %6032 = vmatprep.mubr.msk.bf16.mxu1 %vm810_vm3, %v6640_v13 }
  0xad   : > { %6073 = vmatmul.mubr.msk.bf16.gmra.mxu0 %vm810_vm3, %v6613_v43 }
  0xae   : > { %6076 = vmatprep.mubr.msk.bf16.mxu0 %vm810_vm3, %v6633_v7 }
  0xaf   : > { %6033 = vmatmul.mubr.msk.bf16.gmra.mxu1 %vm810_vm3, %v6677_v9 }
  0xb0   : > { %6036 = vmatprep.mubr.msk.bf16.mxu1 %vm810_vm3, %v6709_v63 }
  0xb5   : > { %6077 = vmatmul.mubr.msk.bf16.gmra.mxu0 %vm810_vm3, %v6996_v12 }
  0xb6   : > { %6128 = vmatprep.mubr.msk.bf16.mxu0 %vm810_vm3, %v6540_v55  ;;  %v6323_v55 = vld [vmem:[%s8225_s3 + $0x108] sm:$0xff]  }
  0xb7   : > { %6037 = vmatmul.mubr.msk.bf16.gmra.mxu1 %vm810_vm3, %v7022_v4 }
  0xb8   : > { %6088 = vmatprep.mubr.msk.bf16.mxu1 %vm810_vm3, %v6725_v30  ;;  %v6324_v30 = vld [vmem:[%s8225_s3 + $0xe0] sm:$0xff]  }
  0xbd   : > { %6129 = vmatmul.mubr.msk.bf16.vlgmr.msra.gmra.mxu0 %vm810_vm3, %v6564_v0  ;;  %v6322_v0 = vld [vmem:[%s8225_s3 + $0xe8] sm:$0xff]  }
  0xbe   : > { %6201 = vmatpush3.bf16.msra.mxu0 %v6319_v10  ;;  %6132 = vmatprep.mubr.msk.bf16.mxu0 %vm810_vm3, %v6593_v33  ;;  %v6325_v33 = vld [vmem:[%s8225_s3 + $0x100] sm:$0xff]   ;;  %v728_v10 = vrot.slane %v647_v45, 1 }
  0xbf   : > { %6089 = vmatmul.mubr.msk.bf16.vlgmr.msra.gmra.mxu1 %vm810_vm3, %v6733_v22  ;;  %6202 = vmatprep.subr.bf16.mxu0 %v6321_v34 }
  0xc0   : > { %6161 = vmatpush3.bf16.msra.mxu1 %v6318_v17  ;;  %6092 = vmatprep.mubr.msk.bf16.mxu1 %vm810_vm3, %v6763_v54 }
  0xc1   : > { %6162 = vmatprep.subr.bf16.mxu1 %v6320_v8 }
  0xc2   : > { %6203 = vmatpush3.bf16.msra.mxu0 %v6321_v34 }
  0xc3   : > { %6204 = vmatprep.subr.bf16.mxu0 %v6323_v55 }
  0xc4   : > { %6163 = vmatpush3.bf16.msra.mxu1 %v6320_v8 }
  0xc5   : > { %6133 = vmatmul.mubr.msk.bf16.gmra.mxu0 %vm810_vm3, %v6619_v47  ;;  %6164 = vmatprep.subr.bf16.mxu1 %v6322_v0 }
  0xc6   : > { %6136 = vmatprep.mubr.msk.bf16.mxu0 %vm810_vm3, %v6671_v53  ;;  %6205 = vmatpush3.bf16.msra.mxu0 %v6323_v55 }
  0xc7   : > { %6093 = vmatmul.mubr.msk.bf16.gmra.mxu1 %vm810_vm3, %v6767_v19  ;;  %6206 = vmatprep.subr.bf16.mxu0 %v6325_v33 }
  0xc8   : > { %6096 = vmatprep.mubr.msk.bf16.mxu1 %vm810_vm3, %v6801_v29  ;;  %6165 = vmatpush3.bf16.msra.mxu1 %v6322_v0 }
  0xc9   : > { %6166 = vmatprep.subr.bf16.mxu1 %v6324_v30 }
  0xca   : > { %6207 = vmatpush3.bf16.msra.mxu0 %v6325_v33 }
  0xcc   : > { %6167 = vmatpush3.bf16.msra.mxu1 %v6324_v30 }
  0xcd   : > { %6137 = vmatmul.mubr.msk.bf16.gmra.mxu0 %vm810_vm3, %v6699_v48 }
  0xce   : > { %6140 = vmatprep.mubr.msk.bf16.mxu0 %vm810_vm3, %v6493_v37  ;;  %v7087_v37 = vld [vmem:[%s8226_s4] ss:$0 sm:$0xff] }
  0xcf   : > { %6097 = vmatmul.mubr.msk.bf16.gmra.mxu1 %vm810_vm3, %v6807_v62 }
  0xd0   : > { %6100 = vmatprep.mubr.msk.bf16.mxu1 %vm810_vm3, %v6827_v58 }
  0xd5   : > { %6141 = vmatmul.mubr.msk.bf16.gmra.mxu0 %vm810_vm3, %v6531_v51 }
  0xd6   : > { %6144 = vmatprep.mubr.msk.bf16.mxu0 %vm810_vm3, %v6544_v56 }
  0xd7   : > { %6101 = vmatmul.mubr.msk.bf16.gmra.mxu1 %vm810_vm3, %v6833_v25 }
  0xd8   : > { %6104 = vmatprep.mubr.msk.bf16.mxu1 %vm810_vm3, %v6851_v36 }
  0xdd   : > { %v7082_v53 = vpop.f32.mrf.mxu0  ;;  %6145 = vmatmul.mubr.msk.bf16.gmra.mxu0 %vm810_vm3, %v6589_v28 }
  0xde   : > { %6148 = vmatprep.mubr.msk.bf16.mxu0 %vm810_vm3, %v6610_v41  ;;  %v5906_v51 = vpop.f32.mrf.mxu1 }
  0xdf   : > { %6105 = vmatmul.mubr.msk.bf16.gmra.mxu1 %vm810_vm3, %v6857_v2  ;;  %v7095_v56 = vpop.f32.mrf.mxu0  ;;  %v7098_v47 = vadd.f32 %v5906_v51, %v7087_v37 }
  0xe0   : > { %6108 = vmatprep.mubr.msk.bf16.mxu1 %vm810_vm3, %v6875_v44  ;;  %v957_v48 = vpop.f32.mrf.mxu1 }
  0xe1   : > { %v7102_v16 = vpop.f32.mrf.mxu0  ;;  %v7105_v28 = vadd.f32 %v7087_v37, %v957_v48 }
  0xe2   : > { %v5907_v27 = vpop.f32.mrf.mxu1 }
  0xe3   : > { %v7107_v41 = vpop.f32.mrf.mxu0  ;;  %v7110_v40 = vadd.f32 %v5907_v27, %v7087_v37 }
  0xe4   : > { %v960_v52 = vpop.f32.mrf.mxu1 }
  0xe5   : > { %v7112_v26 = vpop.f32.mrf.mxu0  ;;  %6149 = vmatmul.mubr.msk.bf16.gmra.mxu0 %vm810_vm3, %v6640_v13  ;;  %v7117_v31 = vadd.f32 %v7087_v37, %v960_v52 }
  0xe6   : > { %6152 = vmatprep.mubr.msk.bf16.mxu0 %vm810_vm3, %v6677_v9  ;;  %v5910_v57 = vpop.f32.mrf.mxu1 }
  0xe7   : > { %6109 = vmatmul.mubr.msk.bf16.gmra.mxu1 %vm810_vm3, %v6881_v24  ;;  %v7123_v38 = vpop.f32.mrf.mxu0  ;;  %v7126_v49 = vadd.f32 %v5910_v57, %v7087_v37 }
  0xe8   : > { %6112 = vmatprep.mubr.msk.bf16.mxu1 %vm810_vm3, %v6899_v6  ;;  %v973_v15 = vpop.f32.mrf.mxu1 }
  0xe9   : > { %v7130_v13 = vpop.f32.mrf.mxu0  ;;  %v7133_v42 = vadd.f32 %v7087_v37, %v973_v15 }
  0xea   : > { %v5911_v18 = vpop.f32.mrf.mxu1 }
  0xeb   : > { %v7135_v9 = vpop.f32.mrf.mxu0  ;;  %v7138_v1 = vadd.f32 %v5911_v18, %v7087_v37 }
  0xec   : > { %v976_v17 = vpop.f32.mrf.mxu1 }
  0xed   : > { %v5898_v23 = vpop.f32.mrf.mxu0  ;;  %6153 = vmatmul.mubr.msk.bf16.gmra.mxu0 %vm810_vm3, %v6709_v63  ;;  %v7145_v50 = vadd.f32 %v7087_v37, %v976_v17  ;;  %v729_v63 = vor.u32 %v728_v10, %v644_v20 }
  0xee   : > { %v7148_v34 = vadd.f32 %v5898_v23, %v7087_v37  ;;  %6156 = vmatprep.mubr.msk.bf16.mxu0 %vm810_vm3, %v7022_v4  ;;  %v5914_v8 = vpop.f32.mrf.mxu1 }
  0xef   : > { %6113 = vmatmul.mubr.msk.bf16.gmra.mxu1 %vm810_vm3, %v6905_v35  ;;  %v925_v55 = vpop.f32.mrf.mxu0  ;;  %v7155_v45 = vadd.f32 %v5914_v8, %v7087_v37  ;;  %v7178_v15 = vsel %vm6691_vm6, %v729_v63, 0 }
  0xf0   : > { %v7158_v0 = vadd.f32 %v7087_v37, %v925_v55  ;;  %6116 = vmatprep.mubr.msk.bf16.mxu1 %vm810_vm3, %v6919_v14  ;;  %v989_v33 = vpop.f32.mrf.mxu1 }
  0xf1   : > { %v5899_v30 = vpop.f32.mrf.mxu0  ;;  %v7165_v4 = vadd.f32 %v7087_v37, %v989_v33 }
  0xf2   : > { %v7168_v51 = vadd.f32 %v5899_v30, %v7087_v37  ;;  %v5915_v48 = vpop.f32.mrf.mxu1 }
  0xf3   : > { %v928_v27 = vpop.f32.mrf.mxu0  ;;  %v7171_v52 = vadd.f32 %v5915_v48, %v7087_v37 }
  0xf4   : > { %v7174_v57 = vadd.f32 %v7087_v37, %v928_v27  ;;  %v992_v20 = vpop.f32.mrf.mxu1 }
  0xf5   : > { %v5902_v18 = vpop.f32.mrf.mxu0  ;;  %6157 = vmatmul.mubr.msk.bf16.gmra.mxu0 %vm810_vm3, %v6433_v11  ;;  %v7183_v10 = vadd.f32 %v7087_v37, %v992_v20 }
  0xf6   : > { %v7186_v17 = vadd.f32 %v5902_v18, %v7087_v37  ;;  %6208 = vmatprep.mubr.msk.bf16.mxu0 %vm810_vm3, %v6733_v22  ;;  %v5918_v23 = vpop.f32.mrf.mxu1 }
  0xf7   : > { %6117 = vmatmul.mubr.msk.bf16.gmra.mxu1 %vm810_vm3, %v7178_v15  ;;  %v941_v61 = vpop.f32.mrf.mxu0  ;;  %v7193_v8 = vadd.f32 %v5918_v23, %v7087_v37 }
  0xf8   : > { %v7196_v55 = vadd.f32 %v7087_v37, %v941_v61  ;;  %6168 = vmatprep.mubr.msk.bf16.mxu1 %vm810_vm3, %v6462_v21  ;;  %v1005_v11 = vpop.f32.mrf.mxu1  ;;  %v902_v21 = vadd.f32 %v7082_v53, %v7087_v37 }
  0xf9   : > { %8248 = vst [vmem:[#allocation2_spill] sm:$0xff] %v7193_v8  ;;  %v5903_v63 = vpop.f32.mrf.mxu0  ;;  %v7201_v33 = vadd.f32 %v7087_v37, %v1005_v11 }
  0xfa   : > { %v7204_v22 = vadd.f32 %v5903_v63, %v7087_v37  ;;  %v5919_v30 = vpop.f32.mrf.mxu1 }
  0xfb   : > { %8249 = vst [vmem:[#allocation3_spill] sm:$0xff] %v7201_v33  ;;  %v944_v48 = vpop.f32.mrf.mxu0  ;;  %v7207_v27 = vadd.f32 %v5919_v30, %v7087_v37  ;;  %v894_v30 = vadd.f32 %v7087_v37, %v7095_v56 }
  0xfc   : > { %v7210_v20 = vadd.f32 %v7087_v37, %v944_v48  ;;  %v1008_v18 = vpop.f32.mrf.mxu1 }
  0xfd   : > { %8250 = vst [vmem:[#allocation4_spill] sm:$0xff] %v7207_v27  ;;  %v5970_v23 = vpop.f32.mrf.mxu0  ;;  %6209 = vmatmul.mubr.msk.bf16.vlgmr.msra.gmra.mxu0 %vm810_vm3, %v6763_v54  ;;  %v7217_v61 = vadd.f32 %v7087_v37, %v1008_v18  ;;  %v905_v18 = vadd.f32 %v7102_v16, %v7087_v37 }
  0xfe   : > { %6212 = vmatprep.mubr.msk.bf16.mxu0 %vm810_vm3, %v6767_v19 }
  0xff   : > { %8251 = vst [vmem:[#allocation5_spill] sm:$0xff] %v7217_v61  ;;  %v5930_v11 = vpop.f32.mrf.mxu1  ;;  %6169 = vmatmul.mubr.msk.bf16.vlgmr.msra.gmra.mxu1 %vm810_vm3, %v6481_v32  ;;  %v1393_v63 = vpop.f32.mrf.mxu0  ;;  %v897_v32 = vadd.f32 %v7087_v37, %v7107_v41 }
 0x100   : > { %v1248_v48 = vadd.f32 %v5930_v11, %v902_v21  ;;  %6172 = vmatprep.mubr.msk.bf16.mxu1 %vm810_vm3, %v6516_v46  ;;  %v918_v46 = vadd.f32 %v7112_v26, %v7087_v37 }
 0x101   : > { %v1119_v54 = vpop.f32.mrf.mxu1  ;;  %v5971_v53 = vpop.f32.mrf.mxu0 }
 0x102   : > { %v7229_v61 = vadd.f32 %v5970_v23, %v1248_v48  ;;  %v1246_v19 = vadd.f32 %v1119_v54, %v894_v30  ;;  %v921_v54 = vadd.f32 %v7130_v13, %v7087_v37 }
 0x103   : > { %v5931_v27 = vpop.f32.mrf.mxu1  ;;  %v1396_v33 = vpop.f32.mrf.mxu0 }
 0x104   : > { %v7233_v8 = vadd.f32 %v1393_v63, %v1246_v19  ;;  %v1249_v56 = vadd.f32 %v5931_v27, %v905_v18  ;;  %v910_v27 = vadd.f32 %v7087_v37, %v7123_v38  ;;  %v913_v38 = vadd.f32 %v7087_v37, %v7135_v9 }
 0x105   : > { %v1122_v21 = vpop.f32.mrf.mxu1  ;;  %v5974_v11 = vpop.f32.mrf.mxu0  ;;  %6213 = vmatmul.mubr.msk.bf16.gmra.mxu0 %vm810_vm3, %v6801_v29 }
 0x106   : > { %v7239_v16 = vadd.f32 %v5971_v53, %v1249_v56  ;;  %v1247_v23 = vadd.f32 %v1122_v21, %v897_v32  ;;  %6216 = vmatprep.mubr.msk.bf16.mxu0 %vm810_vm3, %v6807_v62 }
 0x107   : > { %v5934_v30 = vpop.f32.mrf.mxu1  ;;  %6173 = vmatmul.mubr.msk.bf16.gmra.mxu1 %vm810_vm3, %v6550_v59  ;;  %v1409_v41 = vpop.f32.mrf.mxu0 }
 0x108   : > { %v7247_v63 = vadd.f32 %v1396_v33, %v1247_v23  ;;  %v1252_v29 = vadd.f32 %v5934_v30, %v918_v46  ;;  %6176 = vmatprep.mubr.msk.bf16.mxu1 %vm810_vm3, %v6604_v39  ;;  %v6326_v46 = vld [vmem:[%s6438_s6 + $0x38] sm:$0xff]  }
 0x109   : > { %v1135_v26 = vpop.f32.mrf.mxu1  ;;  %v5975_v48 = vpop.f32.mrf.mxu0 }
 0x10a   : > { %v7253_v62 = vadd.f32 %v5974_v11, %v1252_v29  ;;  %v1250_v53 = vadd.f32 %v1135_v26, %v910_v27 }
 0x10b   : > { %v5935_v18 = vpop.f32.mrf.mxu1  ;;  %v1412_v59 = vpop.f32.mrf.mxu0 }
 0x10c   : > { %v7257_v33 = vadd.f32 %v1409_v41, %v1250_v53  ;;  %v1253_v19 = vadd.f32 %v5935_v18, %v921_v54  ;;  %v6327_v53 = vld [vmem:[%s6438_s6 + $0x40] sm:$0xff]  }
 0x10d   : > { %v1138_v32 = vpop.f32.mrf.mxu1  ;;  %v5978_v56 = vpop.f32.mrf.mxu0  ;;  %6217 = vmatmul.mubr.msk.bf16.gmra.mxu0 %vm810_vm3, %v6827_v58 }
 0x10e   : > { %v7261_v39 = vadd.f32 %v5975_v48, %v1253_v19  ;;  %v1251_v13 = vadd.f32 %v1138_v32, %v913_v38  ;;  %6220 = vmatprep.mubr.msk.bf16.mxu0 %vm810_vm3, %v6833_v25  ;;  %v6328_v38 = vld [vmem:[%s6438_s6 + $0x48] sm:$0xff]  }
 0x10f   : > { %v5938_v21 = vpop.f32.mrf.mxu1  ;;  %6177 = vmatmul.mubr.msk.bf16.gmra.mxu1 %vm810_vm3, %v6626_v60  ;;  %v1425_v11 = vpop.f32.mrf.mxu0 }
 0x110   : > { %v7267_v37 = vadd.f32 %v1412_v59, %v1251_v13  ;;  %v1256_v9 = vadd.f32 %v5938_v21, %v7148_v34  ;;  %6180 = vmatprep.mubr.msk.bf16.mxu1 %vm810_vm3, %v6326_v46 }
 0x111   : > { %v1151_v58 = vpop.f32.mrf.mxu1  ;;  %v5979_v23 = vpop.f32.mrf.mxu0 }
 0x112   : > { %v7272_v30 = vadd.f32 %v5978_v56, %v1256_v9  ;;  %v1254_v41 = vadd.f32 %v1151_v58, %v7158_v0  ;;  %v6329_v58 = vld [vmem:[%s6438_s6 + $0x50] sm:$0xff]  }
 0x113   : > { %v5939_v25 = vpop.f32.mrf.mxu1  ;;  %v1428_v27 = vpop.f32.mrf.mxu0 }
 0x114   : > { %v7275_v29 = vadd.f32 %v1425_v11, %v1254_v41  ;;  %v1257_v60 = vadd.f32 %v5939_v25, %v7168_v51  ;;  %v6330_v25 = vld [vmem:[%s6438_s6 + $0x58] sm:$0xff]  }
 0x115   : > { %v1154_v26 = vpop.f32.mrf.mxu1  ;;  %v5982_v48 = vpop.f32.mrf.mxu0  ;;  %6221 = vmatmul.mubr.msk.bf16.gmra.mxu0 %vm810_vm3, %v6851_v36 }
 0x116   : > { %v7280_v34 = vadd.f32 %v5979_v23, %v1257_v60  ;;  %v1255_v54 = vadd.f32 %v1154_v26, %v7174_v57  ;;  %6224 = vmatprep.mubr.msk.bf16.mxu0 %vm810_vm3, %v6857_v2 }
 0x117   : > { %v5942_v0 = vpop.f32.mrf.mxu1  ;;  %6181 = vmatmul.mubr.msk.bf16.gmra.mxu1 %vm810_vm3, %v6327_v53  ;;  %v1441_v18 = vpop.f32.mrf.mxu0 }
 0x118   : > { %v7287_v59 = vadd.f32 %v1428_v27, %v1255_v54  ;;  %v1260_v51 = vadd.f32 %v5942_v0, %v7186_v17  ;;  %6184 = vmatprep.mubr.msk.bf16.mxu1 %vm810_vm3, %v6328_v38 }
 0x119   : > { %v1167_v36 = vpop.f32.mrf.mxu1  ;;  %v5983_v19 = vpop.f32.mrf.mxu0 }
 0x11a   : > { %v7292_v32 = vadd.f32 %v5982_v48, %v1260_v51  ;;  %v1258_v57 = vadd.f32 %v1167_v36, %v7196_v55 }
 0x11b   : > { %v5943_v2 = vpop.f32.mrf.mxu1  ;;  %v1444_v56 = vpop.f32.mrf.mxu0 }
 0x11c   : > { %v7295_v13 = vadd.f32 %v1441_v18, %v1258_v57  ;;  %v1261_v21 = vadd.f32 %v5943_v2, %v7204_v22 }
 0x11d   : > { %v1170_v11 = vpop.f32.mrf.mxu1  ;;  %v5986_v9 = vpop.f32.mrf.mxu0  ;;  %6225 = vmatmul.mubr.msk.bf16.gmra.mxu0 %vm810_vm3, %v6875_v44 }
 0x11e   : > { %v7300_v17 = vadd.f32 %v5983_v19, %v1261_v21  ;;  %v1259_v46 = vadd.f32 %v1170_v11, %v7210_v20  ;;  %6228 = vmatprep.mubr.msk.bf16.mxu0 %vm810_vm3, %v6881_v24 }
 0x11f   : > { %v5946_v55 = vpop.f32.mrf.mxu1  ;;  %6185 = vmatmul.mubr.msk.bf16.gmra.mxu1 %vm810_vm3, %v6329_v58  ;;  %v1457_v23 = vpop.f32.mrf.mxu0 }
 0x120   : > { %v7307_v41 = vadd.f32 %v1444_v56, %v1259_v46  ;;  %v1264_v22 = vadd.f32 %v5946_v55, %v7098_v47  ;;  %6188 = vmatprep.mubr.msk.bf16.mxu1 %vm810_vm3, %v6330_v25 }
 0x121   : > { %v1183_v44 = vpop.f32.mrf.mxu1  ;;  %v5987_v27 = vpop.f32.mrf.mxu0 }
 0x122   : > { %v7312_v60 = vadd.f32 %v5986_v9, %v1264_v22  ;;  %v1262_v20 = vadd.f32 %v1183_v44, %v7105_v28  ;;  %v6331_v28 = vld [vmem:[%s6438_s6 + $0x60] sm:$0xff]   ;;  %s5635_s6 = sshll.u32 %s8261_s18, 5 }
 0x123   : > { %v5947_v24 = vpop.f32.mrf.mxu1  ;;  %v1460_v26 = vpop.f32.mrf.mxu0  ;;  %s7660_s9 = scalar_lea.vmem %s8227_s5, %s5635_s6 }
 0x124   : > { %v7315_v48 = vadd.f32 %v1457_v23, %v1262_v20  ;;  %v1265_v54 = vadd.f32 %v5947_v24, %v7110_v40 }
 0x125   : > { %v1186_v0 = vpop.f32.mrf.mxu1  ;;  %v5990_v53 = vpop.f32.mrf.mxu0  ;;  %6229 = vmatmul.mubr.msk.bf16.gmra.mxu0 %vm810_vm3, %v6899_v6 }
 0x126   : > { %v7320_v47 = vadd.f32 %v5987_v27, %v1265_v54  ;;  %v1263_v18 = vadd.f32 %v1186_v0, %v7117_v31  ;;  %6232 = vmatprep.mubr.msk.bf16.mxu0 %vm810_vm3, %v6905_v35 }
 0x127   : > { %v5950_v51 = vpop.f32.mrf.mxu1  ;;  %6189 = vmatmul.mubr.msk.bf16.gmra.mxu1 %vm810_vm3, %v6331_v28  ;;  %v1473_v38 = vpop.f32.mrf.mxu0 }
 0x128   : > { %v7327_v36 = vadd.f32 %v1460_v26, %v1263_v18  ;;  %v1268_v40 = vadd.f32 %v5950_v51, %v7126_v49  ;;  %6192 = vmatprep.mubr.msk.bf16.mxu1 %vm810_vm3, %v6613_v43  ;;  %v8252_v26 = vld [vmem:[#allocation2_spill] sm:$0xff]  ;;  %v8253_v18 = vld [vmem:[#allocation3_spill] sm:$0xff] }
 0x129   : > { %v1199_v6 = vpop.f32.mrf.mxu1  ;;  %v5991_v19 = vpop.f32.mrf.mxu0 }
 0x12a   : > { %v7332_v57 = vadd.f32 %v5990_v53, %v1268_v40  ;;  %v1266_v31 = vadd.f32 %v1199_v6, %v7133_v42 }
 0x12b   : > { %v5951_v2 = vpop.f32.mrf.mxu1  ;;  %v1476_v35 = vpop.f32.mrf.mxu0 }
 0x12c   : > { %v7335_v56 = vadd.f32 %v1473_v38, %v1266_v31  ;;  %v1269_v21 = vadd.f32 %v5951_v2, %v7138_v1  ;;  %v8255_v31 = vld [vmem:[#allocation5_spill] sm:$0xff] }
 0x12d   : > { %v1202_v11 = vpop.f32.mrf.mxu1  ;;  %v5994_v9 = vpop.f32.mrf.mxu0  ;;  %6233 = vmatmul.mubr.msk.bf16.gmra.mxu0 %vm810_vm3, %v6919_v14 }
 0x12e   : > { %v7340_v49 = vadd.f32 %v5991_v19, %v1269_v21  ;;  %v1267_v43 = vadd.f32 %v1202_v11, %v7145_v50  ;;  %6236 = vmatprep.mubr.msk.bf16.mxu0 %vm810_vm3, %v7178_v15 }
 0x12f   : > { %v5954_v46 = vpop.f32.mrf.mxu1  ;;  %6193 = vmatmul.mubr.msk.bf16.gmra.mxu1 %vm810_vm3, %v6633_v7  ;;  %v1489_v42 = vpop.f32.mrf.mxu0 }
 0x130   : > { %v7347_v55 = vadd.f32 %v1476_v35, %v1267_v43  ;;  %v1272_v1 = vadd.f32 %v5954_v46, %v7155_v45  ;;  %6196 = vmatprep.mubr.msk.bf16.mxu1 %vm810_vm3, %v6996_v12 }
 0x131   : > { %v1215_v14 = vpop.f32.mrf.mxu1  ;;  %v5995_v58 = vpop.f32.mrf.mxu0 }
 0x132   : > { %v7352_v23 = vadd.f32 %v5994_v9, %v1272_v1  ;;  %v1270_v50 = vadd.f32 %v1215_v14, %v7165_v4 }
 0x133   : > { %v5955_v22 = vpop.f32.mrf.mxu1  ;;  %v1492_v15 = vpop.f32.mrf.mxu0 }
 0x134   : > { %v7355_v25 = vadd.f32 %v1489_v42, %v1270_v50  ;;  %v1273_v7 = vadd.f32 %v5955_v22, %v7171_v52 }
 0x135   : > { %v1218_v44 = vpop.f32.mrf.mxu1  ;;  %v5998_v27 = vpop.f32.mrf.mxu0  ;;  %6237 = vmatmul.mubr.msk.bf16.gmra.mxu0 %vm810_vm3, %v6703_v5 }
 0x136   : > { %v7360_v45 = vadd.f32 %v5995_v58, %v1273_v7  ;;  %v1271_v12 = vadd.f32 %v1218_v44, %v7183_v10  ;;  %v8254_v10 = vld [vmem:[#allocation4_spill] sm:$0xff] }
 0x137   : > { %v5958_v20 = vpop.f32.mrf.mxu1  ;;  %6197 = vmatmul.mubr.msk.bf16.gmra.mxu1 %vm810_vm3, %v6412_v3  ;;  %v1505_v4 = vpop.f32.mrf.mxu0 }
 0x138   : > { %v7365_v24 = vadd.f32 %v1492_v15, %v1271_v12  ;;  %v1276_v54 = vadd.f32 %v5958_v20, %v8252_v26 }
 0x139   : > { %v1231_v0 = vpop.f32.mrf.mxu1  ;;  %v5999_v52 = vpop.f32.mrf.mxu0 }
 0x13a   : > { %v7368_v53 = vadd.f32 %v5998_v27, %v1276_v54  ;;  %v1274_v51 = vadd.f32 %v1231_v0, %v8253_v18 }
 0x13b   : > { %v5959_v5 = vpop.f32.mrf.mxu1  ;;  %v1508_v28 = vpop.f32.mrf.mxu0 }
 0x13c   : > { %v7371_v38 = vadd.f32 %v1505_v4, %v1274_v51  ;;  %v1277_v40 = vadd.f32 %v5959_v5, %v8254_v10 }
 0x13d   : > { %v1234_v6 = vpop.f32.mrf.mxu1  ;;  %v6050_v19 = vpop.f32.mrf.mxu0 }
 0x13e   : > { %v7374_v3 = vadd.f32 %v5999_v52, %v1277_v40  ;;  %v1275_v2 = vadd.f32 %v1234_v6, %v8255_v31 }
 0x13f   : > { %v6010_v35 = vpop.f32.mrf.mxu1  ;;  %v1850_v21 = vpop.f32.mrf.mxu0 }
 0x140   : > { %v7377_v11 = vadd.f32 %v1508_v28, %v1275_v2  ;;  %v1751_v9 = vadd.f32 %v6010_v35, %v7229_v61 }
 0x141   : > { %v1622_v43 = vpop.f32.mrf.mxu1  ;;  %v6051_v46 = vpop.f32.mrf.mxu0 }
 0x142   : > { %v7380_v42 = vadd.f32 %v6050_v19, %v1751_v9  ;;  %v1749_v1 = vadd.f32 %v1622_v43, %v7233_v8 }
 0x143   : > { %v6011_v14 = vpop.f32.mrf.mxu1  ;;  %v1853_v58 = vpop.f32.mrf.mxu0 }
 0x144   : > { %v7383_v50 = vadd.f32 %v1850_v21, %v1749_v1  ;;  %v1752_v22 = vadd.f32 %v6011_v14, %v7239_v16 }
 0x145   : > { %v1625_v15 = vpop.f32.mrf.mxu1  ;;  %v6054_v7 = vpop.f32.mrf.mxu0 }
 0x146   : > { %v7386_v44 = vadd.f32 %v6051_v46, %v1752_v22  ;;  %v1750_v27 = vadd.f32 %v1625_v15, %v7247_v63 }
 0x147   : > { %v6014_v12 = vpop.f32.mrf.mxu1  ;;  %v1866_v61 = vpop.f32.mrf.mxu0 }
 0x148   : > { %v7389_v20 = vadd.f32 %v1853_v58, %v1750_v27  ;;  %v1755_v4 = vadd.f32 %v6014_v12, %v7253_v62 }
 0x149   : > { %v1638_v26 = vpop.f32.mrf.mxu1  ;;  %v6055_v8 = vpop.f32.mrf.mxu0 }
 0x14a   : > { %v7392_v54 = vadd.f32 %v6054_v7, %v1755_v4  ;;  %v1753_v0 = vadd.f32 %v1638_v26, %v7257_v33 }
 0x14b   : > { %v6015_v52 = vpop.f32.mrf.mxu1  ;;  %v1869_v16 = vpop.f32.mrf.mxu0 }
 0x14c   : > { %v7395_v18 = vadd.f32 %v1866_v61, %v1753_v0  ;;  %v1756_v51 = vadd.f32 %v6015_v52, %v7261_v39 }
 0x14d   : > { %v1641_v5 = vpop.f32.mrf.mxu1  ;;  %v6058_v63 = vpop.f32.mrf.mxu0 }
 0x14e   : > { %v7398_v28 = vadd.f32 %v6055_v8, %v1756_v51  ;;  %v1754_v10 = vadd.f32 %v1641_v5, %v7267_v37 }
 0x14f   : > { %v6018_v40 = vpop.f32.mrf.mxu1  ;;  %v1882_v62 = vpop.f32.mrf.mxu0 }
 0x150   : > { %v7401_v6 = vadd.f32 %v1869_v16, %v1754_v10  ;;  %v1759_v19 = vadd.f32 %v6018_v40, %v7272_v30 }
 0x151   : > { %v1654_v31 = vpop.f32.mrf.mxu1  ;;  %v6059_v33 = vpop.f32.mrf.mxu0 }
 0x152   : > { %v7404_v2 = vadd.f32 %v6058_v63, %v1759_v19  ;;  %v1757_v35 = vadd.f32 %v1654_v31, %v7275_v29 }
 0x153   : > { %v6019_v21 = vpop.f32.mrf.mxu1  ;;  %v1885_v39 = vpop.f32.mrf.mxu0 }
 0x154   : > { %v7407_v9 = vadd.f32 %v1882_v62, %v1757_v35  ;;  %v1760_v43 = vadd.f32 %v6019_v21, %v7280_v34 }
 0x155   : > { %v1657_v46 = vpop.f32.mrf.mxu1  ;;  %v6062_v37 = vpop.f32.mrf.mxu0 }
 0x156   : > { %v7410_v1 = vadd.f32 %v6059_v33, %v1760_v43  ;;  %v1758_v14 = vadd.f32 %v1657_v46, %v7287_v59 }
 0x157   : > { %v6022_v58 = vpop.f32.mrf.mxu1  ;;  %v1898_v30 = vpop.f32.mrf.mxu0 }
 0x158   : > { %v7413_v22 = vadd.f32 %v1885_v39, %v1758_v14  ;;  %v1763_v15 = vadd.f32 %v6022_v58, %v7292_v32 }
 0x159   : > { %v1670_v7 = vpop.f32.mrf.mxu1  ;;  %v6063_v29 = vpop.f32.mrf.mxu0 }
 0x15a   : > { %v7416_v27 = vadd.f32 %v6062_v37, %v1763_v15  ;;  %v1761_v12 = vadd.f32 %v1670_v7, %v7295_v13 }
 0x15b   : > { %v6023_v61 = vpop.f32.mrf.mxu1  ;;  %v1901_v34 = vpop.f32.mrf.mxu0 }
 0x15c   : > { %v7419_v4 = vadd.f32 %v1898_v30, %v1761_v12  ;;  %v1764_v26 = vadd.f32 %v6023_v61, %v7300_v17 }
 0x15d   : > { %v1673_v8 = vpop.f32.mrf.mxu1  ;;  %v6066_v59 = vpop.f32.mrf.mxu0 }
 0x15e   : > { %v7422_v0 = vadd.f32 %v6063_v29, %v1764_v26  ;;  %v1762_v52 = vadd.f32 %v1673_v8, %v7307_v41 }
 0x15f   : > { %v6026_v16 = vpop.f32.mrf.mxu1  ;;  %v1914_v32 = vpop.f32.mrf.mxu0 }
 0x160   : > { %v7425_v51 = vadd.f32 %v1901_v34, %v1762_v52  ;;  %v1767_v5 = vadd.f32 %v6026_v16, %v7312_v60 }
 0x161   : > { %v1686_v63 = vpop.f32.mrf.mxu1  ;;  %v6067_v13 = vpop.f32.mrf.mxu0 }
 0x162   : > { %v7428_v10 = vadd.f32 %v6066_v59, %v1767_v5  ;;  %v1765_v40 = vadd.f32 %v1686_v63, %v7315_v48 }
 0x163   : > { %v6027_v62 = vpop.f32.mrf.mxu1  ;;  %v1917_v17 = vpop.f32.mrf.mxu0 }
 0x164   : > { %v7431_v19 = vadd.f32 %v1914_v32, %v1765_v40  ;;  %v1768_v31 = vadd.f32 %v6027_v62, %v7320_v47 }
 0x165   : > { %v1689_v33 = vpop.f32.mrf.mxu1  ;;  %v6070_v41 = vpop.f32.mrf.mxu0 }
 0x166   : > { %v7434_v35 = vadd.f32 %v6067_v13, %v1768_v31  ;;  %v1766_v21 = vadd.f32 %v1689_v33, %v7327_v36 }
 0x167   : > { %v6030_v39 = vpop.f32.mrf.mxu1  ;;  %v1930_v60 = vpop.f32.mrf.mxu0 }
 0x168   : > { %v7437_v43 = vadd.f32 %v1917_v17, %v1766_v21  ;;  %v1771_v46 = vadd.f32 %v6030_v39, %v7332_v57 }
 0x169   : > { %v1702_v37 = vpop.f32.mrf.mxu1  ;;  %v6071_v48 = vpop.f32.mrf.mxu0 }
 0x16a   : > { %v7440_v14 = vadd.f32 %v6070_v41, %v1771_v46  ;;  %v1769_v58 = vadd.f32 %v1702_v37, %v7335_v56 }
 0x16b   : > { %v6031_v30 = vpop.f32.mrf.mxu1  ;;  %v1933_v47 = vpop.f32.mrf.mxu0 }
 0x16c   : > { %v7443_v15 = vadd.f32 %v1930_v60, %v1769_v58  ;;  %v1772_v7 = vadd.f32 %v6031_v30, %v7340_v49 }
 0x16d   : > { %v1705_v29 = vpop.f32.mrf.mxu1  ;;  %v6074_v36 = vpop.f32.mrf.mxu0 }
 0x16e   : > { %v7446_v12 = vadd.f32 %v6071_v48, %v1772_v7  ;;  %v1770_v61 = vadd.f32 %v1705_v29, %v7347_v55 }
 0x16f   : > { %v6034_v34 = vpop.f32.mrf.mxu1  ;;  %v1946_v57 = vpop.f32.mrf.mxu0 }
 0x170   : > { %v7449_v26 = vadd.f32 %v1933_v47, %v1770_v61  ;;  %v1775_v8 = vadd.f32 %v6034_v34, %v7352_v23 }
 0x171   : > { %v1718_v59 = vpop.f32.mrf.mxu1  ;;  %v6075_v56 = vpop.f32.mrf.mxu0 }
 0x172   : > { %v7452_v52 = vadd.f32 %v6074_v36, %v1775_v8  ;;  %v1773_v16 = vadd.f32 %v1718_v59, %v7355_v25 }
 0x173   : > { %v6035_v32 = vpop.f32.mrf.mxu1  ;;  %v1949_v49 = vpop.f32.mrf.mxu0 }
 0x174   : > { %v7455_v5 = vadd.f32 %v1946_v57, %v1773_v16  ;;  %v1776_v63 = vadd.f32 %v6035_v32, %v7360_v45 }
 0x175   : > { %v1721_v13 = vpop.f32.mrf.mxu1  ;;  %v6078_v55 = vpop.f32.mrf.mxu0 }
 0x176   : > { %v7458_v40 = vadd.f32 %v6075_v56, %v1776_v63  ;;  %v1774_v62 = vadd.f32 %v1721_v13, %v7365_v24 }
 0x177   : > { %v6038_v17 = vpop.f32.mrf.mxu1  ;;  %v1962_v23 = vpop.f32.mrf.mxu0 }
 0x178   : > { %v7461_v31 = vadd.f32 %v1949_v49, %v1774_v62  ;;  %v1779_v33 = vadd.f32 %v6038_v17, %v7368_v53 }
 0x179   : > { %v1734_v41 = vpop.f32.mrf.mxu1  ;;  %v6079_v25 = vpop.f32.mrf.mxu0 }
 0x17a   : > { %v7464_v21 = vadd.f32 %v6078_v55, %v1779_v33  ;;  %v1777_v39 = vadd.f32 %v1734_v41, %v7371_v38 }
 0x17b   : > { %v6039_v60 = vpop.f32.mrf.mxu1  ;;  %v1965_v45 = vpop.f32.mrf.mxu0 }
 0x17c   : > { %v7467_v46 = vadd.f32 %v1962_v23, %v1777_v39  ;;  %v1780_v37 = vadd.f32 %v6039_v60, %v7374_v3 }
 0x17d   : > { %v1737_v48 = vpop.f32.mrf.mxu1  ;;  %v7470_v24 = vpop.f32.mrf.mxu0 }
 0x17e   : > { %v7472_v58 = vadd.f32 %v6079_v25, %v1780_v37  ;;  %v1778_v30 = vadd.f32 %v1737_v48, %v7377_v11 }
 0x17f   : > { %v7475_v53 = vpop.f32.mrf.mxu1  ;;  %v7477_v47 = vpop.f32.mrf.mxu0 }
 0x180   : > { %v7479_v7 = vadd.f32 %v1965_v45, %v1778_v30 }
 0x181   : > { %v7481_v38 = vpop.f32.mrf.mxu1  ;;  %v7483_v29 = vpop.f32.mrf.mxu0 }
 0x183   : > { %v7485_v36 = vpop.f32.mrf.mxu1  ;;  %v7487_v3 = vpop.f32.mrf.mxu0 }
 0x185   : > { %v7489_v61 = vpop.f32.mrf.mxu1  ;;  %v6134_v34 = vpop.f32.mrf.mxu0 }
 0x187   : > { %v6094_v57 = vpop.f32.mrf.mxu1  ;;  %v2324_v8 = vpop.f32.mrf.mxu0 }
 0x188   : > { %v2212_v11 = vadd.f32 %v6094_v57, %v7392_v54 }
 0x189   : > { %v2095_v59 = vpop.f32.mrf.mxu1  ;;  %v6135_v56 = vpop.f32.mrf.mxu0 }
 0x18a   : > { %v7492_v16 = vadd.f32 %v6134_v34, %v2212_v11  ;;  %v2210_v32 = vadd.f32 %v2095_v59, %v7395_v18 }
 0x18b   : > { %v6095_v49 = vpop.f32.mrf.mxu1  ;;  %v2327_v63 = vpop.f32.mrf.mxu0 }
 0x18c   : > { %v7495_v13 = vadd.f32 %v2324_v8, %v2210_v32  ;;  %v2213_v55 = vadd.f32 %v6095_v49, %v7398_v28 }
 0x18d   : > { %v2098_v62 = vpop.f32.mrf.mxu1  ;;  %v6138_v17 = vpop.f32.mrf.mxu0 }
 0x18e   : > { %v7498_v23 = vadd.f32 %v6135_v56, %v2213_v55  ;;  %v2211_v33 = vadd.f32 %v2098_v62, %v7401_v6 }
 0x18f   : > { %v6098_v41 = vpop.f32.mrf.mxu1  ;;  %v2340_v54 = vpop.f32.mrf.mxu0 }
 0x190   : > { %v7501_v25 = vadd.f32 %v2327_v63, %v2211_v33  ;;  %v2216_v39 = vadd.f32 %v6098_v41, %v7404_v2 }
 0x191   : > { %v2111_v60 = vpop.f32.mrf.mxu1  ;;  %v6139_v18 = vpop.f32.mrf.mxu0 }
 0x192   : > { %v7504_v45 = vadd.f32 %v6138_v17, %v2216_v39  ;;  %v2214_v37 = vadd.f32 %v2111_v60, %v7407_v9 }
 0x193   : > { %v6099_v48 = vpop.f32.mrf.mxu1  ;;  %v2343_v28 = vpop.f32.mrf.mxu0 }
 0x194   : > { %v7507_v30 = vadd.f32 %v2340_v54, %v2214_v37  ;;  %v2217_v34 = vadd.f32 %v6099_v48, %v7410_v1 }
 0x195   : > { %v2114_v57 = vpop.f32.mrf.mxu1  ;;  %v6142_v6 = vpop.f32.mrf.mxu0 }
 0x196   : > { %v7510_v8 = vadd.f32 %v6139_v18, %v2217_v34  ;;  %v2215_v11 = vadd.f32 %v2114_v57, %v7413_v22 }
 0x197   : > { %v6102_v59 = vpop.f32.mrf.mxu1  ;;  %v2356_v2 = vpop.f32.mrf.mxu0 }
 0x198   : > { %v7513_v56 = vadd.f32 %v2343_v28, %v2215_v11  ;;  %v2220_v32 = vadd.f32 %v6102_v59, %v7416_v27 }
 0x199   : > { %v2127_v49 = vpop.f32.mrf.mxu1  ;;  %v6143_v9 = vpop.f32.mrf.mxu0 }
 0x19a   : > { %v7516_v63 = vadd.f32 %v6142_v6, %v2220_v32  ;;  %v2218_v55 = vadd.f32 %v2127_v49, %v7419_v4 }
 0x19b   : > { %v6103_v62 = vpop.f32.mrf.mxu1  ;;  %v2359_v1 = vpop.f32.mrf.mxu0 }
 0x19c   : > { %v7519_v17 = vadd.f32 %v2356_v2, %v2218_v55  ;;  %v2221_v33 = vadd.f32 %v6103_v62, %v7422_v0 }
 0x19d   : > { %v2130_v41 = vpop.f32.mrf.mxu1  ;;  %v6146_v22 = vpop.f32.mrf.mxu0 }
 0x19e   : > { %v7522_v54 = vadd.f32 %v6143_v9, %v2221_v33  ;;  %v2219_v39 = vadd.f32 %v2130_v41, %v7425_v51 }
 0x19f   : > { %v6106_v60 = vpop.f32.mrf.mxu1  ;;  %v2372_v27 = vpop.f32.mrf.mxu0 }
 0x1a0   : > { %v7525_v18 = vadd.f32 %v2359_v1, %v2219_v39  ;;  %v2224_v37 = vadd.f32 %v6106_v60, %v7428_v10 }
 0x1a1   : > { %v2143_v48 = vpop.f32.mrf.mxu1  ;;  %v6147_v4 = vpop.f32.mrf.mxu0 }
 0x1a2   : > { %v7528_v28 = vadd.f32 %v6146_v22, %v2224_v37  ;;  %v2222_v34 = vadd.f32 %v2143_v48, %v7431_v19 }
 0x1a3   : > { %v6107_v57 = vpop.f32.mrf.mxu1  ;;  %v2375_v0 = vpop.f32.mrf.mxu0 }
 0x1a4   : > { %v7531_v6 = vadd.f32 %v2372_v27, %v2222_v34  ;;  %v2225_v11 = vadd.f32 %v6107_v57, %v7434_v35 }
 0x1a5   : > { %v2146_v59 = vpop.f32.mrf.mxu1  ;;  %v6150_v51 = vpop.f32.mrf.mxu0 }
 0x1a6   : > { %v7534_v2 = vadd.f32 %v6147_v4, %v2225_v11  ;;  %v2223_v32 = vadd.f32 %v2146_v59, %v7437_v43 }
 0x1a7   : > { %v6110_v49 = vpop.f32.mrf.mxu1  ;;  %v2388_v10 = vpop.f32.mrf.mxu0 }
 0x1a8   : > { %v7537_v9 = vadd.f32 %v2375_v0, %v2223_v32  ;;  %v2228_v55 = vadd.f32 %v6110_v49, %v7440_v14 }
 0x1a9   : > { %v2159_v62 = vpop.f32.mrf.mxu1  ;;  %v6151_v19 = vpop.f32.mrf.mxu0 }
 0x1aa   : > { %v7540_v1 = vadd.f32 %v6150_v51, %v2228_v55  ;;  %v2226_v33 = vadd.f32 %v2159_v62, %v7443_v15 }
 0x1ab   : > { %v6111_v41 = vpop.f32.mrf.mxu1  ;;  %v2391_v35 = vpop.f32.mrf.mxu0 }
 0x1ac   : > { %v7543_v22 = vadd.f32 %v2388_v10, %v2226_v33  ;;  %v2229_v39 = vadd.f32 %v6111_v41, %v7446_v12 }
 0x1ad   : > { %v2162_v60 = vpop.f32.mrf.mxu1  ;;  %v6154_v43 = vpop.f32.mrf.mxu0 }
 0x1ae   : > { %v7546_v27 = vadd.f32 %v6151_v19, %v2229_v39  ;;  %v2227_v37 = vadd.f32 %v2162_v60, %v7449_v26  ;;  %v2992_v60 = vlaneseq }
 0x1af   : > { %v6114_v48 = vpop.f32.mrf.mxu1  ;;  %v2404_v14 = vpop.f32.mrf.mxu0 }
 0x1b0   : > { %v7549_v4 = vadd.f32 %v2391_v35, %v2227_v37  ;;  %v2232_v34 = vadd.f32 %v6114_v48, %v7452_v52  ;;  %v6357_v35 = vmov 1983009808  }
 0x1b1   : > { %v2175_v57 = vpop.f32.mrf.mxu1  ;;  %v6155_v15 = vpop.f32.mrf.mxu0  ;;  %v2990_v39 = vunpack.c.l.s4 %v6357_v35 }
 0x1b2   : > { %v7552_v0 = vadd.f32 %v6154_v43, %v2232_v34  ;;  %v2230_v11 = vadd.f32 %v2175_v57, %v7455_v5 }
 0x1b3   : > { %v6115_v59 = vpop.f32.mrf.mxu1  ;;  %v2407_v12 = vpop.f32.mrf.mxu0 }
 0x1b4   : > { %v7555_v51 = vadd.f32 %v2404_v14, %v2230_v11  ;;  %v2233_v32 = vadd.f32 %v6115_v59, %v7458_v40  ;;  %v2208_v40 = vadd.f32 %v7475_v53, %v7380_v42  ;;  %v2206_v14 = vadd.f32 %v7481_v38, %v7383_v50 }
 0x1b5   : > { %v2178_v49 = vpop.f32.mrf.mxu1  ;;  %v6158_v26 = vpop.f32.mrf.mxu0  ;;  %v2991_v11 = vunpack.c.0.s8 %v2990_v39  ;;  %v2993_v59 = vshrl.u32 %v2992_v60, 7  ;;  %v2209_v42 = vadd.f32 %v7485_v36, %v7386_v44 }
 0x1b6   : > { %v7558_v10 = vadd.f32 %v6155_v15, %v2233_v32  ;;  %v2231_v55 = vadd.f32 %v2178_v49, %v7461_v31  ;;  %v2435_v50 = vadd.f32 %v7477_v47, %v2206_v14 }
 0x1b7   : > { %v6118_v62 = vpop.f32.mrf.mxu1  ;;  %v2420_v52 = vpop.f32.mrf.mxu0 }
 0x1b8   : > { %v7561_v19 = vadd.f32 %v2407_v12, %v2231_v55  ;;  %v2236_v33 = vadd.f32 %v6118_v62, %v7464_v21  ;;  %v2437_v12 = vadd.f32 %v7470_v24, %v2208_v40  ;;  %v2438_v24 = vadd.f32 %v7483_v29, %v2209_v42 }
 0x1b9   : > { %v2191_v41 = vpop.f32.mrf.mxu1  ;;  %v6159_v5 = vpop.f32.mrf.mxu0 }
 0x1ba   : > { %v7566_v43 = vadd.f32 %v6158_v26, %v2236_v33  ;;  %v2234_v37 = vadd.f32 %v2191_v41, %v7467_v46  ;;  %v2207_v26 = vadd.f32 %v7489_v61, %v7389_v20 }
 0x1bb   : > { %v6119_v48 = vpop.f32.mrf.mxu1  ;;  %v2423_v31 = vpop.f32.mrf.mxu0 }
 0x1bc   : > { %v7571_v34 = vadd.f32 %v2420_v52, %v2234_v37  ;;  %v2237_v21 = vadd.f32 %v6119_v48, %v7472_v58  ;;  %v7586_v52 = vsub.s32 %v2991_v11, %v2993_v59  ;;  %v2436_v47 = vadd.f32 %v7487_v3, %v2207_v26 }
 0x1bd   : > { %v2194_v57 = vpop.f32.mrf.mxu1  ;;  %v6210_v15 = vpop.f32.mrf.mxu0 }
 0x1be   : > { %v7577_v53 = vadd.f32 %v6159_v5, %v2237_v21  ;;  %v2235_v46 = vadd.f32 %v2194_v57, %v7479_v7 }
 0x1bf   : > { %v6170_v32 = vpop.f32.mrf.mxu1  ;;  %v2765_v58 = vpop.f32.mrf.mxu0 }
 0x1c0   : > { %v7581_v38 = vadd.f32 %v2423_v31, %v2235_v46  ;;  %v2665_v49 = vadd.f32 %v6170_v32, %v2437_v12 }
 0x1c1   : > { %v2536_v55 = vpop.f32.mrf.mxu1  ;;  %v6211_v5 = vpop.f32.mrf.mxu0 }
 0x1c2   : > { %v2894_v62 = vadd.f32 %v6210_v15, %v2665_v49  ;;  %v2663_v44 = vadd.f32 %v2536_v55, %v2435_v50 }
 0x1c3   : > { %v6171_v36 = vpop.f32.mrf.mxu1  ;;  %v2768_v14 = vpop.f32.mrf.mxu0 }
 0x1c4   : > { %v2926_v33 = vmax.f32 %v2894_v62, 0.0  ;;  %v2892_v7 = vadd.f32 %v2765_v58, %v2663_v44  ;;  %v2666_v41 = vadd.f32 %v6171_v36, %v2438_v24 }
 0x1c5   : > { %v2539_v35 = vpop.f32.mrf.mxu1 }
 0x1c6   : > { %v3022_v39 = vcombine.high %v2926_v33, %v2926_v33  ;;  %v3029_v60 = vrot.slane %v2926_v33, %v7586_v52  ;;  %v2924_v20 = vmax.f32 %v2892_v7, 0.0  ;;  %v2895_v61 = vadd.f32 %v6211_v5, %v2666_v41 }
 0x1c7   : > { %v2664_v40 = vadd.f32 %v2539_v35, %v2436_v47 }
 0x1c8   : > { %v3036_v29 = vrot.slane %v3022_v39, %v7586_v52  ;;  %v3037_v37 = vcombine.high %v3029_v60, %v3029_v60  ;;  %v3717_v48 = vsel %vm3660_vm7, %v3029_v60, -inf  ;;  %v2988_v31 = vcombine.high %v2924_v20, %v2924_v20 }
 0x1c9   : > { %v3718_v21 = vrot.slane %v3717_v48, 4  ;;  %v2995_v57 = vrot.slane %v2924_v20, %v7586_v52  ;;  %v7593_v15 = vmax.f32 %v2895_v61, 0.0  ;;  %v7595_v3 = vadd.f32 %v2768_v14, %v2664_v40 }
 0x1ca   : > { %v3038_v11 = vcombine.high %v3036_v29, %v3036_v29  ;;  %v3724_v59 = vsel %vm3660_vm7, %v3037_v37, -inf  ;;  %v3731_v12 = vsel %vm3660_vm7, %v3036_v29, -inf  ;;  %v3002_v42 = vrot.slane %v2988_v31, %v7586_v52 }
 0x1cb   : > { %v3719_v46 = vmax.f32 %v3717_v48, %v3718_v21  ;;  %v3725_v32 = vrot.slane %v3724_v59, 4  ;;  %v3732_v50 = vrot.slane %v3731_v12, 4  ;;  %v3003_v49 = vcombine.high %v2995_v57, %v2995_v57 }
 0x1cc   : > { %v3738_v58 = vsel %vm3660_vm7, %v3038_v11, -inf  ;;  %v3004_v26 = vcombine.high %v3002_v42, %v3002_v42  ;;  %v3661_v55 = vsel %vm3660_vm7, %v2995_v57, -inf  ;;  %v3675_v24 = vsel %vm3660_vm7, %v3002_v42, -inf }
 0x1cd   : > { %v3720_v62 = vrot.slane %v3719_v46, 2  ;;  %v3726_v44 = vmax.f32 %v3724_v59, %v3725_v32  ;;  %v3733_v36 = vmax.f32 %v3731_v12, %v3732_v50  ;;  %v3739_v33 = vrot.slane %v3738_v58, 4 }
 0x1ce   : > { %v3662_v7 = vrot.slane %v3661_v55, 4  ;;  %v3668_v41 = vsel %vm3660_vm7, %v3003_v49, -inf  ;;  %v3676_v5 = vrot.slane %v3675_v24, 4  ;;  %v3682_v47 = vsel %vm3660_vm7, %v3004_v26, -inf }
 0x1cf   : > { %v3721_v35 = vmax.f32 %v3719_v46, %v3720_v62  ;;  %v3727_v39 = vrot.slane %v3726_v44, 2  ;;  %v3734_v60 = vrot.slane %v3733_v36, 2  ;;  %v3740_v20 = vmax.f32 %v3738_v58, %v3739_v33 }
 0x1d0   : > { %v3663_v61 = vmax.f32 %v3661_v55, %v3662_v7  ;;  %v3669_v40 = vrot.slane %v3668_v41, 4  ;;  %v3677_v29 = vmax.f32 %v3675_v24, %v3676_v5  ;;  %v3683_v37 = vrot.slane %v3682_v47, 4 }
 0x1d1   : > { %v3722_v48 = vrot.slane %v3721_v35, 1  ;;  %v3728_v31 = vmax.f32 %v3726_v44, %v3727_v39  ;;  %v3735_v14 = vmax.f32 %v3733_v36, %v3734_v60  ;;  %v3741_v21 = vrot.slane %v3740_v20, 2 }
 0x1d2   : > { %v3664_v57 = vrot.slane %v3663_v61, 2  ;;  %v3670_v11 = vmax.f32 %v3668_v41, %v3669_v40  ;;  %v3678_v59 = vrot.slane %v3677_v29, 2  ;;  %v3684_v12 = vmax.f32 %v3682_v47, %v3683_v37 }
 0x1d3   : > { %v3723_v42 = vmax.f32 %v3721_v35, %v3722_v48  ;;  %v3729_v32 = vrot.slane %v3728_v31, 1  ;;  %v3736_v50 = vrot.slane %v3735_v14, 1  ;;  %v3742_v49 = vmax.f32 %v3740_v20, %v3741_v21 }
 0x1d4   : > { %v3665_v46 = vmax.f32 %v3663_v61, %v3664_v57  ;;  %v3671_v26 = vrot.slane %v3670_v11, 2  ;;  %v3679_v62 = vmax.f32 %v3677_v29, %v3678_v59  ;;  %v3685_v58 = vrot.slane %v3684_v12, 2 }
 0x1d5   : > { %v3730_v55 = vmax.f32 %v3728_v31, %v3729_v32  ;;  %v3737_v33 = vmax.f32 %v3735_v14, %v3736_v50  ;;  %v3743_v24 = vrot.slane %v3742_v49, 1  ;;  %v4558_v7 = vsel %vm810_vm3, %v3723_v42, -inf }
 0x1d6   : > { %v3666_v44 = vrot.slane %v3665_v46, 1  ;;  %v3672_v36 = vmax.f32 %v3670_v11, %v3671_v26  ;;  %v3680_v5 = vrot.slane %v3679_v62, 1  ;;  %v3686_v39 = vmax.f32 %v3684_v12, %v3685_v58 }
 0x1d7   : > { %v3744_v41 = vmax.f32 %v3742_v49, %v3743_v24  ;;  %v4561_v47 = vsel %vm810_vm3, %v3730_v55, -inf  ;;  %v4564_v35 = vsel %vm810_vm3, %v3737_v33, -inf  ;;  %v3039_v60 = vcombine.high %v7593_v15, %v7593_v15 }
 0x1d8   : > { %v3667_v20 = vmax.f32 %v3665_v46, %v3666_v44  ;;  %v3673_v61 = vrot.slane %v3672_v36, 1  ;;  %v3681_v40 = vmax.f32 %v3679_v62, %v3680_v5  ;;  %v3687_v29 = vrot.slane %v3686_v39, 1 }
 0x1d9   : > { %v4567_v37 = vsel %vm810_vm3, %v3744_v41, -inf  ;;  %v3046_v48 = vrot.slane %v7593_v15, %v7586_v52  ;;  %v3053_v31 = vrot.slane %v3039_v60, %v7586_v52  ;;  %v2925_v14 = vmax.f32 %v7595_v3, 0.0 }
 0x1da   : > { %v3674_v21 = vmax.f32 %v3672_v36, %v3673_v61  ;;  %v3688_v57 = vmax.f32 %v3686_v39, %v3687_v29  ;;  %v4557_v11 = vsel %vm810_vm3, %v3667_v20, -inf  ;;  %v4563_v59 = vsel %vm810_vm3, %v3681_v40, -inf  ;;  %v6174_v40 = vpop.f32.mrf.mxu1 }
 0x1db   : > { %v4559_v12 = vmax.f32 %v4557_v11, %v4558_v7  ;;  %v4565_v42 = vmax.f32 %v4563_v59, %v4564_v35  ;;  %v3054_v32 = vcombine.high %v3046_v48, %v3046_v48  ;;  %v3055_v50 = vcombine.high %v3053_v31, %v3053_v31 }
 0x1dc   : > { %v4560_v49 = vsel %vm810_vm3, %v3674_v21, -inf  ;;  %v4566_v46 = vsel %vm810_vm3, %v3688_v57, -inf  ;;  %v3745_v15 = vsel %vm3660_vm7, %v3046_v48, -inf  ;;  %v3759_v26 = vsel %vm3660_vm7, %v3053_v31, -inf }
 0x1dd   : > { %v4562_v62 = vmax.f32 %v4560_v49, %v4561_v47  ;;  %v4568_v3 = vmax.f32 %v4566_v46, %v4567_v37  ;;  %v5636_v58 = vpack.c.bf16 %v4559_v12, %v4559_v12  ;;  %v5638_v55 = vpack.c.bf16 %v4565_v42, %v4565_v42 }
 0x1de   : > { %v3746_v33 = vrot.slane %v3745_v15, 4  ;;  %v3752_v24 = vsel %vm3660_vm7, %v3054_v32, -inf  ;;  %v3760_v44 = vrot.slane %v3759_v26, 4  ;;  %v3766_v7 = vsel %vm3660_vm7, %v3055_v50, -inf }
 0x1df   : > { %v5637_v36 = vpack.c.bf16 %v4562_v62, %v4562_v62  ;;  %v5639_v5 = vpack.c.bf16 %v4568_v3, %v4568_v3  ;;  %v5005_v39 = vunpack.c.l.b16 %v5636_v58  ;;  %v5007_v41 = vunpack.c.l.b16 %v5638_v55  ;;  %v2552_v62 = vpop.f32.mrf.mxu1 }
 0x1e0   : > { %v3747_v35 = vmax.f32 %v3745_v15, %v3746_v33  ;;  %v3753_v60 = vrot.slane %v3752_v24, 4  ;;  %v3761_v20 = vmax.f32 %v3759_v26, %v3760_v44  ;;  %v3767_v61 = vrot.slane %v3766_v7, 4  ;;  %v6214_v26 = vpop.f32.mrf.mxu0 }
 0x1e1   : > { %v5006_v29 = vunpack.c.l.b16 %v5637_v36  ;;  %v5008_v47 = vunpack.c.l.b16 %v5639_v5  ;;  %v3005_v37 = vcombine.high %v2925_v14, %v2925_v14  ;;  %v3012_v48 = vrot.slane %v2925_v14, %v7586_v52 }
 0x1e2   : > { %v3748_v31 = vrot.slane %v3747_v35, 2  ;;  %v3754_v21 = vmax.f32 %v3752_v24, %v3753_v60  ;;  %v3762_v57 = vrot.slane %v3761_v20, 2  ;;  %v3768_v11 = vmax.f32 %v3766_v7, %v3767_v61 }
 0x1e3   : > { %v5070_v59 = vsel %vm5069_vm8, %v5006_v29, %v5005_v39  ;;  %v3019_v12 = vrot.slane %v3005_v37, %v7586_v52  ;;  %v3020_v42 = vcombine.high %v3012_v48, %v3012_v48  ;;  %v3689_v32 = vsel %vm3660_vm7, %v3012_v48, -inf  ;;  %v2781_v29 = vpop.f32.mrf.mxu0  ;;  %v6175_v37 = vpop.f32.mrf.mxu1 }
 0x1e4   : > { %v5072_v50 = vsel %vm5071_vm9, %v5007_v41, %v5070_v59  ;;  %v3749_v49 = vmax.f32 %v3747_v35, %v3748_v31  ;;  %v3755_v46 = vrot.slane %v3754_v21, 2  ;;  %v3763_v15 = vmax.f32 %v3761_v20, %v3762_v57 }
 0x1e5   : > { %v3769_v14 = vrot.slane %v3768_v11, 2  ;;  %v3021_v3 = vcombine.high %v3019_v12, %v3019_v12  ;;  %v3690_v58 = vrot.slane %v3689_v32, 4  ;;  %v3696_v55 = vsel %vm3660_vm7, %v3020_v42, -inf }
 0x1e6   : > { %v3750_v33 = vrot.slane %v3749_v49, 1  ;;  %v3756_v24 = vmax.f32 %v3754_v21, %v3755_v46  ;;  %v3764_v44 = vrot.slane %v3763_v15, 1  ;;  %v3697_v7 = vrot.slane %v3696_v55, 4 }
 0x1e7   : > { %v3770_v36 = vmax.f32 %v3768_v11, %v3769_v14  ;;  %v3691_v5 = vmax.f32 %v3689_v32, %v3690_v58  ;;  %v3703_v39 = vsel %vm3660_vm7, %v3019_v12, -inf  ;;  %v3710_v41 = vsel %vm3660_vm7, %v3021_v3, -inf }
 0x1e8   : > { %v3751_v35 = vmax.f32 %v3749_v49, %v3750_v33  ;;  %v3757_v60 = vrot.slane %v3756_v24, 1  ;;  %v3765_v20 = vmax.f32 %v3763_v15, %v3764_v44  ;;  %v3698_v61 = vmax.f32 %v3696_v55, %v3697_v7  ;;  %v6215_v33 = vpop.f32.mrf.mxu0  ;;  %v2555_v44 = vpop.f32.mrf.mxu1 }
 0x1e9   : > { %v3771_v48 = vrot.slane %v3770_v36, 1  ;;  %v3692_v31 = vrot.slane %v3691_v5, 2  ;;  %v3704_v57 = vrot.slane %v3703_v39, 4  ;;  %v3711_v59 = vrot.slane %v3710_v41, 4 }
 0x1ea   : > { %v3758_v42 = vmax.f32 %v3756_v24, %v3757_v60  ;;  %v4570_v21 = vsel %vm810_vm3, %v3751_v35, -inf  ;;  %v4576_v11 = vsel %vm810_vm3, %v3765_v20, -inf  ;;  %v3699_v32 = vrot.slane %v3698_v61, 2 }
 0x1eb   : > { %v3772_v46 = vmax.f32 %v3770_v36, %v3771_v48  ;;  %v3693_v12 = vmax.f32 %v3691_v5, %v3692_v31  ;;  %v3705_v14 = vmax.f32 %v3703_v39, %v3704_v57  ;;  %v3712_v3 = vmax.f32 %v3710_v41, %v3711_v59  ;;  %v2784_v57 = vpop.f32.mrf.mxu0 }
 0x1ec   : > { %v4573_v49 = vsel %vm810_vm3, %v3758_v42, -inf  ;;  %v3700_v15 = vmax.f32 %v3698_v61, %v3699_v32  ;;  %v5074_v58 = vsel %vm5073_vm10, %v5008_v47, %v5072_v50  ;;  %v2669_v55 = vadd.f32 %v6174_v40, %v7492_v16 }
 0x1ed   : > { %v4579_v24 = vsel %vm810_vm3, %v3772_v46, -inf  ;;  %v3694_v7 = vrot.slane %v3693_v12, 1  ;;  %v3706_v35 = vrot.slane %v3705_v14, 2  ;;  %v3713_v60 = vrot.slane %v3712_v3, 2 }
 0x1ee   : > { %v3701_v20 = vrot.slane %v3700_v15, 1  ;;  %v2898_v36 = vadd.f32 %v6214_v26, %v2669_v55  ;;  %v2667_v5 = vadd.f32 %v2552_v62, %v7495_v13  ;;  %v2670_v39 = vadd.f32 %v6175_v37, %v7498_v23 }
 0x1ef   : > { %v3695_v41 = vmax.f32 %v3693_v12, %v3694_v7  ;;  %v3707_v61 = vmax.f32 %v3705_v14, %v3706_v35  ;;  %v3714_v47 = vmax.f32 %v3712_v3, %v3713_v60  ;;  %v2668_v16 = vadd.f32 %v2555_v44, %v7501_v25 }
 0x1f0   : > { %v3702_v40 = vmax.f32 %v3700_v15, %v3701_v20  ;;  %v2930_v50 = vmax.f32 %v2898_v36, 0.0  ;;  %v2896_v48 = vadd.f32 %v2781_v29, %v2667_v5  ;;  %v2899_v31 = vadd.f32 %v6215_v33, %v2670_v39 }
 0x1f1   : > { %v3708_v59 = vrot.slane %v3707_v61, 1  ;;  %v3715_v42 = vrot.slane %v3714_v47, 1  ;;  %v4569_v32 = vsel %vm810_vm3, %v3695_v41, -inf  ;;  %v7641_v26 = vadd.f32 %v2784_v57, %v2668_v16 }
 0x1f2   : > { %v4571_v13 = vmax.f32 %v4569_v32, %v4570_v21  ;;  %v4572_v23 = vsel %vm810_vm3, %v3702_v40, -inf  ;;  %v3090_v62 = vcombine.high %v2930_v50, %v2930_v50  ;;  %v3097_v37 = vrot.slane %v2930_v50, %v7586_v52 }
 0x1f3   : > { %v3709_v25 = vmax.f32 %v3707_v61, %v3708_v59  ;;  %v3716_v46 = vmax.f32 %v3714_v47, %v3715_v42  ;;  %v4574_v12 = vmax.f32 %v4572_v23, %v4573_v49  ;;  %v2928_v29 = vmax.f32 %v2896_v48, 0.0 }
 0x1f4   : > { %v5640_v14 = vpack.c.bf16 %v4571_v13, %v4571_v13  ;;  %v3104_v3 = vrot.slane %v3090_v62, %v7586_v52  ;;  %v3105_v15 = vcombine.high %v3097_v37, %v3097_v37  ;;  %v3829_v55 = vsel %vm3660_vm7, %v3097_v37, -inf }
 0x1f5   : > { %v4575_v33 = vsel %vm810_vm3, %v3709_v25, -inf  ;;  %v4578_v21 = vsel %vm810_vm3, %v3716_v46, -inf  ;;  %v5641_v44 = vpack.c.bf16 %v4574_v12, %v4574_v12  ;;  %v3830_v7 = vrot.slane %v3829_v55, 4 }
 0x1f6   : > { %v4577_v35 = vmax.f32 %v4575_v33, %v4576_v11  ;;  %v4580_v60 = vmax.f32 %v4578_v21, %v4579_v24  ;;  %v5009_v20 = vunpack.c.l.b16 %v5640_v14  ;;  %v3106_v36 = vcombine.high %v3104_v3, %v3104_v3 }
 0x1f7   : > { %v5010_v49 = vunpack.c.l.b16 %v5641_v44  ;;  %v3831_v5 = vmax.f32 %v3829_v55, %v3830_v7  ;;  %v3836_v39 = vsel %vm3660_vm7, %v3105_v15, -inf  ;;  %v3843_v41 = vsel %vm3660_vm7, %v3104_v3, -inf }
 0x1f8   : > { %v5642_v61 = vpack.c.bf16 %v4577_v35, %v4577_v35  ;;  %v5643_v47 = vpack.c.bf16 %v4580_v60, %v4580_v60  ;;  %v5076_v16 = vsel %vm5075_vm11, %v5009_v20, %v5074_v58  ;;  %v3837_v40 = vrot.slane %v3836_v39, 4 }
 0x1f9   : > { %v5078_v50 = vsel %vm5077_vm12, %v5010_v49, %v5076_v16  ;;  %v3832_v48 = vrot.slane %v3831_v5, 2  ;;  %v3844_v57 = vrot.slane %v3843_v41, 4  ;;  %v3850_v11 = vsel %vm3660_vm7, %v3106_v36, -inf }
 0x1fa   : > { %v5011_v24 = vunpack.c.l.b16 %v5642_v61  ;;  %v5012_v59 = vunpack.c.l.b16 %v5643_v47  ;;  %v3838_v42 = vmax.f32 %v3836_v39, %v3837_v40  ;;  %v3851_v32 = vrot.slane %v3850_v11, 4 }
 0x1fb   : > { %v3833_v13 = vmax.f32 %v3831_v5, %v3832_v48  ;;  %v3845_v23 = vmax.f32 %v3843_v41, %v3844_v57  ;;  %v3056_v62 = vcombine.high %v2928_v29, %v2928_v29  ;;  %v3063_v37 = vrot.slane %v2928_v29, %v7586_v52 }
 0x1fc   : > { %v5080_v25 = vsel %vm5079_vm13, %v5011_v24, %v5078_v50  ;;  %v3839_v58 = vrot.slane %v3838_v42, 2  ;;  %v3852_v46 = vmax.f32 %v3850_v11, %v3851_v32  ;;  %v2931_v12 = vmax.f32 %v2899_v31, 0.0 }
 0x1fd   : > { %v5082_v14 = vsel %vm5081_vm14, %v5012_v59, %v5080_v25  ;;  %v3834_v3 = vrot.slane %v3833_v13, 1  ;;  %v3846_v15 = vrot.slane %v3845_v23, 2  ;;  %v3070_v55 = vrot.slane %v3056_v62, %v7586_v52 }
 0x1fe   : > { %v5132_v33 = vpack.c.b16 %v5082_v14, %v5082_v14  ;;  %v3840_v21 = vmax.f32 %v3838_v42, %v3839_v58  ;;  %v3853_v29 = vrot.slane %v3852_v46, 2  ;;  %v3071_v44 = vcombine.high %v3063_v37, %v3063_v37 }
 0x1ff   : > { %v3835_v7 = vmax.f32 %v3833_v13, %v3834_v3  ;;  %v3847_v35 = vmax.f32 %v3845_v23, %v3846_v15  ;;  %v3072_v60 = vcombine.high %v3070_v55, %v3070_v55  ;;  %v3773_v31 = vsel %vm3660_vm7, %v3063_v37, -inf }
 0x200   : > { %5149 = vst.msk [vmem:[%s7660_s9] sm:$0xf] %vm5148_vm15, %v5132_v33  ;;  %v3841_v20 = vrot.slane %v3840_v21, 1  ;;  %v3854_v36 = vmax.f32 %v3852_v46, %v3853_v29  ;;  %v3774_v49 = vrot.slane %v3773_v31, 4  ;;  %v3780_v5 = vsel %vm3660_vm7, %v3071_v44, -inf }
 0x201   : > { %v3848_v39 = vrot.slane %v3847_v35, 1  ;;  %v4582_v41 = vsel %vm810_vm3, %v3835_v7, -inf  ;;  %v3781_v61 = vrot.slane %v3780_v5, 4  ;;  %v3787_v47 = vsel %vm3660_vm7, %v3070_v55, -inf }
 0x202   : > { %v3842_v16 = vmax.f32 %v3840_v21, %v3841_v20  ;;  %v3855_v40 = vrot.slane %v3854_v36, 1  ;;  %v3775_v50 = vmax.f32 %v3773_v31, %v3774_v49  ;;  %v3788_v48 = vrot.slane %v3787_v47, 4 }
 0x203   : > { %v3849_v57 = vmax.f32 %v3847_v35, %v3848_v39  ;;  %v3782_v11 = vmax.f32 %v3780_v5, %v3781_v61  ;;  %v3794_v24 = vsel %vm3660_vm7, %v3072_v60, -inf  ;;  %v3107_v59 = vcombine.high %v2931_v12, %v2931_v12 }
 0x204   : > { %v3856_v42 = vmax.f32 %v3854_v36, %v3855_v40  ;;  %v4585_v32 = vsel %vm810_vm3, %v3842_v16, -inf  ;;  %v3776_v13 = vrot.slane %v3775_v50, 2  ;;  %v3789_v23 = vmax.f32 %v3787_v47, %v3788_v48 }
 0x205   : > { %v4588_v62 = vsel %vm810_vm3, %v3849_v57, -inf  ;;  %v3783_v37 = vrot.slane %v3782_v11, 2  ;;  %v3795_v25 = vrot.slane %v3794_v24, 4  ;;  %v3114_v58 = vrot.slane %v2931_v12, %v7586_v52 }
 0x206   : > { %v4591_v46 = vsel %vm810_vm3, %v3856_v42, -inf  ;;  %v3777_v14 = vmax.f32 %v3775_v50, %v3776_v13  ;;  %v3790_v3 = vrot.slane %v3789_v23, 2  ;;  %v3121_v15 = vrot.slane %v3107_v59, %v7586_v52 }
 0x207   : > { %v3784_v55 = vmax.f32 %v3782_v11, %v3783_v37  ;;  %v3796_v33 = vmax.f32 %v3794_v24, %v3795_v25  ;;  %v3122_v21 = vcombine.high %v3114_v58, %v3114_v58  ;;  %v3857_v29 = vsel %vm3660_vm7, %v3114_v58, -inf }
 0x208   : > { %v3778_v44 = vrot.slane %v3777_v14, 1  ;;  %v3791_v7 = vmax.f32 %v3789_v23, %v3790_v3  ;;  %v3123_v35 = vcombine.high %v3121_v15, %v3121_v15  ;;  %v3858_v60 = vrot.slane %v3857_v29, 4 }
 0x209   : > { %v3785_v31 = vrot.slane %v3784_v55, 1  ;;  %v3797_v20 = vrot.slane %v3796_v33, 2  ;;  %v3864_v36 = vsel %vm3660_vm7, %v3122_v21, -inf  ;;  %v3871_v12 = vsel %vm3660_vm7, %v3121_v15, -inf }
 0x20a   : > { %v3779_v49 = vmax.f32 %v3777_v14, %v3778_v44  ;;  %v3792_v5 = vrot.slane %v3791_v7, 1  ;;  %v3859_v39 = vmax.f32 %v3857_v29, %v3858_v60  ;;  %v3865_v61 = vrot.slane %v3864_v36, 4 }
 0x20b   : > { %v3786_v47 = vmax.f32 %v3784_v55, %v3785_v31  ;;  %v3798_v16 = vmax.f32 %v3796_v33, %v3797_v20  ;;  %v3872_v40 = vrot.slane %v3871_v12, 4  ;;  %v3878_v50 = vsel %vm3660_vm7, %v3123_v35, -inf  ;;  %v6178_v35 = vpop.f32.mrf.mxu1 }
 0x20c   : > { %v3793_v48 = vmax.f32 %v3791_v7, %v3792_v5  ;;  %v4581_v57 = vsel %vm810_vm3, %v3779_v49, -inf  ;;  %v3860_v11 = vrot.slane %v3859_v39, 2  ;;  %v3866_v24 = vmax.f32 %v3864_v36, %v3865_v61 }
 0x20d   : > { %v3799_v59 = vrot.slane %v3798_v16, 1  ;;  %v4583_v42 = vmax.f32 %v4581_v57, %v4582_v41  ;;  %v4584_v13 = vsel %vm810_vm3, %v3786_v47, -inf  ;;  %v3873_v23 = vmax.f32 %v3871_v12, %v3872_v40  ;;  %v2568_v57 = vpop.f32.mrf.mxu1 }
 0x20e   : > { %v4586_v37 = vmax.f32 %v4584_v13, %v4585_v32  ;;  %v4587_v25 = vsel %vm810_vm3, %v3793_v48, -inf  ;;  %v3861_v58 = vmax.f32 %v3859_v39, %v3860_v11  ;;  %v3867_v14 = vrot.slane %v3866_v24, 2 }
 0x20f   : > { %v3800_v3 = vmax.f32 %v3798_v16, %v3799_v59  ;;  %v4589_v15 = vmax.f32 %v4587_v25, %v4588_v62  ;;  %v5644_v55 = vpack.c.bf16 %v4583_v42, %v4583_v42  ;;  %v3874_v33 = vrot.slane %v3873_v23, 2  ;;  %v6218_v42 = vpop.f32.mrf.mxu0 }
 0x210   : > { %v5645_v21 = vpack.c.bf16 %v4586_v37, %v4586_v37  ;;  %v3862_v29 = vrot.slane %v3861_v58, 1  ;;  %v3868_v44 = vmax.f32 %v3866_v24, %v3867_v14  ;;  %v3879_v7 = vrot.slane %v3878_v50, 4 }
 0x211   : > { %v4590_v60 = vsel %vm810_vm3, %v3800_v3, -inf  ;;  %v5646_v41 = vpack.c.bf16 %v4589_v15, %v4589_v15  ;;  %v5013_v31 = vunpack.c.l.b16 %v5644_v55  ;;  %v3875_v20 = vmax.f32 %v3873_v23, %v3874_v33 }
 0x212   : > { %v4592_v36 = vmax.f32 %v4590_v60, %v4591_v46  ;;  %v5014_v32 = vunpack.c.l.b16 %v5645_v21  ;;  %v3863_v12 = vmax.f32 %v3861_v58, %v3862_v29  ;;  %v3869_v49 = vrot.slane %v3868_v44, 1 }
 0x213   : > { %v5015_v5 = vunpack.c.l.b16 %v5646_v41  ;;  %v3876_v39 = vrot.slane %v3875_v20, 1  ;;  %v3880_v61 = vmax.f32 %v3878_v50, %v3879_v7  ;;  %v2929_v62 = vmax.f32 %v7641_v26, 0.0  ;;  %v2797_v7 = vpop.f32.mrf.mxu0 }
 0x214   : > { %v5647_v47 = vpack.c.bf16 %v4592_v36, %v4592_v36  ;;  %v5083_v16 = vsel %vm5069_vm8, %v5014_v32, %v5013_v31  ;;  %v3870_v40 = vmax.f32 %v3868_v44, %v3869_v49  ;;  %v7687_v48 = vsel %vm810_vm3, %v3863_v12, -inf }
 0x215   : > { %v5084_v11 = vsel %vm5071_vm9, %v5015_v5, %v5083_v16  ;;  %v3877_v24 = vmax.f32 %v3875_v20, %v3876_v39  ;;  %v3881_v46 = vrot.slane %v3880_v61, 2  ;;  %v3073_v59 = vcombine.high %v2929_v62, %v2929_v62 }
 0x216   : > { %v5016_v13 = vunpack.c.l.b16 %v5647_v47  ;;  %v7691_v23 = vsel %vm810_vm3, %v3870_v40, -inf  ;;  %v3080_v26 = vrot.slane %v2929_v62, %v7586_v52  ;;  %v2673_v50 = vadd.f32 %v6178_v35, %v7504_v45 }
 0x217   : > { %v3882_v37 = vmax.f32 %v3880_v61, %v3881_v46  ;;  %v7696_v25 = vsel %vm810_vm3, %v3877_v24, -inf  ;;  %v3087_v58 = vrot.slane %v3073_v59, %v7586_v52  ;;  %v2671_v14 = vadd.f32 %v2568_v57, %v7507_v30 }
 0x218   : > { %v3088_v3 = vcombine.high %v3080_v26, %v3080_v26  ;;  %v3801_v15 = vsel %vm3660_vm7, %v3080_v26, -inf  ;;  %v7702_v55 = vsel %vm5073_vm10, %v5016_v13, %v5084_v11  ;;  %v2902_v33 = vadd.f32 %v6218_v42, %v2673_v50 }
 0x219   : > { %v3883_v21 = vrot.slane %v3882_v37, 1  ;;  %v3089_v29 = vcombine.high %v3087_v58, %v3087_v58  ;;  %v3802_v44 = vrot.slane %v3801_v15, 4  ;;  %v3815_v45 = vsel %vm3660_vm7, %v3087_v58, -inf }
 0x21a   : > { %v3808_v35 = vsel %vm3660_vm7, %v3088_v3, -inf  ;;  %v3816_v60 = vrot.slane %v3815_v45, 4  ;;  %v2934_v41 = vmax.f32 %v2902_v33, 0.0  ;;  %v2900_v31 = vadd.f32 %v2797_v7, %v2671_v14 }
 0x21b   : > { %v3884_v20 = vmax.f32 %v3882_v37, %v3883_v21  ;;  %v3803_v30 = vmax.f32 %v3801_v15, %v3802_v44  ;;  %v3809_v36 = vrot.slane %v3808_v35, 4  ;;  %v3822_v32 = vsel %vm3660_vm7, %v3089_v29, -inf }
 0x21c   : > { %v3817_v12 = vmax.f32 %v3815_v45, %v3816_v60  ;;  %v3823_v49 = vrot.slane %v3822_v32, 4  ;;  %v3158_v5 = vcombine.high %v2934_v41, %v2934_v41  ;;  %v3165_v39 = vrot.slane %v2934_v41, %v7586_v52 }
 0x21d   : > { %v4603_v61 = vsel %vm810_vm3, %v3884_v20, -inf  ;;  %v3804_v62 = vrot.slane %v3803_v30, 2  ;;  %v3810_v47 = vmax.f32 %v3808_v35, %v3809_v36  ;;  %v7709_v16 = vmax.f32 %v2900_v31, 0.0 }
 0x21e   : > { %v3818_v40 = vrot.slane %v3817_v12, 2  ;;  %v3824_v57 = vmax.f32 %v3822_v32, %v3823_v49  ;;  %v3172_v11 = vrot.slane %v3158_v5, %v7586_v52  ;;  %v3173_v24 = vcombine.high %v3165_v39, %v3165_v39 }
 0x21f   : > { %v3805_v46 = vmax.f32 %v3803_v30, %v3804_v62  ;;  %v3811_v59 = vrot.slane %v3810_v47, 2  ;;  %v3941_v42 = vsel %vm3660_vm7, %v3165_v39, -inf  ;;  %v3124_v13 = vcombine.high %v7709_v16, %v7709_v16 }
 0x220   : > { %v3819_v26 = vmax.f32 %v3817_v12, %v3818_v40  ;;  %v3825_v50 = vrot.slane %v3824_v57, 2  ;;  %v3174_v37 = vcombine.high %v3172_v11, %v3172_v11  ;;  %v3942_v58 = vrot.slane %v3941_v42, 4 }
 0x221   : > { %v3806_v14 = vrot.slane %v3805_v46, 1  ;;  %v3812_v3 = vmax.f32 %v3810_v47, %v3811_v59  ;;  %v3948_v15 = vsel %vm3660_vm7, %v3173_v24, -inf  ;;  %v3955_v33 = vsel %vm3660_vm7, %v3172_v11, -inf  ;;  %v6179_v59 = vpop.f32.mrf.mxu1 }
 0x222   : > { %v3820_v21 = vrot.slane %v3819_v26, 1  ;;  %v3826_v29 = vmax.f32 %v3824_v57, %v3825_v50  ;;  %v3943_v44 = vmax.f32 %v3941_v42, %v3942_v58  ;;  %v3949_v45 = vrot.slane %v3948_v15, 4 }
 0x223   : > { %v3807_v7 = vmax.f32 %v3805_v46, %v3806_v14  ;;  %v3813_v35 = vrot.slane %v3812_v3, 1  ;;  %v3956_v60 = vrot.slane %v3955_v33, 4  ;;  %v3962_v41 = vsel %vm3660_vm7, %v3174_v37, -inf }
 0x224   : > { %v3821_v31 = vmax.f32 %v3819_v26, %v3820_v21  ;;  %v3827_v20 = vrot.slane %v3826_v29, 1  ;;  %v3944_v30 = vrot.slane %v3943_v44, 2  ;;  %v3950_v36 = vmax.f32 %v3948_v15, %v3949_v45 }
 0x225   : > { %v3814_v32 = vmax.f32 %v3812_v3, %v3813_v35  ;;  %v4593_v12 = vsel %vm810_vm3, %v3807_v7, -inf  ;;  %v3957_v49 = vmax.f32 %v3955_v33, %v3956_v60  ;;  %v3963_v5 = vrot.slane %v3962_v41, 4  ;;  %v2571_v35 = vpop.f32.mrf.mxu1 }
 0x226   : > { %v3828_v39 = vmax.f32 %v3826_v29, %v3827_v20  ;;  %v4595_v62 = vmax.f32 %v4593_v12, %v7687_v48  ;;  %v4599_v47 = vsel %vm810_vm3, %v3821_v31, -inf  ;;  %v3945_v40 = vmax.f32 %v3943_v44, %v3944_v30 }
 0x227   : > { %v4596_v57 = vsel %vm810_vm3, %v3814_v32, -inf  ;;  %v4601_v11 = vmax.f32 %v4599_v47, %v7696_v25  ;;  %v3951_v24 = vrot.slane %v3950_v36, 2  ;;  %v3958_v46 = vrot.slane %v3957_v49, 2 }
 0x228   : > { %v4598_v42 = vmax.f32 %v4596_v57, %v7691_v23  ;;  %v4602_v26 = vsel %vm810_vm3, %v3828_v39, -inf  ;;  %v5648_v50 = vpack.c.bf16 %v4595_v62, %v4595_v62  ;;  %v3946_v37 = vrot.slane %v3945_v40, 1  ;;  %v6182_v57 = vpop.f32.mrf.mxu1 }
 0x229   : > { %v4604_v58 = vmax.f32 %v4602_v26, %v4603_v61  ;;  %v5650_v14 = vpack.c.bf16 %v4601_v11, %v4601_v11  ;;  %v3952_v3 = vmax.f32 %v3950_v36, %v3951_v24  ;;  %v3959_v48 = vmax.f32 %v3957_v49, %v3958_v46 }
 0x22a   : > { %v5649_v15 = vpack.c.bf16 %v4598_v42, %v4598_v42  ;;  %v5017_v33 = vunpack.c.l.b16 %v5648_v50  ;;  %v3947_v21 = vmax.f32 %v3945_v40, %v3946_v37  ;;  %v3964_v29 = vmax.f32 %v3962_v41, %v3963_v5  ;;  %v6219_v41 = vpop.f32.mrf.mxu0 }
 0x22b   : > { %v5651_v44 = vpack.c.bf16 %v4604_v58, %v4604_v58  ;;  %v5019_v45 = vunpack.c.l.b16 %v5650_v14  ;;  %v3953_v25 = vrot.slane %v3952_v3, 1  ;;  %v3960_v7 = vrot.slane %v3959_v48, 1 }
 0x22c   : > { %v5018_v60 = vunpack.c.l.b16 %v5649_v15  ;;  %v5086_v23 = vsel %vm5075_vm11, %v5017_v33, %v7702_v55  ;;  %v3965_v31 = vrot.slane %v3964_v29, 2  ;;  %v7728_v20 = vsel %vm810_vm3, %v3947_v21, -inf  ;;  %v2800_v26 = vpop.f32.mrf.mxu0  ;;  %v2584_v21 = vpop.f32.mrf.mxu1 }
 0x22d   : > { %v5020_v61 = vunpack.c.l.b16 %v5651_v44  ;;  %v3954_v30 = vmax.f32 %v3952_v3, %v3953_v25  ;;  %v3961_v36 = vmax.f32 %v3959_v48, %v3960_v7  ;;  %v3131_v32 = vrot.slane %v7709_v16, %v7586_v52 }
 0x22e   : > { %v5087_v12 = vsel %vm5077_vm12, %v5018_v60, %v5086_v23  ;;  %v3966_v49 = vmax.f32 %v3964_v29, %v3965_v31  ;;  %v3138_v5 = vrot.slane %v3124_v13, %v7586_v52  ;;  %v2674_v39 = vadd.f32 %v6179_v59, %v7510_v8 }
 0x22f   : > { %v5088_v55 = vsel %vm5079_vm13, %v5019_v45, %v5087_v12  ;;  %v7737_v62 = vsel %vm810_vm3, %v3954_v30, -inf  ;;  %v7740_v47 = vsel %vm810_vm3, %v3961_v36, -inf  ;;  %v3139_v40 = vcombine.high %v3131_v32, %v3131_v32 }
 0x230   : > { %v5089_v16 = vsel %vm5081_vm14, %v5020_v61, %v5088_v55  ;;  %v3967_v11 = vrot.slane %v3966_v49, 1  ;;  %v3140_v24 = vcombine.high %v3138_v5, %v3138_v5  ;;  %v3885_v46 = vsel %vm3660_vm7, %v3131_v32, -inf  ;;  %v6222_v61 = vpop.f32.mrf.mxu0 }
 0x231   : > { %v5133_v13 = vpack.c.b16 %v5089_v16, %v5089_v16  ;;  %v3886_v42 = vrot.slane %v3885_v46, 4  ;;  %v3892_v8 = vsel %vm3660_vm7, %v3139_v40, -inf  ;;  %v3899_v59 = vsel %vm3660_vm7, %v3138_v5, -inf }
 0x232   : > { %v3968_v50 = vmax.f32 %v3966_v49, %v3967_v11  ;;  %v3893_v37 = vrot.slane %v3892_v8, 4  ;;  %v3900_v58 = vrot.slane %v3899_v59, 4  ;;  %v3906_v14 = vsel %vm3660_vm7, %v3140_v24, -inf }
 0x233   : > { %5150 = vst.msk [vmem:[%s7660_s9 + $0x4] sm:$0xf] %vm5148_vm15, %v5133_v13  ;;  %v3887_v3 = vmax.f32 %v3885_v46, %v3886_v42  ;;  %v3907_v48 = vrot.slane %v3906_v14, 4  ;;  %v2903_v15 = vadd.f32 %v6219_v41, %v2674_v39  ;;  %v2672_v33 = vadd.f32 %v2571_v35, %v7513_v56 }
 0x234   : > { %v4615_v29 = vsel %vm810_vm3, %v3968_v50, -inf  ;;  %v3894_v44 = vmax.f32 %v3892_v8, %v3893_v37  ;;  %v3901_v45 = vmax.f32 %v3899_v59, %v3900_v58  ;;  %v2677_v25 = vadd.f32 %v6182_v57, %v7516_v63 }
 0x235   : > { %v3888_v7 = vrot.slane %v3887_v3, 2  ;;  %v3908_v60 = vmax.f32 %v3906_v14, %v3907_v48  ;;  %v2935_v23 = vmax.f32 %v2903_v15, 0.0  ;;  %v2901_v31 = vadd.f32 %v2800_v26, %v2672_v33 }
 0x236   : > { %v3895_v30 = vrot.slane %v3894_v44, 2  ;;  %v3902_v36 = vrot.slane %v3901_v45, 2  ;;  %v2906_v32 = vadd.f32 %v6222_v61, %v2677_v25  ;;  %v7753_v12 = vadd.f32 %v2584_v21, %v7519_v17 }
 0x237   : > { %v3889_v41 = vmax.f32 %v3887_v3, %v3888_v7  ;;  %v3909_v56 = vrot.slane %v3908_v60, 2  ;;  %v3175_v35 = vcombine.high %v2935_v23, %v2935_v23  ;;  %v3182_v49 = vrot.slane %v2935_v23, %v7586_v52 }
 0x238   : > { %v3896_v5 = vmax.f32 %v3894_v44, %v3895_v30  ;;  %v3903_v39 = vmax.f32 %v3901_v45, %v3902_v36  ;;  %v2933_v55 = vmax.f32 %v2901_v31, 0.0  ;;  %v7756_v63 = vmax.f32 %v2906_v32, 0.0 }
 0x239   : > { %v3890_v40 = vrot.slane %v3889_v41, 1  ;;  %v3910_v57 = vmax.f32 %v3908_v60, %v3909_v56  ;;  %v3189_v16 = vrot.slane %v3175_v35, %v7586_v52  ;;  %v3190_v11 = vcombine.high %v3182_v49, %v3182_v49 }
 0x23a   : > { %v3897_v24 = vrot.slane %v3896_v5, 1  ;;  %v3904_v46 = vrot.slane %v3903_v39, 1  ;;  %v3969_v17 = vsel %vm3660_vm7, %v3182_v49, -inf  ;;  %v3141_v13 = vcombine.high %v2933_v55, %v2933_v55 }
 0x23b   : > { %v3891_v42 = vmax.f32 %v3889_v41, %v3890_v40  ;;  %v3911_v8 = vrot.slane %v3910_v57, 1  ;;  %v3191_v59 = vcombine.high %v3189_v16, %v3189_v16  ;;  %v3970_v26 = vrot.slane %v3969_v17, 4 }
 0x23c   : > { %v3898_v50 = vmax.f32 %v3896_v5, %v3897_v24  ;;  %v3905_v37 = vmax.f32 %v3903_v39, %v3904_v46  ;;  %v3976_v58 = vsel %vm3660_vm7, %v3190_v11, -inf  ;;  %v3983_v14 = vsel %vm3660_vm7, %v3189_v16, -inf }
 0x23d   : > { %v3912_v3 = vmax.f32 %v3910_v57, %v3911_v8  ;;  %v4605_v48 = vsel %vm810_vm3, %v3891_v42, -inf  ;;  %v3971_v15 = vmax.f32 %v3969_v17, %v3970_v26  ;;  %v3977_v33 = vrot.slane %v3976_v58, 4 }
 0x23e   : > { %v4607_v21 = vmax.f32 %v4605_v48, %v7728_v20  ;;  %v4608_v44 = vsel %vm810_vm3, %v3898_v50, -inf  ;;  %v4611_v45 = vsel %vm810_vm3, %v3905_v37, -inf  ;;  %v3984_v25 = vrot.slane %v3983_v14, 4 }
 0x23f   : > { %v4610_v7 = vmax.f32 %v4608_v44, %v7737_v62  ;;  %v4613_v60 = vmax.f32 %v4611_v45, %v7740_v47  ;;  %v4614_v23 = vsel %vm810_vm3, %v3912_v3, -inf  ;;  %v3972_v31 = vrot.slane %v3971_v15, 2 }
 0x240   : > { %v4616_v61 = vmax.f32 %v4614_v23, %v4615_v29  ;;  %v5652_v30 = vpack.c.bf16 %v4607_v21, %v4607_v21  ;;  %v3978_v36 = vmax.f32 %v3976_v58, %v3977_v33  ;;  %v3985_v32 = vmax.f32 %v3983_v14, %v3984_v25 }
 0x241   : > { %v5653_v41 = vpack.c.bf16 %v4610_v7, %v4610_v7  ;;  %v5654_v56 = vpack.c.bf16 %v4613_v60, %v4613_v60  ;;  %v3973_v35 = vmax.f32 %v3971_v15, %v3972_v31  ;;  %v3990_v20 = vsel %vm3660_vm7, %v3191_v59, -inf }
 0x242   : > { %v5655_v49 = vpack.c.bf16 %v4616_v61, %v4616_v61  ;;  %v5021_v5 = vunpack.c.l.b16 %v5652_v30  ;;  %v3979_v39 = vrot.slane %v3978_v36, 2  ;;  %v3986_v40 = vrot.slane %v3985_v32, 2 }
 0x243   : > { %v5022_v57 = vunpack.c.l.b16 %v5653_v41  ;;  %v5023_v62 = vunpack.c.l.b16 %v5654_v56  ;;  %v3974_v16 = vrot.slane %v3973_v35, 1  ;;  %v3991_v47 = vrot.slane %v3990_v20, 4 }
 0x244   : > { %v5024_v11 = vunpack.c.l.b16 %v5655_v49  ;;  %v3980_v24 = vmax.f32 %v3978_v36, %v3979_v39  ;;  %v3987_v46 = vmax.f32 %v3985_v32, %v3986_v40  ;;  %v3148_v29 = vrot.slane %v2933_v55, %v7586_v52 }
 0x245   : > { %v5090_v17 = vsel %vm5069_vm8, %v5022_v57, %v5021_v5  ;;  %v3975_v42 = vmax.f32 %v3973_v35, %v3974_v16  ;;  %v3992_v8 = vmax.f32 %v3990_v20, %v3991_v47  ;;  %v3155_v26 = vrot.slane %v3141_v13, %v7586_v52  ;;  %v2813_v5 = vpop.f32.mrf.mxu0 }
 0x246   : > { %v5091_v59 = vsel %vm5071_vm9, %v5023_v62, %v5090_v17  ;;  %v3981_v50 = vrot.slane %v3980_v24, 1  ;;  %v3988_v37 = vrot.slane %v3987_v46, 1  ;;  %v3156_v58 = vcombine.high %v3148_v29, %v3148_v29 }
 0x247   : > { %v3993_v14 = vrot.slane %v3992_v8, 2  ;;  %v4618_v3 = vsel %vm810_vm3, %v3975_v42, -inf  ;;  %v3157_v48 = vcombine.high %v3155_v26, %v3155_v26  ;;  %v3913_v15 = vsel %vm3660_vm7, %v3148_v29, -inf }
 0x248   : > { %v3982_v33 = vmax.f32 %v3980_v24, %v3981_v50  ;;  %v3989_v21 = vmax.f32 %v3987_v46, %v3988_v37  ;;  %v3914_v55 = vrot.slane %v3913_v15, 4  ;;  %v3920_v44 = vsel %vm3660_vm7, %v3156_v58, -inf  ;;  %v7792_v46 = vpop.f32.mrf.mxu1 }
 0x249   : > { %v3994_v45 = vmax.f32 %v3992_v8, %v3993_v14  ;;  %v3921_v25 = vrot.slane %v3920_v44, 4  ;;  %v3927_v13 = vsel %vm3660_vm7, %v3155_v26, -inf  ;;  %v3934_v7 = vsel %vm3660_vm7, %v3157_v48, -inf }
 0x24a   : > { %v4621_v60 = vsel %vm810_vm3, %v3982_v33, -inf  ;;  %v4624_v23 = vsel %vm810_vm3, %v3989_v21, -inf  ;;  %v3915_v31 = vmax.f32 %v3913_v15, %v3914_v55  ;;  %v3928_v61 = vrot.slane %v3927_v13, 4  ;;  %v2587_v55 = vpop.f32.mrf.mxu1 }
 0x24b   : > { %v3995_v30 = vrot.slane %v3994_v45, 1  ;;  %v3922_v36 = vmax.f32 %v3920_v44, %v3921_v25  ;;  %v3935_v32 = vrot.slane %v3934_v7, 4  ;;  %v7782_v41 = vsel %vm5073_vm10, %v5024_v11, %v5091_v59 }
 0x24c   : > { %v3916_v56 = vrot.slane %v3915_v31, 2  ;;  %v3929_v35 = vmax.f32 %v3927_v13, %v3928_v61  ;;  %v3226_v20 = vcombine.high %v7756_v63, %v7756_v63  ;;  %v3233_v49 = vrot.slane %v7756_v63, %v7586_v52 }
 0x24d   : > { %v3996_v39 = vmax.f32 %v3994_v45, %v3995_v30  ;;  %v3923_v40 = vrot.slane %v3922_v36, 2  ;;  %v3936_v57 = vmax.f32 %v3934_v7, %v3935_v32  ;;  %v7789_v62 = vadd.f32 %v2813_v5, %v7753_v12 }
 0x24e   : > { %v3917_v16 = vmax.f32 %v3915_v31, %v3916_v56  ;;  %v3930_v47 = vrot.slane %v3929_v35, 2  ;;  %v3240_v11 = vrot.slane %v3226_v20, %v7586_v52  ;;  %v3241_v24 = vcombine.high %v3233_v49, %v3233_v49 }
 0x24f   : > { %v4627_v29 = vsel %vm810_vm3, %v3996_v39, -inf  ;;  %v3924_v17 = vmax.f32 %v3922_v36, %v3923_v40  ;;  %v3937_v42 = vrot.slane %v3936_v57, 2  ;;  %v4053_v63 = vsel %vm3660_vm7, %v3233_v49, -inf  ;;  %v6186_v40 = vpop.f32.mrf.mxu1 }
 0x250   : > { %v3918_v8 = vrot.slane %v3917_v16, 1  ;;  %v3931_v26 = vmax.f32 %v3929_v35, %v3930_v47  ;;  %v3242_v59 = vcombine.high %v3240_v11, %v3240_v11  ;;  %v4054_v50 = vrot.slane %v4053_v63, 4 }
 0x251   : > { %v3925_v37 = vrot.slane %v3924_v17, 1  ;;  %v3938_v12 = vmax.f32 %v3936_v57, %v3937_v42  ;;  %v4060_v58 = vsel %vm3660_vm7, %v3241_v24, -inf  ;;  %v4067_v14 = vsel %vm3660_vm7, %v3240_v11, -inf }
 0x252   : > { %v3919_v48 = vmax.f32 %v3917_v16, %v3918_v8  ;;  %v3932_v15 = vrot.slane %v3931_v26, 1  ;;  %v4055_v33 = vmax.f32 %v4053_v63, %v4054_v50  ;;  %v4061_v21 = vrot.slane %v4060_v58, 4 }
 0x253   : > { %v3926_v44 = vmax.f32 %v3924_v17, %v3925_v37  ;;  %v3939_v45 = vrot.slane %v3938_v12, 1  ;;  %v4068_v25 = vrot.slane %v4067_v14, 4  ;;  %v4074_v13 = vsel %vm3660_vm7, %v3242_v59, -inf }
 0x254   : > { %v3933_v7 = vmax.f32 %v3931_v26, %v3932_v15  ;;  %v4617_v31 = vsel %vm810_vm3, %v3919_v48, -inf  ;;  %v4056_v61 = vrot.slane %v4055_v33, 2  ;;  %v4062_v30 = vmax.f32 %v4060_v58, %v4061_v21  ;;  %v2600_v58 = vpop.f32.mrf.mxu1 }
 0x255   : > { %v3940_v36 = vmax.f32 %v3938_v12, %v3939_v45  ;;  %v4619_v32 = vmax.f32 %v4617_v31, %v4618_v3  ;;  %v4620_v56 = vsel %vm810_vm3, %v3926_v44, -inf  ;;  %v4069_v35 = vmax.f32 %v4067_v14, %v4068_v25 }
 0x256   : > { %v4622_v20 = vmax.f32 %v4620_v56, %v4621_v60  ;;  %v4623_v49 = vsel %vm810_vm3, %v3933_v7, -inf  ;;  %v4057_v5 = vmax.f32 %v4055_v33, %v4056_v61  ;;  %v4063_v39 = vrot.slane %v4062_v30, 2  ;;  %v6223_v33 = vpop.f32.mrf.mxu0 }
 0x257   : > { %v4625_v57 = vmax.f32 %v4623_v49, %v4624_v23  ;;  %v4626_v16 = vsel %vm810_vm3, %v3940_v36, -inf  ;;  %v5656_v47 = vpack.c.bf16 %v4619_v32, %v4619_v32  ;;  %v4070_v11 = vrot.slane %v4069_v35, 2  ;;  %v6187_v32 = vpop.f32.mrf.mxu1 }
 0x258   : > { %v4628_v24 = vmax.f32 %v4626_v16, %v4627_v29  ;;  %v5657_v17 = vpack.c.bf16 %v4622_v20, %v4622_v20  ;;  %v4058_v42 = vrot.slane %v4057_v5, 1  ;;  %v4064_v63 = vmax.f32 %v4062_v30, %v4063_v39 }
 0x259   : > { %v5658_v8 = vpack.c.bf16 %v4625_v57, %v4625_v57  ;;  %v5025_v3 = vunpack.c.l.b16 %v5656_v47  ;;  %v4071_v26 = vmax.f32 %v4069_v35, %v4070_v11  ;;  %v4075_v59 = vrot.slane %v4074_v13, 4 }
 0x25a   : > { %v5659_v50 = vpack.c.bf16 %v4628_v24, %v4628_v24  ;;  %v5026_v60 = vunpack.c.l.b16 %v5657_v17  ;;  %v4059_v37 = vmax.f32 %v4057_v5, %v4058_v42  ;;  %v4065_v12 = vrot.slane %v4064_v63, 1  ;;  %v2816_v5 = vpop.f32.mrf.mxu0 }
 0x25b   : > { %v5027_v14 = vunpack.c.l.b16 %v5658_v8  ;;  %v5093_v23 = vsel %vm5075_vm11, %v5025_v3, %v7782_v41  ;;  %v4072_v48 = vrot.slane %v4071_v26, 1  ;;  %v4076_v15 = vmax.f32 %v4074_v13, %v4075_v59 }
 0x25c   : > { %v5028_v29 = vunpack.c.l.b16 %v5659_v50  ;;  %v5094_v21 = vsel %vm5077_vm12, %v5026_v60, %v5093_v23  ;;  %v4066_v44 = vmax.f32 %v4064_v63, %v4065_v12  ;;  %v7807_v45 = vsel %vm810_vm3, %v4059_v37, -inf }
 0x25d   : > { %v5095_v25 = vsel %vm5079_vm13, %v5027_v14, %v5094_v21  ;;  %v4073_v7 = vmax.f32 %v4071_v26, %v4072_v48  ;;  %v4077_v31 = vrot.slane %v4076_v15, 2  ;;  %v2936_v61 = vmax.f32 %v7789_v62, 0.0 }
 0x25e   : > { %v5096_v30 = vsel %vm5081_vm14, %v5028_v29, %v5095_v25  ;;  %v7813_v41 = vsel %vm810_vm3, %v4066_v44, -inf  ;;  %v2678_v13 = vadd.f32 %v7792_v46, %v7522_v54  ;;  %v2676_v36 = vadd.f32 %v2587_v55, %v7525_v18 }
 0x25f   : > { %v5134_v56 = vpack.c.b16 %v5096_v30, %v5096_v30  ;;  %v4078_v35 = vmax.f32 %v4076_v15, %v4077_v31  ;;  %v7819_v20 = vsel %vm810_vm3, %v4073_v7, -inf  ;;  %v3192_v49 = vcombine.high %v2936_v61, %v2936_v61 }
 0x260   : > { %v3199_v62 = vrot.slane %v2936_v61, %v7586_v52  ;;  %v2907_v39 = vadd.f32 %v6223_v33, %v2678_v13  ;;  %v2905_v57 = vadd.f32 %v2816_v5, %v2676_v36  ;;  %v7823_v16 = vadd.f32 %v6186_v40, %v7528_v28 }
 0x261   : > { %5151 = vst.msk [vmem:[%s7660_s9 + $0x8] sm:$0xf] %vm5148_vm15, %v5134_v56  ;;  %v4079_v54 = vrot.slane %v4078_v35, 1  ;;  %v3206_v18 = vrot.slane %v3192_v49, %v7586_v52  ;;  %v7829_v46 = vadd.f32 %v2600_v58, %v7531_v6  ;;  %v7832_v55 = vadd.f32 %v6187_v32, %v7534_v2 }
 0x262   : > { %v3207_v47 = vcombine.high %v3199_v62, %v3199_v62  ;;  %v3997_v11 = vsel %vm3660_vm7, %v3199_v62, -inf  ;;  %v2939_v24 = vmax.f32 %v2907_v39, 0.0  ;;  %v7835_v17 = vmax.f32 %v2905_v57, 0.0 }
 0x263   : > { %v4080_v42 = vmax.f32 %v4078_v35, %v4079_v54  ;;  %v3208_v28 = vcombine.high %v3206_v18, %v3206_v18  ;;  %v3998_v40 = vrot.slane %v3997_v11, 4  ;;  %v4011_v63 = vsel %vm3660_vm7, %v3206_v18, -inf }
 0x264   : > { %v4004_v8 = vsel %vm3660_vm7, %v3207_v47, -inf  ;;  %v4012_v3 = vrot.slane %v4011_v63, 4  ;;  %v3243_v26 = vcombine.high %v2939_v24, %v2939_v24  ;;  %v3250_v6 = vrot.slane %v2939_v24, %v7586_v52 }
 0x265   : > { %v4639_v2 = vsel %vm810_vm3, %v4080_v42, -inf  ;;  %v3999_v59 = vmax.f32 %v3997_v11, %v3998_v40  ;;  %v4005_v50 = vrot.slane %v4004_v8, 4  ;;  %v4018_v60 = vsel %vm3660_vm7, %v3208_v28, -inf }
 0x266   : > { %v4013_v37 = vmax.f32 %v4011_v63, %v4012_v3  ;;  %v4019_v12 = vrot.slane %v4018_v60, 4  ;;  %v3257_v58 = vrot.slane %v3243_v26, %v7586_v52  ;;  %v3258_v14 = vcombine.high %v3250_v6, %v3250_v6 }
 0x267   : > { %v4000_v23 = vrot.slane %v3999_v59, 2  ;;  %v4006_v48 = vmax.f32 %v4004_v8, %v4005_v50  ;;  %v4081_v15 = vsel %vm3660_vm7, %v3250_v6, -inf  ;;  %v3209_v33 = vcombine.high %v7835_v17, %v7835_v17 }
 0x268   : > { %v4014_v29 = vrot.slane %v4013_v37, 2  ;;  %v4020_v21 = vmax.f32 %v4018_v60, %v4019_v12  ;;  %v3259_v44 = vcombine.high %v3257_v58, %v3257_v58  ;;  %v4082_v25 = vrot.slane %v4081_v15, 4 }
 0x269   : > { %v4001_v7 = vmax.f32 %v3999_v59, %v4000_v23  ;;  %v4007_v31 = vrot.slane %v4006_v48, 2  ;;  %v4088_v61 = vsel %vm3660_vm7, %v3258_v14, -inf  ;;  %v4095_v30 = vsel %vm3660_vm7, %v3257_v58, -inf }
 0x26a   : > { %v4015_v13 = vmax.f32 %v4013_v37, %v4014_v29  ;;  %v4021_v36 = vrot.slane %v4020_v21, 2  ;;  %v4083_v32 = vmax.f32 %v4081_v15, %v4082_v25  ;;  %v4089_v56 = vrot.slane %v4088_v61, 4 }
 0x26b   : > { %v4002_v35 = vrot.slane %v4001_v7, 1  ;;  %v4008_v49 = vmax.f32 %v4006_v48, %v4007_v31  ;;  %v4096_v5 = vrot.slane %v4095_v30, 4  ;;  %v4102_v62 = vsel %vm3660_vm7, %v3259_v44, -inf }
 0x26c   : > { %v4016_v39 = vrot.slane %v4015_v13, 1  ;;  %v4022_v57 = vmax.f32 %v4020_v21, %v4021_v36  ;;  %v4084_v54 = vrot.slane %v4083_v32, 2  ;;  %v4090_v18 = vmax.f32 %v4088_v61, %v4089_v56 }
 0x26d   : > { %v4003_v47 = vmax.f32 %v4001_v7, %v4002_v35  ;;  %v4009_v11 = vrot.slane %v4008_v49, 1  ;;  %v4097_v24 = vmax.f32 %v4095_v30, %v4096_v5  ;;  %v4103_v42 = vrot.slane %v4102_v62, 4 }
 0x26e   : > { %v4017_v28 = vmax.f32 %v4015_v13, %v4016_v39  ;;  %v4023_v40 = vrot.slane %v4022_v57, 1  ;;  %v4085_v63 = vmax.f32 %v4083_v32, %v4084_v54  ;;  %v4091_v8 = vrot.slane %v4090_v18, 2 }
 0x26f   : > { %v4010_v3 = vmax.f32 %v4008_v49, %v4009_v11  ;;  %v4629_v26 = vsel %vm810_vm3, %v4003_v47, -inf  ;;  %v4098_v6 = vrot.slane %v4097_v24, 2  ;;  %v4104_v59 = vmax.f32 %v4102_v62, %v4103_v42  ;;  %v6226_v49 = vpop.f32.mrf.mxu0 }
 0x270   : > { %v4024_v50 = vmax.f32 %v4022_v57, %v4023_v40  ;;  %v4631_v60 = vmax.f32 %v4629_v26, %v7807_v45  ;;  %v4635_v37 = vsel %vm810_vm3, %v4017_v28, -inf  ;;  %v4086_v12 = vrot.slane %v4085_v63, 1 }
 0x271   : > { %v4632_v58 = vsel %vm810_vm3, %v4010_v3, -inf  ;;  %v4637_v14 = vmax.f32 %v4635_v37, %v7819_v20  ;;  %v4092_v23 = vmax.f32 %v4090_v18, %v4091_v8  ;;  %v4099_v48 = vmax.f32 %v4097_v24, %v4098_v6 }
 0x272   : > { %v4634_v15 = vmax.f32 %v4632_v58, %v7813_v41  ;;  %v4638_v29 = vsel %vm810_vm3, %v4024_v50, -inf  ;;  %v5660_v21 = vpack.c.bf16 %v4631_v60, %v4631_v60  ;;  %v4087_v44 = vmax.f32 %v4085_v63, %v4086_v12  ;;  %v2829_v63 = vpop.f32.mrf.mxu0 }
 0x273   : > { %v4640_v25 = vmax.f32 %v4638_v29, %v4639_v2  ;;  %v5662_v7 = vpack.c.bf16 %v4637_v14, %v4637_v14  ;;  %v4093_v31 = vrot.slane %v4092_v23, 1  ;;  %v4100_v61 = vrot.slane %v4099_v48, 1 }
 0x274   : > { %v5661_v45 = vpack.c.bf16 %v4634_v15, %v4634_v15  ;;  %v5029_v30 = vunpack.c.l.b16 %v5660_v21  ;;  %v4105_v13 = vrot.slane %v4104_v59, 2  ;;  %v7857_v36 = vsel %vm810_vm3, %v4087_v44, -inf  ;;  %v6227_v21 = vpop.f32.mrf.mxu0 }
 0x275   : > { %v5663_v32 = vpack.c.bf16 %v4640_v25, %v4640_v25  ;;  %v5031_v20 = vunpack.c.l.b16 %v5662_v7  ;;  %v4094_v56 = vmax.f32 %v4092_v23, %v4093_v31  ;;  %v4101_v35 = vmax.f32 %v4099_v48, %v4100_v61 }
 0x276   : > { %v5030_v41 = vunpack.c.l.b16 %v5661_v45  ;;  %v4106_v5 = vmax.f32 %v4104_v59, %v4105_v13  ;;  %v3216_v62 = vrot.slane %v7835_v17, %v7586_v52  ;;  %v3223_v2 = vrot.slane %v3209_v33, %v7586_v52 }
 0x277   : > { %v5032_v39 = vunpack.c.l.b16 %v5663_v32  ;;  %v7863_v57 = vsel %vm810_vm3, %v4094_v56, -inf  ;;  %v7866_v54 = vsel %vm810_vm3, %v4101_v35, -inf  ;;  %v2910_v18 = vadd.f32 %v6226_v49, %v7823_v16 }
 0x278   : > { %v5097_v47 = vsel %vm5069_vm8, %v5030_v41, %v5029_v30  ;;  %v4107_v11 = vrot.slane %v4106_v5, 1  ;;  %v3224_v24 = vcombine.high %v3216_v62, %v3216_v62  ;;  %v3225_v42 = vcombine.high %v3223_v2, %v3223_v2 }
 0x279   : > { %v5098_v28 = vsel %vm5071_vm9, %v5031_v20, %v5097_v47  ;;  %v4025_v17 = vsel %vm3660_vm7, %v3216_v62, -inf  ;;  %v4039_v33 = vsel %vm3660_vm7, %v3223_v2, -inf  ;;  %v2942_v40 = vmax.f32 %v2910_v18, 0.0 }
 0x27a   : > { %v4108_v8 = vmax.f32 %v4106_v5, %v4107_v11  ;;  %v4026_v3 = vrot.slane %v4025_v17, 4  ;;  %v4032_v26 = vsel %vm3660_vm7, %v3224_v24, -inf  ;;  %v4040_v6 = vrot.slane %v4039_v33, 4 }
 0x27b   : > { %v4033_v59 = vrot.slane %v4032_v26, 4  ;;  %v4046_v16 = vsel %vm3660_vm7, %v3225_v42, -inf  ;;  %v7876_v50 = vsel %vm5073_vm10, %v5032_v39, %v5098_v28  ;;  %v3294_v60 = vcombine.high %v2942_v40, %v2942_v40 }
 0x27c   : > { %v4651_v37 = vsel %vm810_vm3, %v4108_v8, -inf  ;;  %v4027_v12 = vmax.f32 %v4025_v17, %v4026_v3  ;;  %v4041_v58 = vmax.f32 %v4039_v33, %v4040_v6  ;;  %v4047_v14 = vrot.slane %v4046_v16, 4 }
 0x27d   : > { %v4034_v23 = vmax.f32 %v4032_v26, %v4033_v59  ;;  %v3301_v48 = vrot.slane %v2942_v40, %v7586_v52  ;;  %v3308_v15 = vrot.slane %v3294_v60, %v7586_v52  ;;  %v7882_v29 = vadd.f32 %v2829_v63, %v7829_v46 }
 0x27e   : > { %v4028_v44 = vrot.slane %v4027_v12, 2  ;;  %v4042_v25 = vrot.slane %v4041_v58, 2  ;;  %v4048_v7 = vmax.f32 %v4046_v16, %v4047_v14  ;;  %v7885_v31 = vadd.f32 %v6227_v21, %v7832_v55 }
 0x27f   : > { %v4035_v61 = vrot.slane %v4034_v23, 2  ;;  %v3309_v45 = vcombine.high %v3301_v48, %v3301_v48  ;;  %v3310_v30 = vcombine.high %v3308_v15, %v3308_v15  ;;  %v4165_v13 = vsel %vm3660_vm7, %v3301_v48, -inf }
 0x280   : > { %v4029_v32 = vmax.f32 %v4027_v12, %v4028_v44  ;;  %v4043_v20 = vmax.f32 %v4041_v58, %v4042_v25  ;;  %v4049_v56 = vrot.slane %v4048_v7, 2  ;;  %v4166_v35 = vrot.slane %v4165_v13, 4 }
 0x281   : > { %v4036_v49 = vmax.f32 %v4034_v23, %v4035_v61  ;;  %v4172_v46 = vsel %vm3660_vm7, %v3309_v45, -inf  ;;  %v4179_v41 = vsel %vm3660_vm7, %v3308_v15, -inf  ;;  %v4186_v5 = vsel %vm3660_vm7, %v3310_v30, -inf }
 0x282   : > { %v4030_v62 = vrot.slane %v4029_v32, 1  ;;  %v4044_v2 = vrot.slane %v4043_v20, 1  ;;  %v4050_v55 = vmax.f32 %v4048_v7, %v4049_v56  ;;  %v4167_v39 = vmax.f32 %v4165_v13, %v4166_v35 }
 0x283   : > { %v4037_v18 = vrot.slane %v4036_v49, 1  ;;  %v4173_v47 = vrot.slane %v4172_v46, 4  ;;  %v4180_v11 = vrot.slane %v4179_v41, 4  ;;  %v4187_v24 = vrot.slane %v4186_v5, 4 }
 0x284   : > { %v4031_v42 = vmax.f32 %v4029_v32, %v4030_v62  ;;  %v4045_v28 = vmax.f32 %v4043_v20, %v4044_v2  ;;  %v4051_v17 = vrot.slane %v4050_v55, 1  ;;  %v4168_v33 = vrot.slane %v4167_v39, 2 }
 0x285   : > { %v4038_v40 = vmax.f32 %v4036_v49, %v4037_v18  ;;  %v4174_v63 = vmax.f32 %v4172_v46, %v4173_v47  ;;  %v4181_v8 = vmax.f32 %v4179_v41, %v4180_v11  ;;  %v4188_v3 = vmax.f32 %v4186_v5, %v4187_v24 }
 0x286   : > { %v4052_v26 = vmax.f32 %v4050_v55, %v4051_v17  ;;  %v4641_v6 = vsel %vm810_vm3, %v4031_v42, -inf  ;;  %v4647_v59 = vsel %vm810_vm3, %v4045_v28, -inf  ;;  %v4169_v16 = vmax.f32 %v4167_v39, %v4168_v33  ;;  %v2603_v33 = vpop.f32.mrf.mxu1 }
 0x287   : > { %v4643_v60 = vmax.f32 %v4641_v6, %v7857_v36  ;;  %v4644_v12 = vsel %vm810_vm3, %v4038_v40, -inf  ;;  %v4649_v58 = vmax.f32 %v4647_v59, %v7866_v54  ;;  %v4175_v14 = vrot.slane %v4174_v63, 2 }
 0x288   : > { %v4646_v23 = vmax.f32 %v4644_v12, %v7863_v57  ;;  %v4650_v48 = vsel %vm810_vm3, %v4052_v26, -inf  ;;  %v4170_v15 = vrot.slane %v4169_v16, 1  ;;  %v4182_v21 = vrot.slane %v4181_v8, 2 }
 0x289   : > { %v4652_v44 = vmax.f32 %v4650_v48, %v4651_v37  ;;  %v5664_v25 = vpack.c.bf16 %v4643_v60, %v4643_v60  ;;  %v5666_v7 = vpack.c.bf16 %v4649_v58, %v4649_v58  ;;  %v4176_v61 = vmax.f32 %v4174_v63, %v4175_v14 }
 0x28a   : > { %v5665_v45 = vpack.c.bf16 %v4646_v23, %v4646_v23  ;;  %v4171_v30 = vmax.f32 %v4169_v16, %v4170_v15  ;;  %v4183_v13 = vmax.f32 %v4181_v8, %v4182_v21  ;;  %v4189_v32 = vrot.slane %v4188_v3, 2 }
 0x28b   : > { %v5667_v36 = vpack.c.bf16 %v4652_v44, %v4652_v44  ;;  %v5033_v20 = vunpack.c.l.b16 %v5664_v25  ;;  %v5035_v56 = vunpack.c.l.b16 %v5666_v7  ;;  %v4177_v35 = vrot.slane %v4176_v61, 1 }
 0x28c   : > { %v5034_v54 = vunpack.c.l.b16 %v5665_v45  ;;  %v4184_v49 = vrot.slane %v4183_v13, 1  ;;  %v4190_v46 = vmax.f32 %v4188_v3, %v4189_v32  ;;  %v7899_v57 = vsel %vm810_vm3, %v4171_v30, -inf }
 0x28d   : > { %v5036_v41 = vunpack.c.l.b16 %v5667_v36  ;;  %v5100_v37 = vsel %vm5075_vm11, %v5033_v20, %v7876_v50  ;;  %v4178_v5 = vmax.f32 %v4176_v61, %v4177_v35  ;;  %v2940_v62 = vmax.f32 %v7882_v29, 0.0 }
 0x28e   : > { %v5101_v2 = vsel %vm5077_vm12, %v5034_v54, %v5100_v37  ;;  %v4185_v55 = vmax.f32 %v4183_v13, %v4184_v49  ;;  %v4191_v39 = vrot.slane %v4190_v46, 1  ;;  %v2943_v18 = vmax.f32 %v7885_v31, 0.0 }
 0x28f   : > { %v5102_v47 = vsel %vm5079_vm13, %v5035_v56, %v5101_v2  ;;  %v7908_v11 = vsel %vm810_vm3, %v4178_v5, -inf  ;;  %v3260_v24 = vcombine.high %v2940_v62, %v2940_v62  ;;  %v3267_v42 = vrot.slane %v2940_v62, %v7586_v52  ;;  %v2832_v2 = vpop.f32.mrf.mxu0 }
 0x290   : > { %v5103_v50 = vsel %vm5081_vm14, %v5036_v41, %v5102_v47  ;;  %v4192_v28 = vmax.f32 %v4190_v46, %v4191_v39  ;;  %v7913_v29 = vsel %vm810_vm3, %v4185_v55, -inf  ;;  %v3311_v17 = vcombine.high %v2943_v18, %v2943_v18  ;;  %v6190_v46 = vpop.f32.mrf.mxu1 }
 0x291   : > { %v5135_v40 = vpack.c.b16 %v5103_v50, %v5103_v50  ;;  %v3274_v31 = vrot.slane %v3260_v24, %v7586_v52  ;;  %v3275_v63 = vcombine.high %v3267_v42, %v3267_v42  ;;  %v4109_v8 = vsel %vm3660_vm7, %v3267_v42, -inf }
 0x292   : > { %v7918_v3 = vsel %vm810_vm3, %v4192_v28, -inf  ;;  %v4110_v26 = vrot.slane %v4109_v8, 4  ;;  %v3318_v6 = vrot.slane %v2943_v18, %v7586_v52  ;;  %v3325_v59 = vrot.slane %v3311_v17, %v7586_v52 }
 0x293   : > { %5152 = vst.msk [vmem:[%s7660_s9 + $0xc] sm:$0xf] %vm5148_vm15, %v5135_v40  ;;  %v3276_v16 = vcombine.high %v3274_v31, %v3274_v31  ;;  %v4116_v60 = vsel %vm3660_vm7, %v3275_v63, -inf  ;;  %v4123_v12 = vsel %vm3660_vm7, %v3274_v31, -inf  ;;  %v7927_v58 = vadd.f32 %v2603_v33, %v7537_v9  ;;  %v2616_v63 = vpop.f32.mrf.mxu1 }
 0x294   : > { %v4111_v14 = vmax.f32 %v4109_v8, %v4110_v26  ;;  %v4117_v23 = vrot.slane %v4116_v60, 4  ;;  %v4124_v48 = vrot.slane %v4123_v12, 4  ;;  %v3326_v15 = vcombine.high %v3318_v6, %v3318_v6 }
 0x295   : > { %v4130_v21 = vsel %vm3660_vm7, %v3276_v16, -inf  ;;  %v3327_v44 = vcombine.high %v3325_v59, %v3325_v59  ;;  %v4193_v25 = vsel %vm3660_vm7, %v3318_v6, -inf  ;;  %v4207_v7 = vsel %vm3660_vm7, %v3325_v59, -inf  ;;  %v6230_v16 = vpop.f32.mrf.mxu0 }
 0x296   : > { %v4112_v61 = vrot.slane %v4111_v14, 2  ;;  %v4118_v45 = vmax.f32 %v4116_v60, %v4117_v23  ;;  %v4125_v30 = vmax.f32 %v4123_v12, %v4124_v48  ;;  %v4131_v13 = vrot.slane %v4130_v21, 4 }
 0x297   : > { %v4194_v32 = vrot.slane %v4193_v25, 4  ;;  %v4200_v36 = vsel %vm3660_vm7, %v3326_v15, -inf  ;;  %v4208_v9 = vrot.slane %v4207_v7, 4  ;;  %v4214_v20 = vsel %vm3660_vm7, %v3327_v44, -inf }
 0x298   : > { %v4113_v56 = vmax.f32 %v4111_v14, %v4112_v61  ;;  %v4119_v35 = vrot.slane %v4118_v45, 2  ;;  %v4126_v54 = vrot.slane %v4125_v30, 2  ;;  %v4132_v49 = vmax.f32 %v4130_v21, %v4131_v13 }
 0x299   : > { %v4195_v41 = vmax.f32 %v4193_v25, %v4194_v32  ;;  %v4201_v37 = vrot.slane %v4200_v36, 4  ;;  %v4209_v5 = vmax.f32 %v4207_v7, %v4208_v9  ;;  %v4215_v62 = vrot.slane %v4214_v20, 4 }
 0x29a   : > { %v4114_v55 = vrot.slane %v4113_v56, 1  ;;  %v4120_v39 = vmax.f32 %v4118_v45, %v4119_v35  ;;  %v4127_v18 = vmax.f32 %v4125_v30, %v4126_v54  ;;  %v4133_v47 = vrot.slane %v4132_v49, 2  ;;  %v6191_v30 = vpop.f32.mrf.mxu1 }
 0x29b   : > { %v4196_v24 = vrot.slane %v4195_v41, 2  ;;  %v4202_v42 = vmax.f32 %v4200_v36, %v4201_v37  ;;  %v4210_v50 = vrot.slane %v4209_v5, 2  ;;  %v4216_v28 = vmax.f32 %v4214_v20, %v4215_v62  ;;  %v2845_v20 = vpop.f32.mrf.mxu0 }
 0x29c   : > { %v4115_v17 = vmax.f32 %v4113_v56, %v4114_v55  ;;  %v4121_v33 = vrot.slane %v4120_v39, 1  ;;  %v4128_v40 = vrot.slane %v4127_v18, 1  ;;  %v4134_v31 = vmax.f32 %v4132_v49, %v4133_v47 }
 0x29d   : > { %v4197_v8 = vmax.f32 %v4195_v41, %v4196_v24  ;;  %v4203_v26 = vrot.slane %v4202_v42, 2  ;;  %v4211_v6 = vmax.f32 %v4209_v5, %v4210_v50  ;;  %v4217_v59 = vrot.slane %v4216_v28, 2 }
 0x29e   : > { %v4122_v60 = vmax.f32 %v4120_v39, %v4121_v33  ;;  %v4129_v12 = vmax.f32 %v4127_v18, %v4128_v40  ;;  %v4135_v14 = vrot.slane %v4134_v31, 1  ;;  %v4653_v23 = vsel %vm810_vm3, %v4115_v17, -inf }
 0x29f   : > { %v4655_v48 = vmax.f32 %v4653_v23, %v7899_v57  ;;  %v4198_v15 = vrot.slane %v4197_v8, 1  ;;  %v4204_v21 = vmax.f32 %v4202_v42, %v4203_v26  ;;  %v4212_v44 = vrot.slane %v4211_v6, 1  ;;  %v6231_v42 = vpop.f32.mrf.mxu0 }
 0x2a0   : > { %v4136_v25 = vmax.f32 %v4134_v31, %v4135_v14  ;;  %v4656_v7 = vsel %vm810_vm3, %v4122_v60, -inf  ;;  %v4659_v61 = vsel %vm810_vm3, %v4129_v12, -inf  ;;  %v4218_v45 = vmax.f32 %v4216_v28, %v4217_v59 }
 0x2a1   : > { %v4658_v13 = vmax.f32 %v4656_v7, %v7908_v11  ;;  %v4661_v32 = vmax.f32 %v4659_v61, %v7913_v29  ;;  %v5668_v36 = vpack.c.bf16 %v4655_v48, %v4655_v48  ;;  %v4199_v9 = vmax.f32 %v4197_v8, %v4198_v15  ;;  %v2619_v11 = vpop.f32.mrf.mxu1 }
 0x2a2   : > { %v4662_v56 = vsel %vm810_vm3, %v4136_v25, -inf  ;;  %v4205_v57 = vrot.slane %v4204_v21, 1  ;;  %v4213_v35 = vmax.f32 %v4211_v6, %v4212_v44  ;;  %v4219_v54 = vrot.slane %v4218_v45, 1 }
 0x2a3   : > { %v4664_v49 = vmax.f32 %v4662_v56, %v7918_v3  ;;  %v5669_v41 = vpack.c.bf16 %v4658_v13, %v4658_v13  ;;  %v5670_v37 = vpack.c.bf16 %v4661_v32, %v4661_v32  ;;  %v5037_v5 = vunpack.c.l.b16 %v5668_v36  ;;  %v6194_v59 = vpop.f32.mrf.mxu1 }
 0x2a4   : > { %v4206_v62 = vmax.f32 %v4204_v21, %v4205_v57  ;;  %v4220_v55 = vmax.f32 %v4218_v45, %v4219_v54  ;;  %v7943_v39 = vsel %vm810_vm3, %v4199_v9, -inf  ;;  %v2909_v24 = vadd.f32 %v2832_v2, %v7927_v58 }
 0x2a5   : > { %v5671_v29 = vpack.c.bf16 %v4664_v49, %v4664_v49  ;;  %v5038_v18 = vunpack.c.l.b16 %v5669_v41  ;;  %v5039_v47 = vunpack.c.l.b16 %v5670_v37  ;;  %v7950_v3 = vsel %vm810_vm3, %v4213_v35, -inf }
 0x2a6   : > { %v7947_v50 = vsel %vm810_vm3, %v4206_v62, -inf  ;;  %v2685_v28 = vadd.f32 %v6190_v46, %v7540_v1  ;;  %v2683_v17 = vadd.f32 %v2616_v63, %v7543_v22  ;;  %v2941_v31 = vmax.f32 %v2909_v24, 0.0  ;;  %v2848_v46 = vpop.f32.mrf.mxu0 }
 0x2a7   : > { %v5040_v33 = vunpack.c.l.b16 %v5671_v29  ;;  %v5104_v40 = vsel %vm5069_vm8, %v5038_v18, %v5037_v5  ;;  %v2686_v8 = vadd.f32 %v6191_v30, %v7546_v27  ;;  %v2684_v6 = vadd.f32 %v2619_v11, %v7549_v4 }
 0x2a8   : > { %v5105_v26 = vsel %vm5071_vm9, %v5039_v47, %v5104_v40  ;;  %v2914_v58 = vadd.f32 %v6230_v16, %v2685_v28  ;;  %v2912_v2 = vadd.f32 %v2845_v20, %v2683_v17  ;;  %v7959_v60 = vsel %vm810_vm3, %v4220_v55, -inf }
 0x2a9   : > { %v3277_v12 = vcombine.high %v2941_v31, %v2941_v31  ;;  %v3284_v1 = vrot.slane %v2941_v31, %v7586_v52  ;;  %v7963_v22 = vsel %vm5073_vm10, %v5040_v33, %v5105_v26  ;;  %v7965_v27 = vadd.f32 %v6231_v42, %v2686_v8 }
 0x2aa   : > { %v2946_v63 = vmax.f32 %v2914_v58, 0.0  ;;  %v2944_v14 = vmax.f32 %v2912_v2, 0.0  ;;  %v7967_v23 = vadd.f32 %v2848_v46, %v2684_v6  ;;  %v7972_v15 = vadd.f32 %v6194_v59, %v7552_v0 }
 0x2ab   : > { %v3291_v16 = vrot.slane %v3277_v12, %v7586_v52  ;;  %v3292_v4 = vcombine.high %v3284_v1, %v3284_v1  ;;  %v4137_v48 = vsel %vm3660_vm7, %v3284_v1, -inf }
 0x2ac   : > { %v4138_v21 = vrot.slane %v4137_v48, 4  ;;  %v3362_v44 = vcombine.high %v2946_v63, %v2946_v63  ;;  %v3369_v25 = vrot.slane %v2946_v63, %v7586_v52  ;;  %v3328_v7 = vcombine.high %v2944_v14, %v2944_v14 }
 0x2ad   : > { %v3293_v61 = vcombine.high %v3291_v16, %v3291_v16  ;;  %v4144_v45 = vsel %vm3660_vm7, %v3292_v4, -inf  ;;  %v4151_v30 = vsel %vm3660_vm7, %v3291_v16, -inf  ;;  %v7978_v13 = vrot.slane %v2944_v14, %v7586_v52 }
 0x2ae   : > { %v4139_v32 = vmax.f32 %v4137_v48, %v4138_v21  ;;  %v4145_v36 = vrot.slane %v4144_v45, 4  ;;  %v4152_v9 = vrot.slane %v4151_v30, 4  ;;  %v3376_v20 = vrot.slane %v3362_v44, %v7586_v52 }
 0x2af   : > { %v4158_v0 = vsel %vm3660_vm7, %v3293_v61, -inf  ;;  %v3377_v56 = vcombine.high %v3369_v25, %v3369_v25  ;;  %v4277_v57 = vsel %vm3660_vm7, %v3369_v25, -inf  ;;  %v7984_v35 = vrot.slane %v3328_v7, %v7586_v52 }
 0x2b0   : > { %v4140_v54 = vrot.slane %v4139_v32, 2  ;;  %v4146_v49 = vmax.f32 %v4144_v45, %v4145_v36  ;;  %v4153_v41 = vmax.f32 %v4151_v30, %v4152_v9  ;;  %v4159_v37 = vrot.slane %v4158_v0, 4 }
 0x2b1   : > { %v3378_v5 = vcombine.high %v3376_v20, %v3376_v20  ;;  %v4278_v62 = vrot.slane %v4277_v57, 4  ;;  %v4284_v55 = vsel %vm3660_vm7, %v3377_v56, -inf  ;;  %v4291_v11 = vsel %vm3660_vm7, %v3376_v20, -inf }
 0x2b2   : > { %v4141_v29 = vmax.f32 %v4139_v32, %v4140_v54  ;;  %v4147_v18 = vrot.slane %v4146_v49, 2  ;;  %v4154_v47 = vrot.slane %v4153_v41, 2  ;;  %v4160_v24 = vmax.f32 %v4158_v0, %v4159_v37 }
 0x2b3   : > { %v4279_v42 = vmax.f32 %v4277_v57, %v4278_v62  ;;  %v4285_v28 = vrot.slane %v4284_v55, 4  ;;  %v4292_v17 = vrot.slane %v4291_v11, 4  ;;  %v4298_v33 = vsel %vm3660_vm7, %v3378_v5, -inf }
 0x2b4   : > { %v4142_v40 = vrot.slane %v4141_v29, 1  ;;  %v4148_v31 = vmax.f32 %v4146_v49, %v4147_v18  ;;  %v4155_v8 = vmax.f32 %v4153_v41, %v4154_v47  ;;  %v4161_v26 = vrot.slane %v4160_v24, 2 }
 0x2b5   : > { %v4280_v58 = vrot.slane %v4279_v42, 2  ;;  %v4286_v2 = vmax.f32 %v4284_v55, %v4285_v28  ;;  %v4293_v6 = vmax.f32 %v4291_v11, %v4292_v17  ;;  %v4299_v59 = vrot.slane %v4298_v33, 4 }
 0x2b6   : > { %v4143_v12 = vmax.f32 %v4141_v29, %v4142_v40  ;;  %v4149_v1 = vrot.slane %v4148_v31, 1  ;;  %v4156_v46 = vrot.slane %v4155_v8, 1  ;;  %v4162_v63 = vmax.f32 %v4160_v24, %v4161_v26 }
 0x2b7   : > { %v4281_v14 = vmax.f32 %v4279_v42, %v4280_v58  ;;  %v4287_v16 = vrot.slane %v4286_v2, 2  ;;  %v4294_v4 = vrot.slane %v4293_v6, 2  ;;  %v4300_v48 = vmax.f32 %v4298_v33, %v4299_v59 }
 0x2b8   : > { %v4150_v21 = vmax.f32 %v4148_v31, %v4149_v1  ;;  %v4157_v44 = vmax.f32 %v4155_v8, %v4156_v46  ;;  %v4163_v25 = vrot.slane %v4162_v63, 1  ;;  %v4665_v7 = vsel %vm810_vm3, %v4143_v12, -inf }
 0x2b9   : > { %v4667_v61 = vmax.f32 %v4665_v7, %v7943_v39  ;;  %v4282_v45 = vrot.slane %v4281_v14, 1  ;;  %v4288_v30 = vmax.f32 %v4286_v2, %v4287_v16  ;;  %v4295_v32 = vmax.f32 %v4293_v6, %v4294_v4 }
 0x2ba   : > { %v4164_v36 = vmax.f32 %v4162_v63, %v4163_v25  ;;  %v4668_v9 = vsel %vm810_vm3, %v4150_v21, -inf  ;;  %v4671_v20 = vsel %vm810_vm3, %v4157_v44, -inf  ;;  %v4301_v0 = vrot.slane %v4300_v48, 2 }
 0x2bb   : > { %v4670_v56 = vmax.f32 %v4668_v9, %v7947_v50  ;;  %v4673_v57 = vmax.f32 %v4671_v20, %v7950_v3  ;;  %v5672_v54 = vpack.c.bf16 %v4667_v61, %v4667_v61  ;;  %v4283_v49 = vmax.f32 %v4281_v14, %v4282_v45 }
 0x2bc   : > { %v4674_v41 = vsel %vm810_vm3, %v4164_v36, -inf  ;;  %v4289_v37 = vrot.slane %v4288_v30, 1  ;;  %v4296_v5 = vrot.slane %v4295_v32, 1  ;;  %v4302_v39 = vmax.f32 %v4300_v48, %v4301_v0 }
 0x2bd   : > { %v4676_v62 = vmax.f32 %v4674_v41, %v7959_v60  ;;  %v5673_v55 = vpack.c.bf16 %v4670_v56, %v4670_v56  ;;  %v5674_v11 = vpack.c.bf16 %v4673_v57, %v4673_v57  ;;  %v5041_v29 = vunpack.c.l.b16 %v5672_v54 }
 0x2be   : > { %v4290_v18 = vmax.f32 %v4288_v30, %v4289_v37  ;;  %v4297_v47 = vmax.f32 %v4295_v32, %v4296_v5  ;;  %v4303_v24 = vrot.slane %v4302_v39, 1  ;;  %v2947_v42 = vmax.f32 %v7965_v27, 0.0 }
 0x2bf   : > { %v5675_v50 = vpack.c.bf16 %v4676_v62, %v4676_v62  ;;  %v5042_v28 = vunpack.c.l.b16 %v5673_v55  ;;  %v5043_v3 = vunpack.c.l.b16 %v5674_v11  ;;  %v5107_v17 = vsel %vm5075_vm11, %v5041_v29, %v7963_v22 }
 0x2c0   : > { %v4304_v33 = vmax.f32 %v4302_v39, %v4303_v24  ;;  %v4678_v40 = vsel %vm810_vm3, %v4283_v49, -inf  ;;  %v8002_v31 = vsel %vm810_vm3, %v4290_v18, -inf  ;;  %v3343_v60 = vcombine.high %v7978_v13, %v7978_v13 }
 0x2c1   : > { %v5044_v8 = vunpack.c.l.b16 %v5675_v50  ;;  %v5108_v26 = vsel %vm5077_vm12, %v5042_v28, %v5107_v17  ;;  %v3344_v27 = vcombine.high %v7984_v35, %v7984_v35  ;;  %v4221_v58 = vsel %vm3660_vm7, %v7978_v13, -inf }
 0x2c2   : > { %v5109_v22 = vsel %vm5079_vm13, %v5043_v3, %v5108_v26  ;;  %v4684_v2 = vsel %vm810_vm3, %v4297_v47, -inf  ;;  %v4222_v6 = vrot.slane %v4221_v58, 4  ;;  %v4228_v59 = vsel %vm3660_vm7, %v3343_v60, -inf }
 0x2c3   : > { %v5110_v12 = vsel %vm5081_vm14, %v5044_v8, %v5109_v22  ;;  %v4229_v1 = vrot.slane %v4228_v59, 4  ;;  %v4235_v46 = vsel %vm3660_vm7, %v7984_v35, -inf  ;;  %v4242_v63 = vsel %vm3660_vm7, %v3344_v27, -inf }
 0x2c4   : > { %v5136_v14 = vpack.c.b16 %v5110_v12, %v5110_v12  ;;  %v4223_v16 = vmax.f32 %v4221_v58, %v4222_v6  ;;  %v4236_v4 = vrot.slane %v4235_v46, 4  ;;  %v4243_v13 = vrot.slane %v4242_v63, 4 }
 0x2c5   : > { %v4687_v48 = vsel %vm810_vm3, %v4304_v33, -inf  ;;  %v4230_v21 = vmax.f32 %v4228_v59, %v4229_v1  ;;  %v3379_v44 = vcombine.high %v2947_v42, %v2947_v42  ;;  %v3386_v25 = vrot.slane %v2947_v42, %v7586_v52 }
 0x2c6   : > { %5153 = vst.msk [vmem:[%s7660_s9 + $0x10] sm:$0xf] %vm5148_vm15, %v5136_v14  ;;  %v4224_v7 = vrot.slane %v4223_v16, 2  ;;  %v4237_v61 = vmax.f32 %v4235_v46, %v4236_v4  ;;  %v4244_v45 = vmax.f32 %v4242_v63, %v4243_v13  ;;  %v8023_v30 = vmax.f32 %v7967_v23, 0.0 }
 0x2c7   : > { %v4231_v35 = vrot.slane %v4230_v21, 2  ;;  %v3393_v32 = vrot.slane %v3379_v44, %v7586_v52  ;;  %v3394_v36 = vcombine.high %v3386_v25, %v3386_v25  ;;  %v4305_v9 = vsel %vm3660_vm7, %v3386_v25, -inf }
 0x2c8   : > { %v4225_v20 = vmax.f32 %v4223_v16, %v4224_v7  ;;  %v4238_v0 = vrot.slane %v4237_v61, 2  ;;  %v4245_v56 = vrot.slane %v4244_v45, 2  ;;  %v4306_v57 = vrot.slane %v4305_v9, 4 }
 0x2c9   : > { %v4232_v54 = vmax.f32 %v4230_v21, %v4231_v35  ;;  %v3395_v49 = vcombine.high %v3393_v32, %v3393_v32  ;;  %v4312_v41 = vsel %vm3660_vm7, %v3394_v36, -inf  ;;  %v4319_v37 = vsel %vm3660_vm7, %v3393_v32, -inf  ;;  %v6234_v21 = vpop.f32.mrf.mxu0 }
 0x2ca   : > { %v4226_v5 = vrot.slane %v4225_v20, 1  ;;  %v4239_v39 = vmax.f32 %v4237_v61, %v4238_v0  ;;  %v4246_v23 = vmax.f32 %v4244_v45, %v4245_v56  ;;  %v4307_v62 = vmax.f32 %v4305_v9, %v4306_v57 }
 0x2cb   : > { %v4233_v55 = vrot.slane %v4232_v54, 1  ;;  %v4313_v11 = vrot.slane %v4312_v41, 4  ;;  %v4320_v29 = vrot.slane %v4319_v37, 4  ;;  %v4326_v18 = vsel %vm3660_vm7, %v3395_v49, -inf }
 0x2cc   : > { %v4227_v47 = vmax.f32 %v4225_v20, %v4226_v5  ;;  %v4240_v24 = vrot.slane %v4239_v39, 1  ;;  %v4247_v42 = vrot.slane %v4246_v23, 1  ;;  %v4308_v50 = vrot.slane %v4307_v62, 2 }
 0x2cd   : > { %v4234_v28 = vmax.f32 %v4232_v54, %v4233_v55  ;;  %v4314_v3 = vmax.f32 %v4312_v41, %v4313_v11  ;;  %v4321_v17 = vmax.f32 %v4319_v37, %v4320_v29  ;;  %v4327_v33 = vrot.slane %v4326_v18, 4 }
 0x2ce   : > { %v4241_v60 = vmax.f32 %v4239_v39, %v4240_v24  ;;  %v4248_v8 = vmax.f32 %v4246_v23, %v4247_v42  ;;  %v4677_v26 = vsel %vm810_vm3, %v4227_v47, -inf  ;;  %v4309_v27 = vmax.f32 %v4307_v62, %v4308_v50 }
 0x2cf   : > { %v4679_v58 = vmax.f32 %v4677_v26, %v4678_v40  ;;  %v4680_v22 = vsel %vm810_vm3, %v4234_v28, -inf  ;;  %v4315_v6 = vrot.slane %v4314_v3, 2  ;;  %v4322_v59 = vrot.slane %v4321_v17, 2 }
 0x2d0   : > { %v4682_v12 = vmax.f32 %v4680_v22, %v8002_v31  ;;  %v4683_v1 = vsel %vm810_vm3, %v4241_v60, -inf  ;;  %v4686_v46 = vsel %vm810_vm3, %v4248_v8, -inf  ;;  %v4310_v63 = vrot.slane %v4309_v27, 1  ;;  %v8059_v22 = vpop.f32.mrf.mxu1 }
 0x2d1   : > { %v4685_v14 = vmax.f32 %v4683_v1, %v4684_v2  ;;  %v4688_v16 = vmax.f32 %v4686_v46, %v4687_v48  ;;  %v5676_v4 = vpack.c.bf16 %v4679_v58, %v4679_v58  ;;  %v4316_v13 = vmax.f32 %v4314_v3, %v4315_v6 }
 0x2d2   : > { %v5677_v44 = vpack.c.bf16 %v4682_v12, %v4682_v12  ;;  %v4323_v25 = vmax.f32 %v4321_v17, %v4322_v59  ;;  %v4328_v7 = vmax.f32 %v4326_v18, %v4327_v33  ;;  %v2918_v40 = vadd.f32 %v6234_v21, %v7972_v15 }
 0x2d3   : > { %v5678_v61 = vpack.c.bf16 %v4685_v14, %v4685_v14  ;;  %v5679_v45 = vpack.c.bf16 %v4688_v16, %v4688_v16  ;;  %v4311_v35 = vmax.f32 %v4309_v27, %v4310_v63  ;;  %v4317_v32 = vrot.slane %v4316_v13, 1 }
 0x2d4   : > { %v5045_v31 = vunpack.c.l.b16 %v5676_v4  ;;  %v5046_v36 = vunpack.c.l.b16 %v5677_v44  ;;  %v4324_v9 = vrot.slane %v4323_v25, 1  ;;  %v4329_v20 = vrot.slane %v4328_v7, 2 }
 0x2d5   : > { %v5047_v0 = vunpack.c.l.b16 %v5678_v61  ;;  %v5048_v56 = vunpack.c.l.b16 %v5679_v45  ;;  %v4318_v2 = vmax.f32 %v4316_v13, %v4317_v32  ;;  %v3345_v48 = vcombine.high %v8023_v30, %v8023_v30  ;;  %v6195_v45 = vpop.f32.mrf.mxu1 }
 0x2d6   : > { %v5111_v57 = vsel %vm5069_vm8, %v5046_v36, %v5045_v31  ;;  %v4325_v54 = vmax.f32 %v4323_v25, %v4324_v9  ;;  %v4330_v49 = vmax.f32 %v4328_v7, %v4329_v20  ;;  %v3352_v15 = vrot.slane %v8023_v30, %v7586_v52 }
 0x2d7   : > { %v5112_v41 = vsel %vm5071_vm9, %v5047_v0, %v5111_v57  ;;  %v8043_v37 = vsel %vm810_vm3, %v4311_v35, -inf  ;;  %v3359_v5 = vrot.slane %v3345_v48, %v7586_v52  ;;  %v2950_v39 = vmax.f32 %v2918_v40, 0.0 }
 0x2d8   : > { %v4331_v23 = vrot.slane %v4330_v49, 1  ;;  %v8047_v62 = vsel %vm810_vm3, %v4318_v2, -inf  ;;  %v3360_v55 = vcombine.high %v3352_v15, %v3352_v15  ;;  %v4249_v11 = vsel %vm3660_vm7, %v3352_v15, -inf  ;;  %v2861_v2 = vpop.f32.mrf.mxu0 }
 0x2d9   : > { %v3361_v29 = vcombine.high %v3359_v5, %v3359_v5  ;;  %v4250_v18 = vrot.slane %v4249_v11, 4  ;;  %v4263_v47 = vsel %vm3660_vm7, %v3359_v5, -inf  ;;  %v8052_v30 = vsel %vm5073_vm10, %v5048_v56, %v5112_v41 }
 0x2da   : > { %v4696_v24 = vsel %vm810_vm3, %v4325_v54, -inf  ;;  %v4256_v42 = vsel %vm3660_vm7, %v3360_v55, -inf  ;;  %v4264_v50 = vrot.slane %v4263_v47, 4  ;;  %v3430_v28 = vcombine.high %v2950_v39, %v2950_v39 }
 0x2db   : > { %v4251_v3 = vmax.f32 %v4249_v11, %v4250_v18  ;;  %v4257_v17 = vrot.slane %v4256_v42, 4  ;;  %v4270_v33 = vsel %vm3660_vm7, %v3361_v29, -inf  ;;  %v3437_v60 = vrot.slane %v2950_v39, %v7586_v52 }
 0x2dc   : > { %v4332_v8 = vmax.f32 %v4330_v49, %v4331_v23  ;;  %v4265_v26 = vmax.f32 %v4263_v47, %v4264_v50  ;;  %v4271_v27 = vrot.slane %v4270_v33, 4  ;;  %v3444_v58 = vrot.slane %v3430_v28, %v7586_v52  ;;  %v2635_v23 = vpop.f32.mrf.mxu1 }
 0x2dd   : > { %v4252_v6 = vrot.slane %v4251_v3, 2  ;;  %v4258_v59 = vmax.f32 %v4256_v42, %v4257_v17  ;;  %v3445_v12 = vcombine.high %v3437_v60, %v3437_v60  ;;  %v4389_v1 = vsel %vm3660_vm7, %v3437_v60, -inf }
 0x2de   : > { %v4266_v46 = vrot.slane %v4265_v26, 2  ;;  %v4272_v63 = vmax.f32 %v4270_v33, %v4271_v27  ;;  %v3446_v14 = vcombine.high %v3444_v58, %v3444_v58  ;;  %v4390_v16 = vrot.slane %v4389_v1, 4 }
 0x2df   : > { %v4253_v4 = vmax.f32 %v4251_v3, %v4252_v6  ;;  %v4259_v13 = vrot.slane %v4258_v59, 2  ;;  %v4396_v21 = vsel %vm3660_vm7, %v3445_v12, -inf  ;;  %v4403_v44 = vsel %vm3660_vm7, %v3444_v58, -inf  ;;  %v6235_v3 = vpop.f32.mrf.mxu0  ;;  %v6198_v12 = vpop.f32.mrf.mxu1 }
 0x2e0   : > { %v4267_v25 = vmax.f32 %v4265_v26, %v4266_v46  ;;  %v4273_v7 = vrot.slane %v4272_v63, 2  ;;  %v4391_v40 = vmax.f32 %v4389_v1, %v4390_v16  ;;  %v4397_v61 = vrot.slane %v4396_v21, 4 }
 0x2e1   : > { %v4254_v35 = vrot.slane %v4253_v4, 1  ;;  %v4260_v32 = vmax.f32 %v4258_v59, %v4259_v13  ;;  %v4404_v31 = vrot.slane %v4403_v44, 4  ;;  %v4410_v36 = vsel %vm3660_vm7, %v3446_v14, -inf  ;;  %v2864_v13 = vpop.f32.mrf.mxu0 }
 0x2e2   : > { %v4268_v9 = vrot.slane %v4267_v25, 1  ;;  %v4274_v20 = vmax.f32 %v4272_v63, %v4273_v7  ;;  %v4392_v0 = vrot.slane %v4391_v40, 2  ;;  %v4398_v56 = vmax.f32 %v4396_v21, %v4397_v61 }
 0x2e3   : > { %v4255_v48 = vmax.f32 %v4253_v4, %v4254_v35  ;;  %v4261_v57 = vrot.slane %v4260_v32, 1  ;;  %v4405_v54 = vmax.f32 %v4403_v44, %v4404_v31  ;;  %v4411_v49 = vrot.slane %v4410_v36, 4 }
 0x2e4   : > { %v4269_v15 = vmax.f32 %v4267_v25, %v4268_v9  ;;  %v4275_v41 = vrot.slane %v4274_v20, 1  ;;  %v4393_v5 = vmax.f32 %v4391_v40, %v4392_v0  ;;  %v4399_v39 = vrot.slane %v4398_v56, 2  ;;  %v2648_v40 = vpop.f32.mrf.mxu1 }
 0x2e5   : > { %v4262_v55 = vmax.f32 %v4260_v32, %v4261_v57  ;;  %v4689_v11 = vsel %vm810_vm3, %v4255_v48, -inf  ;;  %v4406_v29 = vrot.slane %v4405_v54, 2  ;;  %v4412_v18 = vmax.f32 %v4410_v36, %v4411_v49 }
 0x2e6   : > { %v4276_v47 = vmax.f32 %v4274_v20, %v4275_v41  ;;  %v4691_v42 = vmax.f32 %v4689_v11, %v8043_v37  ;;  %v4695_v50 = vsel %vm810_vm3, %v4269_v15, -inf  ;;  %v4394_v28 = vrot.slane %v4393_v5, 1 }
 0x2e7   : > { %v4692_v17 = vsel %vm810_vm3, %v4262_v55, -inf  ;;  %v4697_v33 = vmax.f32 %v4695_v50, %v4696_v24  ;;  %v4400_v60 = vmax.f32 %v4398_v56, %v4399_v39  ;;  %v4407_v26 = vmax.f32 %v4405_v54, %v4406_v29  ;;  %v6238_v56 = vpop.f32.mrf.mxu0 }
 0x2e8   : > { %v4699_v27 = vsel %vm810_vm3, %v4332_v8, -inf  ;;  %v4694_v58 = vmax.f32 %v4692_v17, %v8047_v62  ;;  %v4698_v6 = vsel %vm810_vm3, %v4276_v47, -inf  ;;  %v5680_v59 = vpack.c.bf16 %v4691_v42, %v4691_v42 }
 0x2e9   : > { %v4700_v1 = vmax.f32 %v4698_v6, %v4699_v27  ;;  %v5682_v46 = vpack.c.bf16 %v4697_v33, %v4697_v33  ;;  %v4401_v37 = vrot.slane %v4400_v60, 1  ;;  %v4408_v63 = vrot.slane %v4407_v26, 1  ;;  %v2877_v39 = vpop.f32.mrf.mxu0 }
 0x2ea   : > { %v5681_v14 = vpack.c.bf16 %v4694_v58, %v4694_v58  ;;  %v5049_v16 = vunpack.c.l.b16 %v5680_v59  ;;  %v4413_v4 = vrot.slane %v4412_v18, 2  ;;  %v4395_v44 = vmax.f32 %v4393_v5, %v4394_v28 }
 0x2eb   : > { %v5683_v21 = vpack.c.bf16 %v4700_v1, %v4700_v1  ;;  %v5051_v24 = vunpack.c.l.b16 %v5682_v46  ;;  %v2687_v7 = vadd.f32 %v8059_v22, %v7555_v51  ;;  %v4402_v35 = vmax.f32 %v4400_v60, %v4401_v37 }
 0x2ec   : > { %v5050_v25 = vunpack.c.l.b16 %v5681_v14  ;;  %v5114_v8 = vsel %vm5075_vm11, %v5049_v16, %v8052_v30  ;;  %v4414_v62 = vmax.f32 %v4412_v18, %v4413_v4  ;;  %v4409_v32 = vmax.f32 %v4407_v26, %v4408_v63 }
 0x2ed   : > { %v5052_v61 = vunpack.c.l.b16 %v5683_v21  ;;  %v2690_v31 = vadd.f32 %v6195_v45, %v7558_v10  ;;  %v2916_v20 = vadd.f32 %v2861_v2, %v2687_v7  ;;  %v2688_v0 = vadd.f32 %v2635_v23, %v7561_v19 }
 0x2ee   : > { %v5115_v36 = vsel %vm5077_vm12, %v5050_v25, %v5114_v8  ;;  %v4415_v9 = vrot.slane %v4414_v62, 1  ;;  %v2693_v57 = vadd.f32 %v6198_v12, %v7566_v43  ;;  %v2691_v51 = vadd.f32 %v2648_v40, %v7571_v34 }
 0x2ef   : > { %v5116_v48 = vsel %vm5079_vm13, %v5051_v24, %v5115_v36  ;;  %v2919_v30 = vadd.f32 %v6235_v3, %v2690_v31  ;;  %v2948_v49 = vmax.f32 %v2916_v20, 0.0  ;;  %v2917_v10 = vadd.f32 %v2864_v13, %v2688_v0 }
 0x2f0   : > { %v5117_v22 = vsel %vm5081_vm14, %v5052_v61, %v5116_v48  ;;  %v4416_v54 = vmax.f32 %v4414_v62, %v4415_v9  ;;  %v8084_v15 = vsel %vm810_vm3, %v4395_v44, -inf  ;;  %v8087_v19 = vsel %vm810_vm3, %v4402_v35, -inf }
 0x2f1   : > { %v5137_v45 = vpack.c.b16 %v5117_v22, %v5117_v22  ;;  %v2951_v2 = vmax.f32 %v2919_v30, 0.0  ;;  %v8090_v41 = vsel %vm810_vm3, %v4409_v32, -inf  ;;  %v3396_v5 = vcombine.high %v2948_v49, %v2948_v49 }
 0x2f2   : > { %v3403_v43 = vrot.slane %v2948_v49, %v7586_v52  ;;  %v8093_v34 = vadd.f32 %v6238_v56, %v2693_v57  ;;  %v8098_v23 = vsel %vm810_vm3, %v4416_v54, -inf  ;;  %v8101_v29 = vadd.f32 %v2877_v39, %v2691_v51 }
 0x2f3   : > { %5154 = vst.msk [vmem:[%s7660_s9 + $0x14] sm:$0xf] %vm5148_vm15, %v5137_v45  ;;  %v3447_v55 = vcombine.high %v2951_v2, %v2951_v2  ;;  %v3454_v11 = vrot.slane %v2951_v2, %v7586_v52  ;;  %v3410_v18 = vrot.slane %v3396_v5, %v7586_v52  ;;  %v8105_v50 = vmax.f32 %v2917_v10, 0.0 }
 0x2f4   : > { %v3411_v47 = vcombine.high %v3403_v43, %v3403_v43  ;;  %v4333_v42 = vsel %vm3660_vm7, %v3403_v43, -inf }
 0x2f5   : > { %v4334_v28 = vrot.slane %v4333_v42, 4  ;;  %v3461_v3 = vrot.slane %v3447_v55, %v7586_v52  ;;  %v3462_v17 = vcombine.high %v3454_v11, %v3454_v11  ;;  %v4417_v33 = vsel %vm3660_vm7, %v3454_v11, -inf }
 0x2f6   : > { %v3412_v60 = vcombine.high %v3410_v18, %v3410_v18  ;;  %v4340_v26 = vsel %vm3660_vm7, %v3411_v47, -inf  ;;  %v4347_v27 = vsel %vm3660_vm7, %v3410_v18, -inf  ;;  %v4418_v58 = vrot.slane %v4417_v33, 4 }
 0x2f7   : > { %v4335_v6 = vmax.f32 %v4333_v42, %v4334_v28  ;;  %v4341_v59 = vrot.slane %v4340_v26, 4  ;;  %v4348_v12 = vrot.slane %v4347_v27, 4  ;;  %v3463_v1 = vcombine.high %v3461_v3, %v3461_v3 }
 0x2f8   : > { %v4354_v46 = vsel %vm3660_vm7, %v3412_v60, -inf  ;;  %v4419_v37 = vmax.f32 %v4417_v33, %v4418_v58  ;;  %v4424_v63 = vsel %vm3660_vm7, %v3462_v17, -inf  ;;  %v4431_v14 = vsel %vm3660_vm7, %v3461_v3, -inf }
 0x2f9   : > { %v4336_v16 = vrot.slane %v4335_v6, 2  ;;  %v4342_v4 = vmax.f32 %v4340_v26, %v4341_v59  ;;  %v4349_v13 = vmax.f32 %v4347_v27, %v4348_v12  ;;  %v4355_v21 = vrot.slane %v4354_v46, 4 }
 0x2fa   : > { %v4420_v24 = vrot.slane %v4419_v37, 2  ;;  %v4425_v44 = vrot.slane %v4424_v63, 4  ;;  %v4432_v25 = vrot.slane %v4431_v14, 4  ;;  %v4438_v8 = vsel %vm3660_vm7, %v3463_v1, -inf }
 0x2fb   : > { %v4337_v62 = vmax.f32 %v4335_v6, %v4336_v16  ;;  %v4343_v7 = vrot.slane %v4342_v4, 2  ;;  %v4350_v40 = vrot.slane %v4349_v13, 2  ;;  %v4356_v61 = vmax.f32 %v4354_v46, %v4355_v21 }
 0x2fc   : > { %v4421_v35 = vmax.f32 %v4419_v37, %v4420_v24  ;;  %v4426_v32 = vmax.f32 %v4424_v63, %v4425_v44  ;;  %v4433_v31 = vmax.f32 %v4431_v14, %v4432_v25  ;;  %v4439_v36 = vrot.slane %v4438_v8, 4 }
 0x2fd   : > { %v4338_v9 = vrot.slane %v4337_v62, 1  ;;  %v4344_v20 = vmax.f32 %v4342_v4, %v4343_v7  ;;  %v4351_v0 = vmax.f32 %v4349_v13, %v4350_v40  ;;  %v4357_v56 = vrot.slane %v4356_v61, 2 }
 0x2fe   : > { %v4422_v48 = vrot.slane %v4421_v35, 1  ;;  %v4427_v30 = vrot.slane %v4426_v32, 2  ;;  %v4434_v57 = vrot.slane %v4433_v31, 2  ;;  %v4440_v51 = vmax.f32 %v4438_v8, %v4439_v36 }
 0x2ff   : > { %v4339_v22 = vmax.f32 %v4337_v62, %v4338_v9  ;;  %v4345_v54 = vrot.slane %v4344_v20, 1  ;;  %v4352_v49 = vrot.slane %v4351_v0, 1  ;;  %v4358_v10 = vmax.f32 %v4356_v61, %v4357_v56 }
 0x300   : > { %v4428_v45 = vmax.f32 %v4426_v32, %v4427_v30  ;;  %v4435_v2 = vmax.f32 %v4433_v31, %v4434_v57  ;;  %v4441_v5 = vrot.slane %v4440_v51, 2  ;;  %v3413_v43 = vcombine.high %v8105_v50, %v8105_v50 }
 0x301   : > { %v4346_v39 = vmax.f32 %v4344_v20, %v4345_v54  ;;  %v4353_v55 = vmax.f32 %v4351_v0, %v4352_v49  ;;  %v4359_v11 = vrot.slane %v4358_v10, 1  ;;  %v4701_v18 = vsel %vm810_vm3, %v4339_v22, -inf }
 0x302   : > { %v4703_v47 = vmax.f32 %v4701_v18, %v8084_v15  ;;  %v4423_v42 = vmax.f32 %v4421_v35, %v4422_v48  ;;  %v4429_v28 = vrot.slane %v4428_v45, 1  ;;  %v4442_v3 = vmax.f32 %v4440_v51, %v4441_v5 }
 0x303   : > { %v4360_v17 = vmax.f32 %v4358_v10, %v4359_v11  ;;  %v4704_v33 = vsel %vm810_vm3, %v4346_v39, -inf  ;;  %v4707_v60 = vsel %vm810_vm3, %v4353_v55, -inf  ;;  %v4436_v26 = vrot.slane %v4435_v2, 1 }
 0x304   : > { %v4706_v27 = vmax.f32 %v4704_v33, %v8087_v19  ;;  %v4709_v58 = vmax.f32 %v4707_v60, %v8090_v41  ;;  %v5684_v6 = vpack.c.bf16 %v4703_v47, %v4703_v47  ;;  %v2954_v59 = vmax.f32 %v8093_v34, 0.0 }
 0x305   : > { %v4710_v12 = vsel %vm810_vm3, %v4360_v17, -inf  ;;  %v4443_v1 = vrot.slane %v4442_v3, 1  ;;  %v3420_v15 = vrot.slane %v8105_v50, %v7586_v52  ;;  %v8128_v46 = vmax.f32 %v8101_v29, 0.0 }
 0x306   : > { %v4712_v37 = vmax.f32 %v4710_v12, %v8098_v23  ;;  %v5685_v63 = vpack.c.bf16 %v4706_v27, %v4706_v27  ;;  %v5686_v14 = vpack.c.bf16 %v4709_v58, %v4709_v58  ;;  %v8132_v19 = vsel %vm810_vm3, %v4423_v42, -inf }
 0x307   : > { %v5053_v41 = vunpack.c.l.b16 %v5684_v6  ;;  %v4430_v16 = vmax.f32 %v4428_v45, %v4429_v28  ;;  %v4437_v4 = vmax.f32 %v4435_v2, %v4436_v26  ;;  %v3427_v34 = vrot.slane %v3413_v43, %v7586_v52 }
 0x308   : > { %v5687_v13 = vpack.c.bf16 %v4712_v37, %v4712_v37  ;;  %v5054_v21 = vunpack.c.l.b16 %v5685_v63  ;;  %v5055_v24 = vunpack.c.l.b16 %v5686_v14  ;;  %v3428_v44 = vcombine.high %v3420_v15, %v3420_v15 }
 0x309   : > { %v4444_v50 = vmax.f32 %v4442_v3, %v4443_v1  ;;  %v3429_v25 = vcombine.high %v3427_v34, %v3427_v34  ;;  %v4361_v29 = vsel %vm3660_vm7, %v3420_v15, -inf  ;;  %v4375_v23 = vsel %vm3660_vm7, %v3427_v34, -inf }
 0x30a   : > { %v5056_v8 = vunpack.c.l.b16 %v5687_v13  ;;  %v5118_v62 = vsel %vm5069_vm8, %v5054_v21, %v5053_v41  ;;  %v4362_v7 = vrot.slane %v4361_v29, 4  ;;  %v4368_v40 = vsel %vm3660_vm7, %v3428_v44, -inf }
 0x30b   : > { %v5119_v61 = vsel %vm5071_vm9, %v5055_v24, %v5118_v62  ;;  %v4369_v35 = vrot.slane %v4368_v40, 4  ;;  %v4376_v32 = vrot.slane %v4375_v23, 4  ;;  %v4382_v31 = vsel %vm3660_vm7, %v3429_v25, -inf }
 0x30c   : > { %v4363_v36 = vmax.f32 %v4361_v29, %v4362_v7  ;;  %v4383_v9 = vrot.slane %v4382_v31, 4  ;;  %v8142_v20 = vsel %vm5073_vm10, %v5056_v8, %v5119_v61  ;;  %v3498_v0 = vcombine.high %v2954_v59, %v2954_v59 }
 0x30d   : > { %v4717_v56 = vsel %vm810_vm3, %v4430_v16, -inf  ;;  %v4370_v48 = vmax.f32 %v4368_v40, %v4369_v35  ;;  %v4377_v30 = vmax.f32 %v4375_v23, %v4376_v32  ;;  %v3505_v57 = vrot.slane %v2954_v59, %v7586_v52 }
 0x30e   : > { %v4720_v51 = vsel %vm810_vm3, %v4437_v4, -inf  ;;  %v4364_v22 = vrot.slane %v4363_v36, 2  ;;  %v4384_v54 = vmax.f32 %v4382_v31, %v4383_v9  ;;  %v3512_v49 = vrot.slane %v3498_v0, %v7586_v52 }
 0x30f   : > { %v4371_v10 = vrot.slane %v4370_v48, 2  ;;  %v4378_v45 = vrot.slane %v4377_v30, 2  ;;  %v3513_v2 = vcombine.high %v3505_v57, %v3505_v57  ;;  %v4501_v5 = vsel %vm3660_vm7, %v3505_v57, -inf }
 0x310   : > { %v4365_v43 = vmax.f32 %v4363_v36, %v4364_v22  ;;  %v4385_v39 = vrot.slane %v4384_v54, 2  ;;  %v3514_v55 = vcombine.high %v3512_v49, %v3512_v49  ;;  %v4502_v11 = vrot.slane %v4501_v5, 4 }
 0x311   : > { %v4372_v18 = vmax.f32 %v4370_v48, %v4371_v10  ;;  %v4379_v47 = vmax.f32 %v4377_v30, %v4378_v45  ;;  %v4508_v42 = vsel %vm3660_vm7, %v3513_v2, -inf  ;;  %v4515_v28 = vsel %vm3660_vm7, %v3512_v49, -inf }
 0x312   : > { %v4366_v3 = vrot.slane %v4365_v43, 1  ;;  %v4386_v17 = vmax.f32 %v4384_v54, %v4385_v39  ;;  %v4503_v33 = vmax.f32 %v4501_v5, %v4502_v11  ;;  %v4509_v60 = vrot.slane %v4508_v42, 4  ;;  %v6199_v54 = vpop.f32.mrf.mxu1 }
 0x313   : > { %v4373_v26 = vrot.slane %v4372_v18, 1  ;;  %v4380_v27 = vrot.slane %v4379_v47, 1  ;;  %v4516_v58 = vrot.slane %v4515_v28, 4  ;;  %v4522_v6 = vsel %vm3660_vm7, %v3514_v55, -inf }
 0x314   : > { %v4367_v59 = vmax.f32 %v4365_v43, %v4366_v3  ;;  %v4387_v12 = vrot.slane %v4386_v17, 1  ;;  %v4504_v1 = vrot.slane %v4503_v33, 2  ;;  %v4510_v15 = vmax.f32 %v4508_v42, %v4509_v60 }
 0x315   : > { %v4374_v37 = vmax.f32 %v4372_v18, %v4373_v26  ;;  %v4381_v63 = vmax.f32 %v4379_v47, %v4380_v27  ;;  %v4517_v14 = vmax.f32 %v4515_v28, %v4516_v58  ;;  %v4523_v41 = vrot.slane %v4522_v6, 4  ;;  %v6239_v58 = vpop.f32.mrf.mxu0 }
 0x316   : > { %v4388_v16 = vmax.f32 %v4386_v17, %v4387_v12  ;;  %v4713_v4 = vsel %vm810_vm3, %v4367_v59, -inf  ;;  %v4505_v34 = vmax.f32 %v4503_v33, %v4504_v1  ;;  %v4511_v13 = vrot.slane %v4510_v15, 2  ;;  %v2651_v17 = vpop.f32.mrf.mxu1 }
 0x317   : > { %v4715_v21 = vmax.f32 %v4713_v4, %v8132_v19  ;;  %v4716_v24 = vsel %vm810_vm3, %v4374_v37, -inf  ;;  %v4719_v44 = vsel %vm810_vm3, %v4381_v63, -inf  ;;  %v4518_v25 = vrot.slane %v4517_v14, 2 }
 0x318   : > { %v4723_v29 = vsel %vm810_vm3, %v4444_v50, -inf  ;;  %v4718_v23 = vmax.f32 %v4716_v24, %v4717_v56  ;;  %v4721_v8 = vmax.f32 %v4719_v44, %v4720_v51  ;;  %v4722_v62 = vsel %vm810_vm3, %v4388_v16, -inf }
 0x319   : > { %v4724_v7 = vmax.f32 %v4722_v62, %v4723_v29  ;;  %v5688_v40 = vpack.c.bf16 %v4715_v21, %v4715_v21  ;;  %v4512_v61 = vmax.f32 %v4510_v15, %v4511_v13  ;;  %v3464_v35 = vcombine.high %v8128_v46, %v8128_v46 }
 0x31a   : > { %v5689_v32 = vpack.c.bf16 %v4718_v23, %v4718_v23  ;;  %v5690_v31 = vpack.c.bf16 %v4721_v8, %v4721_v8  ;;  %v4524_v19 = vmax.f32 %v4522_v6, %v4523_v41  ;;  %v3471_v36 = vrot.slane %v8128_v46, %v7586_v52  ;;  %v2880_v23 = vpop.f32.mrf.mxu0 }
 0x31b   : > { %v5691_v9 = vpack.c.bf16 %v4724_v7, %v4724_v7  ;;  %v5057_v0 = vunpack.c.l.b16 %v5688_v40  ;;  %v4506_v48 = vrot.slane %v4505_v34, 1  ;;  %v4519_v50 = vmax.f32 %v4517_v14, %v4518_v25 }
 0x31c   : > { %v5058_v56 = vunpack.c.l.b16 %v5689_v32  ;;  %v5059_v30 = vunpack.c.l.b16 %v5690_v31  ;;  %v4513_v57 = vrot.slane %v4512_v61, 1  ;;  %v4525_v10 = vrot.slane %v4524_v19, 2 }
 0x31d   : > { %v5060_v51 = vunpack.c.l.b16 %v5691_v9  ;;  %v5121_v22 = vsel %vm5075_vm11, %v5057_v0, %v8142_v20  ;;  %v3478_v45 = vrot.slane %v3464_v35, %v7586_v52  ;;  %v3479_v2 = vcombine.high %v3471_v36, %v3471_v36 }
 0x31e   : > { %v5122_v49 = vsel %vm5077_vm12, %v5058_v56, %v5121_v22  ;;  %v4507_v5 = vmax.f32 %v4505_v34, %v4506_v48  ;;  %v4520_v43 = vrot.slane %v4519_v50, 1  ;;  %v4445_v39 = vsel %vm3660_vm7, %v3471_v36, -inf }
 0x31f   : > { %v5123_v46 = vsel %vm5079_vm13, %v5059_v30, %v5122_v49  ;;  %v4514_v11 = vmax.f32 %v4512_v61, %v4513_v57  ;;  %v3480_v18 = vcombine.high %v3478_v45, %v3478_v45  ;;  %v4446_v47 = vrot.slane %v4445_v39, 4 }
 0x320   : > { %v5124_v55 = vsel %vm5081_vm14, %v5060_v51, %v5123_v46  ;;  %v4452_v42 = vsel %vm3660_vm7, %v3479_v2, -inf  ;;  %v4459_v28 = vsel %vm3660_vm7, %v3478_v45, -inf  ;;  %v2694_v3 = vadd.f32 %v6199_v54, %v7577_v53 }
 0x321   : > { %v5138_v20 = vpack.c.b16 %v5124_v55, %v5124_v55  ;;  %v4526_v33 = vmax.f32 %v4524_v19, %v4525_v10  ;;  %v4447_v60 = vmax.f32 %v4445_v39, %v4446_v47  ;;  %v4453_v26 = vrot.slane %v4452_v42, 4 }
 0x322   : > { %v4460_v27 = vrot.slane %v4459_v28, 4  ;;  %v4521_v6 = vmax.f32 %v4519_v50, %v4520_v43  ;;  %v4466_v59 = vsel %vm3660_vm7, %v3480_v18, -inf  ;;  %v2923_v12 = vadd.f32 %v6239_v58, %v2694_v3 }
 0x323   : > { %5155 = vst.msk [vmem:[%s7660_s9 + $0x18] sm:$0xf] %vm5148_vm15, %v5138_v20  ;;  %v4448_v1 = vrot.slane %v4447_v60, 2  ;;  %v4454_v15 = vmax.f32 %v4452_v42, %v4453_v26  ;;  %v2692_v63 = vadd.f32 %v2651_v17, %v7581_v38  ;;  %v4726_v14 = vsel %vm810_vm3, %v4507_v5, -inf }
 0x324   : > { %v4461_v37 = vmax.f32 %v4459_v28, %v4460_v27  ;;  %v4729_v53 = vsel %vm810_vm3, %v4514_v11, -inf  ;;  %v4467_v41 = vrot.slane %v4466_v59, 4  ;;  %v2955_v16 = vmax.f32 %v2923_v12, 0.0 }
 0x325   : > { %v4527_v4 = vrot.slane %v4526_v33, 1  ;;  %v4449_v34 = vmax.f32 %v4447_v60, %v4448_v1  ;;  %v4455_v13 = vrot.slane %v4454_v15, 2  ;;  %v4732_v24 = vsel %vm810_vm3, %v4521_v6, -inf }
 0x326   : > { %v4462_v21 = vrot.slane %v4461_v37, 2  ;;  %v4468_v44 = vmax.f32 %v4466_v59, %v4467_v41  ;;  %v3515_v25 = vcombine.high %v2955_v16, %v2955_v16  ;;  %v3522_v29 = vrot.slane %v2955_v16, %v7586_v52 }
 0x327   : > { %v4450_v8 = vrot.slane %v4449_v34, 1  ;;  %v4456_v62 = vmax.f32 %v4454_v15, %v4455_v13  ;;  %v2921_v7 = vadd.f32 %v2880_v23, %v2692_v63  ;;  %v4528_v31 = vmax.f32 %v4526_v33, %v4527_v4 }
 0x328   : > { %v4463_v38 = vmax.f32 %v4461_v37, %v4462_v21  ;;  %v4469_v40 = vrot.slane %v4468_v44, 2  ;;  %v3529_v61 = vrot.slane %v3515_v25, %v7586_v52  ;;  %v3530_v35 = vcombine.high %v3522_v29, %v3522_v29 }
 0x329   : > { %v4529_v32 = vsel %vm3660_vm7, %v3522_v29, -inf  ;;  %v4451_v19 = vmax.f32 %v4449_v34, %v4450_v8  ;;  %v4457_v36 = vrot.slane %v4456_v62, 1  ;;  %v2953_v45 = vmax.f32 %v2921_v7, 0.0 }
 0x32a   : > { %v4464_v9 = vrot.slane %v4463_v38, 1  ;;  %v4470_v0 = vmax.f32 %v4468_v44, %v4469_v40  ;;  %v3531_v48 = vcombine.high %v3529_v61, %v3529_v61  ;;  %v4536_v50 = vsel %vm3660_vm7, %v3530_v35, -inf }
 0x32b   : > { %v4543_v56 = vsel %vm3660_vm7, %v3529_v61, -inf  ;;  %v4458_v30 = vmax.f32 %v4456_v62, %v4457_v36  ;;  %v4725_v51 = vsel %vm810_vm3, %v4451_v19, -inf  ;;  %v4530_v22 = vrot.slane %v4529_v32, 4 }
 0x32c   : > { %v4465_v57 = vmax.f32 %v4463_v38, %v4464_v9  ;;  %v4471_v54 = vrot.slane %v4470_v0, 1  ;;  %v4727_v49 = vmax.f32 %v4725_v51, %v4726_v14  ;;  %v4544_v10 = vrot.slane %v4543_v56, 4 }
 0x32d   : > { %v4728_v2 = vsel %vm810_vm3, %v4458_v30, -inf  ;;  %v4537_v5 = vrot.slane %v4536_v50, 4  ;;  %v4550_v43 = vsel %vm3660_vm7, %v3531_v48, -inf  ;;  %v4735_v47 = vsel %vm810_vm3, %v4528_v31, -inf }
 0x32e   : > { %v4731_v46 = vsel %vm810_vm3, %v4465_v57, -inf  ;;  %v4472_v39 = vmax.f32 %v4470_v0, %v4471_v54  ;;  %v4730_v55 = vmax.f32 %v4728_v2, %v4729_v53  ;;  %v5692_v18 = vpack.c.bf16 %v4727_v49, %v4727_v49 }
 0x32f   : > { %v4733_v11 = vmax.f32 %v4731_v46, %v4732_v24  ;;  %v4531_v20 = vmax.f32 %v4529_v32, %v4530_v22  ;;  %v4551_v42 = vrot.slane %v4550_v43, 4  ;;  %v4545_v33 = vmax.f32 %v4543_v56, %v4544_v10 }
 0x330   : > { %v4734_v28 = vsel %vm810_vm3, %v4472_v39, -inf  ;;  %v5693_v3 = vpack.c.bf16 %v4730_v55, %v4730_v55  ;;  %v5061_v26 = vunpack.c.l.b16 %v5692_v18  ;;  %v4538_v27 = vmax.f32 %v4536_v50, %v4537_v5 }
 0x331   : > { %v5694_v17 = vpack.c.bf16 %v4733_v11, %v4733_v11  ;;  %v4736_v60 = vmax.f32 %v4734_v28, %v4735_v47  ;;  %v4552_v59 = vmax.f32 %v4550_v43, %v4551_v42  ;;  %v3481_v12 = vcombine.high %v2953_v45, %v2953_v45 }
 0x332   : > { %v5062_v58 = vunpack.c.l.b16 %v5693_v3  ;;  %v4532_v15 = vrot.slane %v4531_v20, 2  ;;  %v4546_v63 = vrot.slane %v4545_v33, 2  ;;  %v3488_v14 = vrot.slane %v2953_v45, %v7586_v52 }
 0x333   : > { %v5063_v6 = vunpack.c.l.b16 %v5694_v17  ;;  %v5695_v1 = vpack.c.bf16 %v4736_v60, %v4736_v60  ;;  %v3495_v53 = vrot.slane %v3481_v12, %v7586_v52  ;;  %v4539_v16 = vrot.slane %v4538_v27, 2 }
 0x334   : > { %v5125_v37 = vsel %vm5069_vm8, %v5062_v58, %v5061_v26  ;;  %v4553_v4 = vrot.slane %v4552_v59, 2  ;;  %v3496_v34 = vcombine.high %v3488_v14, %v3488_v14  ;;  %v4533_v24 = vmax.f32 %v4531_v20, %v4532_v15 }
 0x335   : > { %v5126_v41 = vsel %vm5071_vm9, %v5063_v6, %v5125_v37  ;;  %v3497_v13 = vcombine.high %v3495_v53, %v3495_v53  ;;  %v5064_v21 = vunpack.c.l.b16 %v5695_v1  ;;  %v4473_v44 = vsel %vm3660_vm7, %v3488_v14, -inf }
 0x336   : > { %v4487_v25 = vsel %vm3660_vm7, %v3495_v53, -inf  ;;  %v4547_v29 = vmax.f32 %v4545_v33, %v4546_v63  ;;  %v4474_v23 = vrot.slane %v4473_v44, 4  ;;  %v4480_v8 = vsel %vm3660_vm7, %v3496_v34, -inf }
 0x337   : > { %v4488_v62 = vrot.slane %v4487_v25, 4  ;;  %v4540_v38 = vmax.f32 %v4538_v27, %v4539_v16  ;;  %v4481_v7 = vrot.slane %v4480_v8, 4  ;;  %v4494_v52 = vsel %vm3660_vm7, %v3497_v13, -inf }
 0x338   : > { %v4554_v40 = vmax.f32 %v4552_v59, %v4553_v4  ;;  %v4475_v61 = vmax.f32 %v4473_v44, %v4474_v23  ;;  %v4495_v32 = vrot.slane %v4494_v52, 4  ;;  %v4534_v31 = vrot.slane %v4533_v24, 1 }
 0x339   : > { %v4489_v35 = vmax.f32 %v4487_v25, %v4488_v62  ;;  %v4482_v19 = vmax.f32 %v4480_v8, %v4481_v7  ;;  %v5127_v36 = vsel %vm5073_vm10, %v5064_v21, %v5126_v41  ;;  %v4548_v9 = vrot.slane %v4547_v29, 1 }
 0x33a   : > { %v4476_v0 = vrot.slane %v4475_v61, 2  ;;  %v4496_v50 = vmax.f32 %v4494_v52, %v4495_v32  ;;  %v4541_v56 = vrot.slane %v4540_v38, 1  ;;  %v4555_v57 = vrot.slane %v4554_v40, 1 }
 0x33b   : > { %v4490_v48 = vrot.slane %v4489_v35, 2  ;;  %v4483_v30 = vrot.slane %v4482_v19, 2  ;;  %v4535_v49 = vmax.f32 %v4533_v24, %v4534_v31  ;;  %v4549_v45 = vmax.f32 %v4547_v29, %v4548_v9 }
 0x33c   : > { %v4477_v51 = vmax.f32 %v4475_v61, %v4476_v0  ;;  %v4497_v54 = vrot.slane %v4496_v50, 2  ;;  %v4542_v43 = vmax.f32 %v4540_v38, %v4541_v56  ;;  %v4556_v55 = vmax.f32 %v4554_v40, %v4555_v57 }
 0x33d   : > { %v4491_v22 = vmax.f32 %v4489_v35, %v4490_v48  ;;  %v4484_v10 = vmax.f32 %v4482_v19, %v4483_v30  ;;  %v4738_v20 = vsel %vm810_vm3, %v4535_v49, -inf  ;;  %v4744_v28 = vsel %vm810_vm3, %v4549_v45, -inf }
 0x33e   : > { %v4478_v2 = vrot.slane %v4477_v51, 1  ;;  %v4498_v5 = vmax.f32 %v4496_v50, %v4497_v54  ;;  %v4741_v60 = vsel %vm810_vm3, %v4542_v43, -inf  ;;  %v4747_v6 = vsel %vm810_vm3, %v4556_v55, -inf }
 0x33f   : > { %v4492_v46 = vrot.slane %v4491_v22, 1  ;;  %v4485_v39 = vrot.slane %v4484_v10, 1 }
 0x340   : > { %v4479_v11 = vmax.f32 %v4477_v51, %v4478_v2  ;;  %v4499_v47 = vrot.slane %v4498_v5, 1 }
 0x341   : > { %v4493_v18 = vmax.f32 %v4491_v22, %v4492_v46  ;;  %v4486_v42 = vmax.f32 %v4484_v10, %v4485_v39 }
 0x342   : > { %v4500_v3 = vmax.f32 %v4498_v5, %v4499_v47  ;;  %v4737_v17 = vsel %vm810_vm3, %v4479_v11, -inf }
 0x343   : > { %v4743_v33 = vsel %vm810_vm3, %v4493_v18, -inf  ;;  %v4739_v26 = vmax.f32 %v4737_v17, %v4738_v20  ;;  %v4740_v27 = vsel %vm810_vm3, %v4486_v42, -inf }
 0x344   : > { %v4745_v58 = vmax.f32 %v4743_v33, %v4744_v28  ;;  %v4742_v59 = vmax.f32 %v4740_v27, %v4741_v60  ;;  %v4746_v12 = vsel %vm810_vm3, %v4500_v3, -inf }
 0x345   : > { %v4748_v1 = vmax.f32 %v4746_v12, %v4747_v6  ;;  %v5696_v15 = vpack.c.bf16 %v4739_v26, %v4739_v26 }
 0x346   : > { %v5698_v37 = vpack.c.bf16 %v4745_v58, %v4745_v58  ;;  %v5697_v63 = vpack.c.bf16 %v4742_v59, %v4742_v59 }
 0x347   : > { %v5699_v14 = vpack.c.bf16 %v4748_v1, %v4748_v1  ;;  %v5065_v53 = vunpack.c.l.b16 %v5696_v15 }
 0x348   : > { %v5067_v41 = vunpack.c.l.b16 %v5698_v37  ;;  %v5066_v16 = vunpack.c.l.b16 %v5697_v63 }
 0x349   : > { %v5068_v4 = vunpack.c.l.b16 %v5699_v14  ;;  %v5128_v34 = vsel %vm5075_vm11, %v5065_v53, %v5127_v36 }
 0x34a   : > { %v5129_v13 = vsel %vm5077_vm12, %v5066_v16, %v5128_v34 }
 0x34b   : > { %v5130_v21 = vsel %vm5079_vm13, %v5067_v41, %v5129_v13 }
 0x34c   : > { %v5131_v24 = vsel %vm5081_vm14, %v5068_v4, %v5130_v21 }
 0x34d   : > { %v5139_v44 = vpack.c.b16 %v5131_v24, %v5131_v24 }
 0x34f   : > { %5156 = vst.msk [vmem:[%s7660_s9 + $0x1c] sm:$0xf] %vm5148_vm15, %v5139_v44 }
 0x350 PF: > { %s15_s20 = sadd.s32 1, %s6354_s20   ;;  %s8256_s18 = smov %s6350_s19 }
 0x351   : > { %p12_p5 = scmp.ge.s32.totalorder %s15_s20, 4   ;;  %s8257_s19 = smov %s8259_s1 }
 0x353   :  { %14 = sbr.rel (!%p12_p5) target bundleno = 2 (0x2), region = 84 }

</bundles_post_ra>
